<compile_context>
chip_gen: v6e
topology: v6e:2x2x1
jax: 0.10.0
libtpu: 0.0.40
codegen_flags: <defaults>
</compile_context>

<pallas_src>
import math

import jax
import jax.numpy as jnp
from jax.experimental import pallas as pl
from jax.experimental.pallas import tpu as pltpu

F32 = jnp.float32
BF16 = jnp.bfloat16  # MXU-native weight dtype; all accumulation stays f32

# Mamba block constants (fixed by MKMIL.__init__: d_model=256, d_state=16, d_conv=4, expand=2)
D_MODEL = 256
D_STATE = 16
D_CONV = 4
EXPAND = 2
D_INNER = EXPAND * D_MODEL          # 512
DT_RANK = math.ceil(D_MODEL / 16)   # 16
XPROJ_PAD = 128                     # x_proj output (dt|B|C = 48 cols) lane-padded to 128

N_CLASSES = 2


# ------------------------- small math helpers (in-kernel) -------------------------

def _sigmoid(x):
    return 1.0 / (1.0 + jnp.exp(-x))


def _softplus(x):
    return jnp.maximum(x, 0.0) + jnp.log(1.0 + jnp.exp(-jnp.abs(x)))


# ------------------------------ the fused forward kernel ---------------------------

def _mkmil_fused_kernel(
    # inputs
    data_ref, fc1a_w_ref, fc1a_b_ref, fc1b_w_ref, fc1b_b_ref,
    ln_g_ref, ln_b_ref, in_w_ref, conv_w_ref, conv_b_ref,
    xproj_w_ref, dt_w_ref, dt_b_ref, a_t_ref, d_ref, out_w_ref,
    fc2_w_ref, fc2_b_ref, norm_g_ref, norm_b_ref,
    att_w1_ref, att_b1_ref, att_w2_ref, att_b2_ref, cls_w_ref, cls_b_ref,
    # outputs
    pooled_ref, scores_ref, logits_ref, probs_ref,
    # scratch (persists across the layer grid axis)
    h_ref,
):
    l = pl.program_id(1)
    n_layers = pl.num_programs(1)
    N = data_ref.shape[1]

    # -------- stage 1 (l == 0): _fc1 = Linear(1024,512) -> Linear(512,256) -> ReLU ----
    @pl.when(l == 0)
    def _():
        x0 = data_ref[0]                                                     # (N, 1024)
        h1 = jnp.dot(x0.astype(BF16), fc1a_w_ref[...],
                     preferred_element_type=F32) + fc1a_b_ref[...]
        h2 = jnp.dot(h1.astype(BF16), fc1b_w_ref[...],
                     preferred_element_type=F32) + fc1b_b_ref[...]
        h_ref[...] = jnp.maximum(h2, 0.0)                                    # (N, 256)

    # -------- stage 2 (every l): LayerNorm -> Mamba mixer -> residual add -------------
    h_in = h_ref[...]                                                        # (N, 256)

    mu = jnp.mean(h_in, axis=-1, keepdims=True)
    hc = h_in - mu
    var = jnp.mean(hc * hc, axis=-1, keepdims=True)
    hn = hc * jax.lax.rsqrt(var + 1e-5) * ln_g_ref[0] + ln_b_ref[0]

    # in_proj (no bias) -> split x | z
    xz = jnp.dot(hn.astype(BF16), in_w_ref[0], preferred_element_type=F32)   # (N, 1024)
    x_raw = xz[:, :D_INNER]
    z = xz[:, D_INNER:]

    # causal depthwise conv1d (kernel 4) + SiLU — static shifted slices, no scratch
    cw = conv_w_ref[0]                                                       # (4, 512)
    xpad = jnp.concatenate(
        [jnp.zeros((D_CONV - 1, D_INNER), F32), x_raw], axis=0)              # (N+3, 512)
    acc = conv_b_ref[0]
    for k in range(D_CONV):                                                  # 4 static taps
        acc = acc + cw[k:k + 1, :] * xpad[k:k + N, :]
    x = acc * _sigmoid(acc)                                                  # (N, 512)

    # factored x_proj (dt | B | C, lanes padded to 128) + dt_proj
    xb = x.astype(BF16)
    proj = jnp.dot(xb, xproj_w_ref[0], preferred_element_type=F32)           # (N, 128)
    dt_low = proj[:, :DT_RANK]                                               # (N, 16)
    bmat = proj[:, DT_RANK:DT_RANK + D_STATE]                                # (N, 16)
    cmat = proj[:, DT_RANK + D_STATE:DT_RANK + 2 * D_STATE]                  # (N, 16)

    delta = _softplus(
        jnp.dot(dt_low.astype(BF16), dt_w_ref[0], preferred_element_type=F32)
        + dt_b_ref[0])                                                       # (N, 512)

    # selective scan — hoist exp / outer products / lane broadcasts out of the serial loop
    a_t = a_t_ref[0]                                                         # (16, 512)
    dA = jnp.exp(delta[:, None, :] * a_t[None, :, :])                        # (N, 16, 512)
    dx = delta * x                                                           # (N, 512)
    dBx = dx[:, None, :] * bmat[:, :, None]                                  # (N, 16, 512)
    c_b = jnp.broadcast_to(cmat[:, :, None], (N, D_STATE, D_INNER))          # (N, 16, 512)

    state = jnp.zeros((D_STATE, D_INNER), F32)
    y_rows = []
    for t in range(N):        # N static & small; only mul/add + one reduce stay serial
        state = dA[t] * state + dBx[t]
        y_rows.append(jnp.sum(state * c_b[t], axis=0, keepdims=True))        # (1, 512)
    y = d_ref[0] * x + jnp.concatenate(y_rows, axis=0)                       # (N, 512)

    # gate with SiLU(z), project back, fused residual add
    y = y * (z * _sigmoid(z))
    out = jnp.dot(y.astype(BF16), out_w_ref[0], preferred_element_type=F32)  # (N, 256)
    h_new = h_in + out
    h_ref[...] = h_new

    # -------- stage 3 (l == last): fc2 -> ReLU -> LN -> attention pool -> classifier ---
    @pl.when(l == n_layers - 1)
    def _():
        h2 = jnp.maximum(
            jnp.dot(h_new.astype(BF16), fc2_w_ref[...],
                    preferred_element_type=F32) + fc2_b_ref[...], 0.0)       # (N, 512)

        mu2 = jnp.mean(h2, axis=-1, keepdims=True)
        hc2 = h2 - mu2
        var2 = jnp.mean(hc2 * hc2, axis=-1, keepdims=True)
        h3 = hc2 * jax.lax.rsqrt(var2 + 1e-5) * norm_g_ref[...] + norm_b_ref[...]

        a = jnp.tanh(jnp.dot(h3.astype(BF16), att_w1_ref[...],
                             preferred_element_type=F32) + att_b1_ref[...])  # (N, 128)
        s = jnp.sum(a * att_w2_ref[...], axis=-1, keepdims=True) + att_b2_ref[...]  # (N, 1)
        scores_ref[0] = s                                                    # pre-softmax A_1

        m = jnp.max(s, axis=0, keepdims=True)                                # softmax over N
        e = jnp.exp(s - m)
        p = e / jnp.sum(e, axis=0, keepdims=True)
        pooled = jnp.sum(p * h3, axis=0, keepdims=True)                      # (1, 512)
        pooled_ref[0] = pooled

        logits = jnp.dot(pooled, cls_w_ref[...],
                         preferred_element_type=F32) + cls_b_ref[...]        # (1, n_classes)
        logits_ref[0] = logits
        ml = jnp.max(logits, axis=-1, keepdims=True)
        el = jnp.exp(logits - ml)
        probs_ref[0] = el / jnp.sum(el, axis=-1, keepdims=True)


# --------------------------------------- forward -----------------------------------

def mkmil_forward(params, data):
    """data: (B, N, n_features) float32; B must be 1 (the reference squeezes dim 0)."""
    B, N, C = data.shape
    L = params["in_w"].shape[0]
    n_classes = params["cls_w"].shape[1]

    def wspec(shape):   # whole-array weight, fetched once (constant block index)
        return pl.BlockSpec(shape, lambda b, l: (0, 0))

    def lspec(shape):   # layer-stacked weight, indexed by the layer grid axis
        return pl.BlockSpec((1,) + shape, lambda b, l: (l, 0, 0))

    pooled, scores, logits3, probs3 = pl.pallas_call(
        _mkmil_fused_kernel,
        out_shape=(
            jax.ShapeDtypeStruct((B, 1, 512), F32),          # pooled feature
            jax.ShapeDtypeStruct((B, N, 1), F32),            # raw attention scores
            jax.ShapeDtypeStruct((B, 1, n_classes), F32),    # logits
            jax.ShapeDtypeStruct((B, 1, n_classes), F32),    # softmax probs
        ),
        grid=(B, L),
        in_specs=[
            pl.BlockSpec((1, N, C), lambda b, l: (b, 0, 0)),                 # data
            wspec((C, 512)), wspec((1, 512)),                                # fc1a
            wspec((512, D_MODEL)), wspec((1, D_MODEL)),                      # fc1b
            lspec((1, D_MODEL)), lspec((1, D_MODEL)),                        # ln_g, ln_b
            lspec((D_MODEL, 2 * D_INNER)),                                   # in_proj
            lspec((D_CONV, D_INNER)), lspec((1, D_INNER)),                   # conv_w, conv_b
            lspec((D_INNER, XPROJ_PAD)),                                     # x_proj (dt|B|C)
            lspec((DT_RANK, D_INNER)), lspec((1, D_INNER)),                  # dt_proj, dt_bias
            lspec((D_STATE, D_INNER)), lspec((1, D_INNER)),                  # A_T, D
            lspec((D_INNER, D_MODEL)),                                       # out_proj
            wspec((D_MODEL, 512)), wspec((1, 512)),                          # fc2
            wspec((1, 512)), wspec((1, 512)),                                # norm
            wspec((512, 128)), wspec((1, 128)),                              # attention L1
            wspec((1, 128)), wspec((1, 1)),                                  # attention L2
            wspec((512, n_classes)), wspec((1, n_classes)),                  # classifier
        ],
        out_specs=(
            pl.BlockSpec((1, 1, 512), lambda b, l: (b, 0, 0)),
            pl.BlockSpec((1, N, 1), lambda b, l: (b, 0, 0)),
            pl.BlockSpec((1, 1, n_classes), lambda b, l: (b, 0, 0)),
            pl.BlockSpec((1, 1, n_classes), lambda b, l: (b, 0, 0)),
        ),
        scratch_shapes=[pltpu.VMEM((N, D_MODEL), F32)],                      # resident h
        compiler_params=pltpu.CompilerParams(
            dimension_semantics=("parallel", "arbitrary"),
            vmem_limit_bytes=32 * 1024 * 1024),
    )(data.astype(F32),
      params["fc1a_w"], params["fc1a_b"], params["fc1b_w"], params["fc1b_b"],
      params["ln_g"], params["ln_b"], params["in_w"], params["conv_w"], params["conv_b"],
      params["xproj_w"], params["dt_w"], params["dt_b"], params["A_T"], params["D"],
      params["out_w"],
      params["fc2_w"], params["fc2_b"], params["norm_g"], params["norm_b"],
      params["att_w1"], params["att_b1"], params["att_w2"], params["att_b2"],
      params["cls_w"], params["cls_b"])

    weights = jnp.transpose(scores, (0, 2, 1))     # torch A_1: pre-softmax, (B, 1, N)
    feature = pooled[0]                            # torch .squeeze(0): (1, 512) for B == 1
    logits = logits3[0]
    y_prob = probs3[0]
    y_hat = jnp.argmax(logits, axis=1)             # trivial glue outside the kernel
    return {"logits": logits, "Y_prob": y_prob, "Y_hat": y_hat,
            "weights": weights, "feature": feature}


# ---------------------------- deterministic parameter init -------------------------

def init_params(key, n_features=1024, n_classes=N_CLASSES, n_layers=2):
    keys = jax.random.split(key, 6 + 5 * n_layers)
    ki = iter(keys)

    def xavier(k, fan_in, fan_out, dtype=F32):     # stored pre-transposed as W^T (in, out)
        std = math.sqrt(2.0 / (fan_in + fan_out))
        return (std * jax.random.normal(k, (fan_in, fan_out), F32)).astype(dtype)

    params = {
        "fc1a_w": xavier(next(ki), n_features, 512, BF16), "fc1a_b": jnp.zeros((1, 512), F32),
        "fc1b_w": xavier(next(ki), 512, D_MODEL, BF16),    "fc1b_b": jnp.zeros((1, D_MODEL), F32),
        "fc2_w":  xavier(next(ki), D_MODEL, 512, BF16),    "fc2_b":  jnp.zeros((1, 512), F32),
        "norm_g": jnp.ones((1, 512), F32),                 "norm_b": jnp.zeros((1, 512), F32),
        "att_w1": xavier(next(ki), 512, 128, BF16),        "att_b1": jnp.zeros((1, 128), F32),
        "att_w2": xavier(next(ki), 1, 128, F32),           "att_b2": jnp.zeros((1, 1), F32),
        "cls_w":  xavier(next(ki), 512, n_classes, F32),   "cls_b":  jnp.zeros((1, n_classes), F32),
    }

    ln_g, ln_b, in_w, conv_w, conv_b = [], [], [], [], []
    xproj_w, dt_w, dt_b, a_t, d_skip, out_w = [], [], [], [], [], []
    for _ in range(n_layers):
        k_in, k_conv, k_xp, k_dt, k_out = (next(ki) for _ in range(5))
        ln_g.append(jnp.ones((1, D_MODEL), F32))
        ln_b.append(jnp.zeros((1, D_MODEL), F32))
        in_w.append(xavier(k_in, D_MODEL, 2 * D_INNER, BF16))        # in_proj has no bias
        conv_w.append(jax.random.uniform(k_conv, (D_CONV, D_INNER), F32) - 0.5)
        conv_b.append(jnp.zeros((1, D_INNER), F32))
        xw = xavier(k_xp, D_INNER, DT_RANK + 2 * D_STATE)            # (512, 48): dt | B | C
        xproj_w.append(jnp.zeros((D_INNER, XPROJ_PAD), F32)
                       .at[:, :DT_RANK + 2 * D_STATE].set(xw).astype(BF16))
        dt_w.append(xavier(k_dt, DT_RANK, D_INNER, BF16))
        dt_b.append(jnp.zeros((1, D_INNER), F32))
        a_t.append(-jnp.tile(jnp.arange(1, D_STATE + 1, dtype=F32)[:, None], (1, D_INNER)))
        d_skip.append(jnp.ones((1, D_INNER), F32))
        out_w.append(xavier(k_out, D_INNER, D_MODEL, BF16))

    params.update({
        "ln_g": jnp.stack(ln_g), "ln_b": jnp.stack(ln_b),
        "in_w": jnp.stack(in_w), "conv_w": jnp.stack(conv_w), "conv_b": jnp.stack(conv_b),
        "xproj_w": jnp.stack(xproj_w), "dt_w": jnp.stack(dt_w), "dt_b": jnp.stack(dt_b),
        "A_T": jnp.stack(a_t), "D": jnp.stack(d_skip), "out_w": jnp.stack(out_w),
    })
    return params


if __name__ == "__main__":
    key = jax.random.PRNGKey(0)
    pkey, dkey = jax.random.split(key)
    params = init_params(pkey, n_features=1024, n_classes=N_CLASSES, n_layers=2)
    data = jax.random.normal(dkey, (1, 16, 1024), F32)   # (B=1 bag, N=16 instances, 1024 feats)

    fwd = jax.jit(mkmil_forward)
    out = fwd(params, data)
    jax.block_until_ready(out)

    assert out["logits"].shape == (1, N_CLASSES)
    assert out["Y_prob"].shape == (1, N_CLASSES)
    assert out["Y_hat"].shape == (1,)
    assert out["weights"].shape == (1, 1, 16)
    assert out["feature"].shape == (1, 512)
    assert bool(jnp.all(jnp.isfinite(out["logits"])))
    assert bool(jnp.all(jnp.isfinite(out["feature"])))
    print("KERNEL_OK")
</pallas_src>

<mosaic_0001>
module attributes {stable_mosaic.version = 11 : i64} {
  func.func @_mkmil_fused_kernel(%arg0: i32, %arg1: i32, %arg2: memref<1x16x1024xf32, #tpu.memory_space<vmem>>, %arg3: memref<1024x512xbf16, #tpu.memory_space<vmem>>, %arg4: memref<1x512xf32, #tpu.memory_space<vmem>>, %arg5: memref<512x256xbf16, #tpu.memory_space<vmem>>, %arg6: memref<1x256xf32, #tpu.memory_space<vmem>>, %arg7: memref<1x1x256xf32, #tpu.memory_space<vmem>>, %arg8: memref<1x1x256xf32, #tpu.memory_space<vmem>>, %arg9: memref<1x256x1024xbf16, #tpu.memory_space<vmem>>, %arg10: memref<1x4x512xf32, #tpu.memory_space<vmem>>, %arg11: memref<1x1x512xf32, #tpu.memory_space<vmem>>, %arg12: memref<1x512x128xbf16, #tpu.memory_space<vmem>>, %arg13: memref<1x16x512xbf16, #tpu.memory_space<vmem>>, %arg14: memref<1x1x512xf32, #tpu.memory_space<vmem>>, %arg15: memref<1x16x512xf32, #tpu.memory_space<vmem>>, %arg16: memref<1x1x512xf32, #tpu.memory_space<vmem>>, %arg17: memref<1x512x256xbf16, #tpu.memory_space<vmem>>, %arg18: memref<256x512xbf16, #tpu.memory_space<vmem>>, %arg19: memref<1x512xf32, #tpu.memory_space<vmem>>, %arg20: memref<1x512xf32, #tpu.memory_space<vmem>>, %arg21: memref<1x512xf32, #tpu.memory_space<vmem>>, %arg22: memref<512x128xbf16, #tpu.memory_space<vmem>>, %arg23: memref<1x128xf32, #tpu.memory_space<vmem>>, %arg24: memref<1x128xf32, #tpu.memory_space<vmem>>, %arg25: memref<1x1xf32, #tpu.memory_space<vmem>>, %arg26: memref<512x2xf32, #tpu.memory_space<vmem>>, %arg27: memref<1x2xf32, #tpu.memory_space<vmem>>, %arg28: memref<1x1x512xf32, #tpu.memory_space<vmem>>, %arg29: memref<1x16x1xf32, #tpu.memory_space<vmem>>, %arg30: memref<1x1x2xf32, #tpu.memory_space<vmem>>, %arg31: memref<1x1x2xf32, #tpu.memory_space<vmem>>, %arg32: memref<16x256xf32, #tpu.memory_space<vmem>>) attributes {dimension_semantics = [#tpu.dimension_semantics<parallel>, #tpu.dimension_semantics<arbitrary>], iteration_bounds = array<i64: 1, 2>, scalar_prefetch = 0 : i64, scratch_operands = 1 : i64, tpu.core_type = #tpu.core_type<tc>, window_params = [{transform_indices = @transform_0, window_bounds = array<i64: 1, 16, 1024>}, {pipeline_mode = #tpu.pipeline_mode<synchronous>, transform_indices = @transform_1, window_bounds = array<i64: 1024, 512>}, {pipeline_mode = #tpu.pipeline_mode<synchronous>, transform_indices = @transform_2, window_bounds = array<i64: 1, 512>}, {pipeline_mode = #tpu.pipeline_mode<synchronous>, transform_indices = @transform_3, window_bounds = array<i64: 512, 256>}, {pipeline_mode = #tpu.pipeline_mode<synchronous>, transform_indices = @transform_4, window_bounds = array<i64: 1, 256>}, {transform_indices = @transform_5, window_bounds = array<i64: 1, 1, 256>}, {transform_indices = @transform_6, window_bounds = array<i64: 1, 1, 256>}, {transform_indices = @transform_7, window_bounds = array<i64: 1, 256, 1024>}, {transform_indices = @transform_8, window_bounds = array<i64: 1, 4, 512>}, {transform_indices = @transform_9, window_bounds = array<i64: 1, 1, 512>}, {transform_indices = @transform_10, window_bounds = array<i64: 1, 512, 128>}, {transform_indices = @transform_11, window_bounds = array<i64: 1, 16, 512>}, {transform_indices = @transform_12, window_bounds = array<i64: 1, 1, 512>}, {transform_indices = @transform_13, window_bounds = array<i64: 1, 16, 512>}, {transform_indices = @transform_14, window_bounds = array<i64: 1, 1, 512>}, {transform_indices = @transform_15, window_bounds = array<i64: 1, 512, 256>}, {pipeline_mode = #tpu.pipeline_mode<synchronous>, transform_indices = @transform_16, window_bounds = array<i64: 256, 512>}, {pipeline_mode = #tpu.pipeline_mode<synchronous>, transform_indices = @transform_17, window_bounds = array<i64: 1, 512>}, {pipeline_mode = #tpu.pipeline_mode<synchronous>, transform_indices = @transform_18, window_bounds = array<i64: 1, 512>}, {pipeline_mode = #tpu.pipeline_mode<synchronous>, transform_indices = @transform_19, window_bounds = array<i64: 1, 512>}, {pipeline_mode = #tpu.pipeline_mode<synchronous>, transform_indices = @transform_20, window_bounds = array<i64: 512, 128>}, {pipeline_mode = #tpu.pipeline_mode<synchronous>, transform_indices = @transform_21, window_bounds = array<i64: 1, 128>}, {pipeline_mode = #tpu.pipeline_mode<synchronous>, transform_indices = @transform_22, window_bounds = array<i64: 1, 128>}, {pipeline_mode = #tpu.pipeline_mode<synchronous>, transform_indices = @transform_23, window_bounds = array<i64: 1, 1>}, {pipeline_mode = #tpu.pipeline_mode<synchronous>, transform_indices = @transform_24, window_bounds = array<i64: 512, 2>}, {pipeline_mode = #tpu.pipeline_mode<synchronous>, transform_indices = @transform_25, window_bounds = array<i64: 1, 2>}, {transform_indices = @transform_26, window_bounds = array<i64: 1, 1, 512>}, {transform_indices = @transform_27, window_bounds = array<i64: 1, 16, 1>}, {transform_indices = @transform_28, window_bounds = array<i64: 1, 1, 2>}, {transform_indices = @transform_29, window_bounds = array<i64: 1, 1, 2>}]} {
    %c0_i32 = arith.constant 0 : i32
    %0 = arith.cmpi eq, %arg1, %c0_i32 : i32
    %1 = arith.extui %0 : i1 to i32
    %c0_i32_0 = arith.constant 0 : i32
    %2 = arith.cmpi ne, %1, %c0_i32_0 : i32
    scf.if %2 {
      %c0_73 = arith.constant 0 : index
      %c0_74 = arith.constant 0 : index
      %c0_75 = arith.constant 0 : index
      %312 = vector.load %arg2[%c0_73, %c0_74, %c0_75] : memref<1x16x1024xf32, #tpu.memory_space<vmem>>, vector<1x16x1024xf32>
      %313 = vector.shape_cast %312 : vector<1x16x1024xf32> to vector<16x1024xf32>
      %314 = arith.truncf %313 : vector<16x1024xf32> to vector<16x1024xbf16>
      %c0_76 = arith.constant 0 : index
      %c0_77 = arith.constant 0 : index
      %315 = vector.load %arg3[%c0_76, %c0_77] : memref<1024x512xbf16, #tpu.memory_space<vmem>>, vector<1024x512xbf16>
      %cst_78 = arith.constant dense<0.000000e+00> : vector<16x512xf32>
      %316 = tpu.matmul %314, %315, %cst_78 {dimension_numbers = #tpu.dot_dimension_numbers<[1], [0], [0], [1], [0, 0, 1, 1], [], []>} : vector<16x1024xbf16>, vector<1024x512xbf16>, vector<16x512xf32> -> vector<16x512xf32>
      %c0_79 = arith.constant 0 : index
      %c0_80 = arith.constant 0 : index
      %317 = vector.load %arg4[%c0_79, %c0_80] : memref<1x512xf32, #tpu.memory_space<vmem>>, vector<1x512xf32>
      %318 = vector.broadcast %317 : vector<1x512xf32> to vector<16x512xf32>
      %319 = arith.addf %316, %318 : vector<16x512xf32>
      %320 = arith.truncf %319 : vector<16x512xf32> to vector<16x512xbf16>
      %c0_81 = arith.constant 0 : index
      %c0_82 = arith.constant 0 : index
      %321 = vector.load %arg5[%c0_81, %c0_82] : memref<512x256xbf16, #tpu.memory_space<vmem>>, vector<512x256xbf16>
      %cst_83 = arith.constant dense<0.000000e+00> : vector<16x256xf32>
      %322 = tpu.matmul %320, %321, %cst_83 {dimension_numbers = #tpu.dot_dimension_numbers<[1], [0], [0], [1], [0, 0, 1, 1], [], []>} : vector<16x512xbf16>, vector<512x256xbf16>, vector<16x256xf32> -> vector<16x256xf32>
      %c0_84 = arith.constant 0 : index
      %c0_85 = arith.constant 0 : index
      %323 = vector.load %arg6[%c0_84, %c0_85] : memref<1x256xf32, #tpu.memory_space<vmem>>, vector<1x256xf32>
      %324 = vector.broadcast %323 : vector<1x256xf32> to vector<16x256xf32>
      %325 = arith.addf %322, %324 : vector<16x256xf32>
      %cst_86 = arith.constant 0.000000e+00 : f32
      %326 = vector.broadcast %cst_86 : f32 to vector<16x256xf32>
      %327 = arith.maximumf %325, %326 : vector<16x256xf32>
      %c0_87 = arith.constant 0 : index
      %c0_88 = arith.constant 0 : index
      %328 = vector.load %arg32[%c0_87, %c0_88] : memref<16x256xf32, #tpu.memory_space<vmem>>, vector<16x256xf32>
      tpu.vector_store %arg32[%c0_87, %c0_88], %327 {strides = array<i32>} : memref<16x256xf32, #tpu.memory_space<vmem>>, vector<16x256xf32>,
    } else {
    }
    %c0 = arith.constant 0 : index
    %c0_1 = arith.constant 0 : index
    %3 = vector.load %arg32[%c0, %c0_1] : memref<16x256xf32, #tpu.memory_space<vmem>>, vector<16x256xf32>
    %cst = arith.constant dense<0.000000e+00> : vector<16xf32>
    %4 = vector.multi_reduction <add>, %3, %cst [1] : vector<16x256xf32> to vector<16xf32>
    %5 = vector.shape_cast %4 : vector<16xf32> to vector<16x1xf32>
    %cst_2 = arith.constant 2.560000e+02 : f32
    %6 = vector.broadcast %cst_2 : f32 to vector<16x1xf32>
    %7 = arith.divf %5, %6 : vector<16x1xf32>
    %8 = vector.broadcast %7 : vector<16x1xf32> to vector<16x256xf32>
    %9 = arith.subf %3, %8 : vector<16x256xf32>
    %10 = arith.mulf %9, %9 : vector<16x256xf32>
    %cst_3 = arith.constant dense<0.000000e+00> : vector<16xf32>
    %11 = vector.multi_reduction <add>, %10, %cst_3 [1] : vector<16x256xf32> to vector<16xf32>
    %12 = vector.shape_cast %11 : vector<16xf32> to vector<16x1xf32>
    %cst_4 = arith.constant 2.560000e+02 : f32
    %13 = vector.broadcast %cst_4 : f32 to vector<16x1xf32>
    %14 = arith.divf %12, %13 : vector<16x1xf32>
    %cst_5 = arith.constant 9.99999974E-6 : f32
    %15 = vector.broadcast %cst_5 : f32 to vector<16x1xf32>
    %16 = arith.addf %14, %15 : vector<16x1xf32>
    %17 = math.rsqrt %16 : vector<16x1xf32>
    %18 = vector.broadcast %17 : vector<16x1xf32> to vector<16x256xf32>
    %19 = arith.mulf %9, %18 : vector<16x256xf32>
    %c0_6 = arith.constant 0 : index
    %c0_7 = arith.constant 0 : index
    %c0_8 = arith.constant 0 : index
    %20 = vector.load %arg7[%c0_6, %c0_7, %c0_8] : memref<1x1x256xf32, #tpu.memory_space<vmem>>, vector<1x1x256xf32>
    %21 = vector.shape_cast %20 : vector<1x1x256xf32> to vector<1x256xf32>
    %22 = vector.broadcast %21 : vector<1x256xf32> to vector<16x256xf32>
    %23 = arith.mulf %19, %22 : vector<16x256xf32>
    %c0_9 = arith.constant 0 : index
    %c0_10 = arith.constant 0 : index
    %c0_11 = arith.constant 0 : index
    %24 = vector.load %arg8[%c0_9, %c0_10, %c0_11] : memref<1x1x256xf32, #tpu.memory_space<vmem>>, vector<1x1x256xf32>
    %25 = vector.shape_cast %24 : vector<1x1x256xf32> to vector<1x256xf32>
    %26 = vector.broadcast %25 : vector<1x256xf32> to vector<16x256xf32>
    %27 = arith.addf %23, %26 : vector<16x256xf32>
    %28 = arith.truncf %27 : vector<16x256xf32> to vector<16x256xbf16>
    %c0_12 = arith.constant 0 : index
    %c0_13 = arith.constant 0 : index
    %c0_14 = arith.constant 0 : index
    %29 = vector.load %arg9[%c0_12, %c0_13, %c0_14] : memref<1x256x1024xbf16, #tpu.memory_space<vmem>>, vector<1x256x1024xbf16>
    %30 = vector.shape_cast %29 : vector<1x256x1024xbf16> to vector<256x1024xbf16>
    %cst_15 = arith.constant dense<0.000000e+00> : vector<16x1024xf32>
    %31 = tpu.matmul %28, %30, %cst_15 {dimension_numbers = #tpu.dot_dimension_numbers<[1], [0], [0], [1], [0, 0, 1, 1], [], []>} : vector<16x256xbf16>, vector<256x1024xbf16>, vector<16x1024xf32> -> vector<16x1024xf32>
    %32 = vector.extract_strided_slice %31 {offsets = [0, 0], sizes = [16, 512], strides = [1, 1]} : vector<16x1024xf32> to vector<16x512xf32>
    %33 = vector.extract_strided_slice %31 {offsets = [0, 512], sizes = [16, 512], strides = [1, 1]} : vector<16x1024xf32> to vector<16x512xf32>
    %c0_16 = arith.constant 0 : index
    %c0_17 = arith.constant 0 : index
    %c0_18 = arith.constant 0 : index
    %34 = vector.load %arg10[%c0_16, %c0_17, %c0_18] : memref<1x4x512xf32, #tpu.memory_space<vmem>>, vector<1x4x512xf32>
    %35 = vector.shape_cast %34 : vector<1x4x512xf32> to vector<4x512xf32>
    %cst_19 = arith.constant 0.000000e+00 : f32
    %36 = vector.broadcast %cst_19 : f32 to vector<3x512xf32>
    %37 = tpu.concatenate %36, %32 in 0 : vector<3x512xf32>, vector<16x512xf32> -> vector<19x512xf32>
    %c0_20 = arith.constant 0 : index
    %c0_21 = arith.constant 0 : index
    %c0_22 = arith.constant 0 : index
    %38 = vector.load %arg11[%c0_20, %c0_21, %c0_22] : memref<1x1x512xf32, #tpu.memory_space<vmem>>, vector<1x1x512xf32>
    %39 = vector.shape_cast %38 : vector<1x1x512xf32> to vector<1x512xf32>
    %40 = vector.extract_strided_slice %35 {offsets = [0, 0], sizes = [1, 512], strides = [1, 1]} : vector<4x512xf32> to vector<1x512xf32>
    %41 = vector.extract_strided_slice %37 {offsets = [0, 0], sizes = [16, 512], strides = [1, 1]} : vector<19x512xf32> to vector<16x512xf32>
    %42 = vector.broadcast %40 : vector<1x512xf32> to vector<16x512xf32>
    %43 = arith.mulf %42, %41 : vector<16x512xf32>
    %44 = vector.broadcast %39 : vector<1x512xf32> to vector<16x512xf32>
    %45 = arith.addf %44, %43 : vector<16x512xf32>
    %46 = vector.extract_strided_slice %35 {offsets = [1, 0], sizes = [1, 512], strides = [1, 1]} : vector<4x512xf32> to vector<1x512xf32>
    %47 = vector.extract_strided_slice %37 {offsets = [1, 0], sizes = [16, 512], strides = [1, 1]} : vector<19x512xf32> to vector<16x512xf32>
    %48 = vector.broadcast %46 : vector<1x512xf32> to vector<16x512xf32>
    %49 = arith.mulf %48, %47 : vector<16x512xf32>
    %50 = arith.addf %45, %49 : vector<16x512xf32>
    %51 = vector.extract_strided_slice %35 {offsets = [2, 0], sizes = [1, 512], strides = [1, 1]} : vector<4x512xf32> to vector<1x512xf32>
    %52 = vector.extract_strided_slice %37 {offsets = [2, 0], sizes = [16, 512], strides = [1, 1]} : vector<19x512xf32> to vector<16x512xf32>
    %53 = vector.broadcast %51 : vector<1x512xf32> to vector<16x512xf32>
    %54 = arith.mulf %53, %52 : vector<16x512xf32>
    %55 = arith.addf %50, %54 : vector<16x512xf32>
    %56 = vector.extract_strided_slice %35 {offsets = [3, 0], sizes = [1, 512], strides = [1, 1]} : vector<4x512xf32> to vector<1x512xf32>
    %57 = vector.extract_strided_slice %37 {offsets = [3, 0], sizes = [16, 512], strides = [1, 1]} : vector<19x512xf32> to vector<16x512xf32>
    %58 = vector.broadcast %56 : vector<1x512xf32> to vector<16x512xf32>
    %59 = arith.mulf %58, %57 : vector<16x512xf32>
    %60 = arith.addf %55, %59 : vector<16x512xf32>
    %cst_23 = arith.constant 0.000000e+00 : f32
    %61 = vector.broadcast %cst_23 : f32 to vector<16x512xf32>
    %62 = arith.subf %61, %60 : vector<16x512xf32>
    %63 = math.exp %62 : vector<16x512xf32>
    %cst_24 = arith.constant 1.000000e+00 : f32
    %64 = vector.broadcast %cst_24 : f32 to vector<16x512xf32>
    %65 = arith.addf %64, %63 : vector<16x512xf32>
    %cst_25 = arith.constant 1.000000e+00 : f32
    %66 = vector.broadcast %cst_25 : f32 to vector<16x512xf32>
    %67 = arith.divf %66, %65 : vector<16x512xf32>
    %68 = arith.mulf %60, %67 : vector<16x512xf32>
    %69 = arith.truncf %68 : vector<16x512xf32> to vector<16x512xbf16>
    %c0_26 = arith.constant 0 : index
    %c0_27 = arith.constant 0 : index
    %c0_28 = arith.constant 0 : index
    %70 = vector.load %arg12[%c0_26, %c0_27, %c0_28] : memref<1x512x128xbf16, #tpu.memory_space<vmem>>, vector<1x512x128xbf16>
    %71 = vector.shape_cast %70 : vector<1x512x128xbf16> to vector<512x128xbf16>
    %cst_29 = arith.constant dense<0.000000e+00> : vector<16x128xf32>
    %72 = tpu.matmul %69, %71, %cst_29 {dimension_numbers = #tpu.dot_dimension_numbers<[1], [0], [0], [1], [0, 0, 1, 1], [], []>} : vector<16x512xbf16>, vector<512x128xbf16>, vector<16x128xf32> -> vector<16x128xf32>
    %73 = vector.extract_strided_slice %72 {offsets = [0, 0], sizes = [16, 16], strides = [1, 1]} : vector<16x128xf32> to vector<16x16xf32>
    %74 = vector.extract_strided_slice %72 {offsets = [0, 16], sizes = [16, 16], strides = [1, 1]} : vector<16x128xf32> to vector<16x16xf32>
    %75 = vector.extract_strided_slice %72 {offsets = [0, 32], sizes = [16, 16], strides = [1, 1]} : vector<16x128xf32> to vector<16x16xf32>
    %76 = arith.truncf %73 : vector<16x16xf32> to vector<16x16xbf16>
    %c0_30 = arith.constant 0 : index
    %c0_31 = arith.constant 0 : index
    %c0_32 = arith.constant 0 : index
    %77 = vector.load %arg13[%c0_30, %c0_31, %c0_32] : memref<1x16x512xbf16, #tpu.memory_space<vmem>>, vector<1x16x512xbf16>
    %78 = vector.shape_cast %77 : vector<1x16x512xbf16> to vector<16x512xbf16>
    %cst_33 = arith.constant dense<0.000000e+00> : vector<16x512xf32>
    %79 = tpu.matmul %76, %78, %cst_33 {dimension_numbers = #tpu.dot_dimension_numbers<[1], [0], [0], [1], [0, 0, 1, 1], [], []>} : vector<16x16xbf16>, vector<16x512xbf16>, vector<16x512xf32> -> vector<16x512xf32>
    %c0_34 = arith.constant 0 : index
    %c0_35 = arith.constant 0 : index
    %c0_36 = arith.constant 0 : index
    %80 = vector.load %arg14[%c0_34, %c0_35, %c0_36] : memref<1x1x512xf32, #tpu.memory_space<vmem>>, vector<1x1x512xf32>
    %81 = vector.shape_cast %80 : vector<1x1x512xf32> to vector<1x512xf32>
    %82 = vector.broadcast %81 : vector<1x512xf32> to vector<16x512xf32>
    %83 = arith.addf %79, %82 : vector<16x512xf32>
    %cst_37 = arith.constant 0.000000e+00 : f32
    %84 = vector.broadcast %cst_37 : f32 to vector<16x512xf32>
    %85 = arith.maximumf %83, %84 : vector<16x512xf32>
    %86 = math.absf %83 : vector<16x512xf32>
    %cst_38 = arith.constant 0.000000e+00 : f32
    %87 = vector.broadcast %cst_38 : f32 to vector<16x512xf32>
    %88 = arith.subf %87, %86 : vector<16x512xf32>
    %89 = math.exp %88 : vector<16x512xf32>
    %cst_39 = arith.constant 1.000000e+00 : f32
    %90 = vector.broadcast %cst_39 : f32 to vector<16x512xf32>
    %91 = arith.addf %90, %89 : vector<16x512xf32>
    %92 = math.log %91 : vector<16x512xf32>
    %93 = arith.addf %85, %92 : vector<16x512xf32>
    %c0_40 = arith.constant 0 : index
    %c0_41 = arith.constant 0 : index
    %c0_42 = arith.constant 0 : index
    %94 = vector.load %arg15[%c0_40, %c0_41, %c0_42] : memref<1x16x512xf32, #tpu.memory_space<vmem>>, vector<1x16x512xf32>
    %95 = vector.shape_cast %94 : vector<1x16x512xf32> to vector<16x512xf32>
    %96 = vector.shape_cast %93 : vector<16x512xf32> to vector<16x1x512xf32>
    %97 = vector.shape_cast %95 : vector<16x512xf32> to vector<1x16x512xf32>
    %98 = vector.broadcast %96 : vector<16x1x512xf32> to vector<16x16x512xf32>
    %99 = vector.broadcast %97 : vector<1x16x512xf32> to vector<16x16x512xf32>
    %100 = arith.mulf %98, %99 : vector<16x16x512xf32>
    %101 = math.exp %100 : vector<16x16x512xf32>
    %102 = arith.mulf %93, %68 : vector<16x512xf32>
    %103 = vector.shape_cast %102 : vector<16x512xf32> to vector<16x1x512xf32>
    %104 = vector.shape_cast %74 : vector<16x16xf32> to vector<16x16x1xf32>
    %105 = vector.broadcast %103 : vector<16x1x512xf32> to vector<16x16x512xf32>
    %106 = vector.broadcast %104 : vector<16x16x1xf32> to vector<16x16x512xf32>
    %107 = arith.mulf %105, %106 : vector<16x16x512xf32>
    %108 = vector.shape_cast %75 : vector<16x16xf32> to vector<16x16x1xf32>
    %109 = vector.shape_cast %108 : vector<16x16x1xf32> to vector<16x16x1xf32>
    %110 = vector.broadcast %109 : vector<16x16x1xf32> to vector<16x16x512xf32>
    %cst_43 = arith.constant 0.000000e+00 : f32
    %111 = vector.broadcast %cst_43 : f32 to vector<16x512xf32>
    %112 = vector.extract_strided_slice %101 {offsets = [0, 0, 0], sizes = [1, 16, 512], strides = [1, 1, 1]} : vector<16x16x512xf32> to vector<1x16x512xf32>
    %113 = vector.shape_cast %112 : vector<1x16x512xf32> to vector<16x512xf32>
    %114 = arith.mulf %113, %111 : vector<16x512xf32>
    %115 = vector.extract_strided_slice %107 {offsets = [0, 0, 0], sizes = [1, 16, 512], strides = [1, 1, 1]} : vector<16x16x512xf32> to vector<1x16x512xf32>
    %116 = vector.shape_cast %115 : vector<1x16x512xf32> to vector<16x512xf32>
    %117 = arith.addf %114, %116 : vector<16x512xf32>
    %118 = vector.extract_strided_slice %110 {offsets = [0, 0, 0], sizes = [1, 16, 512], strides = [1, 1, 1]} : vector<16x16x512xf32> to vector<1x16x512xf32>
    %119 = vector.shape_cast %118 : vector<1x16x512xf32> to vector<16x512xf32>
    %120 = arith.mulf %117, %119 : vector<16x512xf32>
    %cst_44 = arith.constant dense<0.000000e+00> : vector<512xf32>
    %121 = vector.multi_reduction <add>, %120, %cst_44 [0] : vector<16x512xf32> to vector<512xf32>
    %122 = vector.shape_cast %121 : vector<512xf32> to vector<1x512xf32>
    %123 = vector.extract_strided_slice %101 {offsets = [1, 0, 0], sizes = [1, 16, 512], strides = [1, 1, 1]} : vector<16x16x512xf32> to vector<1x16x512xf32>
    %124 = vector.shape_cast %123 : vector<1x16x512xf32> to vector<16x512xf32>
    %125 = arith.mulf %124, %117 : vector<16x512xf32>
    %126 = vector.extract_strided_slice %107 {offsets = [1, 0, 0], sizes = [1, 16, 512], strides = [1, 1, 1]} : vector<16x16x512xf32> to vector<1x16x512xf32>
    %127 = vector.shape_cast %126 : vector<1x16x512xf32> to vector<16x512xf32>
    %128 = arith.addf %125, %127 : vector<16x512xf32>
    %129 = vector.extract_strided_slice %110 {offsets = [1, 0, 0], sizes = [1, 16, 512], strides = [1, 1, 1]} : vector<16x16x512xf32> to vector<1x16x512xf32>
    %130 = vector.shape_cast %129 : vector<1x16x512xf32> to vector<16x512xf32>
    %131 = arith.mulf %128, %130 : vector<16x512xf32>
    %cst_45 = arith.constant dense<0.000000e+00> : vector<512xf32>
    %132 = vector.multi_reduction <add>, %131, %cst_45 [0] : vector<16x512xf32> to vector<512xf32>
    %133 = vector.shape_cast %132 : vector<512xf32> to vector<1x512xf32>
    %134 = vector.extract_strided_slice %101 {offsets = [2, 0, 0], sizes = [1, 16, 512], strides = [1, 1, 1]} : vector<16x16x512xf32> to vector<1x16x512xf32>
    %135 = vector.shape_cast %134 : vector<1x16x512xf32> to vector<16x512xf32>
    %136 = arith.mulf %135, %128 : vector<16x512xf32>
    %137 = vector.extract_strided_slice %107 {offsets = [2, 0, 0], sizes = [1, 16, 512], strides = [1, 1, 1]} : vector<16x16x512xf32> to vector<1x16x512xf32>
    %138 = vector.shape_cast %137 : vector<1x16x512xf32> to vector<16x512xf32>
    %139 = arith.addf %136, %138 : vector<16x512xf32>
    %140 = vector.extract_strided_slice %110 {offsets = [2, 0, 0], sizes = [1, 16, 512], strides = [1, 1, 1]} : vector<16x16x512xf32> to vector<1x16x512xf32>
    %141 = vector.shape_cast %140 : vector<1x16x512xf32> to vector<16x512xf32>
    %142 = arith.mulf %139, %141 : vector<16x512xf32>
    %cst_46 = arith.constant dense<0.000000e+00> : vector<512xf32>
    %143 = vector.multi_reduction <add>, %142, %cst_46 [0] : vector<16x512xf32> to vector<512xf32>
    %144 = vector.shape_cast %143 : vector<512xf32> to vector<1x512xf32>
    %145 = vector.extract_strided_slice %101 {offsets = [3, 0, 0], sizes = [1, 16, 512], strides = [1, 1, 1]} : vector<16x16x512xf32> to vector<1x16x512xf32>
    %146 = vector.shape_cast %145 : vector<1x16x512xf32> to vector<16x512xf32>
    %147 = arith.mulf %146, %139 : vector<16x512xf32>
    %148 = vector.extract_strided_slice %107 {offsets = [3, 0, 0], sizes = [1, 16, 512], strides = [1, 1, 1]} : vector<16x16x512xf32> to vector<1x16x512xf32>
    %149 = vector.shape_cast %148 : vector<1x16x512xf32> to vector<16x512xf32>
    %150 = arith.addf %147, %149 : vector<16x512xf32>
    %151 = vector.extract_strided_slice %110 {offsets = [3, 0, 0], sizes = [1, 16, 512], strides = [1, 1, 1]} : vector<16x16x512xf32> to vector<1x16x512xf32>
    %152 = vector.shape_cast %151 : vector<1x16x512xf32> to vector<16x512xf32>
    %153 = arith.mulf %150, %152 : vector<16x512xf32>
    %cst_47 = arith.constant dense<0.000000e+00> : vector<512xf32>
    %154 = vector.multi_reduction <add>, %153, %cst_47 [0] : vector<16x512xf32> to vector<512xf32>
    %155 = vector.shape_cast %154 : vector<512xf32> to vector<1x512xf32>
    %156 = vector.extract_strided_slice %101 {offsets = [4, 0, 0], sizes = [1, 16, 512], strides = [1, 1, 1]} : vector<16x16x512xf32> to vector<1x16x512xf32>
    %157 = vector.shape_cast %156 : vector<1x16x512xf32> to vector<16x512xf32>
    %158 = arith.mulf %157, %150 : vector<16x512xf32>
    %159 = vector.extract_strided_slice %107 {offsets = [4, 0, 0], sizes = [1, 16, 512], strides = [1, 1, 1]} : vector<16x16x512xf32> to vector<1x16x512xf32>
    %160 = vector.shape_cast %159 : vector<1x16x512xf32> to vector<16x512xf32>
    %161 = arith.addf %158, %160 : vector<16x512xf32>
    %162 = vector.extract_strided_slice %110 {offsets = [4, 0, 0], sizes = [1, 16, 512], strides = [1, 1, 1]} : vector<16x16x512xf32> to vector<1x16x512xf32>
    %163 = vector.shape_cast %162 : vector<1x16x512xf32> to vector<16x512xf32>
    %164 = arith.mulf %161, %163 : vector<16x512xf32>
    %cst_48 = arith.constant dense<0.000000e+00> : vector<512xf32>
    %165 = vector.multi_reduction <add>, %164, %cst_48 [0] : vector<16x512xf32> to vector<512xf32>
    %166 = vector.shape_cast %165 : vector<512xf32> to vector<1x512xf32>
    %167 = vector.extract_strided_slice %101 {offsets = [5, 0, 0], sizes = [1, 16, 512], strides = [1, 1, 1]} : vector<16x16x512xf32> to vector<1x16x512xf32>
    %168 = vector.shape_cast %167 : vector<1x16x512xf32> to vector<16x512xf32>
    %169 = arith.mulf %168, %161 : vector<16x512xf32>
    %170 = vector.extract_strided_slice %107 {offsets = [5, 0, 0], sizes = [1, 16, 512], strides = [1, 1, 1]} : vector<16x16x512xf32> to vector<1x16x512xf32>
    %171 = vector.shape_cast %170 : vector<1x16x512xf32> to vector<16x512xf32>
    %172 = arith.addf %169, %171 : vector<16x512xf32>
    %173 = vector.extract_strided_slice %110 {offsets = [5, 0, 0], sizes = [1, 16, 512], strides = [1, 1, 1]} : vector<16x16x512xf32> to vector<1x16x512xf32>
    %174 = vector.shape_cast %173 : vector<1x16x512xf32> to vector<16x512xf32>
    %175 = arith.mulf %172, %174 : vector<16x512xf32>
    %cst_49 = arith.constant dense<0.000000e+00> : vector<512xf32>
    %176 = vector.multi_reduction <add>, %175, %cst_49 [0] : vector<16x512xf32> to vector<512xf32>
    %177 = vector.shape_cast %176 : vector<512xf32> to vector<1x512xf32>
    %178 = vector.extract_strided_slice %101 {offsets = [6, 0, 0], sizes = [1, 16, 512], strides = [1, 1, 1]} : vector<16x16x512xf32> to vector<1x16x512xf32>
    %179 = vector.shape_cast %178 : vector<1x16x512xf32> to vector<16x512xf32>
    %180 = arith.mulf %179, %172 : vector<16x512xf32>
    %181 = vector.extract_strided_slice %107 {offsets = [6, 0, 0], sizes = [1, 16, 512], strides = [1, 1, 1]} : vector<16x16x512xf32> to vector<1x16x512xf32>
    %182 = vector.shape_cast %181 : vector<1x16x512xf32> to vector<16x512xf32>
    %183 = arith.addf %180, %182 : vector<16x512xf32>
    %184 = vector.extract_strided_slice %110 {offsets = [6, 0, 0], sizes = [1, 16, 512], strides = [1, 1, 1]} : vector<16x16x512xf32> to vector<1x16x512xf32>
    %185 = vector.shape_cast %184 : vector<1x16x512xf32> to vector<16x512xf32>
    %186 = arith.mulf %183, %185 : vector<16x512xf32>
    %cst_50 = arith.constant dense<0.000000e+00> : vector<512xf32>
    %187 = vector.multi_reduction <add>, %186, %cst_50 [0] : vector<16x512xf32> to vector<512xf32>
    %188 = vector.shape_cast %187 : vector<512xf32> to vector<1x512xf32>
    %189 = vector.extract_strided_slice %101 {offsets = [7, 0, 0], sizes = [1, 16, 512], strides = [1, 1, 1]} : vector<16x16x512xf32> to vector<1x16x512xf32>
    %190 = vector.shape_cast %189 : vector<1x16x512xf32> to vector<16x512xf32>
    %191 = arith.mulf %190, %183 : vector<16x512xf32>
    %192 = vector.extract_strided_slice %107 {offsets = [7, 0, 0], sizes = [1, 16, 512], strides = [1, 1, 1]} : vector<16x16x512xf32> to vector<1x16x512xf32>
    %193 = vector.shape_cast %192 : vector<1x16x512xf32> to vector<16x512xf32>
    %194 = arith.addf %191, %193 : vector<16x512xf32>
    %195 = vector.extract_strided_slice %110 {offsets = [7, 0, 0], sizes = [1, 16, 512], strides = [1, 1, 1]} : vector<16x16x512xf32> to vector<1x16x512xf32>
    %196 = vector.shape_cast %195 : vector<1x16x512xf32> to vector<16x512xf32>
    %197 = arith.mulf %194, %196 : vector<16x512xf32>
    %cst_51 = arith.constant dense<0.000000e+00> : vector<512xf32>
    %198 = vector.multi_reduction <add>, %197, %cst_51 [0] : vector<16x512xf32> to vector<512xf32>
    %199 = vector.shape_cast %198 : vector<512xf32> to vector<1x512xf32>
    %200 = vector.extract_strided_slice %101 {offsets = [8, 0, 0], sizes = [1, 16, 512], strides = [1, 1, 1]} : vector<16x16x512xf32> to vector<1x16x512xf32>
    %201 = vector.shape_cast %200 : vector<1x16x512xf32> to vector<16x512xf32>
    %202 = arith.mulf %201, %194 : vector<16x512xf32>
    %203 = vector.extract_strided_slice %107 {offsets = [8, 0, 0], sizes = [1, 16, 512], strides = [1, 1, 1]} : vector<16x16x512xf32> to vector<1x16x512xf32>
    %204 = vector.shape_cast %203 : vector<1x16x512xf32> to vector<16x512xf32>
    %205 = arith.addf %202, %204 : vector<16x512xf32>
    %206 = vector.extract_strided_slice %110 {offsets = [8, 0, 0], sizes = [1, 16, 512], strides = [1, 1, 1]} : vector<16x16x512xf32> to vector<1x16x512xf32>
    %207 = vector.shape_cast %206 : vector<1x16x512xf32> to vector<16x512xf32>
    %208 = arith.mulf %205, %207 : vector<16x512xf32>
    %cst_52 = arith.constant dense<0.000000e+00> : vector<512xf32>
    %209 = vector.multi_reduction <add>, %208, %cst_52 [0] : vector<16x512xf32> to vector<512xf32>
    %210 = vector.shape_cast %209 : vector<512xf32> to vector<1x512xf32>
    %211 = vector.extract_strided_slice %101 {offsets = [9, 0, 0], sizes = [1, 16, 512], strides = [1, 1, 1]} : vector<16x16x512xf32> to vector<1x16x512xf32>
    %212 = vector.shape_cast %211 : vector<1x16x512xf32> to vector<16x512xf32>
    %213 = arith.mulf %212, %205 : vector<16x512xf32>
    %214 = vector.extract_strided_slice %107 {offsets = [9, 0, 0], sizes = [1, 16, 512], strides = [1, 1, 1]} : vector<16x16x512xf32> to vector<1x16x512xf32>
    %215 = vector.shape_cast %214 : vector<1x16x512xf32> to vector<16x512xf32>
    %216 = arith.addf %213, %215 : vector<16x512xf32>
    %217 = vector.extract_strided_slice %110 {offsets = [9, 0, 0], sizes = [1, 16, 512], strides = [1, 1, 1]} : vector<16x16x512xf32> to vector<1x16x512xf32>
    %218 = vector.shape_cast %217 : vector<1x16x512xf32> to vector<16x512xf32>
    %219 = arith.mulf %216, %218 : vector<16x512xf32>
    %cst_53 = arith.constant dense<0.000000e+00> : vector<512xf32>
    %220 = vector.multi_reduction <add>, %219, %cst_53 [0] : vector<16x512xf32> to vector<512xf32>
    %221 = vector.shape_cast %220 : vector<512xf32> to vector<1x512xf32>
    %222 = vector.extract_strided_slice %101 {offsets = [10, 0, 0], sizes = [1, 16, 512], strides = [1, 1, 1]} : vector<16x16x512xf32> to vector<1x16x512xf32>
    %223 = vector.shape_cast %222 : vector<1x16x512xf32> to vector<16x512xf32>
    %224 = arith.mulf %223, %216 : vector<16x512xf32>
    %225 = vector.extract_strided_slice %107 {offsets = [10, 0, 0], sizes = [1, 16, 512], strides = [1, 1, 1]} : vector<16x16x512xf32> to vector<1x16x512xf32>
    %226 = vector.shape_cast %225 : vector<1x16x512xf32> to vector<16x512xf32>
    %227 = arith.addf %224, %226 : vector<16x512xf32>
    %228 = vector.extract_strided_slice %110 {offsets = [10, 0, 0], sizes = [1, 16, 512], strides = [1, 1, 1]} : vector<16x16x512xf32> to vector<1x16x512xf32>
    %229 = vector.shape_cast %228 : vector<1x16x512xf32> to vector<16x512xf32>
    %230 = arith.mulf %227, %229 : vector<16x512xf32>
    %cst_54 = arith.constant dense<0.000000e+00> : vector<512xf32>
    %231 = vector.multi_reduction <add>, %230, %cst_54 [0] : vector<16x512xf32> to vector<512xf32>
    %232 = vector.shape_cast %231 : vector<512xf32> to vector<1x512xf32>
    %233 = vector.extract_strided_slice %101 {offsets = [11, 0, 0], sizes = [1, 16, 512], strides = [1, 1, 1]} : vector<16x16x512xf32> to vector<1x16x512xf32>
    %234 = vector.shape_cast %233 : vector<1x16x512xf32> to vector<16x512xf32>
    %235 = arith.mulf %234, %227 : vector<16x512xf32>
    %236 = vector.extract_strided_slice %107 {offsets = [11, 0, 0], sizes = [1, 16, 512], strides = [1, 1, 1]} : vector<16x16x512xf32> to vector<1x16x512xf32>
    %237 = vector.shape_cast %236 : vector<1x16x512xf32> to vector<16x512xf32>
    %238 = arith.addf %235, %237 : vector<16x512xf32>
    %239 = vector.extract_strided_slice %110 {offsets = [11, 0, 0], sizes = [1, 16, 512], strides = [1, 1, 1]} : vector<16x16x512xf32> to vector<1x16x512xf32>
    %240 = vector.shape_cast %239 : vector<1x16x512xf32> to vector<16x512xf32>
    %241 = arith.mulf %238, %240 : vector<16x512xf32>
    %cst_55 = arith.constant dense<0.000000e+00> : vector<512xf32>
    %242 = vector.multi_reduction <add>, %241, %cst_55 [0] : vector<16x512xf32> to vector<512xf32>
    %243 = vector.shape_cast %242 : vector<512xf32> to vector<1x512xf32>
    %244 = vector.extract_strided_slice %101 {offsets = [12, 0, 0], sizes = [1, 16, 512], strides = [1, 1, 1]} : vector<16x16x512xf32> to vector<1x16x512xf32>
    %245 = vector.shape_cast %244 : vector<1x16x512xf32> to vector<16x512xf32>
    %246 = arith.mulf %245, %238 : vector<16x512xf32>
    %247 = vector.extract_strided_slice %107 {offsets = [12, 0, 0], sizes = [1, 16, 512], strides = [1, 1, 1]} : vector<16x16x512xf32> to vector<1x16x512xf32>
    %248 = vector.shape_cast %247 : vector<1x16x512xf32> to vector<16x512xf32>
    %249 = arith.addf %246, %248 : vector<16x512xf32>
    %250 = vector.extract_strided_slice %110 {offsets = [12, 0, 0], sizes = [1, 16, 512], strides = [1, 1, 1]} : vector<16x16x512xf32> to vector<1x16x512xf32>
    %251 = vector.shape_cast %250 : vector<1x16x512xf32> to vector<16x512xf32>
    %252 = arith.mulf %249, %251 : vector<16x512xf32>
    %cst_56 = arith.constant dense<0.000000e+00> : vector<512xf32>
    %253 = vector.multi_reduction <add>, %252, %cst_56 [0] : vector<16x512xf32> to vector<512xf32>
    %254 = vector.shape_cast %253 : vector<512xf32> to vector<1x512xf32>
    %255 = vector.extract_strided_slice %101 {offsets = [13, 0, 0], sizes = [1, 16, 512], strides = [1, 1, 1]} : vector<16x16x512xf32> to vector<1x16x512xf32>
    %256 = vector.shape_cast %255 : vector<1x16x512xf32> to vector<16x512xf32>
    %257 = arith.mulf %256, %249 : vector<16x512xf32>
    %258 = vector.extract_strided_slice %107 {offsets = [13, 0, 0], sizes = [1, 16, 512], strides = [1, 1, 1]} : vector<16x16x512xf32> to vector<1x16x512xf32>
    %259 = vector.shape_cast %258 : vector<1x16x512xf32> to vector<16x512xf32>
    %260 = arith.addf %257, %259 : vector<16x512xf32>
    %261 = vector.extract_strided_slice %110 {offsets = [13, 0, 0], sizes = [1, 16, 512], strides = [1, 1, 1]} : vector<16x16x512xf32> to vector<1x16x512xf32>
    %262 = vector.shape_cast %261 : vector<1x16x512xf32> to vector<16x512xf32>
    %263 = arith.mulf %260, %262 : vector<16x512xf32>
    %cst_57 = arith.constant dense<0.000000e+00> : vector<512xf32>
    %264 = vector.multi_reduction <add>, %263, %cst_57 [0] : vector<16x512xf32> to vector<512xf32>
    %265 = vector.shape_cast %264 : vector<512xf32> to vector<1x512xf32>
    %266 = vector.extract_strided_slice %101 {offsets = [14, 0, 0], sizes = [1, 16, 512], strides = [1, 1, 1]} : vector<16x16x512xf32> to vector<1x16x512xf32>
    %267 = vector.shape_cast %266 : vector<1x16x512xf32> to vector<16x512xf32>
    %268 = arith.mulf %267, %260 : vector<16x512xf32>
    %269 = vector.extract_strided_slice %107 {offsets = [14, 0, 0], sizes = [1, 16, 512], strides = [1, 1, 1]} : vector<16x16x512xf32> to vector<1x16x512xf32>
    %270 = vector.shape_cast %269 : vector<1x16x512xf32> to vector<16x512xf32>
    %271 = arith.addf %268, %270 : vector<16x512xf32>
    %272 = vector.extract_strided_slice %110 {offsets = [14, 0, 0], sizes = [1, 16, 512], strides = [1, 1, 1]} : vector<16x16x512xf32> to vector<1x16x512xf32>
    %273 = vector.shape_cast %272 : vector<1x16x512xf32> to vector<16x512xf32>
    %274 = arith.mulf %271, %273 : vector<16x512xf32>
    %cst_58 = arith.constant dense<0.000000e+00> : vector<512xf32>
    %275 = vector.multi_reduction <add>, %274, %cst_58 [0] : vector<16x512xf32> to vector<512xf32>
    %276 = vector.shape_cast %275 : vector<512xf32> to vector<1x512xf32>
    %277 = vector.extract_strided_slice %101 {offsets = [15, 0, 0], sizes = [1, 16, 512], strides = [1, 1, 1]} : vector<16x16x512xf32> to vector<1x16x512xf32>
    %278 = vector.shape_cast %277 : vector<1x16x512xf32> to vector<16x512xf32>
    %279 = arith.mulf %278, %271 : vector<16x512xf32>
    %280 = vector.extract_strided_slice %107 {offsets = [15, 0, 0], sizes = [1, 16, 512], strides = [1, 1, 1]} : vector<16x16x512xf32> to vector<1x16x512xf32>
    %281 = vector.shape_cast %280 : vector<1x16x512xf32> to vector<16x512xf32>
    %282 = arith.addf %279, %281 : vector<16x512xf32>
    %283 = vector.extract_strided_slice %110 {offsets = [15, 0, 0], sizes = [1, 16, 512], strides = [1, 1, 1]} : vector<16x16x512xf32> to vector<1x16x512xf32>
    %284 = vector.shape_cast %283 : vector<1x16x512xf32> to vector<16x512xf32>
    %285 = arith.mulf %282, %284 : vector<16x512xf32>
    %cst_59 = arith.constant dense<0.000000e+00> : vector<512xf32>
    %286 = vector.multi_reduction <add>, %285, %cst_59 [0] : vector<16x512xf32> to vector<512xf32>
    %287 = vector.shape_cast %286 : vector<512xf32> to vector<1x512xf32>
    %c0_60 = arith.constant 0 : index
    %c0_61 = arith.constant 0 : index
    %c0_62 = arith.constant 0 : index
    %288 = vector.load %arg16[%c0_60, %c0_61, %c0_62] : memref<1x1x512xf32, #tpu.memory_space<vmem>>, vector<1x1x512xf32>
    %289 = vector.shape_cast %288 : vector<1x1x512xf32> to vector<1x512xf32>
    %290 = vector.broadcast %289 : vector<1x512xf32> to vector<16x512xf32>
    %291 = arith.mulf %290, %68 : vector<16x512xf32>
    %292 = tpu.concatenate %122, %133, %144, %155, %166, %177, %188, %199, %210, %221, %232, %243, %254, %265, %276, %287 in 0 : vector<1x512xf32>, vector<1x512xf32>, vector<1x512xf32>, vector<1x512xf32>, vector<1x512xf32>, vector<1x512xf32>, vector<1x512xf32>, vector<1x512xf32>, vector<1x512xf32>, vector<1x512xf32>, vector<1x512xf32>, vector<1x512xf32>, vector<1x512xf32>, vector<1x512xf32>, vector<1x512xf32>, vector<1x512xf32> -> vector<16x512xf32>
    %293 = arith.addf %291, %292 : vector<16x512xf32>
    %cst_63 = arith.constant 0.000000e+00 : f32
    %294 = vector.broadcast %cst_63 : f32 to vector<16x512xf32>
    %295 = arith.subf %294, %33 : vector<16x512xf32>
    %296 = math.exp %295 : vector<16x512xf32>
    %cst_64 = arith.constant 1.000000e+00 : f32
    %297 = vector.broadcast %cst_64 : f32 to vector<16x512xf32>
    %298 = arith.addf %297, %296 : vector<16x512xf32>
    %cst_65 = arith.constant 1.000000e+00 : f32
    %299 = vector.broadcast %cst_65 : f32 to vector<16x512xf32>
    %300 = arith.divf %299, %298 : vector<16x512xf32>
    %301 = arith.mulf %33, %300 : vector<16x512xf32>
    %302 = arith.mulf %293, %301 : vector<16x512xf32>
    %303 = arith.truncf %302 : vector<16x512xf32> to vector<16x512xbf16>
    %c0_66 = arith.constant 0 : index
    %c0_67 = arith.constant 0 : index
    %c0_68 = arith.constant 0 : index
    %304 = vector.load %arg17[%c0_66, %c0_67, %c0_68] : memref<1x512x256xbf16, #tpu.memory_space<vmem>>, vector<1x512x256xbf16>
    %305 = vector.shape_cast %304 : vector<1x512x256xbf16> to vector<512x256xbf16>
    %cst_69 = arith.constant dense<0.000000e+00> : vector<16x256xf32>
    %306 = tpu.matmul %303, %305, %cst_69 {dimension_numbers = #tpu.dot_dimension_numbers<[1], [0], [0], [1], [0, 0, 1, 1], [], []>} : vector<16x512xbf16>, vector<512x256xbf16>, vector<16x256xf32> -> vector<16x256xf32>
    %307 = arith.addf %3, %306 : vector<16x256xf32>
    %c0_70 = arith.constant 0 : index
    %c0_71 = arith.constant 0 : index
    %308 = vector.load %arg32[%c0_70, %c0_71] : memref<16x256xf32, #tpu.memory_space<vmem>>, vector<16x256xf32>
    tpu.vector_store %arg32[%c0_70, %c0_71], %307 {strides = array<i32>} : memref<16x256xf32, #tpu.memory_space<vmem>>, vector<16x256xf32>,
    %c1_i32 = arith.constant 1 : i32
    %309 = arith.cmpi eq, %arg1, %c1_i32 : i32
    %310 = arith.extui %309 : i1 to i32
    %c0_i32_72 = arith.constant 0 : i32
    %311 = arith.cmpi ne, %310, %c0_i32_72 : i32
    scf.if %311 {
      %312 = arith.truncf %307 : vector<16x256xf32> to vector<16x256xbf16>
      %c0_73 = arith.constant 0 : index
      %c0_74 = arith.constant 0 : index
      %313 = vector.load %arg18[%c0_73, %c0_74] : memref<256x512xbf16, #tpu.memory_space<vmem>>, vector<256x512xbf16>
      %cst_75 = arith.constant dense<0.000000e+00> : vector<16x512xf32>
      %314 = tpu.matmul %312, %313, %cst_75 {dimension_numbers = #tpu.dot_dimension_numbers<[1], [0], [0], [1], [0, 0, 1, 1], [], []>} : vector<16x256xbf16>, vector<256x512xbf16>, vector<16x512xf32> -> vector<16x512xf32>
      %c0_76 = arith.constant 0 : index
      %c0_77 = arith.constant 0 : index
      %315 = vector.load %arg19[%c0_76, %c0_77] : memref<1x512xf32, #tpu.memory_space<vmem>>, vector<1x512xf32>
      %316 = vector.broadcast %315 : vector<1x512xf32> to vector<16x512xf32>
      %317 = arith.addf %314, %316 : vector<16x512xf32>
      %cst_78 = arith.constant 0.000000e+00 : f32
      %318 = vector.broadcast %cst_78 : f32 to vector<16x512xf32>
      %319 = arith.maximumf %317, %318 : vector<16x512xf32>
      %cst_79 = arith.constant dense<0.000000e+00> : vector<16xf32>
      %320 = vector.multi_reduction <add>, %319, %cst_79 [1] : vector<16x512xf32> to vector<16xf32>
      %321 = vector.shape_cast %320 : vector<16xf32> to vector<16x1xf32>
      %cst_80 = arith.constant 5.120000e+02 : f32
      %322 = vector.broadcast %cst_80 : f32 to vector<16x1xf32>
      %323 = arith.divf %321, %322 : vector<16x1xf32>
      %324 = vector.broadcast %323 : vector<16x1xf32> to vector<16x512xf32>
      %325 = arith.subf %319, %324 : vector<16x512xf32>
      %326 = arith.mulf %325, %325 : vector<16x512xf32>
      %cst_81 = arith.constant dense<0.000000e+00> : vector<16xf32>
      %327 = vector.multi_reduction <add>, %326, %cst_81 [1] : vector<16x512xf32> to vector<16xf32>
      %328 = vector.shape_cast %327 : vector<16xf32> to vector<16x1xf32>
      %cst_82 = arith.constant 5.120000e+02 : f32
      %329 = vector.broadcast %cst_82 : f32 to vector<16x1xf32>
      %330 = arith.divf %328, %329 : vector<16x1xf32>
      %cst_83 = arith.constant 9.99999974E-6 : f32
      %331 = vector.broadcast %cst_83 : f32 to vector<16x1xf32>
      %332 = arith.addf %330, %331 : vector<16x1xf32>
      %333 = math.rsqrt %332 : vector<16x1xf32>
      %334 = vector.broadcast %333 : vector<16x1xf32> to vector<16x512xf32>
      %335 = arith.mulf %325, %334 : vector<16x512xf32>
      %c0_84 = arith.constant 0 : index
      %c0_85 = arith.constant 0 : index
      %336 = vector.load %arg20[%c0_84, %c0_85] : memref<1x512xf32, #tpu.memory_space<vmem>>, vector<1x512xf32>
      %337 = vector.broadcast %336 : vector<1x512xf32> to vector<16x512xf32>
      %338 = arith.mulf %335, %337 : vector<16x512xf32>
      %c0_86 = arith.constant 0 : index
      %c0_87 = arith.constant 0 : index
      %339 = vector.load %arg21[%c0_86, %c0_87] : memref<1x512xf32, #tpu.memory_space<vmem>>, vector<1x512xf32>
      %340 = vector.broadcast %339 : vector<1x512xf32> to vector<16x512xf32>
      %341 = arith.addf %338, %340 : vector<16x512xf32>
      %342 = arith.truncf %341 : vector<16x512xf32> to vector<16x512xbf16>
      %c0_88 = arith.constant 0 : index
      %c0_89 = arith.constant 0 : index
      %343 = vector.load %arg22[%c0_88, %c0_89] : memref<512x128xbf16, #tpu.memory_space<vmem>>, vector<512x128xbf16>
      %cst_90 = arith.constant dense<0.000000e+00> : vector<16x128xf32>
      %344 = tpu.matmul %342, %343, %cst_90 {dimension_numbers = #tpu.dot_dimension_numbers<[1], [0], [0], [1], [0, 0, 1, 1], [], []>} : vector<16x512xbf16>, vector<512x128xbf16>, vector<16x128xf32> -> vector<16x128xf32>
      %c0_91 = arith.constant 0 : index
      %c0_92 = arith.constant 0 : index
      %345 = vector.load %arg23[%c0_91, %c0_92] : memref<1x128xf32, #tpu.memory_space<vmem>>, vector<1x128xf32>
      %346 = vector.broadcast %345 : vector<1x128xf32> to vector<16x128xf32>
      %347 = arith.addf %344, %346 : vector<16x128xf32>
      %348 = math.tanh %347 : vector<16x128xf32>
      %c0_93 = arith.constant 0 : index
      %c0_94 = arith.constant 0 : index
      %349 = vector.load %arg24[%c0_93, %c0_94] : memref<1x128xf32, #tpu.memory_space<vmem>>, vector<1x128xf32>
      %350 = vector.broadcast %349 : vector<1x128xf32> to vector<16x128xf32>
      %351 = arith.mulf %348, %350 : vector<16x128xf32>
      %cst_95 = arith.constant dense<0.000000e+00> : vector<16xf32>
      %352 = vector.multi_reduction <add>, %351, %cst_95 [1] : vector<16x128xf32> to vector<16xf32>
      %353 = vector.shape_cast %352 : vector<16xf32> to vector<16x1xf32>
      %c0_96 = arith.constant 0 : index
      %c0_97 = arith.constant 0 : index
      %354 = vector.load %arg25[%c0_96, %c0_97] : memref<1x1xf32, #tpu.memory_space<vmem>>, vector<1x1xf32>
      %355 = vector.broadcast %354 : vector<1x1xf32> to vector<16x1xf32>
      %356 = arith.addf %353, %355 : vector<16x1xf32>
      %c0_98 = arith.constant 0 : index
      %c0_99 = arith.constant 0 : index
      %c0_100 = arith.constant 0 : index
      %357 = vector.load %arg29[%c0_98, %c0_99, %c0_100] : memref<1x16x1xf32, #tpu.memory_space<vmem>>, vector<1x16x1xf32>
      %358 = vector.shape_cast %357 : vector<1x16x1xf32> to vector<16x1xf32>
      %359 = vector.shape_cast %356 : vector<16x1xf32> to vector<1x16x1xf32>
      tpu.vector_store %arg29[%c0_98, %c0_99, %c0_100], %359 {strides = array<i32>} : memref<1x16x1xf32, #tpu.memory_space<vmem>>, vector<1x16x1xf32>,
      %cst_101 = arith.constant dense<0xFF800000> : vector<1xf32>
      %360 = vector.multi_reduction <maximumf>, %356, %cst_101 [0] : vector<16x1xf32> to vector<1xf32>
      %361 = vector.shape_cast %360 : vector<1xf32> to vector<1x1xf32>
      %362 = vector.broadcast %361 : vector<1x1xf32> to vector<16x1xf32>
      %363 = arith.subf %356, %362 : vector<16x1xf32>
      %364 = math.exp %363 : vector<16x1xf32>
      %cst_102 = arith.constant dense<0.000000e+00> : vector<1xf32>
      %365 = vector.multi_reduction <add>, %364, %cst_102 [0] : vector<16x1xf32> to vector<1xf32>
      %366 = vector.shape_cast %365 : vector<1xf32> to vector<1x1xf32>
      %367 = vector.broadcast %366 : vector<1x1xf32> to vector<16x1xf32>
      %368 = arith.divf %364, %367 : vector<16x1xf32>
      %369 = vector.broadcast %368 : vector<16x1xf32> to vector<16x512xf32>
      %370 = arith.mulf %369, %341 : vector<16x512xf32>
      %cst_103 = arith.constant dense<0.000000e+00> : vector<512xf32>
      %371 = vector.multi_reduction <add>, %370, %cst_103 [0] : vector<16x512xf32> to vector<512xf32>
      %372 = vector.shape_cast %371 : vector<512xf32> to vector<1x512xf32>
      %c0_104 = arith.constant 0 : index
      %c0_105 = arith.constant 0 : index
      %c0_106 = arith.constant 0 : index
      %373 = vector.load %arg28[%c0_104, %c0_105, %c0_106] : memref<1x1x512xf32, #tpu.memory_space<vmem>>, vector<1x1x512xf32>
      %374 = vector.shape_cast %373 : vector<1x1x512xf32> to vector<1x512xf32>
      %375 = vector.shape_cast %372 : vector<1x512xf32> to vector<1x1x512xf32>
      tpu.vector_store %arg28[%c0_104, %c0_105, %c0_106], %375 {strides = array<i32>} : memref<1x1x512xf32, #tpu.memory_space<vmem>>, vector<1x1x512xf32>,
      %c0_107 = arith.constant 0 : index
      %c0_108 = arith.constant 0 : index
      %376 = vector.load %arg26[%c0_107, %c0_108] : memref<512x2xf32, #tpu.memory_space<vmem>>, vector<512x2xf32>
      %cst_109 = arith.constant dense<0.000000e+00> : vector<1x2xf32>
      %377 = tpu.matmul %372, %376, %cst_109 {dimension_numbers = #tpu.dot_dimension_numbers<[1], [0], [0], [1], [0, 0, 1, 1], [], []>} : vector<1x512xf32>, vector<512x2xf32>, vector<1x2xf32> -> vector<1x2xf32>
      %c0_110 = arith.constant 0 : index
      %c0_111 = arith.constant 0 : index
      %378 = vector.load %arg27[%c0_110, %c0_111] : memref<1x2xf32, #tpu.memory_space<vmem>>, vector<1x2xf32>
      %379 = arith.addf %377, %378 : vector<1x2xf32>
      %c0_112 = arith.constant 0 : index
      %c0_113 = arith.constant 0 : index
      %c0_114 = arith.constant 0 : index
      %380 = vector.load %arg30[%c0_112, %c0_113, %c0_114] : memref<1x1x2xf32, #tpu.memory_space<vmem>>, vector<1x1x2xf32>
      %381 = vector.shape_cast %380 : vector<1x1x2xf32> to vector<1x2xf32>
      %382 = vector.shape_cast %379 : vector<1x2xf32> to vector<1x1x2xf32>
      tpu.vector_store %arg30[%c0_112, %c0_113, %c0_114], %382 {strides = array<i32>} : memref<1x1x2xf32, #tpu.memory_space<vmem>>, vector<1x1x2xf32>,
      %cst_115 = arith.constant dense<0xFF800000> : vector<1xf32>
      %383 = vector.multi_reduction <maximumf>, %379, %cst_115 [1] : vector<1x2xf32> to vector<1xf32>
      %384 = vector.shape_cast %383 : vector<1xf32> to vector<1x1xf32>
      %385 = vector.broadcast %384 : vector<1x1xf32> to vector<1x2xf32>
      %386 = arith.subf %379, %385 : vector<1x2xf32>
      %387 = math.exp %386 : vector<1x2xf32>
      %cst_116 = arith.constant dense<0.000000e+00> : vector<1xf32>
      %388 = vector.multi_reduction <add>, %387, %cst_116 [1] : vector<1x2xf32> to vector<1xf32>
      %389 = vector.shape_cast %388 : vector<1xf32> to vector<1x1xf32>
      %390 = vector.broadcast %389 : vector<1x1xf32> to vector<1x2xf32>
      %391 = arith.divf %387, %390 : vector<1x2xf32>
      %c0_117 = arith.constant 0 : index
      %c0_118 = arith.constant 0 : index
      %c0_119 = arith.constant 0 : index
      %392 = vector.load %arg31[%c0_117, %c0_118, %c0_119] : memref<1x1x2xf32, #tpu.memory_space<vmem>>, vector<1x1x2xf32>
      %393 = vector.shape_cast %392 : vector<1x1x2xf32> to vector<1x2xf32>
      %394 = vector.shape_cast %391 : vector<1x2xf32> to vector<1x1x2xf32>
      tpu.vector_store %arg31[%c0_117, %c0_118, %c0_119], %394 {strides = array<i32>} : memref<1x1x2xf32, #tpu.memory_space<vmem>>, vector<1x1x2xf32>,
    } else {
    }
    return
  }
  func.func @transform_0(%arg0: i32, %arg1: i32) -> (i32, i32, i32) {
    %c0_i32 = arith.constant 0 : i32
    %c0_i32_0 = arith.constant 0 : i32
    %c0_i32_1 = arith.constant 0 : i32
    return %arg0, %c0_i32, %c0_i32_0 : i32, i32, i32
  }
  func.func @transform_1(%arg0: i32, %arg1: i32) -> (i32, i32) {
    %c0_i32 = arith.constant 0 : i32
    %c0_i32_0 = arith.constant 0 : i32
    %c0_i32_1 = arith.constant 0 : i32
    return %c0_i32, %c0_i32_0 : i32, i32
  }
  func.func @transform_2(%arg0: i32, %arg1: i32) -> (i32, i32) {
    %c0_i32 = arith.constant 0 : i32
    %c0_i32_0 = arith.constant 0 : i32
    %c0_i32_1 = arith.constant 0 : i32
    return %c0_i32, %c0_i32_0 : i32, i32
  }
  func.func @transform_3(%arg0: i32, %arg1: i32) -> (i32, i32) {
    %c0_i32 = arith.constant 0 : i32
    %c0_i32_0 = arith.constant 0 : i32
    %c0_i32_1 = arith.constant 0 : i32
    return %c0_i32, %c0_i32_0 : i32, i32
  }
  func.func @transform_4(%arg0: i32, %arg1: i32) -> (i32, i32) {
    %c0_i32 = arith.constant 0 : i32
    %c0_i32_0 = arith.constant 0 : i32
    %c0_i32_1 = arith.constant 0 : i32
    return %c0_i32, %c0_i32_0 : i32, i32
  }
  func.func @transform_5(%arg0: i32, %arg1: i32) -> (i32, i32, i32) {
    %c0_i32 = arith.constant 0 : i32
    %c0_i32_0 = arith.constant 0 : i32
    %c0_i32_1 = arith.constant 0 : i32
    return %arg1, %c0_i32, %c0_i32_0 : i32, i32, i32
  }
  func.func @transform_6(%arg0: i32, %arg1: i32) -> (i32, i32, i32) {
    %c0_i32 = arith.constant 0 : i32
    %c0_i32_0 = arith.constant 0 : i32
    %c0_i32_1 = arith.constant 0 : i32
    return %arg1, %c0_i32, %c0_i32_0 : i32, i32, i32
  }
  func.func @transform_7(%arg0: i32, %arg1: i32) -> (i32, i32, i32) {
    %c0_i32 = arith.constant 0 : i32
    %c0_i32_0 = arith.constant 0 : i32
    %c0_i32_1 = arith.constant 0 : i32
    return %arg1, %c0_i32, %c0_i32_0 : i32, i32, i32
  }
  func.func @transform_8(%arg0: i32, %arg1: i32) -> (i32, i32, i32) {
    %c0_i32 = arith.constant 0 : i32
    %c0_i32_0 = arith.constant 0 : i32
    %c0_i32_1 = arith.constant 0 : i32
    return %arg1, %c0_i32, %c0_i32_0 : i32, i32, i32
  }
  func.func @transform_9(%arg0: i32, %arg1: i32) -> (i32, i32, i32) {
    %c0_i32 = arith.constant 0 : i32
    %c0_i32_0 = arith.constant 0 : i32
    %c0_i32_1 = arith.constant 0 : i32
    return %arg1, %c0_i32, %c0_i32_0 : i32, i32, i32
  }
  func.func @transform_10(%arg0: i32, %arg1: i32) -> (i32, i32, i32) {
    %c0_i32 = arith.constant 0 : i32
    %c0_i32_0 = arith.constant 0 : i32
    %c0_i32_1 = arith.constant 0 : i32
    return %arg1, %c0_i32, %c0_i32_0 : i32, i32, i32
  }
  func.func @transform_11(%arg0: i32, %arg1: i32) -> (i32, i32, i32) {
    %c0_i32 = arith.constant 0 : i32
    %c0_i32_0 = arith.constant 0 : i32
    %c0_i32_1 = arith.constant 0 : i32
    return %arg1, %c0_i32, %c0_i32_0 : i32, i32, i32
  }
  func.func @transform_12(%arg0: i32, %arg1: i32) -> (i32, i32, i32) {
    %c0_i32 = arith.constant 0 : i32
    %c0_i32_0 = arith.constant 0 : i32
    %c0_i32_1 = arith.constant 0 : i32
    return %arg1, %c0_i32, %c0_i32_0 : i32, i32, i32
  }
  func.func @transform_13(%arg0: i32, %arg1: i32) -> (i32, i32, i32) {
    %c0_i32 = arith.constant 0 : i32
    %c0_i32_0 = arith.constant 0 : i32
    %c0_i32_1 = arith.constant 0 : i32
    return %arg1, %c0_i32, %c0_i32_0 : i32, i32, i32
  }
  func.func @transform_14(%arg0: i32, %arg1: i32) -> (i32, i32, i32) {
    %c0_i32 = arith.constant 0 : i32
    %c0_i32_0 = arith.constant 0 : i32
    %c0_i32_1 = arith.constant 0 : i32
    return %arg1, %c0_i32, %c0_i32_0 : i32, i32, i32
  }
  func.func @transform_15(%arg0: i32, %arg1: i32) -> (i32, i32, i32) {
    %c0_i32 = arith.constant 0 : i32
    %c0_i32_0 = arith.constant 0 : i32
    %c0_i32_1 = arith.constant 0 : i32
    return %arg1, %c0_i32, %c0_i32_0 : i32, i32, i32
  }
  func.func @transform_16(%arg0: i32, %arg1: i32) -> (i32, i32) {
    %c0_i32 = arith.constant 0 : i32
    %c0_i32_0 = arith.constant 0 : i32
    %c0_i32_1 = arith.constant 0 : i32
    return %c0_i32, %c0_i32_0 : i32, i32
  }
  func.func @transform_17(%arg0: i32, %arg1: i32) -> (i32, i32) {
    %c0_i32 = arith.constant 0 : i32
    %c0_i32_0 = arith.constant 0 : i32
    %c0_i32_1 = arith.constant 0 : i32
    return %c0_i32, %c0_i32_0 : i32, i32
  }
  func.func @transform_18(%arg0: i32, %arg1: i32) -> (i32, i32) {
    %c0_i32 = arith.constant 0 : i32
    %c0_i32_0 = arith.constant 0 : i32
    %c0_i32_1 = arith.constant 0 : i32
    return %c0_i32, %c0_i32_0 : i32, i32
  }
  func.func @transform_19(%arg0: i32, %arg1: i32) -> (i32, i32) {
    %c0_i32 = arith.constant 0 : i32
    %c0_i32_0 = arith.constant 0 : i32
    %c0_i32_1 = arith.constant 0 : i32
    return %c0_i32, %c0_i32_0 : i32, i32
  }
  func.func @transform_20(%arg0: i32, %arg1: i32) -> (i32, i32) {
    %c0_i32 = arith.constant 0 : i32
    %c0_i32_0 = arith.constant 0 : i32
    %c0_i32_1 = arith.constant 0 : i32
    return %c0_i32, %c0_i32_0 : i32, i32
  }
  func.func @transform_21(%arg0: i32, %arg1: i32) -> (i32, i32) {
    %c0_i32 = arith.constant 0 : i32
    %c0_i32_0 = arith.constant 0 : i32
    %c0_i32_1 = arith.constant 0 : i32
    return %c0_i32, %c0_i32_0 : i32, i32
  }
  func.func @transform_22(%arg0: i32, %arg1: i32) -> (i32, i32) {
    %c0_i32 = arith.constant 0 : i32
    %c0_i32_0 = arith.constant 0 : i32
    %c0_i32_1 = arith.constant 0 : i32
    return %c0_i32, %c0_i32_0 : i32, i32
  }
  func.func @transform_23(%arg0: i32, %arg1: i32) -> (i32, i32) {
    %c0_i32 = arith.constant 0 : i32
    %c0_i32_0 = arith.constant 0 : i32
    %c0_i32_1 = arith.constant 0 : i32
    return %c0_i32, %c0_i32_0 : i32, i32
  }
  func.func @transform_24(%arg0: i32, %arg1: i32) -> (i32, i32) {
    %c0_i32 = arith.constant 0 : i32
    %c0_i32_0 = arith.constant 0 : i32
    %c0_i32_1 = arith.constant 0 : i32
    return %c0_i32, %c0_i32_0 : i32, i32
  }
  func.func @transform_25(%arg0: i32, %arg1: i32) -> (i32, i32) {
    %c0_i32 = arith.constant 0 : i32
    %c0_i32_0 = arith.constant 0 : i32
    %c0_i32_1 = arith.constant 0 : i32
    return %c0_i32, %c0_i32_0 : i32, i32
  }
  func.func @transform_26(%arg0: i32, %arg1: i32) -> (i32, i32, i32) {
    %c0_i32 = arith.constant 0 : i32
    %c0_i32_0 = arith.constant 0 : i32
    %c0_i32_1 = arith.constant 0 : i32
    return %arg0, %c0_i32, %c0_i32_0 : i32, i32, i32
  }
  func.func @transform_27(%arg0: i32, %arg1: i32) -> (i32, i32, i32) {
    %c0_i32 = arith.constant 0 : i32
    %c0_i32_0 = arith.constant 0 : i32
    %c0_i32_1 = arith.constant 0 : i32
    return %arg0, %c0_i32, %c0_i32_0 : i32, i32, i32
  }
  func.func @transform_28(%arg0: i32, %arg1: i32) -> (i32, i32, i32) {
    %c0_i32 = arith.constant 0 : i32
    %c0_i32_0 = arith.constant 0 : i32
    %c0_i32_1 = arith.constant 0 : i32
    return %arg0, %c0_i32, %c0_i32_0 : i32, i32, i32
  }
  func.func @transform_29(%arg0: i32, %arg1: i32) -> (i32, i32, i32) {
    %c0_i32 = arith.constant 0 : i32
    %c0_i32_0 = arith.constant 0 : i32
    %c0_i32_1 = arith.constant 0 : i32
    return %arg0, %c0_i32, %c0_i32_0 : i32, i32, i32
  }
}

</mosaic_0001>

<bundles_post_ra>
// kernel: mkmil_forward.1
= control target key start
LH: loop header
LB: loop body
LE: loop exit
PB: predicated region body
PF: predicated region fallthrough
CT: control target
= control target key end

     0   :  { %s13851_s6 = smov 1   ;;  %s13852_s10 = smov 2   ;;  %s18129_s0 = inlined_call_operand.smem [shape: u32[30], index: -1, kind: input, shape index: {}] }
   0x1   :  { %s13921_s5 = sld [smem:[%s18129_s0]]   ;;  %s13853_s14 = smov 3  }
   0x2   :  { %s13926_s9 = sld [smem:[%s18129_s0 + %s13851_s6]]   ;;  %s13854_s18 = smov 4  }
   0x3   :  { %s13931_s13 = sld [smem:[%s18129_s0 + %s13852_s10]]   ;;  %s13855_s22 = smov 5  }
   0x4   :  { %s13936_s17 = sld [smem:[%s18129_s0 + %s13853_s14]]   ;;  %s13856_s26 = smov 6  }
   0x5   :  { %s13941_s21 = sld [smem:[%s18129_s0 + %s13854_s18]]   ;;  %s13857_s30 = smov 7  }
   0x6   :  { %s13946_s25 = sld [smem:[%s18129_s0 + %s13855_s22]]   ;;  %s13858_s4 = smov 8  }
   0x7   :  { %s13951_s29 = sld [smem:[%s18129_s0 + %s13856_s26]]   ;;  %s13859_s10 = smov 9  }
   0x8   :  { %18403 = sst [smem:[#allocation49_spill]] %s13926_s9  ;;  %s13860_s15 = smov 10  }
   0x9   :  { %s13956_s3 = sld [smem:[%s18129_s0 + %s13857_s30]]   ;;  %s13861_s20 = smov 11  }
   0xa   :  { %18404 = sst [smem:[#allocation50_spill]] %s13936_s17  ;;  %s13862_s26 = smov 12  }
   0xb   :  { %18405 = sst [smem:[#allocation51_spill]] %s13941_s21  ;;  %s13863_s1 = smov 13  }
   0xc   :  { %18406 = sst [smem:[#allocation52_spill]] %s13946_s25  ;;  %s13864_s7 = smov 14  }
   0xd   :  { %18407 = sst [smem:[#allocation53_spill]] %s13951_s29  ;;  %s13866_s22 = smov 16  }
   0xe   :  { %s13961_s8 = sld [smem:[%s18129_s0 + %s13858_s4]]   ;;  %s13867_s28 = smov 17  }
   0xf   :  { %18408 = sst [smem:[#allocation54_spill]] %s13956_s3  ;;  %s13874_s23 = smov 24  }
  0x10   :  { %s13966_s14 = sld [smem:[%s18129_s0 + %s13859_s10]]   ;;  %s13876_s10 = smov 26  }
  0x11   :  { %s13971_s19 = sld [smem:[%s18129_s0 + %s13860_s15]]   ;;  %s13865_s15 = smov 15  }
  0x12   :  { %s13976_s24 = sld [smem:[%s18129_s0 + %s13861_s20]]   ;;  %s13877_s16 = smov 27  }
  0x13   :  { %s13981_s30 = sld [smem:[%s18129_s0 + %s13862_s26]]  }
  0x14   :  { %18409 = sst [smem:[#allocation55_spill]] %s13961_s8 }
  0x15   :  { %s13986_s6 = sld [smem:[%s18129_s0 + %s13863_s1]]   ;;  %s13875_s1 = smov 25  }
  0x16   :  { %18410 = sst [smem:[#allocation56_spill]] %s13966_s14 }
  0x17   :  { %s13991_s12 = sld [smem:[%s18129_s0 + %s13864_s7]]   ;;  %s13868_s7 = smov 18  }
  0x18   :  { %18411 = sst [smem:[#allocation57_spill]] %s13976_s24 }
  0x19   :  { %s13996_s20 = sld [smem:[%s18129_s0 + %s13865_s15]]   ;;  %s13869_s15 = smov 19  }
  0x1a   :  { %s14001_s27 = sld [smem:[%s18129_s0 + %s13866_s22]]   ;;  %s13870_s22 = smov 20  }
  0x1b   :  { %18412 = sst [smem:[#allocation58_spill]] %s13986_s6 }
  0x1c   :  { %s14006_s4 = sld [smem:[%s18129_s0 + %s13867_s28]]   ;;  %s13871_s28 = smov 21  }
  0x1d   :  { %s14011_s21 = sld [smem:[%s18129_s0 + %s13868_s7]]   ;;  %s13872_s7 = smov 22  }
  0x1e   :  { %s14016_s17 = sld [smem:[%s18129_s0 + %s13869_s15]]   ;;  %s13873_s15 = smov 23  }
  0x1f   :  { %18413 = sst [smem:[#allocation59_spill]] %s13996_s20 }
  0x20   :  { %18414 = sst [smem:[#allocation60_spill]] %s14001_s27 }
  0x21   :  { %s14021_s8 = sld [smem:[%s18129_s0 + %s13870_s22]]  }
  0x22   :  { %s14026_s29 = sld [smem:[%s18129_s0 + %s13871_s28]]  }
  0x23   :  { %18415 = sst [smem:[#allocation61_spill]] %s14011_s21 }
  0x24   :  { %s14031_s25 = sld [smem:[%s18129_s0 + %s13872_s7]]  }
  0x25   :  { %s10908_s20 = sld [smem:[%s18129_s0 + %s13873_s15]]  }
  0x26   :  { %s14039_s6 = sld [smem:[%s18129_s0 + %s13874_s23]]   ;;  %s13878_s23 = smov 28  }
  0x27   :  { %18416 = sst [smem:[#allocation62_spill]] %s14021_s8 }
  0x28   :  { %18417 = sst [smem:[#allocation63_spill]] %s14026_s29 }
  0x29   :  { %s14044_s24 = sld [smem:[%s18129_s0 + %s13875_s1]]   ;;  %s13879_s1 = smov 29  }
  0x2a   :  { %18418 = sst [smem:[#allocation64_spill]] %s14031_s25 }
  0x2b   :  { %s14049_s14 = sld [smem:[%s18129_s0 + %s13876_s10]]   ;;  %v65_v0 = vstv %s10908_s20 }
  0x2c   :  { %18419 = sst [smem:[#allocation65_spill]] %s14039_s6  ;;  %66 = vst [vmem:[#allocation3] sm:$0x1] %v65_v0 }
  0x2d   :  { %s14054_s29 = sld [smem:[%s18129_s0 + %s13877_s16]]  }
  0x2e   :  { %s14059_s6 = sld [smem:[%s18129_s0 + %s13878_s23]]  }
  0x2f   :  { %18420 = sst [smem:[#allocation66_spill]] %s14044_s24 }
  0x30   :  { %s14064_s24 = sld [smem:[%s18129_s0 + %s13879_s1]]  }
  0x31   :  { %18421 = sst [smem:[#allocation67_spill]] %s14049_s14 }
  0x33   :  { %18422 = sst [smem:[#allocation68_spill]] %s14054_s29 }
  0x34   :  { %18423 = sst [smem:[#allocation69_spill]] %s14059_s6 }
  0x36   :  { %18424 = sst [smem:[#allocation70_spill]] %s14064_s24 }
  0x37   :  { %67 = vsyncpa [#allocation5], 0 }
  0x38   :  { %68 = vsyncpa [#allocation8], 0 }
  0x39   :  { %69 = vsyncpa [#allocation11], 0 }
  0x3a   :  { %71 = vsyncpa [#allocation11 + $0x1], 0 }
  0x3b   :  { %72 = vsyncpa [#allocation14], 0 }
  0x3c   :  { %74 = vsyncpa [#allocation14 + $0x1], 0 }
  0x3d   :  { %75 = vsyncpa [#allocation17], 0 }
  0x3e   :  { %77 = vsyncpa [#allocation17 + $0x1], 0 }
  0x3f   :  { %78 = vsyncpa [#allocation20], 0 }
  0x40   :  { %80 = vsyncpa [#allocation20 + $0x1], 0 }
  0x41   :  { %81 = vsyncpa [#allocation23], 0 }
  0x42   :  { %82 = vsyncpa [#allocation26], 0 }
  0x43   :  { %83 = vsyncpa [#allocation29], 0 }
  0x44   :  { %84 = vsyncpa [#allocation32], 0 }
  0x45   :  { %85 = vsyncpa [#allocation6], 0 }
  0x46   :  { %86 = vsyncpa [#allocation36], 0  ;;  %s14066_s0 = smov 0   ;;  %s14068_s20 = smov 0  }
  0x47   :  { %s14070_s10 = smov 0   ;;  %s14072_s7 = smov 0  }
  0x48   :  { %s14074_s11 = smov 0   ;;  %s14076_s16 = smov 0  }
  0x49 LB: > { %s18425_s3 = sld [smem:[#allocation54_spill]]  ;;  %s13880_s15 = smov [#allocation7]   ;;  %s13829_s0 = sphi %s14066_s0, %s19112_s0   ;;  %s13849_s16 = sphi %s14076_s16, %s92_s16   ;;  %s13845_s11 = sphi %s14074_s11, %s19115_s11   ;;  %s13841_s7 = sphi %s14072_s7, %s19114_s7   ;;  %s13837_s10 = sphi %s14070_s10, %s19110_s10   ;;  %s13833_s20 = sphi %s14068_s20, %s19113_s20  }
  0x4a   : > { %18426 = sst [smem:[#allocation71_spill]] %s13837_s10  ;;  %s847_s18 = sshll.u32 %s13880_s15, 4  ;;  %s848_s18 = int_to_ptr.vmem [resolvable:$true] %s847_s18 }
  0x4b   : > { %18427 = sst [smem:[#allocation72_spill]] %s13841_s7  ;;  %s14097_s23 = sadd.s32 4294967295, %s13849_s16  }
  0x4c   : > { %18428 = sst [smem:[#allocation73_spill]] %s13849_s16  ;;  %p10916_p0 = scmp.ge.s32.totalorder %s13849_s16, 1 }
  0x4d   : > { %p18142_p1 = scmp.eq.s32.totalorder %s14097_s23, 0  ;;  %p819_p2 = scmp.lt.s32.totalorder %s13849_s16, 3 }
  0x4e   : > { %s13881_s26 = smov [#allocation22]   ;;  %s13882_s2 = smov [#allocation25]  }
  0x4f   : > { %p14102_p3 = pnand %p10916_p0, %p819_p2  ;;  %s877_s1 = sshll.u32 %s13881_s26, 4  ;;  %s14114_s1 = int_to_ptr.vmem [resolvable:$true] %s877_s1 }
  0x50   : > { %s902_s15 = sshll.u32 %s13882_s2, 4  ;;  %s13208_s14 = scalar_lea.vmem %s848_s18, 32768  ;;  %s14116_s15 = int_to_ptr.vmem [resolvable:$true] %s902_s15 }
  0x51   : > { %s18429_s22 = scalar_select %p14102_p3, 1, 0 }
  0x52   : > { %p11871_p4 = pneg %p14102_p3  ;;  %p13209_p7 = scmp.ne.s32.totalorder %s848_s18, %s13208_s14 }
  0x53   : > { %p13216_p10 = scmp.lt.s32.totalorder %s848_s18, %s848_s18  ;;  %p13217_p11 = scmp.lt.s32.totalorder %s13208_s14, %s13208_s14 }
  0x54   : > { %p14110_p5 = pnand %p11871_p4, %p18142_p1 }
  0x55   : > { %p13218_p12 = por %p13217_p11, %p13216_p10 }
  0x56   : > { %s18430_s28 = scalar_select %p14110_p5, 1, 0 }
  0x57   : > { %p14120_p6 = pneg %p14110_p5 }
  0x59   : > { %s18431_s24 = scalar_select %p14120_p6, 1, 0 }
  0x5a   : > { %p13211_p8 = pnand %p13209_p7, %p14120_p6 }
  0x5c   : > { %p13212_p9 = pneg %p13211_p8 }
  0x5e   : > { %p13219_p13 = pnand %p13218_p12, %p13212_p9 }
  0x60   : > { %13222 = shalt.err (!%p13219_p13)
}
  0x61   : > { %s18136_s26 = smov 256   ;;  %s18432_s9 = sld [smem:[#allocation49_spill]] }
  0x62   : > { %s18137_s2 = smov 16   ;;  %s13234_s6 = scalar_lea.vmem %s14114_s1, 8192 }
  0x63   : > { %p13235_p0 = scmp.ne.s32.totalorder %s14114_s1, %s13234_s6  ;;  %p13242_p7 = scmp.lt.s32.totalorder %s14114_s1, %s14114_s1 }
  0x64   : > { %p13243_p8 = scmp.lt.s32.totalorder %s13234_s6, %s13234_s6 }
  0x65   : > { %p13237_p2 = pnand %p13235_p0, %p14120_p6 }
  0x66   : > { %p13244_p9 = por %p13243_p8, %p13242_p7 }
  0x67   : > { %11877 = dma.hbm_to_vmem [thread:$0]  (!%p14110_p5), %s18432_s9, 32768, %s848_s18, [#allocation8], %s18136_s26, %s18136_s26, %s18137_s2  }
  0x68   : > { %p13238_p4 = pneg %p13237_p2 }
  0x6a   : > { %p13245_p10 = pnand %p13244_p9, %p13238_p4 }
  0x6c   : > { %13248 = shalt.err (!%p13245_p10)
}
  0x6d   : > { %s18433_s27 = sld [smem:[#allocation60_spill]]  ;;  %s13260_s14 = scalar_lea.vmem %s14116_s15, 64 }
  0x6e   : > { %p13261_p11 = scmp.ne.s32.totalorder %s14116_s15, %s13260_s14  ;;  %p13268_p0 = scmp.lt.s32.totalorder %s14116_s15, %s14116_s15 }
  0x6f   : > { %p13269_p2 = scmp.lt.s32.totalorder %s13260_s14, %s13260_s14 }
  0x70   : > { %p13263_p12 = pnand %p13261_p11, %p14120_p6 }
  0x71   : > { %p13270_p4 = por %p13269_p2, %p13268_p0 }
  0x72   : > { %p13264_p13 = pneg %p13263_p12 }
  0x73   : > { %11883 = dma.hbm_to_vmem [thread:$0]  (!%p14110_p5), %s18433_s27, 8192, %s14114_s1, [#allocation23], %s18136_s26, %s18136_s26, %s18137_s2  }
  0x74   : > { %p13271_p7 = pnand %p13270_p4, %p13264_p13 }
  0x76   : > { %13274 = shalt.err (!%p13271_p7)
}
  0x77   : > { %s18434_s21 = sld [smem:[#allocation61_spill]]  ;;  %s13885_s6 = smov [#allocation28]  }
  0x78   : > { %s923_s18 = sshll.u32 %s13885_s6, 4  ;;  %s13886_s1 = smov [#allocation31]   ;;  %s924_s18 = int_to_ptr.vmem [resolvable:$true] %s923_s18 }
  0x79   : > { %s948_s26 = sshll.u32 %s13886_s1, 4  ;;  %s13286_s2 = scalar_lea.vmem %s924_s18, 4096  ;;  %s949_s26 = int_to_ptr.vmem [resolvable:$true] %s948_s26 }
  0x7a   : > { %p13287_p8 = scmp.ne.s32.totalorder %s924_s18, %s13286_s2  ;;  %p13294_p11 = scmp.lt.s32.totalorder %s924_s18, %s924_s18 }
  0x7b   : > { %p13295_p12 = scmp.lt.s32.totalorder %s13286_s2, %s13286_s2 }
  0x7c   : > { %p13289_p9 = pnand %p13287_p8, %p14120_p6 }
  0x7d   : > { %11889 = dma.hbm_to_vmem [thread:$0]  (!%p14110_p5), %s18434_s21, 64, %s14116_s15, [#allocation26]  }
  0x7e   : > { %p13290_p10 = pneg %p13289_p9  ;;  %p13296_p13 = por %p13295_p12, %p13294_p11 }
  0x80   : > { %p13297_p0 = pnand %p13296_p13, %p13290_p10 }
  0x82   : > { %13300 = shalt.err (!%p13297_p0)
}
  0x83   : > { %s18138_s14 = smov 64   ;;  %s18435_s8 = sld [smem:[#allocation62_spill]] }
  0x84   : > { %s18140_s15 = smov 4   ;;  %s13312_s6 = scalar_lea.vmem %s949_s26, 16 }
  0x85   : > { %p13313_p2 = scmp.ne.s32.totalorder %s949_s26, %s13312_s6  ;;  %s13319_s2 = scalar_lea.vmem %s949_s26, 32 }
  0x86   : > { %p13320_p8 = scmp.lt.s32.totalorder %s949_s26, %s949_s26  ;;  %p13321_p9 = scmp.lt.s32.totalorder %s13319_s2, %s13312_s6 }
  0x87   : > { %p13315_p4 = pnand %p13313_p2, %p14120_p6 }
  0x88   : > { %p13322_p10 = por %p13321_p9, %p13320_p8 }
  0x89   : > { %11895 = dma.hbm_to_vmem [thread:$0]  (!%p14110_p5), %s18435_s8, 4096, %s924_s18, [#allocation29], %s18138_s14, %s18138_s14, %s18140_s15  }
  0x8a   : > { %p13316_p7 = pneg %p13315_p4 }
  0x8c   : > { %p13323_p11 = pnand %p13322_p10, %p13316_p7 }
  0x8e   : > { %13326 = shalt.err (!%p13323_p11)
}
  0x8f   : > { %s18436_s25 = sld [smem:[#allocation64_spill]]  ;;  %s101_s18 = sadd.s32 1, %s13845_s11 }
  0x90   : > { %p102_p12 = scmp.ge.s32.totalorder %s101_s18, 2  ;;  %s273_s1 = sadd.s32 1, %s13837_s10 }
  0x91   : > { %p280_p13 = scmp.ne.s32.totalorder %s13837_s10, %s13833_s20  ;;  %p281_p0 = scmp.eq.s32.totalorder %s13849_s16, 0 }
  0x92   : > { %s19117_s18 = smov (%p102_p12, %s101_s18), 0  ;;  %p286_p4 = scmp.ne.s32.totalorder %s13833_s20, %s13829_s0 }
  0x93   : > { %18437 = sst [smem:[#allocation74_spill]] %s19117_s18  ;;  %p14175_p2 = por %p281_p0, %p280_p13 }
  0x94   : > { %s270_s2 = ssub.s32 %s13845_s11, %s19117_s18  ;;  %p11941_p7 = scmp.lt.s32.totalorder %s13849_s16, 2 }
  0x95   : > { %11901 = dma.hbm_to_vmem [thread:$0]  (!%p14110_p5), %s18436_s25, 16, %s949_s26, [#allocation32]  }
  0x96   : > { %p271_p8 = scmp.eq.s32.totalorder %s270_s2, 0  ;;  %p14186_p9 = por %p18142_p1, %p286_p4 }
  0x97   : > { %s14191_s14 = sand.u32 1, %s13849_s16   ;;  %s14194_s15 = sand.u32 1, %s13837_s10  }
  0x98   : > { %s18439_s26 = scalar_select %p14186_p9, 1, 0 }
  0x99   : > { %s14197_s8 = scalar_select %p271_p8, %s13837_s10, %s273_s1  }
  0x9a   : > { %18440 = sst [smem:[#allocation75_spill]] %s18439_s26  ;;  %s10929_s9 = sshll.u32 %s14194_s15, 10 }
  0x9b   : > { %18441 = sst [smem:[#allocation76_spill]] %s14197_s8  ;;  %s11636_s0 = sshll.u32 %s13845_s11, 14 }
  0x9c   : > { %s14202_s21 = scalar_lea.hbm %s18425_s3, %s11636_s0  ;;  %s994_s2 = scalar_lea.vmem [#allocation10], %s10929_s9 }
  0x9d   : > { %s1001_s25 = sshll.u32 %s994_s2, 4  ;;  %p14208_p10 = pnand %p11941_p7, %p14175_p2  ;;  %s14204_s25 = int_to_ptr.vmem [resolvable:$true] %s1001_s25 }
  0x9e   : > { %s13327_s1 = scalar_lea.hbm %s14202_s21, 16384  ;;  %s13332_s9 = scalar_lea.hbm %s18425_s3, 32768 }
  0x9f   : > { %s18442_s27 = scalar_select %p14208_p10, 1, 0 }
  0xa0   : > { %p13328_p11 = scmp.ne.s32.totalorder %s14202_s21, %s13327_s1  ;;  %p14217_p12 = pneg %p14208_p10 }
  0xa1   : > { %p13333_p4 = scmp.lt.s32.totalorder %s14202_s21, %s18425_s3  ;;  %p13334_p8 = scmp.lt.s32.totalorder %s13332_s9, %s13327_s1 }
  0xa2   : > { %s18443_s0 = scalar_select %p14217_p12, 1, 0 }
  0xa3   : > { %p13330_p13 = pnand %p14217_p12, %p13328_p11  ;;  %p13335_p2 = por %p13334_p8, %p13333_p4 }
  0xa5   : > { %p13331_p0 = pneg %p13330_p13 }
  0xa7   : > { %p13336_p7 = pnand %p13335_p2, %p13331_p0 }
  0xa9   : > { %13339 = shalt.err (!%p13336_p7)
}
  0xaa   : > { %s13340_s6 = scalar_lea.vmem %s14204_s25, 16384  ;;  %s13889_s2 = smov [#allocation10]  }
  0xab   : > { %p13341_p1 = scmp.ne.s32.totalorder %s14204_s25, %s13340_s6  ;;  %s13345_s18 = sshll.u32 %s13889_s2, 4  ;;  %s13346_s18 = int_to_ptr.vmem [resolvable:$false] %s13345_s18 }
  0xac   : > { %s13347_s8 = scalar_lea.vmem %s13346_s18, 32768  ;;  %p13348_p11 = scmp.lt.s32.totalorder %s14204_s25, %s13346_s18 }
  0xad   : > { %p13343_p9 = pnand %p13341_p1, %p14217_p12  ;;  %p13349_p13 = scmp.lt.s32.totalorder %s13347_s8, %s13340_s6 }
  0xaf   : > { %p13344_p3 = pneg %p13343_p9  ;;  %p13350_p5 = por %p13349_p13, %p13348_p11 }
  0xb1   : > { %p13351_p6 = pnand %p13350_p5, %p13344_p3 }
  0xb3   : > { %13354 = shalt.err (!%p13351_p6)
}
  0xb4   : > { %s18156_s1 = smov 512   ;;  %s18158_s9 = smov 32  }
  0xb5   : > { %s18444_s8 = scalar_lea.sflag [#allocation11], %s14191_s14  ;;  %s10935_s18 = sshll.u32 %s14194_s15, 8 }
  0xb6   : > { %11908 = dma.hbm_to_vmem [thread:$0]  (!%p14208_p10), %s14202_s21, 16384, %s14204_s25, %s18444_s8, %s18156_s1, %s18156_s1, %s18158_s9  }
  0xb7   : > { %s11638_s6 = sshll.u32 %s13845_s11, 12  ;;  %s1042_s3 = scalar_lea.vmem [#allocation13], %s10935_s18 }
  0xb8   : > { %s14243_s2 = scalar_lea.hbm %s13971_s19, %s11638_s6  ;;  %s1049_s10 = sshll.u32 %s1042_s3, 4  ;;  %s14248_s10 = int_to_ptr.vmem [resolvable:$true] %s1049_s10 }
  0xb9   : > { %s14246_s16 = sshll.u32 %s14194_s15, 2  ;;  %s14251_s29 = sshll.u32 %s13845_s11, 6 }
  0xba   : > { %s18159_s7 = scalar_lea.sflag [#allocation14], %s14191_s14  ;;  %s13355_s26 = scalar_lea.hbm %s14243_s2, 4096 }
  0xbb   : > { %p13356_p1 = scmp.ne.s32.totalorder %s14243_s2, %s13355_s26  ;;  %s13360_s21 = scalar_lea.hbm %s13971_s19, 8192 }
  0xbc   : > { %p13361_p6 = scmp.lt.s32.totalorder %s14243_s2, %s13971_s19  ;;  %p13362_p9 = scmp.lt.s32.totalorder %s13360_s21, %s13355_s26 }
  0xbd   : > { %p13358_p3 = pnand %p13356_p1, %p14217_p12 }
  0xbe   : > { %p13363_p0 = por %p13362_p9, %p13361_p6 }
  0xbf   : > { %p13359_p5 = pneg %p13358_p3 }
  0xc1   : > { %p13364_p4 = pnand %p13363_p0, %p13359_p5 }
  0xc3   : > { %13367 = shalt.err (!%p13364_p4)
}
  0xc4   : > { %s13368_s25 = scalar_lea.vmem %s14248_s10, 4096  ;;  %s13892_s3 = smov [#allocation13]  }
  0xc5   : > { %p13369_p8 = scmp.ne.s32.totalorder %s14248_s10, %s13368_s25  ;;  %s13373_s8 = sshll.u32 %s13892_s3, 4  ;;  %s13374_s8 = int_to_ptr.vmem [resolvable:$false] %s13373_s8 }
  0xc6   : > { %s13375_s18 = scalar_lea.vmem %s13374_s8, 8192  ;;  %p13376_p11 = scmp.lt.s32.totalorder %s14248_s10, %s13374_s8 }
  0xc7   : > { %p13371_p2 = pnand %p13369_p8, %p14217_p12  ;;  %p13377_p13 = scmp.lt.s32.totalorder %s13375_s18, %s13368_s25 }
  0xc9   : > { %p13372_p7 = pneg %p13371_p2  ;;  %p13378_p1 = por %p13377_p13, %p13376_p11 }
  0xcb   : > { %p13379_p3 = pnand %p13378_p1, %p13372_p7 }
  0xcd   : > { %13382 = shalt.err (!%p13379_p3)
}
  0xce   : > { %s18445_s26 = smov 4   ;;  %s18446_s6 = smov 64  }
  0xcf   : > { %11914 = dma.hbm_to_vmem [thread:$0]  (!%p14208_p10), %s14243_s2, 4096, %s14248_s10, %s18159_s7, %s18446_s6, %s18446_s6, %s18445_s26  }
  0xd0   : > { %s14277_s21 = scalar_lea.hbm %s13981_s30, %s14251_s29  ;;  %s1084_s25 = scalar_lea.vmem [#allocation16], %s14246_s16 }
  0xd1   : > { %s1092_s3 = sshll.u32 %s1084_s25, 4  ;;  %s18157_s8 = scalar_lea.sflag [#allocation17], %s14191_s14  ;;  %s1093_s3 = int_to_ptr.vmem [resolvable:$true] %s1092_s3 }
  0xd2   : > { %s13383_s18 = scalar_lea.hbm %s14277_s21, 64  ;;  %s13388_s1 = scalar_lea.hbm %s13981_s30, 128 }
  0xd3   : > { %p13384_p5 = scmp.ne.s32.totalorder %s14277_s21, %s13383_s18  ;;  %p13389_p0 = scmp.lt.s32.totalorder %s14277_s21, %s13981_s30 }
  0xd4   : > { %p13390_p4 = scmp.lt.s32.totalorder %s13388_s1, %s13383_s18 }
  0xd5   : > { %p13386_p6 = pnand %p13384_p5, %p14217_p12 }
  0xd6   : > { %p13391_p8 = por %p13390_p4, %p13389_p0 }
  0xd7   : > { %p13387_p9 = pneg %p13386_p6 }
  0xd9   : > { %p13392_p2 = pnand %p13391_p8, %p13387_p9 }
  0xdb   : > { %13395 = shalt.err (!%p13392_p2)
}
  0xdc   : > { %s13396_s10 = scalar_lea.vmem %s1093_s3, 64  ;;  %s13893_s2 = smov [#allocation16]  }
  0xdd   : > { %p13397_p7 = scmp.ne.s32.totalorder %s1093_s3, %s13396_s10  ;;  %s13401_s26 = sshll.u32 %s13893_s2, 4  ;;  %s13402_s26 = int_to_ptr.vmem [resolvable:$false] %s13401_s26 }
  0xde   : > { %s13403_s25 = scalar_lea.vmem %s13402_s26, 128  ;;  %p13404_p1 = scmp.lt.s32.totalorder %s1093_s3, %s13402_s26 }
  0xdf   : > { %p13399_p11 = pnand %p13397_p7, %p14217_p12  ;;  %p13405_p3 = scmp.lt.s32.totalorder %s13403_s25, %s13396_s10 }
  0xe1   : > { %p13400_p13 = pneg %p13399_p11  ;;  %p13406_p5 = por %p13405_p3, %p13404_p1 }
  0xe3   : > { %p13407_p6 = pnand %p13406_p5, %p13400_p13 }
  0xe5   : > { %13410 = shalt.err (!%p13407_p6)
}
  0xe6   : > { %11920 = dma.hbm_to_vmem [thread:$0]  (!%p14208_p10), %s14277_s21, 64, %s1093_s3, %s18157_s8  }
  0xe7   : > { %s14297_s1 = scalar_lea.hbm %s13991_s12, %s14251_s29  ;;  %s1124_s18 = scalar_lea.vmem [#allocation19], %s14246_s16 }
  0xe8   : > { %s1132_s10 = sshll.u32 %s1124_s18, 4  ;;  %s18164_s2 = scalar_lea.sflag [#allocation20], %s14191_s14  ;;  %s1133_s10 = int_to_ptr.vmem [resolvable:$true] %s1132_s10 }
  0xe9   : > { %s13411_s26 = scalar_lea.hbm %s14297_s1, 64  ;;  %s13416_s25 = scalar_lea.hbm %s13991_s12, 128 }
  0xea   : > { %p13412_p9 = scmp.ne.s32.totalorder %s14297_s1, %s13411_s26  ;;  %p13417_p8 = scmp.lt.s32.totalorder %s14297_s1, %s13991_s12 }
  0xeb   : > { %p13418_p2 = scmp.lt.s32.totalorder %s13416_s25, %s13411_s26 }
  0xec   : > { %p13414_p0 = pnand %p13412_p9, %p14217_p12 }
  0xed   : > { %p13419_p7 = por %p13418_p2, %p13417_p8 }
  0xee   : > { %p13415_p4 = pneg %p13414_p0 }
  0xf0   : > { %p13420_p11 = pnand %p13419_p7, %p13415_p4 }
  0xf2   : > { %13423 = shalt.err (!%p13420_p11)
}
  0xf3   : > { %s13424_s21 = scalar_lea.vmem %s1133_s10, 64  ;;  %s13894_s3 = smov [#allocation19]  }
  0xf4   : > { %p13425_p13 = scmp.ne.s32.totalorder %s1133_s10, %s13424_s21  ;;  %s13429_s18 = sshll.u32 %s13894_s3, 4  ;;  %s13430_s18 = int_to_ptr.vmem [resolvable:$false] %s13429_s18 }
  0xf5   : > { %s13431_s8 = scalar_lea.vmem %s13430_s18, 128  ;;  %p13432_p5 = scmp.lt.s32.totalorder %s1133_s10, %s13430_s18 }
  0xf6   : > { %p13427_p1 = pnand %p13425_p13, %p14217_p12  ;;  %p13433_p6 = scmp.lt.s32.totalorder %s13431_s8, %s13424_s21 }
  0xf8   : > { %p13428_p3 = pneg %p13427_p1  ;;  %p13434_p9 = por %p13433_p6, %p13432_p5 }
  0xfa   : > { %p13435_p0 = pnand %p13434_p9, %p13428_p3 }
  0xfc   : > { %13438 = shalt.err (!%p13435_p0)
}
  0xfd   : > { %11926 = dma.hbm_to_vmem [thread:$0]  (!%p14208_p10), %s14297_s1, 64, %s1133_s10, %s18164_s2  }
  0xfe   : > { %s13895_s26 = smov [#allocation4]   ;;  %s13896_s9 = smov [#allocation9]  }
  0xff   : > { %s834_s25 = sshll.u32 %s13895_s26, 4  ;;  %s861_s7 = sshll.u32 %s13896_s9, 4  ;;  %s835_s25 = int_to_ptr.vmem [resolvable:$true] %s834_s25  ;;  %s862_s7 = int_to_ptr.vmem [resolvable:$true] %s861_s7 }
 0x100   : > { %s13450_s3 = scalar_lea.vmem %s835_s25, 2048  ;;  %p18447_p8 = scmp.ne.s32.totalorder %s18431_s24, 0 }
 0x101   : > { %p13451_p4 = scmp.ne.s32.totalorder %s835_s25, %s13450_s3  ;;  %p13458_p11 = scmp.lt.s32.totalorder %s835_s25, %s835_s25 }
 0x102   : > { %p13459_p13 = scmp.lt.s32.totalorder %s13450_s3, %s13450_s3 }
 0x103   : > { %p13453_p2 = pnand %p13451_p4, %p18447_p8 }
 0x104   : > { %p13460_p1 = por %p13459_p13, %p13458_p11 }
 0x105   : > { %p13454_p7 = pneg %p13453_p2 }
 0x107   : > { %p13461_p3 = pnand %p13460_p1, %p13454_p7 }
 0x109   : > { %13464 = shalt.err (!%p13461_p3)
}
 0x10a   : > { %s13897_s8 = smov 1024   ;;  %p18448_p5 = scmp.ne.s32.totalorder %s18430_s28, 0 }
 0x10b   : > { %s13476_s1 = scalar_lea.vmem %s862_s7, 64  ;;  %p13484_p4 = scmp.lt.s32.totalorder %s862_s7, %s862_s7 }
 0x10c   : > { %11874 = dma.hbm_to_vmem [thread:$0]  (!%p18448_p5), %s13921_s5, 2048, %s835_s25, [#allocation5], %s13897_s8, %s13897_s8, %s18446_s6  }
 0x10d   : > { %p13477_p6 = scmp.ne.s32.totalorder %s862_s7, %s13476_s1  ;;  %p13485_p2 = scmp.lt.s32.totalorder %s13476_s1, %s13476_s1 }
 0x10f   : > { %p13479_p9 = pnand %p13477_p6, %p18447_p8  ;;  %p13486_p10 = por %p13485_p2, %p13484_p4 }
 0x111   : > { %p13480_p0 = pneg %p13479_p9 }
 0x113   : > { %p13487_p12 = pnand %p13486_p10, %p13480_p0 }
 0x115   : > { %13490 = shalt.err (!%p13487_p12)
}
 0x116   : > { %11880 = dma.hbm_to_vmem [thread:$0]  (!%p18448_p5), %s13931_s13, 64, %s862_s7, [#allocation8]  }
 0x117   : > { %s13898_s9 = smov [#allocation24]   ;;  %s13899_s6 = smov [#allocation27]  }
 0x118   : > { %s891_s10 = sshll.u32 %s13898_s9, 4  ;;  %s913_s21 = sshll.u32 %s13899_s6, 4  ;;  %s892_s10 = int_to_ptr.vmem [resolvable:$true] %s891_s10  ;;  %s914_s21 = int_to_ptr.vmem [resolvable:$true] %s913_s21 }
 0x119   : > { %s13502_s18 = scalar_lea.vmem %s892_s10, 64  ;;  %p13510_p1 = scmp.lt.s32.totalorder %s892_s10, %s892_s10 }
 0x11a   : > { %p13503_p7 = scmp.ne.s32.totalorder %s892_s10, %s13502_s18  ;;  %p13511_p3 = scmp.lt.s32.totalorder %s13502_s18, %s13502_s18 }
 0x11c   : > { %p13505_p11 = pnand %p13503_p7, %p18447_p8  ;;  %p13512_p6 = por %p13511_p3, %p13510_p1 }
 0x11e   : > { %p13506_p13 = pneg %p13505_p11 }
 0x120   : > { %p13513_p10 = pnand %p13512_p6, %p13506_p13 }
 0x122   : > { %13516 = shalt.err (!%p13513_p10)
}
 0x123   : > { %11886 = dma.hbm_to_vmem [thread:$0]  (!%p18448_p5), %s14006_s4, 64, %s892_s10, [#allocation23]  }
 0x124   : > { %s13528_s7 = scalar_lea.vmem %s914_s21, 64  ;;  %p13536_p4 = scmp.lt.s32.totalorder %s914_s21, %s914_s21 }
 0x125   : > { %p13529_p12 = scmp.ne.s32.totalorder %s914_s21, %s13528_s7  ;;  %p13537_p2 = scmp.lt.s32.totalorder %s13528_s7, %s13528_s7 }
 0x127   : > { %p13531_p9 = pnand %p13529_p12, %p18447_p8  ;;  %p13538_p7 = por %p13537_p2, %p13536_p4 }
 0x129   : > { %p13532_p0 = pneg %p13531_p9 }
 0x12b   : > { %p13539_p11 = pnand %p13538_p7, %p13532_p0 }
 0x12d   : > { %13542 = shalt.err (!%p13539_p11)
}
 0x12e   : > { %11892 = dma.hbm_to_vmem [thread:$0]  (!%p18448_p5), %s14016_s17, 64, %s914_s21, [#allocation26]  }
 0x12f   : > { %s13900_s26 = smov [#allocation30]   ;;  %s13901_s3 = smov [#allocation33]  }
 0x130   : > { %s937_s25 = sshll.u32 %s13900_s26, 4  ;;  %s965_s8 = sshll.u32 %s13901_s3, 4  ;;  %s938_s25 = int_to_ptr.vmem [resolvable:$true] %s937_s25  ;;  %s966_s8 = int_to_ptr.vmem [resolvable:$true] %s965_s8 }
 0x131   : > { %s13554_s1 = scalar_lea.vmem %s938_s25, 16  ;;  %s13561_s9 = scalar_lea.vmem %s938_s25, 32 }
 0x132   : > { %p13555_p13 = scmp.ne.s32.totalorder %s938_s25, %s13554_s1  ;;  %p13562_p6 = scmp.lt.s32.totalorder %s938_s25, %s938_s25 }
 0x133   : > { %p13563_p10 = scmp.lt.s32.totalorder %s13561_s9, %s13554_s1 }
 0x134   : > { %p13557_p1 = pnand %p13555_p13, %p18447_p8 }
 0x135   : > { %p13564_p12 = por %p13563_p10, %p13562_p6 }
 0x136   : > { %p13558_p3 = pneg %p13557_p1 }
 0x138   : > { %p13565_p9 = pnand %p13564_p12, %p13558_p3 }
 0x13a   : > { %13568 = shalt.err (!%p13565_p9)
}
 0x13b   : > { %s18449_s10 = sld [smem:[#allocation63_spill]]  ;;  %s13580_s6 = scalar_lea.vmem %s966_s8, 16 }
 0x13c   : > { %p13581_p0 = scmp.ne.s32.totalorder %s966_s8, %s13580_s6  ;;  %s13587_s21 = scalar_lea.vmem %s966_s8, 32 }
 0x13d   : > { %p13588_p7 = scmp.lt.s32.totalorder %s966_s8, %s966_s8  ;;  %p13589_p11 = scmp.lt.s32.totalorder %s13587_s21, %s13580_s6 }
 0x13e   : > { %p13583_p4 = pnand %p13581_p0, %p18447_p8 }
 0x13f   : > { %p13590_p13 = por %p13589_p11, %p13588_p7 }
 0x140   : > { %p13584_p2 = pneg %p13583_p4 }
 0x141   : > { %11898 = dma.hbm_to_vmem [thread:$0]  (!%p18448_p5), %s18449_s10, 16, %s938_s25, [#allocation29]  }
 0x142   : > { %p13591_p1 = pnand %p13590_p13, %p13584_p2 }
 0x144   : > { %13594 = shalt.err (!%p13591_p1)
}
 0x145   : > { %s18450_s18 = sld [smem:[#allocation66_spill]]  ;;  %s1023_s25 = scalar_lea.vmem [#allocation12], %s14246_s16 }
 0x146   : > { %s18451_s7 = sld [smem:[#allocation56_spill]]  ;;  %s1031_s3 = sshll.u32 %s1023_s25, 4  ;;  %s1032_s3 = int_to_ptr.vmem [resolvable:$true] %s1031_s3 }
 0x147   : > { %s10938_s1 = sshll.u32 %s14194_s15, 5  ;;  %p18453_p3 = scmp.ne.s32.totalorder %s18443_s0, 0 }
 0x14b   : > { %11904 = dma.hbm_to_vmem [thread:$0]  (!%p18448_p5), %s18450_s18, 16, %s966_s8, [#allocation32]  }
 0x14c   : > { %s18452_s26 = smov %s18451_s7  ;;  %s14348_s24 = scalar_lea.hbm %s18451_s7, %s14251_s29 }
 0x14d   : > { %s13595_s9 = scalar_lea.hbm %s14348_s24, 64  ;;  %s13600_s28 = scalar_lea.hbm %s18452_s26, 128 }
 0x14e   : > { %p13596_p8 = scmp.ne.s32.totalorder %s14348_s24, %s13595_s9  ;;  %p13601_p12 = scmp.lt.s32.totalorder %s14348_s24, %s18452_s26 }
 0x14f   : > { %p13602_p9 = scmp.lt.s32.totalorder %s13600_s28, %s13595_s9 }
 0x150   : > { %p13598_p6 = pnand %p13596_p8, %p18453_p3 }
 0x151   : > { %p13603_p0 = por %p13602_p9, %p13601_p12 }
 0x152   : > { %p13599_p10 = pneg %p13598_p6 }
 0x154   : > { %p13604_p4 = pnand %p13603_p0, %p13599_p10 }
 0x156   : > { %13607 = shalt.err (!%p13604_p4)
}
 0x157   : > { %s13608_s29 = scalar_lea.vmem %s1032_s3, 64  ;;  %s13902_s16 = smov [#allocation12]  }
 0x158   : > { %p13609_p5 = scmp.ne.s32.totalorder %s1032_s3, %s13608_s29  ;;  %s13613_s8 = sshll.u32 %s13902_s16, 4  ;;  %s13614_s8 = int_to_ptr.vmem [resolvable:$false] %s13613_s8 }
 0x159   : > { %s13615_s10 = scalar_lea.vmem %s13614_s8, 128  ;;  %p13616_p11 = scmp.lt.s32.totalorder %s1032_s3, %s13614_s8 }
 0x15a   : > { %p13611_p2 = pnand %p13609_p5, %p18453_p3  ;;  %p13617_p13 = scmp.lt.s32.totalorder %s13615_s10, %s13608_s29 }
 0x15c   : > { %p13612_p7 = pneg %p13611_p2  ;;  %p13618_p1 = por %p13617_p13, %p13616_p11 }
 0x15e   : > { %p13619_p8 = pnand %p13618_p1, %p13612_p7 }
 0x160   : > { %13622 = shalt.err (!%p13619_p8)
}
 0x161   : > { %p18454_p6 = scmp.ne.s32.totalorder %s18442_s27, 0  ;;  %s18455_s6 = scalar_lea.sflag [#allocation11], %s14191_s14 }
 0x162   : > { %s18456_s21 = sld [smem:[#allocation57_spill]]  ;;  %s11639_s18 = sshll.u32 %s13845_s11, 9 }
 0x163   : > { %11911 = dma.hbm_to_vmem [thread:$0]  (!%p18454_p6), %s14348_s24, 64, %s1032_s3, %s18455_s6  }
 0x164   : > { %s1063_s25 = scalar_lea.vmem [#allocation15], %s10938_s1  ;;  %s10944_s28 = sshll.u32 %s14194_s15, 6 }
 0x165   : > { %s1070_s9 = sshll.u32 %s1063_s25, 4  ;;  %s14370_s9 = int_to_ptr.vmem [resolvable:$true] %s1070_s9 }
 0x168   : > { %s14368_s7 = scalar_lea.hbm %s18456_s21, %s11639_s18  ;;  %s13628_s16 = scalar_lea.hbm %s18456_s21, 1024 }
 0x169   : > { %s13623_s29 = scalar_lea.hbm %s14368_s7, 512  ;;  %p13629_p0 = scmp.lt.s32.totalorder %s14368_s7, %s18456_s21 }
 0x16a   : > { %p13624_p10 = scmp.ne.s32.totalorder %s14368_s7, %s13623_s29  ;;  %p13630_p4 = scmp.lt.s32.totalorder %s13628_s16, %s13623_s29 }
 0x16c   : > { %p13626_p12 = pnand %p13624_p10, %p18453_p3  ;;  %p13631_p5 = por %p13630_p4, %p13629_p0 }
 0x16e   : > { %p13627_p9 = pneg %p13626_p12 }
 0x170   : > { %p13632_p2 = pnand %p13631_p5, %p13627_p9 }
 0x172   : > { %13635 = shalt.err (!%p13632_p2)
}
 0x173   : > { %s13636_s24 = scalar_lea.vmem %s14370_s9, 512  ;;  %s13903_s3 = smov [#allocation15]  }
 0x174   : > { %p13637_p7 = scmp.ne.s32.totalorder %s14370_s9, %s13636_s24  ;;  %s13641_s1 = sshll.u32 %s13903_s3, 4  ;;  %s13642_s1 = int_to_ptr.vmem [resolvable:$false] %s13641_s1 }
 0x175   : > { %s13643_s8 = scalar_lea.vmem %s13642_s1, 1024  ;;  %p13644_p1 = scmp.lt.s32.totalorder %s14370_s9, %s13642_s1 }
 0x176   : > { %p13639_p11 = pnand %p13637_p7, %p18453_p3  ;;  %p13645_p8 = scmp.lt.s32.totalorder %s13643_s8, %s13636_s24 }
 0x178   : > { %p13640_p13 = pneg %p13639_p11  ;;  %p13646_p10 = por %p13645_p8, %p13644_p1 }
 0x17a   : > { %p13647_p12 = pnand %p13646_p10, %p13640_p13 }
 0x17c   : > { %13650 = shalt.err (!%p13647_p12)
}
 0x17d   : > { %s18457_s10 = smov 16   ;;  %s18458_s6 = smov 256  }
 0x17e   : > { %s18459_s18 = scalar_lea.sflag [#allocation14], %s14191_s14  ;;  %s18460_s25 = sld [smem:[#allocation58_spill]] }
 0x17f   : > { %11917 = dma.hbm_to_vmem [thread:$0]  (!%p18454_p6), %s14368_s7, 512, %s14370_s9, %s18459_s18, %s18458_s6, %s18458_s6, %s18457_s10  }
 0x180   : > { %s11641_s29 = sshll.u32 %s13845_s11, 10  ;;  %s1103_s24 = scalar_lea.vmem [#allocation18], %s10944_s28 }
 0x181   : > { %s1110_s3 = sshll.u32 %s1103_s24, 4  ;;  %s10950_s1 = sshll.u32 %s14194_s15, 9  ;;  %s14400_s3 = int_to_ptr.vmem [resolvable:$true] %s1110_s3 }
 0x184   : > { %s14396_s16 = scalar_lea.hbm %s18460_s25, %s11641_s29  ;;  %s13656_s2 = scalar_lea.hbm %s18460_s25, 2048 }
 0x185   : > { %s13651_s8 = scalar_lea.hbm %s14396_s16, 1024  ;;  %p13657_p5 = scmp.lt.s32.totalorder %s14396_s16, %s18460_s25 }
 0x186   : > { %p13652_p9 = scmp.ne.s32.totalorder %s14396_s16, %s13651_s8  ;;  %p13658_p2 = scmp.lt.s32.totalorder %s13656_s2, %s13651_s8 }
 0x188   : > { %p13654_p0 = pnand %p13652_p9, %p18453_p3  ;;  %p13659_p7 = por %p13658_p2, %p13657_p5 }
 0x18a   : > { %p13655_p4 = pneg %p13654_p0 }
 0x18c   : > { %p13660_p11 = pnand %p13659_p7, %p13655_p4 }
 0x18e   : > { %13663 = shalt.err (!%p13660_p11)
}
 0x18f   : > { %s13664_s7 = scalar_lea.vmem %s14400_s3, 1024  ;;  %s13904_s9 = smov [#allocation18]  }
 0x190   : > { %p13665_p13 = scmp.ne.s32.totalorder %s14400_s3, %s13664_s7  ;;  %s13669_s28 = sshll.u32 %s13904_s9, 4  ;;  %s13670_s28 = int_to_ptr.vmem [resolvable:$false] %s13669_s28 }
 0x191   : > { %s13671_s10 = scalar_lea.vmem %s13670_s28, 2048  ;;  %p13672_p10 = scmp.lt.s32.totalorder %s14400_s3, %s13670_s28 }
 0x192   : > { %p13667_p1 = pnand %p13665_p13, %p18453_p3  ;;  %p13673_p12 = scmp.lt.s32.totalorder %s13671_s10, %s13664_s7 }
 0x194   : > { %p13668_p8 = pneg %p13667_p1  ;;  %p13674_p9 = por %p13673_p12, %p13672_p10 }
 0x196   : > { %p13675_p0 = pnand %p13674_p9, %p13668_p8 }
 0x198   : > { %13678 = shalt.err (!%p13675_p0)
}
 0x199   : > { %s18461_s2 = smov 32   ;;  %s18462_s6 = smov 512  }
 0x19a   : > { %s18463_s18 = scalar_lea.sflag [#allocation17], %s14191_s14  ;;  %s18464_s29 = sld [smem:[#allocation59_spill]] }
 0x19b   : > { %11923 = dma.hbm_to_vmem [thread:$0]  (!%p18454_p6), %s14396_s16, 1024, %s14400_s3, %s18463_s18, %s18462_s6, %s18462_s6, %s18461_s2  }
 0x19c   : > { %s11643_s24 = sshll.u32 %s13845_s11, 13  ;;  %s1143_s7 = scalar_lea.vmem [#allocation21], %s10950_s1 }
 0x19d   : > { %s1150_s9 = sshll.u32 %s1143_s7, 4  ;;  %s14430_s9 = int_to_ptr.vmem [resolvable:$true] %s1150_s9 }
 0x1a0   : > { %s14426_s8 = scalar_lea.hbm %s18464_s29, %s11643_s24  ;;  %s13684_s10 = scalar_lea.hbm %s18464_s29, 16384 }
 0x1a1   : > { %s13679_s28 = scalar_lea.hbm %s14426_s8, 8192  ;;  %p13685_p7 = scmp.lt.s32.totalorder %s14426_s8, %s18464_s29 }
 0x1a2   : > { %p13680_p4 = scmp.ne.s32.totalorder %s14426_s8, %s13679_s28  ;;  %p13686_p11 = scmp.lt.s32.totalorder %s13684_s10, %s13679_s28 }
 0x1a4   : > { %p13682_p5 = pnand %p13680_p4, %p18453_p3  ;;  %p13687_p13 = por %p13686_p11, %p13685_p7 }
 0x1a6   : > { %p13683_p2 = pneg %p13682_p5 }
 0x1a8   : > { %p13688_p1 = pnand %p13687_p13, %p13683_p2 }
 0x1aa   : > { %13691 = shalt.err (!%p13688_p1)
}
 0x1ab   : > { %s13692_s15 = scalar_lea.vmem %s14430_s9, 8192  ;;  %s13905_s16 = smov [#allocation21]  }
 0x1ac   : > { %p13693_p8 = scmp.ne.s32.totalorder %s14430_s9, %s13692_s15  ;;  %s13697_s3 = sshll.u32 %s13905_s16, 4  ;;  %s13698_s3 = int_to_ptr.vmem [resolvable:$false] %s13697_s3 }
 0x1ad   : > { %s13699_s1 = scalar_lea.vmem %s13698_s3, 16384  ;;  %p13700_p9 = scmp.lt.s32.totalorder %s14430_s9, %s13698_s3 }
 0x1ae   : > { %p13695_p10 = pnand %p13693_p8, %p18453_p3  ;;  %p13701_p0 = scmp.lt.s32.totalorder %s13699_s1, %s13692_s15 }
 0x1b0   : > { %p13696_p12 = pneg %p13695_p10  ;;  %p13702_p4 = por %p13701_p0, %p13700_p9 }
 0x1b2   : > { %p13703_p5 = pnand %p13702_p4, %p13696_p12 }
 0x1b4   : > { %13706 = shalt.err (!%p13703_p5)
}
 0x1b5   : > { %s13906_s2 = smov 128   ;;  %s13907_s6 = smov 8  }
 0x1b6   : > { %s18465_s18 = scalar_lea.sflag [#allocation20], %s14191_s14  ;;  %p18466_p3 = scmp.ne.s32.totalorder %s18429_s22, 0 }
 0x1b7   : > { %11929 = dma.hbm_to_vmem [thread:$0]  (!%p18454_p6), %s14426_s8, 8192, %s14430_s9, %s18465_s18, %s13906_s2, %s13906_s2, %s13907_s6  }
 0x1b8   : > { %1162 = sbr.rel (%p18466_p3) target bundleno = 4544 (0x11c0), region = 124 }
 0x1bd   : > { %p18467_p2 = scmp.eq.s32.totalorder %s14097_s23, 0 }
 0x1bf   : > { %13780 = dma.done.wait (%p18467_p2), [#allocation5], 2048   ;;  %p18468_p7 = pmov %p18467_p2 }
 0x1c0   : > { %p18469_p11 = pmov %p18467_p2 }
 0x1c1   : > { %13782 = vsyncadd (%p18468_p7), [#allocation5], 4294965248 }
 0x1c2   : > { %13784 = dma.done.wait (%p18469_p11), [#allocation8], 32832   ;;  %p18470_p13 = pmov %p18467_p2 }
 0x1c3   : > { %s18471_s27 = sld [smem:[#allocation75_spill]]  ;;  %s1176_s14 = sand.u32 1, %s14097_s23  }
 0x1c4   : > { %13786 = vsyncadd (%p18470_p13), [#allocation8], 4294934464  ;;  %s1178_s0 = sand.u32 1, %s13833_s20   ;;  %s1177_s22 = scalar_lea.sflag [#allocation11], %s1176_s14 }
 0x1c5   : > { %s10957_s24 = sshll.u32 %s1178_s0, 10 }
 0x1c6   : > { %s14462_s8 = scalar_lea.vmem [#allocation10], %s10957_s24 }
 0x1c9   : > { %p18472_p6 = scmp.ne.s32.totalorder %s18471_s27, 0 }
 0x1cb   : > { %13788 = dma.done.wait (%p18472_p6), %s1177_s22, 16448  }
 0x1cc   : > { %13790 = vsyncadd (%p18472_p6), %s1177_s22, 4294950848  ;;  %s14468_s7 = sshll.u32 %s1178_s0, 2  ;;  %s10959_s9 = sshll.u32 %s1178_s0, 8 }
 0x1cd   : > { %s1189_s28 = scalar_lea.vmem [#allocation12], %s14468_s7  ;;  %s1195_s10 = scalar_lea.sflag [#allocation14], %s1176_s14 }
 0x1ce   : > { %s14471_s15 = scalar_lea.vmem [#allocation13], %s10959_s9 }
 0x1cf   : > { %13792 = dma.done.wait (%p18472_p6), %s1195_s10, 4608  }
 0x1d0   : > { %13794 = vsyncadd (%p18472_p6), %s1195_s10, 4294962688  ;;  %s10960_s16 = sshll.u32 %s1178_s0, 5  ;;  %s1213_s1 = scalar_lea.sflag [#allocation17], %s1176_s14 }
 0x1d1   : > { %s14477_s3 = scalar_lea.vmem [#allocation15], %s10960_s16 }
 0x1d2   : > { %13796 = dma.done.wait (%p18472_p6), %s1213_s1, 1088  }
 0x1d3   : > { %13798 = vsyncadd (%p18472_p6), %s1213_s1, 4294966208  ;;  %s10962_s6 = sshll.u32 %s1178_s0, 6  ;;  %s1231_s24 = scalar_lea.sflag [#allocation20], %s1176_s14 }
 0x1d4   : > { %s14484_s18 = scalar_lea.vmem [#allocation18], %s10962_s6 }
 0x1d5   : > { %13800 = dma.done.wait (%p18472_p6), %s1231_s24, 8256  }
 0x1d6   : > { %13802 = vsyncadd (%p18472_p6), %s1231_s24, 4294959040  ;;  %s10964_s9 = sshll.u32 %s1178_s0, 9  ;;  %p18473_p1 = pmov %p18467_p2 }
 0x1d7   : > { %s14491_s10 = scalar_lea.vmem [#allocation21], %s10964_s9 }
 0x1d8   : > { %13804 = dma.done.wait (%p18473_p1), [#allocation23], 8256   ;;  %p18474_p8 = pmov %p18473_p1 }
 0x1d9   : > { %p18475_p10 = pmov %p18473_p1 }
 0x1da   : > { %13806 = vsyncadd (%p18474_p8), [#allocation23], 4294959040 }
 0x1db   : > { %13808 = dma.done.wait (%p18475_p10), [#allocation26], 128   ;;  %p18476_p12 = pmov %p18473_p1 }
 0x1dc   : > { %p18477_p9 = pmov %p18473_p1 }
 0x1dd   : > { %13810 = vsyncadd (%p18476_p12), [#allocation26], 4294967168 }
 0x1de   : > { %13812 = dma.done.wait (%p18477_p9), [#allocation29], 4112   ;;  %p18478_p0 = pmov %p18473_p1 }
 0x1e0   : > { %13814 = vsyncadd (%p18478_p0), [#allocation29], 4294963184  ;;  %p18479_p4 = pmov %p18478_p0 }
 0x1e1   : > { %p18480_p5 = pmov %p18478_p0 }
 0x1e2   : > { %13816 = dma.done.wait (%p18479_p4), [#allocation32], 32  }
 0x1e3   : > { %13818 = vsyncadd (%p18480_p5), [#allocation32], 4294967264  ;;  %s18481_s27 = sld [smem:[#allocation72_spill]] }
 0x1e4   : > { %s18482_s14 = sld [smem:[#allocation52_spill]] }
 0x1e5   : > { %s18483_s0 = sld [smem:[#allocation53_spill]] }
 0x1e6   : > { %s18484_s16 = sld [smem:[#allocation55_spill]] }
 0x1e9   : > { %p1401_p3 = scmp.lt.s32.totalorder %s18481_s27, 1  ;;  %p10977_p2 = scmp.ne.s32.totalorder %s18481_s27, 0 }
 0x1eb   : > { %s1402_s1 = scalar_select %p1401_p3, %s18481_s27, 1 }
 0x1ec   : > { %1426 = sbr.rel (%p10977_p2) target bundleno = 1164 (0x48c), region = 204  ;;  %s18485_s27 = sld [smem:[#allocation50_spill]] (!%p10977_p2) }
 0x1ed   : > { %s10973_s6 = sshll.u32 %s1402_s1, 1  ;;  %s11644_s24 = sshll.u32 %s1402_s1, 4 }
 0x1ee   : > { %s14512_s9 = scalar_lea.vmem %s18482_s14, %s10973_s6  ;;  %s14515_s22 = scalar_lea.vmem %s18483_s0, %s10973_s6 }
 0x1ef   : > { %s14518_s2 = scalar_lea.vmem %s18484_s16, %s11644_s24  ;;  %s18486_s14 = sld [smem:[#allocation51_spill]] (!%p10977_p2) }
 0x1f1   : > { %v12059_v1 = vld [vmem:[#allocation7 + $0xe4] ss:$16 sps:$4 sm:$0xff]   ;;  %v12063_v3 = vld [vmem:[#allocation7 + $0xe0] ss:$16 sps:$4 sm:$0xff]   ;;  %v1428_v47 = vld [vmem:[#allocation4 + $0x8] sm:$0xff] }
 0x1f2   : > { %v12061_v2 = vld [vmem:[#allocation7 + $0x2e4] ss:$16 sps:$4 sm:$0xff]   ;;  %3009 = vmatprep.subr.bf16.mxu0 %v12059_v1  ;;  %v12064_v4 = vld [vmem:[#allocation7 + $0x2e0] ss:$16 sps:$4 sm:$0xff]   ;;  %v1436_v48 = vld [vmem:[#allocation4 + $0x48] sm:$0xff] }
 0x1f3   : > { %3052 = vmatprep.subr.bf16.mxu1 %v12061_v2  ;;  %v12065_v5 = vld [vmem:[#allocation7 + $0xc4] ss:$16 sps:$4 sm:$0xff]   ;;  %3010 = vmatpush1.bf16.msra.mxu0 %v12063_v3  ;;  %v12069_v7 = vld [vmem:[#allocation7 + $0xc0] ss:$16 sps:$4 sm:$0xff]   ;;  %v1430_v49 = vld [vmem:[#allocation4 + $0x18] sm:$0xff]  ;;  %v14521_v54 = vpack.c.bf16 %v1436_v48, %v1428_v47 }
 0x1f4   : > { %3053 = vmatpush1.bf16.msra.mxu1 %v12064_v4  ;;  %v12067_v6 = vld [vmem:[#allocation7 + $0x2c4] ss:$16 sps:$4 sm:$0xff]   ;;  %3011 = vmatprep.subr.bf16.mxu0 %v12065_v5  ;;  %v12070_v8 = vld [vmem:[#allocation7 + $0x2c0] ss:$16 sps:$4 sm:$0xff]   ;;  %v1438_v50 = vld [vmem:[#allocation4 + $0x58] sm:$0xff] }
 0x1f5   : > { %3054 = vmatprep.subr.bf16.mxu1 %v12067_v6  ;;  %v12071_v9 = vld [vmem:[#allocation7 + $0xa4] ss:$16 sps:$4 sm:$0xff]   ;;  %v12075_v11 = vld [vmem:[#allocation7 + $0xa0] ss:$16 sps:$4 sm:$0xff]   ;;  %v14523_v55 = vpack.c.bf16 %v1438_v50, %v1430_v49  ;;  %3041 = vmatprep.mubr.bf16.mxu0 %v14521_v54  ;;  %v1442_v47 = vld [vmem:[#allocation4 + $0x78] sm:$0xff] }
 0x1f6   : > { %v12073_v10 = vld [vmem:[#allocation7 + $0x2a4] ss:$16 sps:$4 sm:$0xff]   ;;  %v12076_v12 = vld [vmem:[#allocation7 + $0x2a0] ss:$16 sps:$4 sm:$0xff]  }
 0x1f7   : > { %3012 = vmatpush1.bf16.msra.mxu0 %v12069_v7  ;;  %v12077_v13 = vld [vmem:[#allocation7 + $0x84] ss:$16 sps:$4 sm:$0xff]   ;;  %v12081_v15 = vld [vmem:[#allocation7 + $0x80] ss:$16 sps:$4 sm:$0xff]   ;;  %3084 = vmatprep.mubr.bf16.mxu1 %v14523_v55 }
 0x1f8   : > { %3055 = vmatpush1.bf16.msra.mxu1 %v12070_v8  ;;  %3013 = vmatprep.subr.bf16.mxu0 %v12071_v9  ;;  %v12079_v14 = vld [vmem:[#allocation7 + $0x284] ss:$16 sps:$4 sm:$0xff]   ;;  %v12082_v16 = vld [vmem:[#allocation7 + $0x280] ss:$16 sps:$4 sm:$0xff]  }
 0x1f9   : > { %3056 = vmatprep.subr.bf16.mxu1 %v12073_v10  ;;  %v12083_v17 = vld [vmem:[#allocation7 + $0x64] ss:$16 sps:$4 sm:$0xff]   ;;  %v12087_v19 = vld [vmem:[#allocation7 + $0x60] ss:$16 sps:$4 sm:$0xff]  }
 0x1fa   : > { %v12085_v18 = vld [vmem:[#allocation7 + $0x264] ss:$16 sps:$4 sm:$0xff]   ;;  %v12088_v20 = vld [vmem:[#allocation7 + $0x260] ss:$16 sps:$4 sm:$0xff]  }
 0x1fb   : > { %3014 = vmatpush1.bf16.msra.mxu0 %v12075_v11  ;;  %v12089_v21 = vld [vmem:[#allocation7 + $0x44] ss:$16 sps:$4 sm:$0xff]   ;;  %v12093_v23 = vld [vmem:[#allocation7 + $0x40] ss:$16 sps:$4 sm:$0xff]  }
 0x1fc   : > { %3057 = vmatpush1.bf16.msra.mxu1 %v12076_v12  ;;  %3015 = vmatprep.subr.bf16.mxu0 %v12077_v13  ;;  %v12091_v22 = vld [vmem:[#allocation7 + $0x244] ss:$16 sps:$4 sm:$0xff]   ;;  %v12094_v24 = vld [vmem:[#allocation7 + $0x240] ss:$16 sps:$4 sm:$0xff]  }
 0x1fd   : > { %3058 = vmatprep.subr.bf16.mxu1 %v12079_v14  ;;  %v12095_v25 = vld [vmem:[#allocation7 + $0x24] ss:$16 sps:$4 sm:$0xff]   ;;  %v12099_v27 = vld [vmem:[#allocation7 + $0x20] ss:$16 sps:$4 sm:$0xff]  }
 0x1fe   : > { %v12097_v26 = vld [vmem:[#allocation7 + $0x224] ss:$16 sps:$4 sm:$0xff]   ;;  %v12100_v28 = vld [vmem:[#allocation7 + $0x220] ss:$16 sps:$4 sm:$0xff]  }
 0x1ff   : > { %3016 = vmatpush1.bf16.msra.mxu0 %v12081_v15  ;;  %v12101_v29 = vld [vmem:[#allocation7 + $0x4] ss:$16 sps:$4 sm:$0xff]   ;;  %v12105_v31 = vld [vmem:[#allocation7] ss:$16 sps:$4 sm:$0xff]  }
 0x200   : > { %3059 = vmatpush1.bf16.msra.mxu1 %v12082_v16  ;;  %3017 = vmatprep.subr.bf16.mxu0 %v12083_v17  ;;  %v12103_v30 = vld [vmem:[#allocation7 + $0x204] ss:$16 sps:$4 sm:$0xff]   ;;  %v12106_v32 = vld [vmem:[#allocation7 + $0x200] ss:$16 sps:$4 sm:$0xff]  }
 0x201   : > { %3060 = vmatprep.subr.bf16.mxu1 %v12085_v18  ;;  %v12107_v33 = vld [vmem:[#allocation7 + $0x1e4] ss:$16 sps:$4 sm:$0xff]   ;;  %v12111_v35 = vld [vmem:[#allocation7 + $0x1e0] ss:$16 sps:$4 sm:$0xff]  }
 0x202   : > { %v12109_v34 = vld [vmem:[#allocation7 + $0x3e4] ss:$16 sps:$4 sm:$0xff]   ;;  %v12112_v36 = vld [vmem:[#allocation7 + $0x3e0] ss:$16 sps:$4 sm:$0xff]  }
 0x203   : > { %3018 = vmatpush1.bf16.msra.mxu0 %v12087_v19  ;;  %v12113_v37 = vld [vmem:[#allocation7 + $0x1c4] ss:$16 sps:$4 sm:$0xff]   ;;  %v12117_v39 = vld [vmem:[#allocation7 + $0x1c0] ss:$16 sps:$4 sm:$0xff]  }
 0x204   : > { %3061 = vmatpush1.bf16.msra.mxu1 %v12088_v20  ;;  %3019 = vmatprep.subr.bf16.mxu0 %v12089_v21  ;;  %v12115_v38 = vld [vmem:[#allocation7 + $0x3c4] ss:$16 sps:$4 sm:$0xff]   ;;  %v12118_v40 = vld [vmem:[#allocation7 + $0x3c0] ss:$16 sps:$4 sm:$0xff]  }
 0x205   : > { %3062 = vmatprep.subr.bf16.mxu1 %v12091_v22  ;;  %v12119_v41 = vld [vmem:[#allocation7 + $0x1a4] ss:$16 sps:$4 sm:$0xff]   ;;  %v12123_v43 = vld [vmem:[#allocation7 + $0x1a0] ss:$16 sps:$4 sm:$0xff]  }
 0x206   : > { %v12121_v42 = vld [vmem:[#allocation7 + $0x3a4] ss:$16 sps:$4 sm:$0xff]   ;;  %v12124_v44 = vld [vmem:[#allocation7 + $0x3a0] ss:$16 sps:$4 sm:$0xff]  }
 0x207   : > { %3020 = vmatpush1.bf16.msra.mxu0 %v12093_v23  ;;  %v12125_v45 = vld [vmem:[#allocation7 + $0x184] ss:$16 sps:$4 sm:$0xff]   ;;  %v12129_v51 = vld [vmem:[#allocation7 + $0x180] ss:$16 sps:$4 sm:$0xff]  }
 0x208   : > { %3063 = vmatpush1.bf16.msra.mxu1 %v12094_v24  ;;  %3021 = vmatprep.subr.bf16.mxu0 %v12095_v25  ;;  %v12127_v46 = vld [vmem:[#allocation7 + $0x384] ss:$16 sps:$4 sm:$0xff]   ;;  %v12130_v52 = vld [vmem:[#allocation7 + $0x380] ss:$16 sps:$4 sm:$0xff]  }
 0x209   : > { %3064 = vmatprep.subr.bf16.mxu1 %v12097_v26  ;;  %v12131_v53 = vld [vmem:[#allocation7 + $0x164] ss:$16 sps:$4 sm:$0xff]   ;;  %v12135_v57 = vld [vmem:[#allocation7 + $0x160] ss:$16 sps:$4 sm:$0xff]  }
 0x20a   : > { %v12133_v56 = vld [vmem:[#allocation7 + $0x364] ss:$16 sps:$4 sm:$0xff]   ;;  %v12136_v58 = vld [vmem:[#allocation7 + $0x360] ss:$16 sps:$4 sm:$0xff]  }
 0x20b   : > { %3022 = vmatpush1.bf16.msra.mxu0 %v12099_v27  ;;  %v12137_v59 = vld [vmem:[#allocation7 + $0x144] ss:$16 sps:$4 sm:$0xff]   ;;  %v12141_v61 = vld [vmem:[#allocation7 + $0x140] ss:$16 sps:$4 sm:$0xff]  }
 0x20c   : > { %3065 = vmatpush1.bf16.msra.mxu1 %v12100_v28  ;;  %3023 = vmatprep.subr.bf16.mxu0 %v12101_v29  ;;  %v12139_v60 = vld [vmem:[#allocation7 + $0x344] ss:$16 sps:$4 sm:$0xff]   ;;  %v12142_v62 = vld [vmem:[#allocation7 + $0x340] ss:$16 sps:$4 sm:$0xff]  }
 0x20d   : > { %3066 = vmatprep.subr.bf16.mxu1 %v12103_v30  ;;  %v12143_v63 = vld [vmem:[#allocation7 + $0x124] ss:$16 sps:$4 sm:$0xff]   ;;  %v12147_v1 = vld [vmem:[#allocation7 + $0x120] ss:$16 sps:$4 sm:$0xff]  }
 0x20e   : > { %v12145_v0 = vld [vmem:[#allocation7 + $0x324] ss:$16 sps:$4 sm:$0xff]   ;;  %v12148_v2 = vld [vmem:[#allocation7 + $0x320] ss:$16 sps:$4 sm:$0xff]  }
 0x20f   : > { %3024 = vmatpush1.bf16.msra.mxu0 %v12105_v31  ;;  %v12149_v3 = vld [vmem:[#allocation7 + $0x104] ss:$16 sps:$4 sm:$0xff]   ;;  %v12153_v5 = vld [vmem:[#allocation7 + $0x100] ss:$16 sps:$4 sm:$0xff]  }
 0x210   : > { %3067 = vmatpush1.bf16.msra.mxu1 %v12106_v32  ;;  %3025 = vmatprep.subr.bf16.mxu0 %v12107_v33  ;;  %v12151_v4 = vld [vmem:[#allocation7 + $0x304] ss:$16 sps:$4 sm:$0xff]   ;;  %v12154_v6 = vld [vmem:[#allocation7 + $0x300] ss:$16 sps:$4 sm:$0xff]  }
 0x211   : > { %3068 = vmatprep.subr.bf16.mxu1 %v12109_v34  ;;  %v1427_v7 = vld [vmem:[#allocation4] sm:$0xff]  ;;  %v1429_v9 = vld [vmem:[#allocation4 + $0x10] sm:$0xff] }
 0x212   : > { %v1435_v8 = vld [vmem:[#allocation4 + $0x40] sm:$0xff]  ;;  %v1437_v10 = vld [vmem:[#allocation4 + $0x50] sm:$0xff] }
 0x213   : > { %3026 = vmatpush2.bf16.msra.mxu0 %v12111_v35  ;;  %v12157_v11 = vld [vmem:[#allocation7 + $0x4e4] ss:$16 sps:$4 sm:$0xff]   ;;  %v14527_v13 = vpack.c.bf16 %v1435_v8, %v1427_v7  ;;  %v14529_v14 = vpack.c.bf16 %v1437_v10, %v1429_v9  ;;  %v12155_v15 = vld [vmem:[#allocation7 + $0x4e0] ss:$16 sps:$4 sm:$0xff]  }
 0x214   : > { %3069 = vmatpush2.bf16.msra.mxu1 %v12112_v36  ;;  %3027 = vmatprep.subr.bf16.mxu0 %v12113_v37  ;;  %v12160_v12 = vld [vmem:[#allocation7 + $0x6e4] ss:$16 sps:$4 sm:$0xff]   ;;  %v12158_v16 = vld [vmem:[#allocation7 + $0x6e0] ss:$16 sps:$4 sm:$0xff]  }
 0x215   : > { %3070 = vmatprep.subr.bf16.mxu1 %v12115_v38  ;;  %v12163_v17 = vld [vmem:[#allocation7 + $0x4c4] ss:$16 sps:$4 sm:$0xff]   ;;  %v12161_v19 = vld [vmem:[#allocation7 + $0x4c0] ss:$16 sps:$4 sm:$0xff]  }
 0x216   : > { %v12166_v18 = vld [vmem:[#allocation7 + $0x6c4] ss:$16 sps:$4 sm:$0xff]   ;;  %v12164_v20 = vld [vmem:[#allocation7 + $0x6c0] ss:$16 sps:$4 sm:$0xff]  }
 0x217   : > { %3028 = vmatpush2.bf16.msra.mxu0 %v12117_v39  ;;  %v12169_v21 = vld [vmem:[#allocation7 + $0x4a4] ss:$16 sps:$4 sm:$0xff]   ;;  %v12167_v23 = vld [vmem:[#allocation7 + $0x4a0] ss:$16 sps:$4 sm:$0xff]  }
 0x218   : > { %3071 = vmatpush2.bf16.msra.mxu1 %v12118_v40  ;;  %3029 = vmatprep.subr.bf16.mxu0 %v12119_v41  ;;  %v12172_v22 = vld [vmem:[#allocation7 + $0x6a4] ss:$16 sps:$4 sm:$0xff]   ;;  %v12170_v24 = vld [vmem:[#allocation7 + $0x6a0] ss:$16 sps:$4 sm:$0xff]   ;;  %v1432_v41 = vld [vmem:[#allocation4 + $0x28] sm:$0xff] }
 0x219   : > { %3072 = vmatprep.subr.bf16.mxu1 %v12121_v42  ;;  %v12175_v25 = vld [vmem:[#allocation7 + $0x484] ss:$16 sps:$4 sm:$0xff]   ;;  %v12173_v27 = vld [vmem:[#allocation7 + $0x480] ss:$16 sps:$4 sm:$0xff]   ;;  %v1440_v42 = vld [vmem:[#allocation4 + $0x68] sm:$0xff] }
 0x21a   : > { %v12178_v26 = vld [vmem:[#allocation7 + $0x684] ss:$16 sps:$4 sm:$0xff]   ;;  %v12176_v28 = vld [vmem:[#allocation7 + $0x680] ss:$16 sps:$4 sm:$0xff]  }
 0x21b   : > { %3030 = vmatpush2.bf16.msra.mxu0 %v12123_v43  ;;  %v12181_v29 = vld [vmem:[#allocation7 + $0x464] ss:$16 sps:$4 sm:$0xff]   ;;  %v12179_v31 = vld [vmem:[#allocation7 + $0x460] ss:$16 sps:$4 sm:$0xff]   ;;  %v1434_v43 = vld [vmem:[#allocation4 + $0x38] sm:$0xff] }
 0x21c   : > { %3073 = vmatpush2.bf16.msra.mxu1 %v12124_v44  ;;  %3031 = vmatprep.subr.bf16.mxu0 %v12125_v45  ;;  %v12184_v30 = vld [vmem:[#allocation7 + $0x664] ss:$16 sps:$4 sm:$0xff]   ;;  %v12182_v32 = vld [vmem:[#allocation7 + $0x660] ss:$16 sps:$4 sm:$0xff]   ;;  %v14535_v48 = vpack.c.bf16 %v1442_v47, %v1434_v43  ;;  %v12269_v43 = vld [vmem:[#allocation7 + $0x88] ss:$16 sps:$4 sm:$0xff]  }
 0x21d   : > { %3074 = vmatprep.subr.bf16.mxu1 %v12127_v46  ;;  %v12187_v33 = vld [vmem:[#allocation7 + $0x444] ss:$16 sps:$4 sm:$0xff]   ;;  %v12185_v35 = vld [vmem:[#allocation7 + $0x440] ss:$16 sps:$4 sm:$0xff]   ;;  %v14533_v46 = vpack.c.bf16 %v1440_v42, %v1432_v41  ;;  %v12271_v41 = vld [vmem:[#allocation7 + $0x8c] ss:$16 sps:$4 sm:$0xff]  }
 0x21e   : > { %v12190_v34 = vld [vmem:[#allocation7 + $0x644] ss:$16 sps:$4 sm:$0xff]   ;;  %v12188_v36 = vld [vmem:[#allocation7 + $0x640] ss:$16 sps:$4 sm:$0xff]   ;;  %v12274_v42 = vld [vmem:[#allocation7 + $0x28c] ss:$16 sps:$4 sm:$0xff]  }
 0x21f   : > { %3032 = vmatpush2.bf16.msra.mxu0 %v12129_v51  ;;  %v12193_v37 = vld [vmem:[#allocation7 + $0x424] ss:$16 sps:$4 sm:$0xff]   ;;  %v12191_v39 = vld [vmem:[#allocation7 + $0x420] ss:$16 sps:$4 sm:$0xff]   ;;  %v12280_v47 = vld [vmem:[#allocation7 + $0x26c] ss:$16 sps:$4 sm:$0xff]  }
 0x220   : > { %3075 = vmatpush2.bf16.msra.mxu1 %v12130_v52  ;;  %3033 = vmatprep.subr.bf16.mxu0 %v12131_v53  ;;  %v12196_v38 = vld [vmem:[#allocation7 + $0x624] ss:$16 sps:$4 sm:$0xff]   ;;  %v12194_v40 = vld [vmem:[#allocation7 + $0x620] ss:$16 sps:$4 sm:$0xff]  }
 0x221   : > { %3076 = vmatprep.subr.bf16.mxu1 %v12133_v56  ;;  %v12199_v44 = vld [vmem:[#allocation7 + $0x404] ss:$16 sps:$4 sm:$0xff]   ;;  %v12197_v49 = vld [vmem:[#allocation7 + $0x400] ss:$16 sps:$4 sm:$0xff]  }
 0x222   : > { %v12202_v45 = vld [vmem:[#allocation7 + $0x604] ss:$16 sps:$4 sm:$0xff]   ;;  %v12200_v50 = vld [vmem:[#allocation7 + $0x600] ss:$16 sps:$4 sm:$0xff]  }
 0x223   : > { %3034 = vmatpush2.bf16.msra.mxu0 %v12135_v57  ;;  %v12205_v51 = vld [vmem:[#allocation7 + $0x5e4] ss:$16 sps:$4 sm:$0xff]   ;;  %v12203_v53 = vld [vmem:[#allocation7 + $0x5e0] ss:$16 sps:$4 sm:$0xff]  }
 0x224   : > { %3077 = vmatpush2.bf16.msra.mxu1 %v12136_v58  ;;  %3035 = vmatprep.subr.bf16.mxu0 %v12137_v59  ;;  %v12208_v52 = vld [vmem:[#allocation7 + $0x7e4] ss:$16 sps:$4 sm:$0xff]   ;;  %v12206_v56 = vld [vmem:[#allocation7 + $0x7e0] ss:$16 sps:$4 sm:$0xff]  }
 0x225   : > { %3078 = vmatprep.subr.bf16.mxu1 %v12139_v60  ;;  %v12211_v57 = vld [vmem:[#allocation7 + $0x5c4] ss:$16 sps:$4 sm:$0xff]   ;;  %v12209_v59 = vld [vmem:[#allocation7 + $0x5c0] ss:$16 sps:$4 sm:$0xff]  }
 0x226   : > { %v12214_v58 = vld [vmem:[#allocation7 + $0x7c4] ss:$16 sps:$4 sm:$0xff]   ;;  %v12212_v60 = vld [vmem:[#allocation7 + $0x7c0] ss:$16 sps:$4 sm:$0xff]  }
 0x227   : > { %3036 = vmatpush2.bf16.msra.mxu0 %v12141_v61  ;;  %v12217_v61 = vld [vmem:[#allocation7 + $0x5a4] ss:$16 sps:$4 sm:$0xff]   ;;  %v12227_v7 = vld [vmem:[#allocation7 + $0x560] ss:$16 sps:$4 sm:$0xff]  }
 0x228   : > { %3079 = vmatpush2.bf16.msra.mxu1 %v12142_v62  ;;  %3037 = vmatprep.subr.bf16.mxu0 %v12143_v63  ;;  %v12220_v62 = vld [vmem:[#allocation7 + $0x7a4] ss:$16 sps:$4 sm:$0xff]   ;;  %v12215_v63 = vld [vmem:[#allocation7 + $0x5a0] ss:$16 sps:$4 sm:$0xff]  }
 0x229   : > { %3080 = vmatprep.subr.bf16.mxu1 %v12145_v0  ;;  %v12218_v0 = vld [vmem:[#allocation7 + $0x7a0] ss:$16 sps:$4 sm:$0xff]   ;;  %v12235_v9 = vld [vmem:[#allocation7 + $0x544] ss:$16 sps:$4 sm:$0xff]  }
 0x22a   : > { %v12230_v8 = vld [vmem:[#allocation7 + $0x760] ss:$16 sps:$4 sm:$0xff]   ;;  %v12238_v10 = vld [vmem:[#allocation7 + $0x744] ss:$16 sps:$4 sm:$0xff]  }
 0x22b   : > { %3038 = vmatpush2.bf16.msra.mxu0 %v12147_v1  ;;  %v12223_v1 = vld [vmem:[#allocation7 + $0x584] ss:$16 sps:$4 sm:$0xff]  }
 0x22c   : > { %3081 = vmatpush2.bf16.msra.mxu1 %v12148_v2  ;;  %3039 = vmatprep.subr.bf16.mxu0 %v12149_v3  ;;  %v12226_v2 = vld [vmem:[#allocation7 + $0x784] ss:$16 sps:$4 sm:$0xff]   ;;  %v12221_v3 = vld [vmem:[#allocation7 + $0x580] ss:$16 sps:$4 sm:$0xff]  }
 0x22d   : > { %3082 = vmatprep.subr.bf16.mxu1 %v12151_v4  ;;  %v12224_v4 = vld [vmem:[#allocation7 + $0x780] ss:$16 sps:$4 sm:$0xff]  }
 0x22f   : > { %3040 = vmatpush2.bf16.msra.mxu0 %v12153_v5  ;;  %v12229_v5 = vld [vmem:[#allocation7 + $0x564] ss:$16 sps:$4 sm:$0xff]  }
 0x230   : > { %3083 = vmatpush2.bf16.msra.mxu1 %v12154_v6  ;;  %3095 = vmatprep.subr.bf16.mxu0 %v12157_v11  ;;  %v12232_v6 = vld [vmem:[#allocation7 + $0x764] ss:$16 sps:$4 sm:$0xff]   ;;  %v12233_v11 = vld [vmem:[#allocation7 + $0x540] ss:$16 sps:$4 sm:$0xff]  }
 0x231   : > { %3138 = vmatprep.subr.bf16.mxu1 %v12160_v12  ;;  %v12236_v12 = vld [vmem:[#allocation7 + $0x740] ss:$16 sps:$4 sm:$0xff]  }
 0x232   : > { %3042 = vmatmul.mubr.bf16.vlgmr.msra.gmra.mxu0 %v14527_v13 }
 0x233   : > { %3085 = vmatmul.mubr.bf16.vlgmr.msra.gmra.mxu1 %v14529_v14  ;;  %3096 = vmatpush1.bf16.msra.mxu0 %v12155_v15  ;;  %v12241_v15 = vld [vmem:[#allocation7 + $0x524] ss:$16 sps:$4 sm:$0xff]  }
 0x234   : > { %3139 = vmatpush1.bf16.msra.mxu1 %v12158_v16  ;;  %3097 = vmatprep.subr.bf16.mxu0 %v12163_v17  ;;  %v12244_v16 = vld [vmem:[#allocation7 + $0x724] ss:$16 sps:$4 sm:$0xff]   ;;  %v12239_v17 = vld [vmem:[#allocation7 + $0x520] ss:$16 sps:$4 sm:$0xff]  }
 0x235   : > { %3140 = vmatprep.subr.bf16.mxu1 %v12166_v18  ;;  %3127 = vmatprep.mubr.bf16.mxu0 %v14533_v46  ;;  %v12242_v18 = vld [vmem:[#allocation7 + $0x720] ss:$16 sps:$4 sm:$0xff]  }
 0x236   : > { %3170 = vmatprep.mubr.bf16.mxu1 %v14535_v48 }
 0x237   : > { %3098 = vmatpush1.bf16.msra.mxu0 %v12161_v19  ;;  %v12247_v19 = vld [vmem:[#allocation7 + $0x504] ss:$16 sps:$4 sm:$0xff]  }
 0x238   : > { %3141 = vmatpush1.bf16.msra.mxu1 %v12164_v20  ;;  %3099 = vmatprep.subr.bf16.mxu0 %v12169_v21  ;;  %v12250_v20 = vld [vmem:[#allocation7 + $0x704] ss:$16 sps:$4 sm:$0xff]   ;;  %v12245_v21 = vld [vmem:[#allocation7 + $0x500] ss:$16 sps:$4 sm:$0xff]  }
 0x239   : > { %3142 = vmatprep.subr.bf16.mxu1 %v12172_v22  ;;  %v12248_v22 = vld [vmem:[#allocation7 + $0x700] ss:$16 sps:$4 sm:$0xff]  }
 0x23b   : > { %3100 = vmatpush1.bf16.msra.mxu0 %v12167_v23  ;;  %v1431_v23 = vld [vmem:[#allocation4 + $0x20] sm:$0xff] }
 0x23c   : > { %3143 = vmatpush1.bf16.msra.mxu1 %v12170_v24  ;;  %3101 = vmatprep.subr.bf16.mxu0 %v12175_v25  ;;  %v1439_v24 = vld [vmem:[#allocation4 + $0x60] sm:$0xff]  ;;  %v1433_v25 = vld [vmem:[#allocation4 + $0x30] sm:$0xff] }
 0x23d   : > { %3144 = vmatprep.subr.bf16.mxu1 %v12178_v26  ;;  %v1441_v26 = vld [vmem:[#allocation4 + $0x70] sm:$0xff] }
 0x23f   : > { %3102 = vmatpush1.bf16.msra.mxu0 %v12173_v27  ;;  %v12253_v27 = vld [vmem:[#allocation7 + $0xec] ss:$16 sps:$4 sm:$0xff]  }
 0x240   : > { %3145 = vmatpush1.bf16.msra.mxu1 %v12176_v28  ;;  %3103 = vmatprep.subr.bf16.mxu0 %v12181_v29  ;;  %v12256_v28 = vld [vmem:[#allocation7 + $0x2ec] ss:$16 sps:$4 sm:$0xff]   ;;  %v14539_v29 = vpack.c.bf16 %v1439_v24, %v1431_v23  ;;  %v12329_v23 = vld [vmem:[#allocation7 + $0x148] ss:$16 sps:$4 sm:$0xff]  }
 0x241   : > { %3146 = vmatprep.subr.bf16.mxu1 %v12184_v30  ;;  %v14541_v30 = vpack.c.bf16 %v1441_v26, %v1433_v25  ;;  %v12332_v24 = vld [vmem:[#allocation7 + $0x348] ss:$16 sps:$4 sm:$0xff]   ;;  %v12337_v25 = vld [vmem:[#allocation7 + $0x12c] ss:$16 sps:$4 sm:$0xff]  }
 0x242   : > { %v12340_v26 = vld [vmem:[#allocation7 + $0x32c] ss:$16 sps:$4 sm:$0xff]  }
 0x243   : > { %3104 = vmatpush1.bf16.msra.mxu0 %v12179_v31  ;;  %v12251_v31 = vld [vmem:[#allocation7 + $0xe8] ss:$16 sps:$4 sm:$0xff]  }
 0x244   : > { %3147 = vmatpush1.bf16.msra.mxu1 %v12182_v32  ;;  %3105 = vmatprep.subr.bf16.mxu0 %v12187_v33  ;;  %v12254_v32 = vld [vmem:[#allocation7 + $0x2e8] ss:$16 sps:$4 sm:$0xff]   ;;  %v12259_v33 = vld [vmem:[#allocation7 + $0xcc] ss:$16 sps:$4 sm:$0xff]  }
 0x245   : > { %3148 = vmatprep.subr.bf16.mxu1 %v12190_v34  ;;  %v12262_v34 = vld [vmem:[#allocation7 + $0x2cc] ss:$16 sps:$4 sm:$0xff]  }
 0x247   : > { %3106 = vmatpush1.bf16.msra.mxu0 %v12185_v35  ;;  %v12257_v35 = vld [vmem:[#allocation7 + $0xc8] ss:$16 sps:$4 sm:$0xff]  }
 0x248   : > { %3149 = vmatpush1.bf16.msra.mxu1 %v12188_v36  ;;  %3107 = vmatprep.subr.bf16.mxu0 %v12193_v37  ;;  %v12260_v36 = vld [vmem:[#allocation7 + $0x2c8] ss:$16 sps:$4 sm:$0xff]   ;;  %v12265_v37 = vld [vmem:[#allocation7 + $0xac] ss:$16 sps:$4 sm:$0xff]  }
 0x249   : > { %3150 = vmatprep.subr.bf16.mxu1 %v12196_v38  ;;  %v12268_v38 = vld [vmem:[#allocation7 + $0x2ac] ss:$16 sps:$4 sm:$0xff]  }
 0x24b   : > { %3108 = vmatpush1.bf16.msra.mxu0 %v12191_v39  ;;  %v12263_v39 = vld [vmem:[#allocation7 + $0xa8] ss:$16 sps:$4 sm:$0xff]  }
 0x24c   : > { %3151 = vmatpush1.bf16.msra.mxu1 %v12194_v40  ;;  %3109 = vmatprep.subr.bf16.mxu0 %v12199_v44  ;;  %v12266_v40 = vld [vmem:[#allocation7 + $0x2a8] ss:$16 sps:$4 sm:$0xff]  }
 0x24d   : > { %3152 = vmatprep.subr.bf16.mxu1 %v12202_v45  ;;  %v12272_v44 = vld [vmem:[#allocation7 + $0x288] ss:$16 sps:$4 sm:$0xff]   ;;  %v12277_v45 = vld [vmem:[#allocation7 + $0x6c] ss:$16 sps:$4 sm:$0xff]  }
 0x24f   : > { %3110 = vmatpush1.bf16.msra.mxu0 %v12197_v49  ;;  %v12275_v49 = vld [vmem:[#allocation7 + $0x68] ss:$16 sps:$4 sm:$0xff]  }
 0x250   : > { %3153 = vmatpush1.bf16.msra.mxu1 %v12200_v50  ;;  %3111 = vmatprep.subr.bf16.mxu0 %v12205_v51  ;;  %v12286_v50 = vld [vmem:[#allocation7 + $0x24c] ss:$16 sps:$4 sm:$0xff]   ;;  %v12281_v51 = vld [vmem:[#allocation7 + $0x48] ss:$16 sps:$4 sm:$0xff]  }
 0x251   : > { %3154 = vmatprep.subr.bf16.mxu1 %v12208_v52  ;;  %v12284_v52 = vld [vmem:[#allocation7 + $0x248] ss:$16 sps:$4 sm:$0xff]  }
 0x253   : > { %3112 = vmatpush2.bf16.msra.mxu0 %v12203_v53  ;;  %v12289_v53 = vld [vmem:[#allocation7 + $0x2c] ss:$16 sps:$4 sm:$0xff]  }
 0x254   : > { %3155 = vmatpush2.bf16.msra.mxu1 %v12206_v56  ;;  %3113 = vmatprep.subr.bf16.mxu0 %v12211_v57  ;;  %v12292_v56 = vld [vmem:[#allocation7 + $0x22c] ss:$16 sps:$4 sm:$0xff]   ;;  %v12287_v57 = vld [vmem:[#allocation7 + $0x28] ss:$16 sps:$4 sm:$0xff]  }
 0x255   : > { %3156 = vmatprep.subr.bf16.mxu1 %v12214_v58  ;;  %v12290_v58 = vld [vmem:[#allocation7 + $0x228] ss:$16 sps:$4 sm:$0xff]  }
 0x257   : > { %3114 = vmatpush2.bf16.msra.mxu0 %v12209_v59  ;;  %v12295_v59 = vld [vmem:[#allocation7 + $0xc] ss:$16 sps:$4 sm:$0xff]  }
 0x258   : > { %3157 = vmatpush2.bf16.msra.mxu1 %v12212_v60  ;;  %3115 = vmatprep.subr.bf16.mxu0 %v12217_v61  ;;  %v12298_v60 = vld [vmem:[#allocation7 + $0x20c] ss:$16 sps:$4 sm:$0xff]   ;;  %v12293_v61 = vld [vmem:[#allocation7 + $0x8] ss:$16 sps:$4 sm:$0xff]  }
 0x259   : > { %3158 = vmatprep.subr.bf16.mxu1 %v12220_v62  ;;  %v12296_v62 = vld [vmem:[#allocation7 + $0x208] ss:$16 sps:$4 sm:$0xff]  }
 0x25b   : > { %3116 = vmatpush2.bf16.msra.mxu0 %v12215_v63  ;;  %v12301_v63 = vld [vmem:[#allocation7 + $0x1ec] ss:$16 sps:$4 sm:$0xff]  }
 0x25c   : > { %3159 = vmatpush2.bf16.msra.mxu1 %v12218_v0  ;;  %3117 = vmatprep.subr.bf16.mxu0 %v12223_v1  ;;  %v12304_v0 = vld [vmem:[#allocation7 + $0x3ec] ss:$16 sps:$4 sm:$0xff]   ;;  %v12299_v1 = vld [vmem:[#allocation7 + $0x1e8] ss:$16 sps:$4 sm:$0xff]  }
 0x25d   : > { %3160 = vmatprep.subr.bf16.mxu1 %v12226_v2  ;;  %v12302_v2 = vld [vmem:[#allocation7 + $0x3e8] ss:$16 sps:$4 sm:$0xff]  }
 0x25f   : > { %3118 = vmatpush2.bf16.msra.mxu0 %v12221_v3  ;;  %v12307_v3 = vld [vmem:[#allocation7 + $0x1cc] ss:$16 sps:$4 sm:$0xff]  }
 0x260   : > { %3161 = vmatpush2.bf16.msra.mxu1 %v12224_v4  ;;  %3119 = vmatprep.subr.bf16.mxu0 %v12229_v5  ;;  %v12310_v4 = vld [vmem:[#allocation7 + $0x3cc] ss:$16 sps:$4 sm:$0xff]   ;;  %v12305_v5 = vld [vmem:[#allocation7 + $0x1c8] ss:$16 sps:$4 sm:$0xff]  }
 0x261   : > { %3162 = vmatprep.subr.bf16.mxu1 %v12232_v6  ;;  %v12308_v6 = vld [vmem:[#allocation7 + $0x3c8] ss:$16 sps:$4 sm:$0xff]  }
 0x263   : > { %3120 = vmatpush2.bf16.msra.mxu0 %v12227_v7  ;;  %v12313_v7 = vld [vmem:[#allocation7 + $0x1ac] ss:$16 sps:$4 sm:$0xff]  }
 0x264   : > { %3163 = vmatpush2.bf16.msra.mxu1 %v12230_v8  ;;  %3121 = vmatprep.subr.bf16.mxu0 %v12235_v9  ;;  %v12316_v8 = vld [vmem:[#allocation7 + $0x3ac] ss:$16 sps:$4 sm:$0xff]   ;;  %v12311_v9 = vld [vmem:[#allocation7 + $0x1a8] ss:$16 sps:$4 sm:$0xff]  }
 0x265   : > { %3164 = vmatprep.subr.bf16.mxu1 %v12238_v10  ;;  %v12314_v10 = vld [vmem:[#allocation7 + $0x3a8] ss:$16 sps:$4 sm:$0xff]  }
 0x267   : > { %3122 = vmatpush2.bf16.msra.mxu0 %v12233_v11  ;;  %v12319_v11 = vld [vmem:[#allocation7 + $0x18c] ss:$16 sps:$4 sm:$0xff]  }
 0x268   : > { %3165 = vmatpush2.bf16.msra.mxu1 %v12236_v12  ;;  %3123 = vmatprep.subr.bf16.mxu0 %v12241_v15  ;;  %v12322_v12 = vld [vmem:[#allocation7 + $0x38c] ss:$16 sps:$4 sm:$0xff]   ;;  %v12317_v15 = vld [vmem:[#allocation7 + $0x188] ss:$16 sps:$4 sm:$0xff]  }
 0x269   : > { %3166 = vmatprep.subr.bf16.mxu1 %v12244_v16  ;;  %v12320_v16 = vld [vmem:[#allocation7 + $0x388] ss:$16 sps:$4 sm:$0xff]  }
 0x26b   : > { %3124 = vmatpush2.bf16.msra.mxu0 %v12239_v17  ;;  %v12325_v17 = vld [vmem:[#allocation7 + $0x16c] ss:$16 sps:$4 sm:$0xff]  }
 0x26c   : > { %3167 = vmatpush2.bf16.msra.mxu1 %v12242_v18  ;;  %3125 = vmatprep.subr.bf16.mxu0 %v12247_v19  ;;  %v12328_v18 = vld [vmem:[#allocation7 + $0x36c] ss:$16 sps:$4 sm:$0xff]   ;;  %v12323_v19 = vld [vmem:[#allocation7 + $0x168] ss:$16 sps:$4 sm:$0xff]  }
 0x26d   : > { %3168 = vmatprep.subr.bf16.mxu1 %v12250_v20  ;;  %v12326_v20 = vld [vmem:[#allocation7 + $0x368] ss:$16 sps:$4 sm:$0xff]  }
 0x26f   : > { %3126 = vmatpush2.bf16.msra.mxu0 %v12245_v21  ;;  %v12331_v21 = vld [vmem:[#allocation7 + $0x14c] ss:$16 sps:$4 sm:$0xff]  }
 0x270   : > { %3169 = vmatpush2.bf16.msra.mxu1 %v12248_v22  ;;  %3181 = vmatprep.subr.bf16.mxu0 %v12253_v27  ;;  %v12334_v22 = vld [vmem:[#allocation7 + $0x34c] ss:$16 sps:$4 sm:$0xff]   ;;  %v12335_v27 = vld [vmem:[#allocation7 + $0x128] ss:$16 sps:$4 sm:$0xff]  }
 0x271   : > { %3224 = vmatprep.subr.bf16.mxu1 %v12256_v28  ;;  %v12338_v28 = vld [vmem:[#allocation7 + $0x328] ss:$16 sps:$4 sm:$0xff]  }
 0x272   : > { %3128 = vmatmul.mubr.bf16.vlgmr.msra.gmra.mxu0 %v14539_v29 }
 0x273   : > { %3171 = vmatmul.mubr.bf16.vlgmr.msra.gmra.mxu1 %v14541_v30  ;;  %3182 = vmatpush1.bf16.msra.mxu0 %v12251_v31  ;;  %v12343_v31 = vld [vmem:[#allocation7 + $0x10c] ss:$16 sps:$4 sm:$0xff]  }
 0x274   : > { %3225 = vmatpush1.bf16.msra.mxu1 %v12254_v32  ;;  %3183 = vmatprep.subr.bf16.mxu0 %v12259_v33  ;;  %v12346_v32 = vld [vmem:[#allocation7 + $0x30c] ss:$16 sps:$4 sm:$0xff]   ;;  %v12341_v33 = vld [vmem:[#allocation7 + $0x108] ss:$16 sps:$4 sm:$0xff]  }
 0x275   : > { %3226 = vmatprep.subr.bf16.mxu1 %v12262_v34  ;;  %3213 = vmatprep.mubr.bf16.mxu0 %v14521_v54  ;;  %v12278_v54 = vld [vmem:[#allocation7 + $0x268] ss:$16 sps:$4 sm:$0xff]  }
 0x276   : > { %3256 = vmatprep.mubr.bf16.mxu1 %v14523_v55  ;;  %v12283_v55 = vld [vmem:[#allocation7 + $0x4c] ss:$16 sps:$4 sm:$0xff]   ;;  %v12344_v34 = vld [vmem:[#allocation7 + $0x308] ss:$16 sps:$4 sm:$0xff]  }
 0x277   : > { %3184 = vmatpush1.bf16.msra.mxu0 %v12257_v35  ;;  %v12349_v35 = vld [vmem:[#allocation7 + $0x4ec] ss:$16 sps:$4 sm:$0xff]  }
 0x278   : > { %3227 = vmatpush1.bf16.msra.mxu1 %v12260_v36  ;;  %3185 = vmatprep.subr.bf16.mxu0 %v12265_v37  ;;  %v12352_v36 = vld [vmem:[#allocation7 + $0x6ec] ss:$16 sps:$4 sm:$0xff]   ;;  %v12347_v37 = vld [vmem:[#allocation7 + $0x4e8] ss:$16 sps:$4 sm:$0xff]  }
 0x279   : > { %3228 = vmatprep.subr.bf16.mxu1 %v12268_v38  ;;  %v12350_v38 = vld [vmem:[#allocation7 + $0x6e8] ss:$16 sps:$4 sm:$0xff]  }
 0x27b   : > { %3186 = vmatpush1.bf16.msra.mxu0 %v12263_v39  ;;  %v12355_v39 = vld [vmem:[#allocation7 + $0x4cc] ss:$16 sps:$4 sm:$0xff]  }
 0x27c   : > { %3229 = vmatpush1.bf16.msra.mxu1 %v12266_v40  ;;  %3187 = vmatprep.subr.bf16.mxu0 %v12271_v41  ;;  %v12358_v40 = vld [vmem:[#allocation7 + $0x6cc] ss:$16 sps:$4 sm:$0xff]   ;;  %v12353_v41 = vld [vmem:[#allocation7 + $0x4c8] ss:$16 sps:$4 sm:$0xff]  }
 0x27d   : > { %3230 = vmatprep.subr.bf16.mxu1 %v12274_v42  ;;  %v12356_v42 = vld [vmem:[#allocation7 + $0x6c8] ss:$16 sps:$4 sm:$0xff]  }
 0x27f   : > { %3188 = vmatpush1.bf16.msra.mxu0 %v12269_v43  ;;  %v12361_v43 = vld [vmem:[#allocation7 + $0x4ac] ss:$16 sps:$4 sm:$0xff]  }
 0x280   : > { %3231 = vmatpush1.bf16.msra.mxu1 %v12272_v44  ;;  %3189 = vmatprep.subr.bf16.mxu0 %v12277_v45  ;;  %v12364_v44 = vld [vmem:[#allocation7 + $0x6ac] ss:$16 sps:$4 sm:$0xff]   ;;  %v12359_v45 = vld [vmem:[#allocation7 + $0x4a8] ss:$16 sps:$4 sm:$0xff]  }
 0x281   : > { %3232 = vmatprep.subr.bf16.mxu1 %v12280_v47  ;;  %v12362_v47 = vld [vmem:[#allocation7 + $0x6a8] ss:$16 sps:$4 sm:$0xff]  }
 0x283   : > { %3190 = vmatpush1.bf16.msra.mxu0 %v12275_v49  ;;  %v12367_v49 = vld [vmem:[#allocation7 + $0x48c] ss:$16 sps:$4 sm:$0xff]  }
 0x284   : > { %3233 = vmatpush1.bf16.msra.mxu1 %v12278_v54  ;;  %3191 = vmatprep.subr.bf16.mxu0 %v12283_v55  ;;  %v12370_v54 = vld [vmem:[#allocation7 + $0x68c] ss:$16 sps:$4 sm:$0xff]  }
 0x285   : > { %3234 = vmatprep.subr.bf16.mxu1 %v12286_v50  ;;  %v12373_v55 = vld [vmem:[#allocation7 + $0x46c] ss:$16 sps:$4 sm:$0xff]  }
 0x286   : > { %v12376_v50 = vld [vmem:[#allocation7 + $0x66c] ss:$16 sps:$4 sm:$0xff]  }
 0x287   : > { %3192 = vmatpush1.bf16.msra.mxu0 %v12281_v51  ;;  %v12371_v51 = vld [vmem:[#allocation7 + $0x468] ss:$16 sps:$4 sm:$0xff]  }
 0x288   : > { %3235 = vmatpush1.bf16.msra.mxu1 %v12284_v52  ;;  %3193 = vmatprep.subr.bf16.mxu0 %v12289_v53  ;;  %v12382_v52 = vld [vmem:[#allocation7 + $0x64c] ss:$16 sps:$4 sm:$0xff]   ;;  %v12377_v53 = vld [vmem:[#allocation7 + $0x448] ss:$16 sps:$4 sm:$0xff]  }
 0x289   : > { %3236 = vmatprep.subr.bf16.mxu1 %v12292_v56  ;;  %v12380_v56 = vld [vmem:[#allocation7 + $0x648] ss:$16 sps:$4 sm:$0xff]  }
 0x28b   : > { %3194 = vmatpush1.bf16.msra.mxu0 %v12287_v57  ;;  %v12385_v57 = vld [vmem:[#allocation7 + $0x42c] ss:$16 sps:$4 sm:$0xff]  }
 0x28c   : > { %3237 = vmatpush1.bf16.msra.mxu1 %v12290_v58  ;;  %3195 = vmatprep.subr.bf16.mxu0 %v12295_v59  ;;  %v12388_v58 = vld [vmem:[#allocation7 + $0x62c] ss:$16 sps:$4 sm:$0xff]   ;;  %v12383_v59 = vld [vmem:[#allocation7 + $0x428] ss:$16 sps:$4 sm:$0xff]  }
 0x28d   : > { %3238 = vmatprep.subr.bf16.mxu1 %v12298_v60  ;;  %v12386_v60 = vld [vmem:[#allocation7 + $0x628] ss:$16 sps:$4 sm:$0xff]  }
 0x28f   : > { %3196 = vmatpush1.bf16.msra.mxu0 %v12293_v61  ;;  %v12391_v61 = vld [vmem:[#allocation7 + $0x40c] ss:$16 sps:$4 sm:$0xff]  }
 0x290   : > { %3239 = vmatpush1.bf16.msra.mxu1 %v12296_v62  ;;  %3197 = vmatprep.subr.bf16.mxu0 %v12301_v63  ;;  %v12394_v62 = vld [vmem:[#allocation7 + $0x60c] ss:$16 sps:$4 sm:$0xff]   ;;  %v12389_v63 = vld [vmem:[#allocation7 + $0x408] ss:$16 sps:$4 sm:$0xff]  }
 0x291   : > { %3240 = vmatprep.subr.bf16.mxu1 %v12304_v0  ;;  %v12392_v0 = vld [vmem:[#allocation7 + $0x608] ss:$16 sps:$4 sm:$0xff]  }
 0x293   : > { %3198 = vmatpush2.bf16.msra.mxu0 %v12299_v1  ;;  %v12397_v1 = vld [vmem:[#allocation7 + $0x5ec] ss:$16 sps:$4 sm:$0xff]  }
 0x294   : > { %3241 = vmatpush2.bf16.msra.mxu1 %v12302_v2  ;;  %3199 = vmatprep.subr.bf16.mxu0 %v12307_v3  ;;  %v12400_v2 = vld [vmem:[#allocation7 + $0x7ec] ss:$16 sps:$4 sm:$0xff]   ;;  %v12395_v3 = vld [vmem:[#allocation7 + $0x5e8] ss:$16 sps:$4 sm:$0xff]  }
 0x295   : > { %3242 = vmatprep.subr.bf16.mxu1 %v12310_v4  ;;  %v12398_v4 = vld [vmem:[#allocation7 + $0x7e8] ss:$16 sps:$4 sm:$0xff]  }
 0x297   : > { %3200 = vmatpush2.bf16.msra.mxu0 %v12305_v5  ;;  %v12403_v5 = vld [vmem:[#allocation7 + $0x5cc] ss:$16 sps:$4 sm:$0xff]  }
 0x298   : > { %3243 = vmatpush2.bf16.msra.mxu1 %v12308_v6  ;;  %3201 = vmatprep.subr.bf16.mxu0 %v12313_v7  ;;  %v12406_v6 = vld [vmem:[#allocation7 + $0x7cc] ss:$16 sps:$4 sm:$0xff]   ;;  %v12401_v7 = vld [vmem:[#allocation7 + $0x5c8] ss:$16 sps:$4 sm:$0xff]  }
 0x299   : > { %3244 = vmatprep.subr.bf16.mxu1 %v12316_v8  ;;  %v12404_v8 = vld [vmem:[#allocation7 + $0x7c8] ss:$16 sps:$4 sm:$0xff]  }
 0x29b   : > { %3202 = vmatpush2.bf16.msra.mxu0 %v12311_v9  ;;  %v12409_v9 = vld [vmem:[#allocation7 + $0x5ac] ss:$16 sps:$4 sm:$0xff]  }
 0x29c   : > { %3245 = vmatpush2.bf16.msra.mxu1 %v12314_v10  ;;  %3203 = vmatprep.subr.bf16.mxu0 %v12319_v11  ;;  %v12412_v10 = vld [vmem:[#allocation7 + $0x7ac] ss:$16 sps:$4 sm:$0xff]   ;;  %v12407_v11 = vld [vmem:[#allocation7 + $0x5a8] ss:$16 sps:$4 sm:$0xff]  }
 0x29d   : > { %3246 = vmatprep.subr.bf16.mxu1 %v12322_v12  ;;  %v12410_v12 = vld [vmem:[#allocation7 + $0x7a8] ss:$16 sps:$4 sm:$0xff]  }
 0x29f   : > { %3204 = vmatpush2.bf16.msra.mxu0 %v12317_v15  ;;  %v12415_v15 = vld [vmem:[#allocation7 + $0x58c] ss:$16 sps:$4 sm:$0xff]  }
 0x2a0   : > { %3247 = vmatpush2.bf16.msra.mxu1 %v12320_v16  ;;  %3205 = vmatprep.subr.bf16.mxu0 %v12325_v17  ;;  %v12418_v16 = vld [vmem:[#allocation7 + $0x78c] ss:$16 sps:$4 sm:$0xff]   ;;  %v12413_v17 = vld [vmem:[#allocation7 + $0x588] ss:$16 sps:$4 sm:$0xff]  }
 0x2a1   : > { %3248 = vmatprep.subr.bf16.mxu1 %v12328_v18  ;;  %v12416_v18 = vld [vmem:[#allocation7 + $0x788] ss:$16 sps:$4 sm:$0xff]  }
 0x2a3   : > { %3206 = vmatpush2.bf16.msra.mxu0 %v12323_v19  ;;  %v12421_v19 = vld [vmem:[#allocation7 + $0x56c] ss:$16 sps:$4 sm:$0xff]  }
 0x2a4   : > { %3249 = vmatpush2.bf16.msra.mxu1 %v12326_v20  ;;  %3207 = vmatprep.subr.bf16.mxu0 %v12331_v21  ;;  %v12424_v20 = vld [vmem:[#allocation7 + $0x76c] ss:$16 sps:$4 sm:$0xff]   ;;  %v12419_v21 = vld [vmem:[#allocation7 + $0x568] ss:$16 sps:$4 sm:$0xff]  }
 0x2a5   : > { %3250 = vmatprep.subr.bf16.mxu1 %v12334_v22  ;;  %v12422_v22 = vld [vmem:[#allocation7 + $0x768] ss:$16 sps:$4 sm:$0xff]  }
 0x2a7   : > { %3208 = vmatpush2.bf16.msra.mxu0 %v12329_v23  ;;  %v12427_v23 = vld [vmem:[#allocation7 + $0x54c] ss:$16 sps:$4 sm:$0xff]  }
 0x2a8   : > { %3251 = vmatpush2.bf16.msra.mxu1 %v12332_v24  ;;  %3209 = vmatprep.subr.bf16.mxu0 %v12337_v25  ;;  %v12430_v24 = vld [vmem:[#allocation7 + $0x74c] ss:$16 sps:$4 sm:$0xff]   ;;  %v12425_v25 = vld [vmem:[#allocation7 + $0x548] ss:$16 sps:$4 sm:$0xff]  }
 0x2a9   : > { %3252 = vmatprep.subr.bf16.mxu1 %v12340_v26  ;;  %v12428_v26 = vld [vmem:[#allocation7 + $0x748] ss:$16 sps:$4 sm:$0xff]  }
 0x2ab   : > { %3210 = vmatpush2.bf16.msra.mxu0 %v12335_v27  ;;  %v12433_v27 = vld [vmem:[#allocation7 + $0x52c] ss:$16 sps:$4 sm:$0xff]  }
 0x2ac   : > { %3253 = vmatpush2.bf16.msra.mxu1 %v12338_v28  ;;  %3211 = vmatprep.subr.bf16.mxu0 %v12343_v31  ;;  %v12436_v28 = vld [vmem:[#allocation7 + $0x72c] ss:$16 sps:$4 sm:$0xff]   ;;  %v12431_v31 = vld [vmem:[#allocation7 + $0x528] ss:$16 sps:$4 sm:$0xff]  }
 0x2ad   : > { %3254 = vmatprep.subr.bf16.mxu1 %v12346_v32  ;;  %v12434_v32 = vld [vmem:[#allocation7 + $0x728] ss:$16 sps:$4 sm:$0xff]  }
 0x2af   : > { %3212 = vmatpush2.bf16.msra.mxu0 %v12341_v33  ;;  %v12439_v33 = vld [vmem:[#allocation7 + $0x50c] ss:$16 sps:$4 sm:$0xff]  }
 0x2b0   : > { %3255 = vmatpush2.bf16.msra.mxu1 %v12344_v34  ;;  %3267 = vmatprep.subr.bf16.mxu0 %v12349_v35  ;;  %v12442_v34 = vld [vmem:[#allocation7 + $0x70c] ss:$16 sps:$4 sm:$0xff]   ;;  %v12437_v35 = vld [vmem:[#allocation7 + $0x508] ss:$16 sps:$4 sm:$0xff]  }
 0x2b1   : > { %3310 = vmatprep.subr.bf16.mxu1 %v12352_v36  ;;  %v12440_v36 = vld [vmem:[#allocation7 + $0x708] ss:$16 sps:$4 sm:$0xff]  }
 0x2b2   : > { %3214 = vmatmul.mubr.bf16.vlgmr.msra.gmra.mxu0 %v14527_v13  ;;  %v12365_v13 = vld [vmem:[#allocation7 + $0x488] ss:$16 sps:$4 sm:$0xff]  }
 0x2b3   : > { %3257 = vmatmul.mubr.bf16.vlgmr.msra.gmra.mxu1 %v14529_v14  ;;  %3268 = vmatpush1.bf16.msra.mxu0 %v12347_v37  ;;  %v12368_v14 = vld [vmem:[#allocation7 + $0x688] ss:$16 sps:$4 sm:$0xff]  }
 0x2b4   : > { %3311 = vmatpush1.bf16.msra.mxu1 %v12350_v38  ;;  %3269 = vmatprep.subr.bf16.mxu0 %v12355_v39  ;;  %v12445_v37 = vld [vmem:[%s18485_s27 + $0x74] ss:$8 sps:$4 sm:$0xff]   ;;  %v12443_v38 = vld [vmem:[%s18485_s27 + $0x70] ss:$8 sps:$4 sm:$0xff]   ;;  %v12448_v39 = vld [vmem:[%s18485_s27 + $0x64] ss:$8 sps:$4 sm:$0xff]  }
 0x2b5   : > { %3312 = vmatprep.subr.bf16.mxu1 %v12358_v40  ;;  %3299 = vmatprep.mubr.bf16.mxu0 %v14533_v46  ;;  %v12374_v46 = vld [vmem:[#allocation7 + $0x668] ss:$16 sps:$4 sm:$0xff]  }
 0x2b6   : > { %3342 = vmatprep.mubr.bf16.mxu1 %v14535_v48  ;;  %v12379_v48 = vld [vmem:[#allocation7 + $0x44c] ss:$16 sps:$4 sm:$0xff]  }
 0x2b7   : > { %3270 = vmatpush1.bf16.msra.mxu0 %v12353_v41  ;;  %v12446_v40 = vld [vmem:[%s18485_s27 + $0x60] ss:$8 sps:$4 sm:$0xff]   ;;  %v12451_v41 = vld [vmem:[%s18485_s27 + $0x54] ss:$8 sps:$4 sm:$0xff]  }
 0x2b8   : > { %3313 = vmatpush1.bf16.msra.mxu1 %v12356_v42  ;;  %3271 = vmatprep.subr.bf16.mxu0 %v12361_v43  ;;  %v12449_v42 = vld [vmem:[%s18485_s27 + $0x50] ss:$8 sps:$4 sm:$0xff]   ;;  %v12454_v43 = vld [vmem:[%s18485_s27 + $0x44] ss:$8 sps:$4 sm:$0xff]  }
 0x2b9   : > { %3314 = vmatprep.subr.bf16.mxu1 %v12364_v44  ;;  %v12452_v44 = vld [vmem:[%s18485_s27 + $0x40] ss:$8 sps:$4 sm:$0xff]  }
 0x2bb   : > { %3272 = vmatpush1.bf16.msra.mxu0 %v12359_v45  ;;  %v12491_v45 = vld [vmem:[%s18485_s27 + $0x170] ss:$8 sps:$4 sm:$0xff]  }
 0x2bc   : > { %3315 = vmatpush1.bf16.msra.mxu1 %v12362_v47  ;;  %3273 = vmatprep.subr.bf16.mxu0 %v12367_v49  ;;  %v12496_v47 = vld [vmem:[%s18485_s27 + $0x164] ss:$8 sps:$4 sm:$0xff]   ;;  %v12494_v49 = vld [vmem:[%s18485_s27 + $0x160] ss:$8 sps:$4 sm:$0xff]  }
 0x2bd   : > { %3316 = vmatprep.subr.bf16.mxu1 %v12370_v54  ;;  %v12455_v54 = vld [vmem:[%s18485_s27 + $0x30] ss:$8 sps:$4 sm:$0xff]  }
 0x2bf   : > { %3274 = vmatpush1.bf16.msra.mxu0 %v12365_v13  ;;  %v12499_v13 = vld [vmem:[%s18485_s27 + $0x154] ss:$8 sps:$4 sm:$0xff]  }
 0x2c0   : > { %3317 = vmatpush1.bf16.msra.mxu1 %v12368_v14  ;;  %3275 = vmatprep.subr.bf16.mxu0 %v12373_v55  ;;  %v12460_v14 = vld [vmem:[%s18485_s27 + $0x24] ss:$8 sps:$4 sm:$0xff]   ;;  %v12497_v55 = vld [vmem:[%s18485_s27 + $0x150] ss:$8 sps:$4 sm:$0xff]  }
 0x2c1   : > { %3318 = vmatprep.subr.bf16.mxu1 %v12376_v50  ;;  %v12458_v50 = vld [vmem:[%s18485_s27 + $0x20] ss:$8 sps:$4 sm:$0xff]  }
 0x2c3   : > { %3276 = vmatpush1.bf16.msra.mxu0 %v12371_v51  ;;  %v12502_v51 = vld [vmem:[%s18485_s27 + $0x144] ss:$8 sps:$4 sm:$0xff]  }
 0x2c4   : > { %3319 = vmatpush1.bf16.msra.mxu1 %v12374_v46  ;;  %3277 = vmatprep.subr.bf16.mxu0 %v12379_v48  ;;  %v12463_v46 = vld [vmem:[%s18485_s27 + $0x14] ss:$8 sps:$4 sm:$0xff]   ;;  %v12500_v48 = vld [vmem:[%s18485_s27 + $0x140] ss:$8 sps:$4 sm:$0xff]  }
 0x2c5   : > { %3320 = vmatprep.subr.bf16.mxu1 %v12382_v52  ;;  %v12461_v52 = vld [vmem:[%s18485_s27 + $0x10] ss:$8 sps:$4 sm:$0xff]  }
 0x2c7   : > { %3278 = vmatpush1.bf16.msra.mxu0 %v12377_v53  ;;  %v12505_v53 = vld [vmem:[%s18485_s27 + $0x134] ss:$8 sps:$4 sm:$0xff]  }
 0x2c8   : > { %3321 = vmatpush1.bf16.msra.mxu1 %v12380_v56  ;;  %3279 = vmatprep.subr.bf16.mxu0 %v12385_v57  ;;  %v12466_v56 = vld [vmem:[%s18485_s27 + $0x4] ss:$8 sps:$4 sm:$0xff]   ;;  %v12503_v57 = vld [vmem:[%s18485_s27 + $0x130] ss:$8 sps:$4 sm:$0xff]  }
 0x2c9   : > { %3322 = vmatprep.subr.bf16.mxu1 %v12388_v58  ;;  %v12464_v58 = vld [vmem:[%s18485_s27] ss:$8 sps:$4 sm:$0xff]  }
 0x2cb   : > { %3280 = vmatpush1.bf16.msra.mxu0 %v12383_v59  ;;  %v12508_v59 = vld [vmem:[%s18485_s27 + $0x124] ss:$8 sps:$4 sm:$0xff]  }
 0x2cc   : > { %3323 = vmatpush1.bf16.msra.mxu1 %v12386_v60  ;;  %3281 = vmatprep.subr.bf16.mxu0 %v12391_v61  ;;  %v12469_v60 = vld [vmem:[%s18485_s27 + $0xf4] ss:$8 sps:$4 sm:$0xff]   ;;  %v12506_v61 = vld [vmem:[%s18485_s27 + $0x120] ss:$8 sps:$4 sm:$0xff]  }
 0x2cd   : > { %3324 = vmatprep.subr.bf16.mxu1 %v12394_v62  ;;  %v12467_v62 = vld [vmem:[%s18485_s27 + $0xf0] ss:$8 sps:$4 sm:$0xff]  }
 0x2cf   : > { %3282 = vmatpush1.bf16.msra.mxu0 %v12389_v63  ;;  %v12511_v63 = vld [vmem:[%s18485_s27 + $0x114] ss:$8 sps:$4 sm:$0xff]  }
 0x2d0   : > { %3325 = vmatpush1.bf16.msra.mxu1 %v12392_v0  ;;  %3283 = vmatprep.subr.bf16.mxu0 %v12397_v1  ;;  %v12472_v0 = vld [vmem:[%s18485_s27 + $0xe4] ss:$8 sps:$4 sm:$0xff]   ;;  %v12509_v1 = vld [vmem:[%s18485_s27 + $0x110] ss:$8 sps:$4 sm:$0xff]  }
 0x2d1   : > { %3326 = vmatprep.subr.bf16.mxu1 %v12400_v2  ;;  %v12470_v2 = vld [vmem:[%s18485_s27 + $0xe0] ss:$8 sps:$4 sm:$0xff]  }
 0x2d3   : > { %3284 = vmatpush2.bf16.msra.mxu0 %v12395_v3  ;;  %v12514_v3 = vld [vmem:[%s18485_s27 + $0x104] ss:$8 sps:$4 sm:$0xff]  }
 0x2d4   : > { %3327 = vmatpush2.bf16.msra.mxu1 %v12398_v4  ;;  %3285 = vmatprep.subr.bf16.mxu0 %v12403_v5  ;;  %v12475_v4 = vld [vmem:[%s18485_s27 + $0xd4] ss:$8 sps:$4 sm:$0xff]   ;;  %v12512_v5 = vld [vmem:[%s18485_s27 + $0x100] ss:$8 sps:$4 sm:$0xff]  }
 0x2d5   : > { %3328 = vmatprep.subr.bf16.mxu1 %v12406_v6  ;;  %v12473_v6 = vld [vmem:[%s18485_s27 + $0xd0] ss:$8 sps:$4 sm:$0xff]  }
 0x2d7   : > { %3286 = vmatpush2.bf16.msra.mxu0 %v12401_v7  ;;  %v12517_v7 = vld [vmem:[%s18485_s27 + $0x1f4] ss:$8 sps:$4 sm:$0xff]  }
 0x2d8   : > { %3329 = vmatpush2.bf16.msra.mxu1 %v12404_v8  ;;  %3287 = vmatprep.subr.bf16.mxu0 %v12409_v9  ;;  %v12478_v8 = vld [vmem:[%s18485_s27 + $0xc4] ss:$8 sps:$4 sm:$0xff]   ;;  %v12515_v9 = vld [vmem:[%s18485_s27 + $0x1f0] ss:$8 sps:$4 sm:$0xff]  }
 0x2d9   : > { %3330 = vmatprep.subr.bf16.mxu1 %v12412_v10  ;;  %v12476_v10 = vld [vmem:[%s18485_s27 + $0xc0] ss:$8 sps:$4 sm:$0xff]  }
 0x2db   : > { %3288 = vmatpush2.bf16.msra.mxu0 %v12407_v11  ;;  %v12520_v11 = vld [vmem:[%s18485_s27 + $0x1e4] ss:$8 sps:$4 sm:$0xff]  }
 0x2dc   : > { %3331 = vmatpush2.bf16.msra.mxu1 %v12410_v12  ;;  %3289 = vmatprep.subr.bf16.mxu0 %v12415_v15  ;;  %v12481_v12 = vld [vmem:[%s18485_s27 + $0xb4] ss:$8 sps:$4 sm:$0xff]   ;;  %v12518_v15 = vld [vmem:[%s18485_s27 + $0x1e0] ss:$8 sps:$4 sm:$0xff]  }
 0x2dd   : > { %3332 = vmatprep.subr.bf16.mxu1 %v12418_v16  ;;  %v12479_v16 = vld [vmem:[%s18485_s27 + $0xb0] ss:$8 sps:$4 sm:$0xff]  }
 0x2df   : > { %3290 = vmatpush2.bf16.msra.mxu0 %v12413_v17  ;;  %v12523_v17 = vld [vmem:[%s18485_s27 + $0x1d4] ss:$8 sps:$4 sm:$0xff]  }
 0x2e0   : > { %3333 = vmatpush2.bf16.msra.mxu1 %v12416_v18  ;;  %3291 = vmatprep.subr.bf16.mxu0 %v12421_v19  ;;  %v12484_v18 = vld [vmem:[%s18485_s27 + $0xa4] ss:$8 sps:$4 sm:$0xff]   ;;  %v1709_v19 = vlaneseq }
 0x2e1   : > { %3334 = vmatprep.subr.bf16.mxu1 %v12424_v20  ;;  %v12521_v20 = vld [vmem:[%s18485_s27 + $0x1d0] ss:$8 sps:$4 sm:$0xff]  }
 0x2e3   : > { %3292 = vmatpush2.bf16.msra.mxu0 %v12419_v21  ;;  %v12482_v21 = vld [vmem:[%s18485_s27 + $0xa0] ss:$8 sps:$4 sm:$0xff]  }
 0x2e4   : > { %3335 = vmatpush2.bf16.msra.mxu1 %v12422_v22  ;;  %3293 = vmatprep.subr.bf16.mxu0 %v12427_v23  ;;  %v12526_v22 = vld [vmem:[%s18485_s27 + $0x1c4] ss:$8 sps:$4 sm:$0xff]  }
 0x2e5   : > { %3336 = vmatprep.subr.bf16.mxu1 %v12430_v24 }
 0x2e7   : > { %3294 = vmatpush2.bf16.msra.mxu0 %v12425_v25  ;;  %v12487_v25 = vld [vmem:[%s18485_s27 + $0x94] ss:$8 sps:$4 sm:$0xff]  }
 0x2e8   : > { %3337 = vmatpush2.bf16.msra.mxu1 %v12428_v26  ;;  %3295 = vmatprep.subr.bf16.mxu0 %v12433_v27  ;;  %v14605_v26 = vshrl.u32 %v1709_v19, 7  ;;  %v12524_v27 = vld [vmem:[%s18485_s27 + $0x1c0] ss:$8 sps:$4 sm:$0xff]  }
 0x2e9   : > { %3338 = vmatprep.subr.bf16.mxu1 %v12436_v28  ;;  %v12485_v28 = vld [vmem:[%s18485_s27 + $0x90] ss:$8 sps:$4 sm:$0xff]  }
 0x2eb   : > { %3296 = vmatpush2.bf16.msra.mxu0 %v12431_v31  ;;  %v12529_v31 = vld [vmem:[%s18485_s27 + $0x1b4] ss:$8 sps:$4 sm:$0xff]  }
 0x2ec   : > { %3339 = vmatpush2.bf16.msra.mxu1 %v12434_v32  ;;  %3297 = vmatprep.subr.bf16.mxu0 %v12439_v33 }
 0x2ed   : > { %3340 = vmatprep.subr.bf16.mxu1 %v12442_v34  ;;  %v12490_v34 = vld [vmem:[%s18485_s27 + $0x84] ss:$8 sps:$4 sm:$0xff]  }
 0x2ef   : > { %3298 = vmatpush2.bf16.msra.mxu0 %v12437_v35  ;;  %v1715_v35 = vsub.s32 1, %v14605_v26 }
 0x2f0   : > { %3341 = vmatpush2.bf16.msra.mxu1 %v12440_v36  ;;  %3753 = vmatprep.subr.bf16.mxu0 %v12445_v37  ;;  %v14612_v36 = vld [vmem:[#allocation9] sm:$0xf]  ;;  %v1711_v37 = vsub.s32 0, %v14605_v26 }
 0x2f2   : > { %3300 = vmatmul.mubr.bf16.vlgmr.msra.gmra.mxu0 %v14539_v29  ;;  %v12493_v29 = vld [vmem:[%s18485_s27 + $0x174] ss:$8 sps:$4 sm:$0xff]   ;;  %v3043_v23 = vpop.f32.mrf.mxu0 }
 0x2f3   : > { %3343 = vmatmul.mubr.bf16.vlgmr.msra.gmra.mxu1 %v14541_v30  ;;  %3754 = vmatpush1.bf16.msra.mxu0 %v12443_v38  ;;  %v12457_v30 = vld [vmem:[%s18485_s27 + $0x34] ss:$8 sps:$4 sm:$0xff]   ;;  %v3086_v24 = vpop.f32.mrf.mxu1  ;;  %v12527_v38 = vld [vmem:[%s18485_s27 + $0x1b0] ss:$8 sps:$4 sm:$0xff]  }
 0x2f4   : > { %3755 = vmatprep.subr.bf16.mxu0 %v12448_v39  ;;  %3796 = vmatprep.subr.bf16.mxu1 %v12493_v29  ;;  %v3045_v32 = vpop.f32.mrf.mxu0  ;;  %v12488_v39 = vld [vmem:[%s18485_s27 + $0x80] ss:$8 sps:$4 sm:$0xff]  }
 0x2f5   : > { %3797 = vmatpush1.bf16.msra.mxu1 %v12491_v45  ;;  %v3088_v33 = vpop.f32.mrf.mxu1 }
 0x2f6   : > { %3798 = vmatprep.subr.bf16.mxu1 %v12496_v47 }
 0x2f7   : > { %3756 = vmatpush1.bf16.msra.mxu0 %v12446_v40  ;;  %v3047_v40 = vpop.f32.mrf.mxu0 }
 0x2f8   : > { %3757 = vmatprep.subr.bf16.mxu0 %v12451_v41  ;;  %v3090_v41 = vpop.f32.mrf.mxu1 }
 0x2f9   : > { %3799 = vmatpush1.bf16.msra.mxu1 %v12494_v49 }
 0x2fa   : > { %3800 = vmatprep.subr.bf16.mxu1 %v12499_v13  ;;  %v3092_v45 = vpop.f32.mrf.mxu1  ;;  %v12532_v13 = vld [vmem:[%s18485_s27 + $0x1a4] ss:$8 sps:$4 sm:$0xff]  }
 0x2fb   : > { %3758 = vmatpush1.bf16.msra.mxu0 %v12449_v42  ;;  %v1716_v42 = vrot.slane %v14612_v36, %v1715_v35 }
 0x2fc   : > { %3759 = vmatprep.subr.bf16.mxu0 %v12454_v43  ;;  %v1712_v43 = vrot.slane %v14612_v36, %v1711_v37 }
 0x2fd   : > { %3801 = vmatpush1.bf16.msra.mxu1 %v12497_v55  ;;  %v3046_v29 = vadd.f32 %v3045_v32, %v1716_v42  ;;  %v12530_v55 = vld [vmem:[%s18485_s27 + $0x1a0] ss:$8 sps:$4 sm:$0xff]  }
 0x2fe   : > { %3802 = vmatprep.subr.bf16.mxu1 %v12502_v51  ;;  %v3044_v47 = vadd.f32 %v3043_v23, %v1712_v43 }
 0x2ff   : > { %3760 = vmatpush1.bf16.msra.mxu0 %v12452_v44  ;;  %v3049_v44 = vpop.f32.mrf.mxu0 }
 0x300   : > { %3761 = vmatprep.subr.bf16.mxu0 %v12457_v30  ;;  %v3048_v30 = vadd.f32 %v3047_v40, %v1712_v43 }
 0x301   : > { %3803 = vmatpush1.bf16.msra.mxu1 %v12500_v48 }
 0x302   : > { %3804 = vmatprep.subr.bf16.mxu1 %v12505_v53  ;;  %v3091_v48 = vadd.f32 %v3090_v41, %v3048_v30 }
 0x303   : > { %3762 = vmatpush1.bf16.msra.mxu0 %v12455_v54 }
 0x304   : > { %3763 = vmatprep.subr.bf16.mxu0 %v12460_v14  ;;  %v3050_v14 = vadd.f32 %v3049_v44, %v1716_v42 }
 0x305   : > { %3805 = vmatpush1.bf16.msra.mxu1 %v12503_v57  ;;  %v12535_v57 = vld [vmem:[%s18485_s27 + $0x194] ss:$8 sps:$4 sm:$0xff]  }
 0x306   : > { %3806 = vmatprep.subr.bf16.mxu1 %v12508_v59 }
 0x307   : > { %3764 = vmatpush1.bf16.msra.mxu0 %v12458_v50 }
 0x308   : > { %3765 = vmatprep.subr.bf16.mxu0 %v12463_v46  ;;  %v3089_v46 = vadd.f32 %v3088_v33, %v3046_v29 }
 0x309   : > { %3807 = vmatpush1.bf16.msra.mxu1 %v12506_v61  ;;  %v12533_v61 = vld [vmem:[%s18485_s27 + $0x190] ss:$8 sps:$4 sm:$0xff]  }
 0x30a   : > { %3808 = vmatprep.subr.bf16.mxu1 %v12511_v63 }
 0x30b   : > { %3766 = vmatpush1.bf16.msra.mxu0 %v12461_v52  ;;  %v3087_v52 = vadd.f32 %v3086_v24, %v3044_v47 }
 0x30c   : > { %3767 = vmatprep.subr.bf16.mxu0 %v12466_v56 }
 0x30d   : > { %3809 = vmatpush1.bf16.msra.mxu1 %v12509_v1 }
 0x30e   : > { %3810 = vmatprep.subr.bf16.mxu1 %v12514_v3  ;;  %v12538_v3 = vld [vmem:[%s18485_s27 + $0x184] ss:$8 sps:$4 sm:$0xff]  }
 0x30f   : > { %3768 = vmatpush1.bf16.msra.mxu0 %v12464_v58  ;;  %v3093_v58 = vadd.f32 %v3092_v45, %v3050_v14 }
 0x310   : > { %3769 = vmatprep.subr.bf16.mxu0 %v12469_v60 }
 0x311   : > { %3811 = vmatpush1.bf16.msra.mxu1 %v12512_v5 }
 0x312   : > { %3812 = vmatprep.subr.bf16.mxu1 %v12517_v7 }
 0x313   : > { %3770 = vmatpush2.bf16.msra.mxu0 %v12467_v62 }
 0x314   : > { %3771 = vmatprep.subr.bf16.mxu0 %v12472_v0 }
 0x315   : > { %3813 = vmatpush2.bf16.msra.mxu1 %v12515_v9 }
 0x316   : > { %3814 = vmatprep.subr.bf16.mxu1 %v12520_v11 }
 0x317   : > { %3772 = vmatpush2.bf16.msra.mxu0 %v12470_v2 }
 0x318   : > { %3773 = vmatprep.subr.bf16.mxu0 %v12475_v4 }
 0x319   : > { %3815 = vmatpush2.bf16.msra.mxu1 %v12518_v15 }
 0x31a   : > { %3816 = vmatprep.subr.bf16.mxu1 %v12523_v17  ;;  %v1719_v17 = vsub.s32 2, %v14605_v26 }
 0x31b   : > { %3774 = vmatpush2.bf16.msra.mxu0 %v12473_v6  ;;  %v12536_v6 = vld [vmem:[%s18485_s27 + $0x180] ss:$8 sps:$4 sm:$0xff]  }
 0x31c   : > { %3775 = vmatprep.subr.bf16.mxu0 %v12478_v8 }
 0x31d   : > { %3817 = vmatpush2.bf16.msra.mxu1 %v12521_v20 }
 0x31e   : > { %3818 = vmatprep.subr.bf16.mxu1 %v12526_v22 }
 0x31f   : > { %3776 = vmatpush2.bf16.msra.mxu0 %v12476_v10 }
 0x320   : > { %3777 = vmatprep.subr.bf16.mxu0 %v12481_v12 }
 0x321   : > { %3819 = vmatpush2.bf16.msra.mxu1 %v12524_v27 }
 0x322   : > { %3820 = vmatprep.subr.bf16.mxu1 %v12529_v31 }
 0x323   : > { %3778 = vmatpush2.bf16.msra.mxu0 %v12479_v16  ;;  %v1723_v16 = vsub.s32 3, %v14605_v26 }
 0x324   : > { %3779 = vmatprep.subr.bf16.mxu0 %v12484_v18 }
 0x325   : > { %3821 = vmatpush2.bf16.msra.mxu1 %v12527_v38  ;;  %v1724_v20 = vrot.slane %v14612_v36, %v1723_v16 }
 0x326   : > { %3822 = vmatprep.subr.bf16.mxu1 %v12532_v13 }
 0x327   : > { %3780 = vmatpush2.bf16.msra.mxu0 %v12482_v21  ;;  %v1720_v21 = vrot.slane %v14612_v36, %v1719_v17 }
 0x328   : > { %3781 = vmatprep.subr.bf16.mxu0 %v12487_v25 }
 0x329   : > { %3823 = vmatpush2.bf16.msra.mxu1 %v12530_v55 }
 0x32a   : > { %3824 = vmatprep.subr.bf16.mxu1 %v12535_v57 }
 0x32b   : > { %3782 = vmatpush2.bf16.msra.mxu0 %v12485_v28 }
 0x32c   : > { %3783 = vmatprep.subr.bf16.mxu0 %v12490_v34 }
 0x32d   : > { %3825 = vmatpush2.bf16.msra.mxu1 %v12533_v61 }
 0x32e   : > { %3826 = vmatprep.subr.bf16.mxu1 %v12538_v3 }
 0x32f   : > { %3784 = vmatpush2.bf16.msra.mxu0 %v12488_v39 }
 0x331   : > { %3827 = vmatpush2.bf16.msra.mxu1 %v12536_v6 }
 0x332   : > { %v3129_v49 = vpop.f32.mrf.mxu0 }
 0x333   : > { %v3172_v54 = vpop.f32.mrf.mxu1  ;;  %v3130_v62 = vadd.f32 %v3129_v49, %v3087_v52 }
 0x334   : > { %v3131_v50 = vpop.f32.mrf.mxu0 }
 0x335   : > { %v3174_v51 = vpop.f32.mrf.mxu1  ;;  %v3132_v59 = vadd.f32 %v3131_v50, %v3089_v46  ;;  %v3173_v7 = vadd.f32 %v3172_v54, %v3130_v62  ;;  %v3421_v46 = vld [vmem:[%s18486_s14] sm:$0x3] }
 0x336   : > { %v3133_v53 = vpop.f32.mrf.mxu0  ;;  %v3426_v52 = vrot.slane %v3421_v46, %v1711_v37 }
 0x337   : > { %v3176_v56 = vpop.f32.mrf.mxu1  ;;  %v3134_v60 = vadd.f32 %v3133_v53, %v3091_v48  ;;  %v3175_v4 = vadd.f32 %v3174_v51, %v3132_v59  ;;  %v3430_v53 = vrot.slane %v3421_v46, %v1715_v35 }
 0x338   : > { %v3135_v63 = vpop.f32.mrf.mxu0 }
 0x339   : > { %v3136_v0 = vadd.f32 %v3135_v63, %v3093_v58  ;;  %v3177_v1 = vadd.f32 %v3176_v56, %v3134_v60  ;;  %v3178_v2 = vpop.f32.mrf.mxu1 }
 0x33b   : > { %v3179_v5 = vadd.f32 %v3178_v2, %v3136_v0  ;;  %v3353_v9 = vpack.c.bf16 %v3177_v1, %v3173_v7 }
 0x33d   : > { %v3354_v8 = vpack.c.bf16 %v3179_v5, %v3175_v4 }
 0x33f   : > { %3785 = vmatprep.mubr.bf16.mxu0 %v3354_v8 }
 0x340   : > { %3786 = vmatmul.mubr.bf16.vlgmr.msra.gmra.mxu0 %v3353_v9 }
 0x372   : > { %v3215_v10 = vpop.f32.mrf.mxu0 }
 0x373   : > { %v3258_v11 = vpop.f32.mrf.mxu1  ;;  %v3216_v27 = vadd.f32 %v3215_v10, %v1720_v21 }
 0x374   : > { %v3217_v12 = vpop.f32.mrf.mxu0 }
 0x375   : > { %v3260_v15 = vpop.f32.mrf.mxu1  ;;  %v3218_v24 = vadd.f32 %v3217_v12, %v1724_v20  ;;  %v3259_v40 = vadd.f32 %v3258_v11, %v3216_v27 }
 0x376   : > { %v3219_v18 = vpop.f32.mrf.mxu0 }
 0x377   : > { %v3262_v19 = vpop.f32.mrf.mxu1  ;;  %v3220_v25 = vadd.f32 %v3219_v18, %v1720_v21  ;;  %v3261_v38 = vadd.f32 %v3260_v15, %v3218_v24 }
 0x378   : > { %v3221_v22 = vpop.f32.mrf.mxu0 }
 0x379   : > { %v3264_v23 = vpop.f32.mrf.mxu1  ;;  %v3222_v32 = vadd.f32 %v3221_v22, %v1724_v20  ;;  %v3263_v39 = vadd.f32 %v3262_v19, %v3220_v25 }
 0x37b   : > { %v3265_v43 = vadd.f32 %v3264_v23, %v3222_v32 }
 0x3b2   : > { %v3301_v28 = vpop.f32.mrf.mxu0 }
 0x3b3   : > { %v3344_v31 = vpop.f32.mrf.mxu1  ;;  %v3302_v36 = vadd.f32 %v3301_v28, %v3259_v40 }
 0x3b4   : > { %v3303_v33 = vpop.f32.mrf.mxu0 }
 0x3b5   : > { %v3346_v34 = vpop.f32.mrf.mxu1  ;;  %v3304_v44 = vadd.f32 %v3303_v33, %v3261_v38  ;;  %v3345_v14 = vadd.f32 %v3344_v31, %v3302_v36 }
 0x3b6   : > { %v3305_v41 = vpop.f32.mrf.mxu0 }
 0x3b7   : > { %v3348_v42 = vpop.f32.mrf.mxu1  ;;  %v3306_v45 = vadd.f32 %v3305_v41, %v3263_v39  ;;  %v3347_v54 = vadd.f32 %v3346_v34, %v3304_v44 }
 0x3b8   : > { %v3307_v29 = vpop.f32.mrf.mxu0 }
 0x3b9   : > { %v3308_v30 = vadd.f32 %v3307_v29, %v3265_v43  ;;  %v3349_v47 = vadd.f32 %v3348_v42, %v3306_v45  ;;  %v3350_v49 = vpop.f32.mrf.mxu1 }
 0x3bb   : > { %v3351_v13 = vadd.f32 %v3350_v49, %v3308_v30  ;;  %v3355_v50 = vpack.c.bf16 %v3349_v47, %v3345_v14 }
 0x3bd   : > { %v3356_v55 = vpack.c.bf16 %v3351_v13, %v3347_v54 }
 0x3bf   : > { %3828 = vmatprep.mubr.bf16.mxu1 %v3356_v55 }
 0x3c0   : > { %3829 = vmatmul.mubr.bf16.vlgmr.msra.gmra.mxu1 %v3355_v50 }
 0x400   : > { %v3787_v51 = vpop.f32.mrf.mxu0 }
 0x401   : > { %v3788_v57 = vadd.f32 %v3787_v51, %v3426_v52 }
 0x402   : > { %v3789_v48 = vpop.f32.mrf.mxu0 }
 0x403   : > { %v3790_v59 = vadd.f32 %v3789_v48, %v3430_v53 }
 0x404   : > { %v3791_v56 = vpop.f32.mrf.mxu0 }
 0x405   : > { %v3792_v63 = vadd.f32 %v3791_v56, %v3426_v52 }
 0x406   : > { %v3793_v61 = vpop.f32.mrf.mxu0 }
 0x407   : > { %v3794_v3 = vadd.f32 %v3793_v61, %v3430_v53 }
 0x480   : > { %v3830_v58 = vpop.f32.mrf.mxu1 }
 0x481   : > { %v3831_v60 = vadd.f32 %v3830_v58, %v3788_v57 }
 0x482   : > { %v3832_v62 = vpop.f32.mrf.mxu1 }
 0x483   : > { %v3839_v0 = vmax.f32 %v3831_v60, 0.0  ;;  %v3833_v1 = vadd.f32 %v3832_v62, %v3790_v59 }
 0x484   : > { %v3834_v2 = vpop.f32.mrf.mxu1 }
 0x485   : > { %3843 = vst [vmem:[#allocation2 + $0x10] sm:$0xff] %v3839_v0  ;;  %v3840_v4 = vmax.f32 %v3833_v1, 0.0  ;;  %v3835_v5 = vadd.f32 %v3834_v2, %v3792_v63 }
 0x486   : > { %v3836_v6 = vpop.f32.mrf.mxu1 }
 0x487   : > { %3844 = vst [vmem:[#allocation2] sm:$0xff] %v3840_v4  ;;  %v3841_v37 = vmax.f32 %v3835_v5, 0.0  ;;  %v3837_v26 = vadd.f32 %v3836_v6, %v3794_v3 }
 0x489   : > { %3845 = vst [vmem:[#allocation2 + $0x18] sm:$0xff] %v3841_v37  ;;  %v3842_v35 = vmax.f32 %v3837_v26, 0.0 }
 0x48b   : > { %3846 = vst [vmem:[#allocation2 + $0x8] sm:$0xff] %v3842_v35 }
 0x48c PF: > { %v14638_v7 = vld [vmem:[#allocation2 + $0x10] sm:$0xff]  ;;  %v3974_v15 = vld [vmem:[%s14462_s8 + $0x1c0] sm:$0xff]  ;;  %vm4868_vm0 = vcmask 1042432   ;;  %vm5033_vm1 = vcmask 1046528   ;;  %vm5130_vm2 = vcmask 1045504   ;;  %vm5227_vm3 = vcmask 1044480  }
 0x48d   : > { %v3978_v16 = vld [vmem:[%s14462_s8 + $0x1e0] sm:$0xff]  ;;  %v3975_v17 = vld [vmem:[%s14462_s8 + $0x1c8] sm:$0xff]  ;;  %vm5709_vm4 = vcmask 130048   ;;  %vm8509_vm5 = vcmask 1040384   ;;  %vm8514_vm6 = vcmask 1041408   ;;  %vm8523_vm7 = vcmask 1043456  }
 0x48e   : > { %v14640_v8 = vld [vmem:[#allocation2] sm:$0xff]  ;;  %v11355_v18 = vcombine.high %v3974_v15, %v3978_v16  ;;  %v3979_v19 = vld [vmem:[%s14462_s8 + $0x1e8] sm:$0xff]  ;;  %v11354_v20 = vcombine.low %v3974_v15, %v3978_v16 }
 0x48f   : > { %v3851_v10 = vadd.f32 %v14640_v8, %v14638_v7  ;;  %v3966_v21 = vld [vmem:[%s14462_s8 + $0x180] sm:$0xff]  ;;  %v11357_v23 = vcombine.high %v3975_v17, %v3979_v19  ;;  %v11356_v24 = vcombine.low %v3975_v17, %v3979_v19  ;;  %v3967_v27 = vld [vmem:[%s14462_s8 + $0x188] sm:$0xff] }
 0x490   : > { %v14642_v9 = vld [vmem:[#allocation2 + $0x18] sm:$0xff]  ;;  %v3970_v22 = vld [vmem:[%s14462_s8 + $0x1a0] sm:$0xff]  ;;  %v3971_v28 = vld [vmem:[%s14462_s8 + $0x1a8] sm:$0xff]  ;;  %4686 = vmatprep.subr.bf16.mxu0 %v11355_v18 }
 0x491   : > { %3852 = vadd.xlane.f32.xlu0 %v3851_v10  ;;  %v11347_v25 = vcombine.high %v3966_v21, %v3970_v22  ;;  %v3958_v31 = vld [vmem:[%s14462_s8 + $0x140] sm:$0xff]  ;;  %v11349_v32 = vcombine.high %v3967_v27, %v3971_v28  ;;  %v3959_v34 = vld [vmem:[%s14462_s8 + $0x148] sm:$0xff]  ;;  %4729 = vmatprep.subr.bf16.mxu1 %v11357_v23  ;;  %v11346_v39 = vcombine.low %v3966_v21, %v3970_v22 }
 0x492   : > { %v14646_v11 = vld [vmem:[#allocation2 + $0x8] sm:$0xff]  ;;  %4687 = vmatpush1.bf16.msra.mxu0 %v11354_v20  ;;  %4730 = vmatpush1.bf16.msra.mxu1 %v11356_v24  ;;  %v11348_v40 = vcombine.low %v3967_v27, %v3971_v28 }
 0x493   : > { %v3854_v12 = vadd.f32 %v14646_v11, %v14642_v9  ;;  %v3962_v33 = vld [vmem:[%s14462_s8 + $0x160] sm:$0xff]  ;;  %v3963_v38 = vld [vmem:[%s14462_s8 + $0x168] sm:$0xff]  ;;  %4688 = vmatprep.subr.bf16.mxu0 %v11347_v25  ;;  %4731 = vmatprep.subr.bf16.mxu1 %v11349_v32 }
 0x494   : > { %v11339_v41 = vcombine.high %v3958_v31, %v3962_v33  ;;  %v11341_v42 = vcombine.high %v3959_v34, %v3963_v38  ;;  %v3950_v43 = vld [vmem:[%s14462_s8 + $0x100] sm:$0xff]  ;;  %v3951_v45 = vld [vmem:[%s14462_s8 + $0x108] sm:$0xff]  ;;  %v11338_v29 = vcombine.low %v3958_v31, %v3962_v33  ;;  %v11340_v30 = vcombine.low %v3959_v34, %v3963_v38 }
 0x495   : > { %3855 = vadd.xlane.f32.xlu0 %v3854_v12  ;;  %v3954_v44 = vld [vmem:[%s14462_s8 + $0x120] sm:$0xff]  ;;  %v3955_v36 = vld [vmem:[%s14462_s8 + $0x128] sm:$0xff] }
 0x496   : > { %4689 = vmatpush1.bf16.msra.mxu0 %v11346_v39  ;;  %4732 = vmatpush1.bf16.msra.mxu1 %v11348_v40  ;;  %v11331_v47 = vcombine.high %v3950_v43, %v3954_v44  ;;  %v11333_v49 = vcombine.high %v3951_v45, %v3955_v36  ;;  %v3942_v54 = vld [vmem:[%s14462_s8 + $0xc0] sm:$0xff]  ;;  %v3943_v14 = vld [vmem:[%s14462_s8 + $0xc8] sm:$0xff]  ;;  %v11330_v50 = vcombine.low %v3950_v43, %v3954_v44 }
 0x497   : > { %4690 = vmatprep.subr.bf16.mxu0 %v11339_v41  ;;  %4733 = vmatprep.subr.bf16.mxu1 %v11341_v42  ;;  %v3946_v13 = vld [vmem:[%s14462_s8 + $0xe0] sm:$0xff]  ;;  %v3947_v55 = vld [vmem:[%s14462_s8 + $0xe8] sm:$0xff]  ;;  %v11332_v48 = vcombine.low %v3951_v45, %v3955_v36 }
 0x498   : > { %v3934_v51 = vld [vmem:[%s14462_s8 + $0x80] sm:$0xff]  ;;  %v11323_v52 = vcombine.high %v3942_v54, %v3946_v13  ;;  %v3935_v53 = vld [vmem:[%s14462_s8 + $0x88] sm:$0xff]  ;;  %v11325_v57 = vcombine.high %v3943_v14, %v3947_v55  ;;  %v11322_v58 = vcombine.low %v3942_v54, %v3946_v13  ;;  %v11324_v61 = vcombine.low %v3943_v14, %v3947_v55 }
 0x499   : > { %v3938_v46 = vld [vmem:[%s14462_s8 + $0xa0] sm:$0xff]  ;;  %v3939_v56 = vld [vmem:[%s14462_s8 + $0xa8] sm:$0xff] }
 0x49a   : > { %4691 = vmatpush1.bf16.msra.mxu0 %v11338_v29  ;;  %4734 = vmatpush1.bf16.msra.mxu1 %v11340_v30  ;;  %v3926_v59 = vld [vmem:[%s14462_s8 + $0x40] sm:$0xff]  ;;  %v11315_v62 = vcombine.high %v3934_v51, %v3938_v46  ;;  %v3927_v63 = vld [vmem:[%s14462_s8 + $0x48] sm:$0xff]  ;;  %v11317_v1 = vcombine.high %v3935_v53, %v3939_v56  ;;  %v11314_v2 = vcombine.low %v3934_v51, %v3938_v46 }
 0x49b   : > { %4692 = vmatprep.subr.bf16.mxu0 %v11331_v47  ;;  %4735 = vmatprep.subr.bf16.mxu1 %v11333_v49  ;;  %v3930_v60 = vld [vmem:[%s14462_s8 + $0x60] sm:$0xff]  ;;  %v3931_v0 = vld [vmem:[%s14462_s8 + $0x68] sm:$0xff]  ;;  %v11316_v5 = vcombine.low %v3935_v53, %v3939_v56 }
 0x49c   : > { %v3918_v3 = vld [vmem:[%s14462_s8] sm:$0xff]  ;;  %v11307_v6 = vcombine.high %v3926_v59, %v3930_v60  ;;  %v3919_v37 = vld [vmem:[%s14462_s8 + $0x8] sm:$0xff]  ;;  %v11309_v35 = vcombine.high %v3927_v63, %v3931_v0  ;;  %v11306_v10 = vcombine.low %v3926_v59, %v3930_v60  ;;  %v11308_v16 = vcombine.low %v3927_v63, %v3931_v0 }
 0x49d   : > { %v3922_v4 = vld [vmem:[%s14462_s8 + $0x20] sm:$0xff]  ;;  %v3923_v26 = vld [vmem:[%s14462_s8 + $0x28] sm:$0xff] }
 0x49e   : > { %4693 = vmatpush1.bf16.msra.mxu0 %v11330_v50  ;;  %4736 = vmatpush1.bf16.msra.mxu1 %v11332_v48  ;;  %v4038_v12 = vld [vmem:[%s14462_s8 + $0x3c0] sm:$0xff]  ;;  %v11299_v17 = vcombine.high %v3918_v3, %v3922_v4  ;;  %v4039_v18 = vld [vmem:[%s14462_s8 + $0x3c8] sm:$0xff]  ;;  %v11301_v20 = vcombine.high %v3919_v37, %v3923_v26  ;;  %v11298_v21 = vcombine.low %v3918_v3, %v3922_v4 }
 0x49f   : > { %4694 = vmatprep.subr.bf16.mxu0 %v11323_v52  ;;  %4737 = vmatprep.subr.bf16.mxu1 %v11325_v57  ;;  %v4042_v15 = vld [vmem:[%s14462_s8 + $0x3e0] sm:$0xff]  ;;  %v4043_v19 = vld [vmem:[%s14462_s8 + $0x3e8] sm:$0xff]  ;;  %v11300_v22 = vcombine.low %v3919_v37, %v3923_v26 }
 0x4a0   : > { %v11419_v23 = vcombine.high %v4038_v12, %v4042_v15  ;;  %v11421_v24 = vcombine.high %v4039_v18, %v4043_v19  ;;  %v11418_v25 = vcombine.low %v4038_v12, %v4042_v15  ;;  %v11420_v27 = vcombine.low %v4039_v18, %v4043_v19  ;;  %v4030_v45 = vld [vmem:[%s14462_s8 + $0x380] sm:$0xff]  ;;  %v4031_v36 = vld [vmem:[%s14462_s8 + $0x388] sm:$0xff] }
 0x4a1   : > { %v4022_v54 = vld [vmem:[%s14462_s8 + $0x340] sm:$0xff]  ;;  %v4023_v14 = vld [vmem:[%s14462_s8 + $0x348] sm:$0xff] }
 0x4a2   : > { %4695 = vmatpush1.bf16.msra.mxu0 %v11322_v58  ;;  %4738 = vmatpush1.bf16.msra.mxu1 %v11324_v61  ;;  %v4026_v13 = vld [vmem:[%s14462_s8 + $0x360] sm:$0xff]  ;;  %v4027_v50 = vld [vmem:[%s14462_s8 + $0x368] sm:$0xff] }
 0x4a3   : > { %4696 = vmatprep.subr.bf16.mxu0 %v11315_v62  ;;  %4739 = vmatprep.subr.bf16.mxu1 %v11317_v1  ;;  %v11403_v55 = vcombine.high %v4022_v54, %v4026_v13  ;;  %v11405_v51 = vcombine.high %v4023_v14, %v4027_v50  ;;  %v11402_v46 = vcombine.low %v4022_v54, %v4026_v13  ;;  %v4014_v52 = vld [vmem:[%s14462_s8 + $0x300] sm:$0xff]  ;;  %v4015_v56 = vld [vmem:[%s14462_s8 + $0x308] sm:$0xff] }
 0x4a4   : > { %v11404_v48 = vcombine.low %v4023_v14, %v4027_v50  ;;  %v4018_v53 = vld [vmem:[%s14462_s8 + $0x320] sm:$0xff]  ;;  %v4019_v58 = vld [vmem:[%s14462_s8 + $0x328] sm:$0xff]  ;;  %v18165_v14 = vlaneseq }
 0x4a5   : > { %v11395_v57 = vcombine.high %v4014_v52, %v4018_v53  ;;  %v11394_v59 = vcombine.low %v4014_v52, %v4018_v53  ;;  %v4006_v60 = vld [vmem:[%s14462_s8 + $0x2c0] sm:$0xff]  ;;  %v11397_v62 = vcombine.high %v4015_v56, %v4019_v58  ;;  %v11396_v63 = vcombine.low %v4015_v56, %v4019_v58  ;;  %v4007_v1 = vld [vmem:[%s14462_s8 + $0x2c8] sm:$0xff]  ;;  %v3900_v56 = vld [vmem:[%s14515_s22] sm:$0x3] }
 0x4a6   : > { %4697 = vmatpush1.bf16.msra.mxu0 %v11314_v2  ;;  %4740 = vmatpush1.bf16.msra.mxu1 %v11316_v5  ;;  %v4010_v61 = vld [vmem:[%s14462_s8 + $0x2e0] sm:$0xff]  ;;  %v4011_v2 = vld [vmem:[%s14462_s8 + $0x2e8] sm:$0xff] }
 0x4a7   : > { %4698 = vmatprep.subr.bf16.mxu0 %v11307_v6  ;;  %4741 = vmatprep.subr.bf16.mxu1 %v11309_v35  ;;  %v11387_v0 = vcombine.high %v4006_v60, %v4010_v61  ;;  %v3998_v3 = vld [vmem:[%s14462_s8 + $0x280] sm:$0xff]  ;;  %v11389_v4 = vcombine.high %v4007_v1, %v4011_v2  ;;  %v3999_v6 = vld [vmem:[%s14462_s8 + $0x288] sm:$0xff]  ;;  %v11386_v26 = vcombine.low %v4006_v60, %v4010_v61 }
 0x4a8   : > { %v4002_v5 = vld [vmem:[%s14462_s8 + $0x2a0] sm:$0xff]  ;;  %v4003_v37 = vld [vmem:[%s14462_s8 + $0x2a8] sm:$0xff]  ;;  %v11388_v35 = vcombine.low %v4007_v1, %v4011_v2 }
 0x4a9   : > { %v11381_v12 = vcombine.high %v3999_v6, %v4003_v37  ;;  %v3990_v15 = vld [vmem:[%s14462_s8 + $0x240] sm:$0xff]  ;;  %v3995_v18 = vld [vmem:[%s14462_s8 + $0x268] sm:$0xff]  ;;  %v11378_v19 = vcombine.low %v3998_v3, %v4002_v5 }
 0x4aa   : > { %4699 = vmatpush1.bf16.msra.mxu0 %v11306_v10  ;;  %4742 = vmatpush1.bf16.msra.mxu1 %v11308_v16  ;;  %v11379_v10 = vcombine.high %v3998_v3, %v4002_v5  ;;  %v3994_v16 = vld [vmem:[%s14462_s8 + $0x260] sm:$0xff] }
 0x4ab   : > { %4700 = vmatprep.subr.bf16.mxu0 %v11299_v17  ;;  %4743 = vmatprep.subr.bf16.mxu1 %v11301_v20  ;;  %v3991_v17 = vld [vmem:[%s14462_s8 + $0x248] sm:$0xff]  ;;  %v11380_v20 = vcombine.low %v3999_v6, %v4003_v37  ;;  %v3968_v6 = vld [vmem:[%s14462_s8 + $0x190] sm:$0xff] }
 0x4ac   : > { %v3972_v37 = vld [vmem:[%s14462_s8 + $0x1b0] sm:$0xff] }
 0x4ae   : > { %4701 = vmatpush1.bf16.msra.mxu0 %v11298_v21  ;;  %4744 = vmatpush1.bf16.msra.mxu1 %v11300_v22  ;;  %v11371_v21 = vcombine.high %v3990_v15, %v3994_v16  ;;  %v11373_v22 = vcombine.high %v3991_v17, %v3995_v18 }
 0x4af   : > { %4702 = vmatprep.subr.bf16.mxu0 %v11419_v23  ;;  %4745 = vmatprep.subr.bf16.mxu1 %v11421_v24  ;;  %v3982_v23 = vld [vmem:[%s14462_s8 + $0x200] sm:$0xff] }
 0x4b0   : > { %v3986_v24 = vld [vmem:[%s14462_s8 + $0x220] sm:$0xff] }
 0x4b2   : > { %4703 = vmatpush2.bf16.msra.mxu0 %v11418_v25  ;;  %4746 = vmatpush2.bf16.msra.mxu1 %v11420_v27  ;;  %v3983_v25 = vld [vmem:[%s14462_s8 + $0x208] sm:$0xff] }
 0x4b3   : > { %v3987_v27 = vld [vmem:[%s14462_s8 + $0x228] sm:$0xff] }
 0x51a   : > { %v3853_v28 = vpop.xlane.xlu0 %3852 }
 0x51b   : > { %v3858_v31 = vmul.f32 0.00390625, %v3853_v28  ;;  %v11370_v28 = vcombine.low %v3990_v15, %v3994_v16  ;;  %v3964_v16 = vld [vmem:[%s14462_s8 + $0x170] sm:$0xff] }
 0x51d   : > { %v14687_v32 = vsub.f32 %v14638_v7, %v3858_v31  ;;  %v14690_v33 = vsub.f32 %v14640_v8, %v3858_v31  ;;  %v11372_v31 = vcombine.low %v3991_v17, %v3995_v18  ;;  %v3961_v17 = vld [vmem:[%s14462_s8 + $0x158] sm:$0xff] }
 0x51e   : > { %v3856_v34 = vpop.xlane.xlu0 %3855  ;;  %v3965_v18 = vld [vmem:[%s14462_s8 + $0x178] sm:$0xff] }
 0x51f   : > { %v3859_v38 = vmul.f32 0.00390625, %v3856_v34  ;;  %v3864_v39 = vmul.f32 %v14687_v32, %v14687_v32  ;;  %v3865_v40 = vmul.f32 %v14690_v33, %v14690_v33  ;;  %v11363_v34 = vcombine.high %v3982_v23, %v3986_v24 }
 0x521   : > { %v14697_v41 = vsub.f32 %v14642_v9, %v3859_v38  ;;  %v14700_v42 = vsub.f32 %v14646_v11, %v3859_v38  ;;  %v3868_v7 = vadd.f32 %v3865_v40, %v3864_v39  ;;  %v4034_v9 = vld [vmem:[%s14462_s8 + $0x3a0] sm:$0xff]  ;;  %v4035_v11 = vld [vmem:[%s14462_s8 + $0x3a8] sm:$0xff]  ;;  %v11365_v38 = vcombine.high %v3983_v25, %v3987_v27 }
 0x522   : > { %v11411_v29 = vcombine.high %v4030_v45, %v4034_v9  ;;  %v11413_v30 = vcombine.high %v4031_v36, %v4035_v11  ;;  %v11410_v47 = vcombine.low %v4030_v45, %v4034_v9  ;;  %v11412_v49 = vcombine.low %v4031_v36, %v4035_v11  ;;  %v3981_v45 = vld [vmem:[%s14462_s8 + $0x1f8] sm:$0xff] }
 0x523   : > { %3869 = vadd.xlane.f32.xlu1 %v3868_v7  ;;  %v3866_v8 = vmul.f32 %v14697_v41, %v14697_v41  ;;  %v3867_v43 = vmul.f32 %v14700_v42, %v14700_v42  ;;  %v11362_v39 = vcombine.low %v3982_v23, %v3986_v24  ;;  %v11364_v40 = vcombine.low %v3983_v25, %v3987_v27  ;;  %v3976_v7 = vld [vmem:[%s14462_s8 + $0x1d0] sm:$0xff]  ;;  %v3953_v25 = vld [vmem:[%s14462_s8 + $0x118] sm:$0xff] }
 0x524   : > { %4704 = vmatprep.subr.bf16.mxu0 %v11411_v29  ;;  %4747 = vmatprep.subr.bf16.mxu1 %v11413_v30  ;;  %v3952_v23 = vld [vmem:[%s14462_s8 + $0x110] sm:$0xff]  ;;  %v3957_v27 = vld [vmem:[%s14462_s8 + $0x138] sm:$0xff] }
 0x525   : > { %v3871_v44 = vadd.f32 %v3867_v43, %v3866_v8  ;;  %4705 = vmatpush2.bf16.msra.mxu0 %v11410_v47  ;;  %4748 = vmatpush2.bf16.msra.mxu1 %v11412_v49  ;;  %v3980_v8 = vld [vmem:[%s14462_s8 + $0x1f0] sm:$0xff]  ;;  %v3977_v43 = vld [vmem:[%s14462_s8 + $0x1d8] sm:$0xff] }
 0x526   : > { %4706 = vmatprep.subr.bf16.mxu0 %v11403_v55  ;;  %4749 = vmatprep.subr.bf16.mxu1 %v11405_v51  ;;  %v11358_v9 = vcombine.low %v3976_v7, %v3980_v8  ;;  %v11360_v36 = vcombine.low %v3977_v43, %v3981_v45  ;;  %v11361_v29 = vcombine.high %v3977_v43, %v3981_v45  ;;  %v14739_v55 = vshrl.u32 %v18165_v14, 7  ;;  %v3956_v24 = vld [vmem:[%s14462_s8 + $0x130] sm:$0xff] }
 0x527   : > { %3872 = vadd.xlane.f32.xlu1 %v3871_v44  ;;  %v11359_v44 = vcombine.high %v3976_v7, %v3980_v8  ;;  %v3945_v7 = vld [vmem:[%s14462_s8 + $0xd8] sm:$0xff]  ;;  %v11334_v43 = vcombine.low %v3952_v23, %v3956_v24 }
 0x528   : > { %18487 = vst [vmem:[#allocation77_spill] sm:$0xff] %v14739_v55  ;;  %v14742_v50 = vsub.s32 1, %v14739_v55  ;;  %v14745_v51 = vsub.s32 0, %v14739_v55  ;;  %v3949_v8 = vld [vmem:[%s14462_s8 + $0xf8] sm:$0xff] }
 0x529   : > { %4707 = vmatpush2.bf16.msra.mxu0 %v11402_v46  ;;  %4750 = vmatpush2.bf16.msra.mxu1 %v11404_v48  ;;  %v3884_v46 = vld [vmem:[%s14512_s9] sm:$0x3] }
 0x52a   : > { %4708 = vmatprep.subr.bf16.mxu0 %v11395_v57  ;;  %4751 = vmatprep.subr.bf16.mxu1 %v11397_v62  ;;  %18488 = vst [vmem:[#allocation78_spill] sm:$0xff] %v14742_v50  ;;  %18489 = vst [vmem:[#allocation79_spill] sm:$0xff] %v14745_v51  ;;  %v3893_v53 = vrot.slane %v3884_v46, %v14742_v50  ;;  %v3889_v58 = vrot.slane %v3884_v46, %v14745_v51  ;;  %v3928_v46 = vld [vmem:[%s14462_s8 + $0x50] sm:$0xff] }
 0x52b   : > { %v3909_v60 = vrot.slane %v3900_v56, %v14742_v50  ;;  %v3905_v61 = vrot.slane %v3900_v56, %v14745_v51 }
 0x52d   : > { %4709 = vmatpush2.bf16.msra.mxu0 %v11394_v59  ;;  %4752 = vmatpush2.bf16.msra.mxu1 %v11396_v63 }
 0x52e   : > { %4710 = vmatprep.subr.bf16.mxu0 %v11387_v0  ;;  %4753 = vmatprep.subr.bf16.mxu1 %v11389_v4 }
 0x531   : > { %4711 = vmatpush2.bf16.msra.mxu0 %v11386_v26  ;;  %4754 = vmatpush2.bf16.msra.mxu1 %v11388_v35  ;;  %v3969_v26 = vld [vmem:[%s14462_s8 + $0x198] sm:$0xff] }
 0x532   : > { %4712 = vmatprep.subr.bf16.mxu0 %v11379_v10  ;;  %4755 = vmatprep.subr.bf16.mxu1 %v11381_v12  ;;  %v3973_v35 = vld [vmem:[%s14462_s8 + $0x1b8] sm:$0xff]  ;;  %v3960_v12 = vld [vmem:[%s14462_s8 + $0x150] sm:$0xff] }
 0x533   : > { %v11353_v15 = vcombine.high %v3969_v26, %v3973_v35 }
 0x535   : > { %4713 = vmatpush2.bf16.msra.mxu0 %v11378_v19  ;;  %4756 = vmatpush2.bf16.msra.mxu1 %v11380_v20  ;;  %v11350_v19 = vcombine.low %v3968_v6, %v3972_v37  ;;  %v11352_v20 = vcombine.low %v3969_v26, %v3973_v35 }
 0x536   : > { %4714 = vmatprep.subr.bf16.mxu0 %v11371_v21  ;;  %4757 = vmatprep.subr.bf16.mxu1 %v11373_v22  ;;  %v11343_v21 = vcombine.high %v3960_v12, %v3964_v16  ;;  %v11345_v22 = vcombine.high %v3961_v17, %v3965_v18 }
 0x539   : > { %4715 = vmatpush2.bf16.msra.mxu0 %v11370_v28  ;;  %4758 = vmatpush2.bf16.msra.mxu1 %v11372_v31  ;;  %v11342_v28 = vcombine.low %v3960_v12, %v3964_v16  ;;  %v11344_v31 = vcombine.low %v3961_v17, %v3965_v18  ;;  %v4036_v12 = vld [vmem:[%s14462_s8 + $0x3b0] sm:$0xff] }
 0x53a   : > { %4716 = vmatprep.subr.bf16.mxu0 %v11363_v34  ;;  %4759 = vmatprep.subr.bf16.mxu1 %v11365_v38  ;;  %v11335_v34 = vcombine.high %v3952_v23, %v3956_v24  ;;  %v11337_v38 = vcombine.high %v3953_v25, %v3957_v27  ;;  %v4029_v23 = vld [vmem:[%s14462_s8 + $0x378] sm:$0xff] }
 0x53d   : > { %4717 = vmatpush2.bf16.msra.mxu0 %v11362_v39  ;;  %4760 = vmatpush2.bf16.msra.mxu1 %v11364_v40  ;;  %v3944_v39 = vld [vmem:[%s14462_s8 + $0xd0] sm:$0xff] }
 0x53e   : > { %4772 = vmatprep.subr.bf16.mxu0 %v11359_v44  ;;  %4815 = vmatprep.subr.bf16.mxu1 %v11361_v29  ;;  %v3948_v40 = vld [vmem:[%s14462_s8 + $0xf0] sm:$0xff]  ;;  %v11336_v44 = vcombine.low %v3953_v25, %v3957_v27 }
 0x53f   : > { %v11327_v45 = vcombine.high %v3944_v39, %v3948_v40  ;;  %v3940_v29 = vld [vmem:[%s14462_s8 + $0xb0] sm:$0xff] }
 0x5ac   : > { %v3870_v11 = vpop.xlane.xlu1 %3869 }
 0x5ad   : > { %v3874_v30 = vmul.f32 0.00390625, %v3870_v11  ;;  %v3937_v11 = vld [vmem:[%s14462_s8 + $0x98] sm:$0xff] }
 0x5af   : > { %v3876_v47 = vadd.f32 1e-05, %v3874_v30  ;;  %v3941_v30 = vld [vmem:[%s14462_s8 + $0xb8] sm:$0xff] }
 0x5b0   : > { %v3873_v49 = vpop.xlane.xlu1 %3872 }
 0x5b1   : > { %12673 = vrsqrt.f32 %v3876_v47  ;;  %v3875_v54 = vmul.f32 0.00390625, %v3873_v49  ;;  %v11326_v47 = vcombine.low %v3944_v39, %v3948_v40  ;;  %v11328_v49 = vcombine.low %v3945_v7, %v3949_v8  ;;  %v4021_v39 = vld [vmem:[%s14462_s8 + $0x338] sm:$0xff] }
 0x5b3   : > { %v3877_v13 = vadd.f32 1e-05, %v3875_v54 }
 0x5b5   : > { %12675 = vrsqrt.f32 %v3877_v13  ;;  %v11321_v13 = vcombine.high %v3937_v11, %v3941_v30 }
 0x5be   : > { %v12674_v48 = vpop.eup %12673 }
 0x5bf   : > { %v3881_v52 = vmul.f32 %v12674_v48, %v14690_v33  ;;  %v3880_v57 = vmul.f32 %v12674_v48, %v14687_v32  ;;  %v3932_v48 = vld [vmem:[%s14462_s8 + $0x70] sm:$0xff] }
 0x5c1   : > { %v3897_v33 = vmul.f32 %v3893_v53, %v3881_v52  ;;  %v3896_v0 = vmul.f32 %v3889_v58, %v3880_v57  ;;  %v3929_v52 = vld [vmem:[%s14462_s8 + $0x58] sm:$0xff]  ;;  %v11320_v57 = vcombine.low %v3937_v11, %v3941_v30 }
 0x5c2   : > { %v12676_v59 = vpop.eup %12675 }
 0x5c3   : > { %v3883_v62 = vmul.f32 %v12676_v59, %v14700_v42  ;;  %v3882_v63 = vmul.f32 %v12676_v59, %v14697_v41  ;;  %v3913_v32 = vadd.f32 %v3909_v60, %v3897_v33  ;;  %v3912_v4 = vadd.f32 %v3905_v61, %v3896_v0  ;;  %v3925_v33 = vld [vmem:[%s14462_s8 + $0x38] sm:$0xff] }
 0x5c4   : > { %v11351_v41 = vcombine.high %v3968_v6, %v3972_v37 }
 0x5c5   : > { %v3899_v1 = vmul.f32 %v3893_v53, %v3883_v62  ;;  %v3898_v2 = vmul.f32 %v3889_v58, %v3882_v63  ;;  %v3933_v53 = vld [vmem:[%s14462_s8 + $0x78] sm:$0xff]  ;;  %v11311_v58 = vcombine.high %v3928_v46, %v3932_v48  ;;  %v11310_v63 = vcombine.low %v3928_v46, %v3932_v48 }
 0x5c6   : > { %v11313_v59 = vcombine.high %v3929_v52, %v3933_v53  ;;  %v3921_v62 = vld [vmem:[%s14462_s8 + $0x18] sm:$0xff]  ;;  %v11312_v0 = vcombine.low %v3929_v52, %v3933_v53 }
 0x5c7   : > { %v3915_v3 = vadd.f32 %v3909_v60, %v3899_v1  ;;  %v3914_v5 = vadd.f32 %v3905_v61, %v3898_v2  ;;  %v3920_v60 = vld [vmem:[%s14462_s8 + $0x10] sm:$0xff]  ;;  %v11305_v2 = vcombine.high %v3921_v62, %v3925_v33  ;;  %v11304_v37 = vcombine.low %v3921_v62, %v3925_v33  ;;  %v4005_v46 = vld [vmem:[%s14462_s8 + $0x2b8] sm:$0xff] }
 0x5c8   : > { %v3924_v61 = vld [vmem:[%s14462_s8 + $0x30] sm:$0xff] }
 0x5c9   : > { %v3917_v10 = vpack.c.bf16 %v3915_v3, %v3913_v32  ;;  %v14761_v42 = vpack.c.bf16 %v3914_v5, %v3912_v4  ;;  %v11303_v1 = vcombine.high %v3920_v60, %v3924_v61  ;;  %v4040_v32 = vld [vmem:[%s14462_s8 + $0x3d0] sm:$0xff]  ;;  %v4041_v4 = vld [vmem:[%s14462_s8 + $0x3d8] sm:$0xff]  ;;  %v11302_v6 = vcombine.low %v3920_v60, %v3924_v61 }
 0x5ca   : > { %v4044_v3 = vld [vmem:[%s14462_s8 + $0x3f0] sm:$0xff]  ;;  %v4045_v5 = vld [vmem:[%s14462_s8 + $0x3f8] sm:$0xff] }
 0x5cb   : > { %4718 = vmatprep.mubr.bf16.mxu0 %v3917_v10  ;;  %4761 = vmatprep.mubr.bf16.mxu1 %v3917_v10  ;;  %v11423_v26 = vcombine.high %v4040_v32, %v4044_v3  ;;  %v11425_v35 = vcombine.high %v4041_v4, %v4045_v5  ;;  %v11422_v16 = vcombine.low %v4040_v32, %v4044_v3  ;;  %v3997_v60 = vld [vmem:[%s14462_s8 + $0x278] sm:$0xff] }
 0x5cc   : > { %4719 = vmatmul.mubr.bf16.vlgmr.msra.gmra.mxu0 %v14761_v42  ;;  %4762 = vmatmul.mubr.bf16.vlgmr.msra.gmra.mxu1 %v14761_v42  ;;  %v11424_v17 = vcombine.low %v4041_v4, %v4045_v5  ;;  %v3989_v32 = vld [vmem:[%s14462_s8 + $0x238] sm:$0xff] }
 0x5cd   : > { %4773 = vmatpush1.bf16.msra.mxu0 %v11358_v9  ;;  %4816 = vmatpush1.bf16.msra.mxu1 %v11360_v36  ;;  %v11329_v9 = vcombine.high %v3945_v7, %v3949_v8  ;;  %v3936_v36 = vld [vmem:[%s14462_s8 + $0x90] sm:$0xff] }
 0x5ce   : > { %4804 = vmatprep.mubr.bf16.mxu0 %v3917_v10  ;;  %4847 = vmatprep.mubr.bf16.mxu1 %v3917_v10  ;;  %v11319_v54 = vcombine.high %v3936_v36, %v3940_v29  ;;  %v11318_v56 = vcombine.low %v3936_v36, %v3940_v29  ;;  %v4032_v10 = vld [vmem:[%s14462_s8 + $0x390] sm:$0xff]  ;;  %v4013_v36 = vld [vmem:[%s14462_s8 + $0x2f8] sm:$0xff] }
 0x5cf   : > { %4774 = vmatprep.subr.bf16.mxu0 %v11351_v41  ;;  %4817 = vmatprep.subr.bf16.mxu1 %v11353_v15  ;;  %v4033_v41 = vld [vmem:[%s14462_s8 + $0x398] sm:$0xff]  ;;  %v11415_v18 = vcombine.high %v4032_v10, %v4036_v12  ;;  %v11414_v24 = vcombine.low %v4032_v10, %v4036_v12  ;;  %v12540_v10 = vld [vmem:[%s14471_s15 + $0xf8] sm:$0xff]  }
 0x5d0   : > { %v4037_v15 = vld [vmem:[%s14462_s8 + $0x3b8] sm:$0xff]  ;;  %v12541_v12 = vld [vmem:[%s14471_s15 + $0x38] sm:$0xff]  }
 0x5d1   : > { %4775 = vmatpush1.bf16.msra.mxu0 %v11350_v19  ;;  %4818 = vmatpush1.bf16.msra.mxu1 %v11352_v20  ;;  %v11417_v19 = vcombine.high %v4033_v41, %v4037_v15  ;;  %v4024_v20 = vld [vmem:[%s14462_s8 + $0x350] sm:$0xff]  ;;  %v11416_v25 = vcombine.low %v4033_v41, %v4037_v15  ;;  %v12542_v41 = vld [vmem:[%s14471_s15 + $0xb8] sm:$0xff]   ;;  %v12543_v15 = vld [vmem:[%s14471_s15 + $0x70] sm:$0xff]  }
 0x5d2   : > { %4776 = vmatprep.subr.bf16.mxu0 %v11343_v21  ;;  %4819 = vmatprep.subr.bf16.mxu1 %v11345_v22  ;;  %v4028_v21 = vld [vmem:[%s14462_s8 + $0x370] sm:$0xff]  ;;  %v4025_v22 = vld [vmem:[%s14462_s8 + $0x358] sm:$0xff] }
 0x5d3   : > { %v11407_v27 = vcombine.high %v4024_v20, %v4028_v21  ;;  %v11406_v40 = vcombine.low %v4024_v20, %v4028_v21  ;;  %v11408_v7 = vcombine.low %v4025_v22, %v4029_v23  ;;  %v12549_v20 = vld [vmem:[%s14471_s15 + $0x28] sm:$0xff]  }
 0x5d4   : > { %v12550_v21 = vld [vmem:[%s14471_s15 + $0xa8] sm:$0xff]  }
 0x5d5   : > { %4777 = vmatpush1.bf16.msra.mxu0 %v11342_v28  ;;  %4820 = vmatpush1.bf16.msra.mxu1 %v11344_v31  ;;  %v11409_v28 = vcombine.high %v4025_v22, %v4029_v23  ;;  %v4016_v31 = vld [vmem:[%s14462_s8 + $0x310] sm:$0xff]  ;;  %v12551_v22 = vld [vmem:[%s14471_s15 + $0x60] sm:$0xff]  }
 0x5d6   : > { %4778 = vmatprep.subr.bf16.mxu0 %v11335_v34  ;;  %4821 = vmatprep.subr.bf16.mxu1 %v11337_v38  ;;  %v4020_v34 = vld [vmem:[%s14462_s8 + $0x330] sm:$0xff]  ;;  %v4017_v38 = vld [vmem:[%s14462_s8 + $0x318] sm:$0xff]  ;;  %v12552_v23 = vld [vmem:[%s14471_s15 + $0xe0] sm:$0xff]  }
 0x5d7   : > { %v11399_v8 = vcombine.high %v4016_v31, %v4020_v34  ;;  %v11398_v29 = vcombine.low %v4016_v31, %v4020_v34  ;;  %v11400_v11 = vcombine.low %v4017_v38, %v4021_v39  ;;  %v12557_v31 = vld [vmem:[%s14471_s15 + $0x18] sm:$0xff]  }
 0x5d8   : > { %v12558_v34 = vld [vmem:[%s14471_s15 + $0x98] sm:$0xff]  }
 0x5d9   : > { %4779 = vmatpush1.bf16.msra.mxu0 %v11334_v43  ;;  %4822 = vmatpush1.bf16.msra.mxu1 %v11336_v44  ;;  %v11401_v43 = vcombine.high %v4017_v38, %v4021_v39  ;;  %v4008_v44 = vld [vmem:[%s14462_s8 + $0x2d0] sm:$0xff]  ;;  %v12559_v38 = vld [vmem:[%s14471_s15 + $0x50] sm:$0xff]  }
 0x5da   : > { %4780 = vmatprep.subr.bf16.mxu0 %v11327_v45  ;;  %4823 = vmatprep.subr.bf16.mxu1 %v11329_v9  ;;  %v4012_v45 = vld [vmem:[%s14462_s8 + $0x2f0] sm:$0xff]  ;;  %v4009_v9 = vld [vmem:[%s14462_s8 + $0x2d8] sm:$0xff] }
 0x5db   : > { %v11391_v30 = vcombine.high %v4008_v44, %v4012_v45  ;;  %v11390_v48 = vcombine.low %v4008_v44, %v4012_v45  ;;  %v11392_v52 = vcombine.low %v4009_v9, %v4013_v36  ;;  %v12560_v39 = vld [vmem:[%s14471_s15 + $0xd0] sm:$0xff]   ;;  %v12565_v44 = vld [vmem:[%s14471_s15 + $0x8] sm:$0xff]  }
 0x5dc   : > { %v12566_v45 = vld [vmem:[%s14471_s15 + $0x88] sm:$0xff]  }
 0x5dd   : > { %4781 = vmatpush1.bf16.msra.mxu0 %v11326_v47  ;;  %4824 = vmatpush1.bf16.msra.mxu1 %v11328_v49  ;;  %v11393_v47 = vcombine.high %v4009_v9, %v4013_v36  ;;  %v4000_v49 = vld [vmem:[%s14462_s8 + $0x290] sm:$0xff]  ;;  %v12567_v9 = vld [vmem:[%s14471_s15 + $0x40] sm:$0xff]  }
 0x5de   : > { %4782 = vmatprep.subr.bf16.mxu0 %v11319_v54  ;;  %4825 = vmatprep.subr.bf16.mxu1 %v11321_v13  ;;  %v4004_v54 = vld [vmem:[%s14462_s8 + $0x2b0] sm:$0xff]  ;;  %v4001_v13 = vld [vmem:[%s14462_s8 + $0x298] sm:$0xff]  ;;  %v12568_v36 = vld [vmem:[%s14471_s15 + $0xc0] sm:$0xff]  }
 0x5df   : > { %v11383_v53 = vcombine.high %v4000_v49, %v4004_v54  ;;  %v11382_v61 = vcombine.low %v4000_v49, %v4004_v54  ;;  %v11384_v62 = vcombine.low %v4001_v13, %v4005_v46  ;;  %v14860_v49 = vsub.s32 3, %v14739_v55 }
 0x5e1   : > { %4783 = vmatpush1.bf16.msra.mxu0 %v11318_v56  ;;  %4826 = vmatpush1.bf16.msra.mxu1 %v11320_v57  ;;  %v11385_v56 = vcombine.high %v4001_v13, %v4005_v46  ;;  %v3992_v57 = vld [vmem:[%s14462_s8 + $0x250] sm:$0xff]  ;;  %18491 = vst [vmem:[#allocation81_spill] sm:$0xff] %v14860_v49  ;;  %v4859_v46 = vld [vmem:[%s14518_s2 + $0x8] sm:$0xff] }
 0x5e2   : > { %4784 = vmatprep.subr.bf16.mxu0 %v11311_v58  ;;  %4827 = vmatprep.subr.bf16.mxu1 %v11313_v59  ;;  %v3996_v58 = vld [vmem:[%s14462_s8 + $0x270] sm:$0xff]  ;;  %v3993_v59 = vld [vmem:[%s14462_s8 + $0x258] sm:$0xff] }
 0x5e3   : > { %v11375_v33 = vcombine.high %v3992_v57, %v3996_v58  ;;  %v11374_v3 = vcombine.low %v3992_v57, %v3996_v58  ;;  %v11376_v4 = vcombine.low %v3993_v59, %v3997_v60  ;;  %v14874_v57 = vsub.s32 6, %v14739_v55 }
 0x5e4   : > { %v14877_v58 = vsub.s32 7, %v14739_v55 }
 0x5e5   : > { %4785 = vmatpush1.bf16.msra.mxu0 %v11310_v63  ;;  %4828 = vmatpush1.bf16.msra.mxu1 %v11312_v0  ;;  %v11377_v63 = vcombine.high %v3993_v59, %v3997_v60  ;;  %v3984_v0 = vld [vmem:[%s14462_s8 + $0x210] sm:$0xff]  ;;  %v4897_v59 = vld [vmem:[%s1189_s28] sm:$0xf]  ;;  %v4911_v60 = vrot.slane %v4859_v46, %v14745_v51  ;;  %s18521_s28 = scalar_lea.vmem [#allocation19], %s14468_s7 }
 0x5e6   : > { %4786 = vmatprep.subr.bf16.mxu0 %v11303_v1  ;;  %4829 = vmatprep.subr.bf16.mxu1 %v11305_v2  ;;  %v3988_v1 = vld [vmem:[%s14462_s8 + $0x230] sm:$0xff]  ;;  %v3985_v2 = vld [vmem:[%s14462_s8 + $0x218] sm:$0xff]  ;;  %18492 = vst [vmem:[#allocation82_spill] sm:$0xff] %v14877_v58  ;;  %s18511_s8 = scalar_lea.vmem [#allocation16], %s14468_s7  ;;  %s19096_s7 = sld [smem:[#allocation72_spill]] }
 0x5e7   : > { %v11367_v5 = vcombine.high %v3984_v0, %v3988_v1 }
 0x5e9   : > { %4787 = vmatpush1.bf16.msra.mxu0 %v11302_v6  ;;  %4830 = vmatpush1.bf16.msra.mxu1 %v11304_v37  ;;  %v11369_v6 = vcombine.high %v3985_v2, %v3989_v32  ;;  %v11366_v37 = vcombine.low %v3984_v0, %v3988_v1  ;;  %v5178_v0 = vrot.slane %v4859_v46, %v14860_v49 }
 0x5ea   : > { %4788 = vmatprep.subr.bf16.mxu0 %v11423_v26  ;;  %4831 = vmatprep.subr.bf16.mxu1 %v11425_v35  ;;  %v11368_v26 = vcombine.low %v3985_v2, %v3989_v32  ;;  %v12539_v35 = vld [vmem:[%s14471_s15 + $0x78] sm:$0xff]  }
 0x5ec   : > { %p11528_p7 = scmp.ne.s32.totalorder %s19096_s7, 1 }
 0x5ed   : > { %4789 = vmatpush2.bf16.msra.mxu0 %v11422_v16  ;;  %4832 = vmatpush2.bf16.msra.mxu1 %v11424_v17  ;;  %v12544_v16 = vld [vmem:[%s14471_s15 + $0xf0] sm:$0xff]  }
 0x5ee   : > { %4790 = vmatprep.subr.bf16.mxu0 %v11415_v18  ;;  %4833 = vmatprep.subr.bf16.mxu1 %v11417_v19  ;;  %v12545_v17 = vld [vmem:[%s14471_s15 + $0x30] sm:$0xff]   ;;  %v12548_v19 = vld [vmem:[%s14471_s15 + $0xe8] sm:$0xff]  }
 0x5ef   : > { %v12546_v18 = vld [vmem:[%s14471_s15 + $0xb0] sm:$0xff]  }
 0x5f1   : > { %4791 = vmatpush2.bf16.msra.mxu0 %v11414_v24  ;;  %4834 = vmatpush2.bf16.msra.mxu1 %v11416_v25  ;;  %v12553_v24 = vld [vmem:[%s14471_s15 + $0x20] sm:$0xff]  }
 0x5f2   : > { %4792 = vmatprep.subr.bf16.mxu0 %v11407_v27  ;;  %4835 = vmatprep.subr.bf16.mxu1 %v11409_v28  ;;  %v12554_v25 = vld [vmem:[%s14471_s15 + $0xa0] sm:$0xff]   ;;  %v12555_v27 = vld [vmem:[%s14471_s15 + $0x58] sm:$0xff]  }
 0x5f3   : > { %v12556_v28 = vld [vmem:[%s14471_s15 + $0xd8] sm:$0xff]  }
 0x5f5   : > { %4793 = vmatpush2.bf16.msra.mxu0 %v11406_v40  ;;  %4836 = vmatpush2.bf16.msra.mxu1 %v11408_v7  ;;  %v12561_v40 = vld [vmem:[%s14471_s15 + $0x10] sm:$0xff]  }
 0x5f6   : > { %4794 = vmatprep.subr.bf16.mxu0 %v11399_v8  ;;  %4837 = vmatprep.subr.bf16.mxu1 %v11401_v43  ;;  %v12562_v7 = vld [vmem:[%s14471_s15 + $0x90] sm:$0xff]   ;;  %v12563_v8 = vld [vmem:[%s14471_s15 + $0x48] sm:$0xff]  }
 0x5f7   : > { %v12564_v43 = vld [vmem:[%s14471_s15 + $0xc8] sm:$0xff]  }
 0x5f9   : > { %4795 = vmatpush2.bf16.msra.mxu0 %v11398_v29  ;;  %4838 = vmatpush2.bf16.msra.mxu1 %v11400_v11  ;;  %v12569_v29 = vld [vmem:[%s14471_s15] sm:$0xff]  }
 0x5fa   : > { %4796 = vmatprep.subr.bf16.mxu0 %v11391_v30  ;;  %4839 = vmatprep.subr.bf16.mxu1 %v11393_v47  ;;  %v12570_v11 = vld [vmem:[%s14471_s15 + $0x80] sm:$0xff]   ;;  %v4858_v30 = vld [vmem:[%s14518_s2] sm:$0xff]  ;;  %v14857_v47 = vsub.s32 2, %v14739_v55  ;;  %s19104_s2 = sld [smem:[#allocation69_spill]] (!%p11528_p7) }
 0x5fb   : > { %v4903_v54 = vrot.slane %v4858_v30, %v14745_v51  ;;  %v4976_v13 = vrot.slane %v4858_v30, %v14742_v50 }
 0x5fc   : > { %18490 = vst [vmem:[#allocation80_spill] sm:$0xff] %v14857_v47 }
 0x5fd   : > { %4797 = vmatpush2.bf16.msra.mxu0 %v11390_v48  ;;  %4840 = vmatpush2.bf16.msra.mxu1 %v11392_v52  ;;  %v5073_v48 = vrot.slane %v4858_v30, %v14857_v47  ;;  %v14867_v52 = vsub.s32 4, %v14739_v55 }
 0x5fe   : > { %4798 = vmatprep.subr.bf16.mxu0 %v11383_v53  ;;  %4841 = vmatprep.subr.bf16.mxu1 %v11385_v56  ;;  %v14870_v53 = vsub.s32 5, %v14739_v55  ;;  %v5170_v56 = vrot.slane %v4858_v30, %v14860_v49 }
 0x5ff   : > { %v14892_v1 = vrot.slane %v5073_v48, %v14857_v47  ;;  %v4907_v2 = vrot.slane %v4858_v30, %v14867_v52 }
 0x600   : > { %v4980_v32 = vrot.slane %v4858_v30, %v14870_v53 }
 0x601   : > { %4799 = vmatpush2.bf16.msra.mxu0 %v11382_v61  ;;  %4842 = vmatpush2.bf16.msra.mxu1 %v11384_v62  ;;  %v4984_v61 = vrot.slane %v4859_v46, %v14742_v50  ;;  %v14884_v62 = vrot.slane %v4903_v54, %v14745_v51 }
 0x602   : > { %4800 = vmatprep.subr.bf16.mxu0 %v11375_v33  ;;  %4843 = vmatprep.subr.bf16.mxu1 %v11377_v63  ;;  %v14887_v33 = vrot.slane %v4976_v13, %v14742_v50  ;;  %v5081_v63 = vrot.slane %v4859_v46, %v14857_v47 }
 0x605   : > { %4801 = vmatpush2.bf16.msra.mxu0 %v11374_v3  ;;  %4844 = vmatpush2.bf16.msra.mxu1 %v11376_v4  ;;  %v4915_v3 = vrot.slane %v4859_v46, %v14867_v52  ;;  %v14898_v4 = vrot.slane %v4897_v59, %v14745_v51 }
 0x606   : > { %4802 = vmatprep.subr.bf16.mxu0 %v11367_v5  ;;  %4845 = vmatprep.subr.bf16.mxu1 %v11369_v6  ;;  %v14901_v5 = vrot.slane %v5170_v56, %v14860_v49  ;;  %v5077_v6 = vrot.slane %v4858_v30, %v14874_v57 }
 0x609   : > { %4803 = vmatpush2.bf16.msra.mxu0 %v11366_v37  ;;  %4846 = vmatpush2.bf16.msra.mxu1 %v11368_v26  ;;  %v5174_v37 = vrot.slane %v4858_v30, %v14877_v58  ;;  %v14906_v26 = vrot.slane %v4911_v60, %v14745_v51 }
 0x60a   : > { %11645 = vmatprep.subr.bf16.mxu0 %v12539_v35  ;;  %11667 = vmatprep.subr.bf16.mxu1 %v12540_v10  ;;  %v4988_v35 = vrot.slane %v4859_v46, %v14870_v53  ;;  %v5085_v10 = vrot.slane %v4859_v46, %v14874_v57 }
 0x60c   : > { %4805 = vmatmul.mubr.bf16.vlgmr.msra.gmra.mxu0 %v14761_v42  ;;  %4848 = vmatmul.mubr.bf16.vlgmr.msra.gmra.mxu1 %v14761_v42  ;;  %v12547_v42 = vld [vmem:[%s14471_s15 + $0x68] sm:$0xff]   ;;  %s19101_s15 = sld [smem:[#allocation65_spill]] (!%p11528_p7) }
 0x60d   : > { %11646 = vmatpush3.bf16.msra.mxu0 %v12541_v12  ;;  %11668 = vmatpush3.bf16.msra.mxu1 %v12542_v41  ;;  %v5182_v12 = vrot.slane %v4859_v46, %v14877_v58  ;;  %v14912_v41 = vrot.slane %v4897_v59, %v14857_v47 }
 0x60e   : > { %11647 = vmatprep.subr.bf16.mxu0 %v12543_v15  ;;  %11669 = vmatprep.subr.bf16.mxu1 %v12544_v16  ;;  %v14915_v15 = vrot.slane %v4984_v61, %v14742_v50  ;;  %v14918_v16 = vrot.slane %v5081_v63, %v14857_v47 }
 0x611   : > { %11648 = vmatpush3.bf16.msra.mxu0 %v12545_v17  ;;  %11670 = vmatpush3.bf16.msra.mxu1 %v12546_v18  ;;  %v14921_v17 = vrot.slane %v5178_v0, %v14860_v49 }
 0x612   : > { %11649 = vmatprep.subr.bf16.mxu0 %v12547_v42  ;;  %11671 = vmatprep.subr.bf16.mxu1 %v12548_v19  ;;  %v14928_v19 = vrot.slane %v4907_v2, %v14745_v51 }
 0x615   : > { %11650 = vmatpush3.bf16.msra.mxu0 %v12549_v20  ;;  %11672 = vmatpush3.bf16.msra.mxu1 %v12550_v21  ;;  %v14931_v20 = vrot.slane %v4897_v59, %v14742_v50  ;;  %v14934_v21 = vrot.slane %v4980_v32, %v14742_v50 }
 0x616   : > { %11651 = vmatprep.subr.bf16.mxu0 %v12551_v22  ;;  %11673 = vmatprep.subr.bf16.mxu1 %v12552_v23  ;;  %v14937_v22 = vrot.slane %v4915_v3, %v14745_v51 }
 0x619   : > { %11652 = vmatpush3.bf16.msra.mxu0 %v12553_v24  ;;  %11674 = vmatpush3.bf16.msra.mxu1 %v12554_v25  ;;  %v14942_v25 = vrot.slane %v5077_v6, %v14857_v47 }
 0x61a   : > { %11653 = vmatprep.subr.bf16.mxu0 %v12555_v27  ;;  %11675 = vmatprep.subr.bf16.mxu1 %v12556_v28  ;;  %v14945_v27 = vrot.slane %v5174_v37, %v14860_v49 }
 0x61d   : > { %11654 = vmatpush3.bf16.msra.mxu0 %v12557_v31  ;;  %11676 = vmatpush3.bf16.msra.mxu1 %v12558_v34  ;;  %v14952_v34 = vrot.slane %v4897_v59, %v14860_v49 }
 0x61e   : > { %11655 = vmatprep.subr.bf16.mxu0 %v12559_v38  ;;  %11677 = vmatprep.subr.bf16.mxu1 %v12560_v39  ;;  %v14955_v38 = vrot.slane %v4988_v35, %v14742_v50  ;;  %v14958_v39 = vrot.slane %v5085_v10, %v14857_v47 }
 0x621   : > { %11656 = vmatpush3.bf16.msra.mxu0 %v12561_v40  ;;  %11678 = vmatpush3.bf16.msra.mxu1 %v12562_v7  ;;  %v14961_v40 = vrot.slane %v5182_v12, %v14860_v49 }
 0x622   : > { %11657 = vmatprep.subr.bf16.mxu0 %v12563_v8  ;;  %11679 = vmatprep.subr.bf16.mxu1 %v12564_v43 }
 0x625   : > { %11658 = vmatpush3.bf16.msra.mxu0 %v12565_v44  ;;  %11680 = vmatpush3.bf16.msra.mxu1 %v12566_v45 }
 0x626   : > { %11659 = vmatprep.subr.bf16.mxu0 %v12567_v9  ;;  %11681 = vmatprep.subr.bf16.mxu1 %v12568_v36 }
 0x629   : > { %11660 = vmatpush3.bf16.msra.mxu0 %v12569_v29  ;;  %11682 = vmatpush3.bf16.msra.mxu1 %v12570_v11 }
 0x68c   : > { %v14923_v18 = vpop.f32.mrf.mxu0  ;;  %v14925_v42 = vpop.f32.mrf.mxu1 }
 0x68d   : > { %v4869_v23 = vrot.slane %v14923_v18, 5  ;;  %v4871_v24 = vrot.slane %v14925_v42, 5 }
 0x68e   : > { %v14947_v28 = vpop.f32.mrf.mxu0  ;;  %v14949_v31 = vpop.f32.mrf.mxu1 }
 0x68f   : > { %v4893_v7 = vsel %vm4868_vm0, 0.0, %v4869_v23  ;;  %v4895_v8 = vsel %vm4868_vm0, 0.0, %v4871_v24  ;;  %v18167_v43 = vrot.slane %v14947_v28, 5  ;;  %v18166_v44 = vrot.slane %v14949_v31, 5 }
 0x690   : > { %v4936_v45 = vmul.f32 %v14884_v62, %v4893_v7  ;;  %v5009_v9 = vmul.f32 %v14887_v33, %v4893_v7  ;;  %v14972_v36 = vmul.f32 %v14892_v1, %v4893_v7  ;;  %v14975_v29 = vmul.f32 %v14901_v5, %v4893_v7  ;;  %v4724_v46 = vpop.f32.mrf.mxu0  ;;  %v4767_v48 = vpop.f32.mrf.mxu1 }
 0x691   : > { %v4938_v11 = vmul.f32 %v14906_v26, %v4895_v8  ;;  %v14979_v30 = vmul.f32 %v14915_v15, %v4895_v8  ;;  %v14982_v54 = vmul.f32 %v14918_v16, %v4895_v8  ;;  %v14985_v13 = vmul.f32 %v14921_v17, %v4895_v8 }
 0x692   : > { %v14988_v56 = vadd.f32 %v14898_v4, %v4936_v45  ;;  %v5034_v59 = vrot.slane %v5009_v9, 1  ;;  %v4894_v3 = vsel %vm4868_vm0, 0.0, %v18167_v43  ;;  %v4896_v6 = vsel %vm4868_vm0, 0.0, %v18166_v44 }
 0x693   : > { %v14993_v63 = vadd.f32 %v14912_v41, %v4938_v11  ;;  %v5040_v0 = vrot.slane %v14979_v30, 1  ;;  %v4873_v37 = vrot.slane %v4724_v46, 5  ;;  %v4877_v35 = vrot.slane %v4767_v48, 5 }
 0x694   : > { %v4937_v10 = vmul.f32 %v14928_v19, %v4894_v3  ;;  %v15006_v12 = vmul.f32 %v14934_v21, %v4894_v3  ;;  %v15009_v18 = vmul.f32 %v14942_v25, %v4894_v3  ;;  %v15012_v7 = vmul.f32 %v14945_v27, %v4894_v3 }
 0x695   : > { %v4939_v8 = vmul.f32 %v14937_v22, %v4896_v6  ;;  %v15016_v45 = vmul.f32 %v14955_v38, %v4896_v6  ;;  %v15019_v9 = vmul.f32 %v14958_v39, %v4896_v6  ;;  %v15022_v11 = vmul.f32 %v14961_v40, %v4896_v6 }
 0x696   : > { %v15025_v30 = vadd.f32 %v14931_v20, %v4937_v10  ;;  %v4874_v6 = vsel %vm4868_vm0, %v4869_v23, %v4873_v37  ;;  %v5017_v10 = vmul.f32 %v14887_v33, %v4873_v37  ;;  %v5114_v61 = vmul.f32 %v14892_v1, %v4873_v37 }
 0x697   : > { %v15031_v14 = vadd.f32 %v14952_v34, %v4939_v8  ;;  %v5211_v46 = vmul.f32 %v14901_v5, %v4873_v37  ;;  %v4940_v48 = vmul.f32 %v14884_v62, %v4874_v6  ;;  %v5013_v3 = vmul.f32 %v14887_v33, %v4874_v6 }
 0x698   : > { %v5110_v8 = vmul.f32 %v14892_v1, %v4874_v6  ;;  %v5207_v32 = vmul.f32 %v14901_v5, %v4874_v6  ;;  %v5046_v60 = vrot.slane %v5017_v10, 1  ;;  %v5143_v2 = vrot.slane %v5114_v61, 2 }
 0x699   : > { %v5240_v43 = vrot.slane %v5211_v46, 3  ;;  %v4878_v23 = vsel %vm4868_vm0, %v4871_v24, %v4877_v35  ;;  %v4969_v44 = vadd.f32 %v14898_v4, %v4940_v48  ;;  %v5035_v55 = vrot.slane %v5013_v3, 1  ;;  %v4726_v46 = vpop.f32.mrf.mxu0 }
 0x69a   : > { %v5132_v58 = vrot.slane %v5110_v8, 2  ;;  %v5229_v37 = vrot.slane %v5207_v32, 3  ;;  %v4942_v62 = vmul.f32 %v14906_v26, %v4878_v23  ;;  %v5015_v33 = vmul.f32 %v14915_v15, %v4878_v23 }
 0x69b   : > { %v5019_v1 = vmul.f32 %v14915_v15, %v4877_v35  ;;  %v15052_v5 = vmul.f32 %v14918_v16, %v4878_v23  ;;  %v5036_v61 = vsel %vm5033_vm1, %v5034_v59, %v5035_v55  ;;  %v5047_v42 = vsel %vm5033_vm1, %v5035_v55, %v5046_v60 }
 0x69c   : > { %v5144_v24 = vsel %vm5130_vm2, %v5132_v58, %v5143_v2  ;;  %v15058_v4 = vsel %vm5227_vm3, %v5229_v37, %v5240_v43  ;;  %v5066_v32 = vadd.f32 %v5047_v42, %v4969_v44  ;;  %v4971_v26 = vadd.f32 %v14912_v41, %v4942_v62 }
 0x69d   : > { %v5041_v48 = vrot.slane %v5015_v33, 1  ;;  %v5050_v3 = vrot.slane %v5019_v1, 1  ;;  %v5116_v15 = vmul.f32 %v14918_v16, %v4877_v35  ;;  %v5138_v6 = vrot.slane %v15052_v5, 2 }
 0x69e   : > { %v15064_v10 = vmul.f32 %v14921_v17, %v4878_v23  ;;  %v5213_v55 = vmul.f32 %v14921_v17, %v4877_v35  ;;  %v15067_v59 = vadd.f32 %v5144_v24, %v5066_v32  ;;  %v4875_v60 = vrot.slane %v4726_v46, 5  ;;  %v4769_v24 = vpop.f32.mrf.mxu1 }
 0x69f   : > { %v15070_v43 = vsel %vm5033_vm1, %v5040_v0, %v5041_v48  ;;  %v5051_v44 = vsel %vm5033_vm1, %v5041_v48, %v5050_v3  ;;  %v5147_v2 = vrot.slane %v5116_v15, 2  ;;  %v18493_v62 = vrot.slane %v14947_v28, 5 }
 0x6a0   : > { %v5068_v41 = vadd.f32 %v5051_v44, %v4971_v26  ;;  %v5235_v8 = vrot.slane %v15064_v10, 3  ;;  %v5244_v16 = vrot.slane %v5213_v55, 3  ;;  %v5018_v33 = vmul.f32 %v14934_v21, %v4875_v60 }
 0x6a1   : > { %v4876_v23 = vsel %vm4868_vm0, %v18493_v62, %v4875_v60  ;;  %v5115_v17 = vmul.f32 %v14942_v25, %v4875_v60  ;;  %v5212_v35 = vmul.f32 %v14945_v27, %v4875_v60  ;;  %v5148_v0 = vsel %vm5130_vm2, %v5138_v6, %v5147_v2 }
 0x6a2   : > { %v15086_v1 = vsel %vm5227_vm3, %v5235_v8, %v5244_v16  ;;  %v4941_v42 = vmul.f32 %v14928_v19, %v4876_v23  ;;  %v5014_v28 = vmul.f32 %v14934_v21, %v4876_v23  ;;  %v15090_v46 = vadd.f32 %v5148_v0, %v5068_v41 }
 0x6a3   : > { %v5048_v32 = vrot.slane %v5018_v33, 1  ;;  %v5111_v26 = vmul.f32 %v14942_v25, %v4876_v23  ;;  %v5145_v48 = vrot.slane %v5115_v17, 2  ;;  %v5208_v55 = vmul.f32 %v14945_v27, %v4876_v23 }
 0x6a4   : > { %v4970_v3 = vadd.f32 %v14931_v20, %v4941_v42  ;;  %v5038_v15 = vrot.slane %v5014_v28, 1  ;;  %v5242_v44 = vrot.slane %v5212_v35, 3  ;;  %v4879_v2 = vrot.slane %v4769_v24, 5 }
 0x6a5   : > { %v5135_v60 = vrot.slane %v5111_v26, 2  ;;  %v5062_v16 = vadd.f32 %v5036_v61, %v14988_v56  ;;  %v18494_v19 = vrot.slane %v14972_v36, 2  ;;  %v5232_v62 = vrot.slane %v5208_v55, 3 }
 0x6a6   : > { %v5049_v41 = vsel %vm5033_vm1, %v5038_v15, %v5048_v32  ;;  %v18495_v25 = vrot.slane %v15006_v12, 1  ;;  %v18496_v20 = vrot.slane %v14975_v29, 3  ;;  %v18497_v23 = vrot.slane %v14949_v31, 5 }
 0x6a7   : > { %v5133_v21 = vsel %vm5130_vm2, %v18494_v19, %v5132_v58  ;;  %v5020_v56 = vmul.f32 %v14955_v38, %v4879_v2  ;;  %v5117_v36 = vmul.f32 %v14958_v39, %v4879_v2  ;;  %v5214_v58 = vmul.f32 %v14961_v40, %v4879_v2 }
 0x6a8   : > { %v5039_v33 = vsel %vm5033_vm1, %v18495_v25, %v5038_v15  ;;  %v5230_v27 = vsel %vm5227_vm3, %v18496_v20, %v5229_v37  ;;  %v4880_v17 = vsel %vm4868_vm0, %v18497_v23, %v4879_v2  ;;  %v5067_v15 = vadd.f32 %v5049_v41, %v4970_v3 }
 0x6a9   : > { %v4943_v61 = vmul.f32 %v14937_v22, %v4880_v17  ;;  %v5016_v12 = vmul.f32 %v14955_v38, %v4880_v17  ;;  %v5113_v35 = vmul.f32 %v14958_v39, %v4880_v17  ;;  %v5210_v29 = vmul.f32 %v14961_v40, %v4880_v17 }
 0x6aa   : > { %v5052_v0 = vrot.slane %v5020_v56, 1  ;;  %v5149_v37 = vrot.slane %v5117_v36, 2  ;;  %v5246_v42 = vrot.slane %v5214_v58, 3  ;;  %v5063_v31 = vadd.f32 %v5039_v33, %v15025_v30 }
 0x6ab   : > { %v4972_v28 = vadd.f32 %v14952_v34, %v4943_v61  ;;  %v5044_v24 = vrot.slane %v5016_v12, 1  ;;  %v5141_v32 = vrot.slane %v5113_v35, 2  ;;  %v5238_v26 = vrot.slane %v5210_v29, 3 }
 0x6ac   : > { %v18498_v55 = vrot.slane %v15009_v18, 2  ;;  %v5146_v38 = vsel %vm5130_vm2, %v5135_v60, %v5145_v48  ;;  %v18499_v39 = vrot.slane %v15012_v7, 3  ;;  %v5243_v30 = vsel %vm5227_vm3, %v5232_v62, %v5242_v44 }
 0x6ad   : > { %v5053_v2 = vsel %vm5033_vm1, %v5044_v24, %v5052_v0  ;;  %v18500_v34 = vrot.slane %v15016_v45, 1  ;;  %v5164_v3 = vadd.f32 %v5146_v38, %v5067_v15  ;;  %v18501_v33 = vrot.slane %v15019_v9, 2 }
 0x6ae   : > { %v5136_v22 = vsel %vm5130_vm2, %v18498_v55, %v5135_v60  ;;  %v5233_v40 = vsel %vm5227_vm3, %v18499_v39, %v5232_v62  ;;  %v5069_v41 = vadd.f32 %v5053_v2, %v4972_v28  ;;  %v5150_v60 = vsel %vm5130_vm2, %v5141_v32, %v5149_v37 }
 0x6af   : > { %v5160_v19 = vadd.f32 %v5136_v22, %v5063_v31  ;;  %v5045_v25 = vsel %vm5033_vm1, %v18500_v34, %v5044_v24  ;;  %v5142_v48 = vsel %vm5130_vm2, %v18501_v33, %v5141_v32  ;;  %v18502_v20 = vrot.slane %v15022_v11, 3 }
 0x6b0   : > { %v5065_v18 = vadd.f32 %v5045_v25, %v15031_v14  ;;  %v5247_v45 = vsel %vm5227_vm3, %v5238_v26, %v5246_v42  ;;  %v15141_v62 = vadd.f32 %v5243_v30, %v5164_v3  ;;  %v5166_v17 = vadd.f32 %v5150_v60, %v5069_v41 }
 0x6b1   : > { %v15134_v7 = vadd.f32 %v5233_v40, %v5160_v19  ;;  %v5239_v44 = vsel %vm5227_vm3, %v18502_v20, %v5238_v26  ;;  %v5159_v14 = vadd.f32 %v5133_v21, %v5062_v16  ;;  %v15146_v9 = vadd.f32 %v15058_v4, %v15067_v59 }
 0x6b2   : > { %v5162_v23 = vadd.f32 %v5142_v48, %v5065_v18  ;;  %v5064_v36 = vadd.f32 %v15070_v43, %v14993_v63  ;;  %v18503_v11 = vrot.slane %v14982_v54, 2  ;;  %v5269_v61 = vsub.f32 0.0, %v15141_v62 }
 0x6b3   : > { %v5265_v56 = vsub.f32 0.0, %v15134_v7  ;;  %v15156_v35 = vadd.f32 %v5247_v45, %v5166_v17  ;;  %v15158_v16 = vadd.f32 %v5230_v27, %v5159_v14  ;;  %v5268_v4 = vsub.f32 0.0, %v15146_v9 }
 0x6b4   : > { %v5139_v58 = vsel %vm5130_vm2, %v18503_v11, %v5138_v6  ;;  %v5259_v12 = vadd.f32 %v5239_v44, %v5162_v23  ;;  %v18504_v63 = vrot.slane %v14985_v13, 3  ;;  %v5282_v54 = vmul.f32 1.442695, %v5269_v61 }
 0x6b5   : > { %v5274_v21 = vmul.f32 1.442695, %v5265_v56  ;;  %v5161_v59 = vadd.f32 %v5139_v58, %v5064_v36  ;;  %v5271_v6 = vsub.f32 0.0, %v15156_v35  ;;  %v5264_v29 = vsub.f32 0.0, %v15158_v16 }
 0x6b6   : > { %v5236_v5 = vsel %vm5227_vm3, %v18504_v63, %v5235_v8  ;;  %v5267_v43 = vsub.f32 0.0, %v5259_v12  ;;  %v5280_v0 = vmul.f32 1.442695, %v5268_v4  ;;  %v5262_v37 = vadd.f32 %v15086_v1, %v15090_v46  ;;  %v12576_v4 = vld [vmem:[%s14477_s3 + $0xc] ss:$16 sps:$4 sm:$0xff]  }
 0x6b7   : > { %12677 = vpow2.f32 %v5274_v21  ;;  %v5258_v27 = vadd.f32 %v5236_v5, %v5161_v59  ;;  %v5286_v31 = vmul.f32 1.442695, %v5271_v6  ;;  %v5272_v10 = vmul.f32 1.442695, %v5264_v29  ;;  %v12574_v21 = vld [vmem:[%s14477_s3 + $0x8] ss:$16 sps:$4 sm:$0xff]   ;;  %5770 = vmatprep.subr.bf16.mxu1 %v12576_v4 }
 0x6b8   : > { %12679 = vpow2.f32 %v5282_v54  ;;  %v5278_v42 = vmul.f32 1.442695, %v5267_v43  ;;  %v5270_v28 = vsub.f32 0.0, %v5262_v37  ;;  %v13908_v59 = vmov 0  }
 0x6b9   : > { %12681 = vpow2.f32 %v5280_v0  ;;  %v5266_v13 = vsub.f32 0.0, %v5258_v27 }
 0x6ba   : > { %12683 = vpow2.f32 %v5278_v42  ;;  %v5284_v24 = vmul.f32 1.442695, %v5270_v28 }
 0x6bb   : > { %12685 = vpow2.f32 %v5286_v31  ;;  %v5276_v8 = vmul.f32 1.442695, %v5266_v13 }
 0x6bc   : > { %12687 = vpow2.f32 %v5272_v10 }
 0x6bd   : > { %12689 = vpow2.f32 %v5276_v8 }
 0x6be   : > { %12691 = vpow2.f32 %v5284_v24 }
 0x6c4   : > { %v12678_v32 = vpop.eup %12677 }
 0x6c5   : > { %v12680_v26 = vpop.eup %12679  ;;  %v5289_v15 = vadd.f32 1.0, %v12678_v32 }
 0x6c6   : > { %v12682_v55 = vpop.eup %12681  ;;  %v5293_v22 = vadd.f32 1.0, %v12680_v26 }
 0x6c7   : > { %v12684_v1 = vpop.eup %12683  ;;  %12693 = vrcp.f32 %v5289_v15  ;;  %v5292_v46 = vadd.f32 1.0, %v12682_v55 }
 0x6c8   : > { %v12686_v38 = vpop.eup %12685  ;;  %12695 = vrcp.f32 %v5293_v22  ;;  %v5291_v39 = vadd.f32 1.0, %v12684_v1 }
 0x6c9   : > { %v12688_v40 = vpop.eup %12687  ;;  %v5295_v2 = vadd.f32 1.0, %v12686_v38  ;;  %12697 = vrcp.f32 %v5292_v46 }
 0x6ca   : > { %v12690_v19 = vpop.eup %12689  ;;  %12699 = vrcp.f32 %v5291_v39  ;;  %v5288_v30 = vadd.f32 1.0, %v12688_v40 }
 0x6cb   : > { %v12692_v34 = vpop.eup %12691  ;;  %12701 = vrcp.f32 %v5295_v2  ;;  %v5290_v25 = vadd.f32 1.0, %v12690_v19 }
 0x6cc   : > { %12703 = vrcp.f32 %v5288_v30  ;;  %v5294_v3 = vadd.f32 1.0, %v12692_v34  ;;  %v15203_v63 = vpop.f32.mrf.mxu0  ;;  %v15205_v5 = vpop.f32.mrf.mxu1 }
 0x6cd   : > { %12705 = vrcp.f32 %v5290_v25  ;;  %18508 = vst [vmem:[#allocation86_spill] sm:$0xff] %v15205_v5  ;;  %v18510_v25 = vld [vmem:[#allocation82_spill] sm:$0xff] }
 0x6ce   : > { %12707 = vrcp.f32 %v5294_v3  ;;  %v15207_v54 = vpop.f32.mrf.mxu0  ;;  %v15209_v43 = vpop.f32.mrf.mxu1 }
 0x6d0   : > { %v15211_v6 = vpop.f32.mrf.mxu0  ;;  %v15213_v29 = vpop.f32.mrf.mxu1 }
 0x6d1   : > { %18509 = vst [vmem:[#allocation87_spill] sm:$0xff] %v15213_v29 }
 0x6d2   : > { %v15215_v0 = vpop.f32.mrf.mxu0 }
 0x6d4   : > { %v12694_v18 = vpop.eup %12693 }
 0x6d5   : > { %v12696_v41 = vpop.eup %12695  ;;  %v15171_v33 = vmul.f32 %v12694_v18, %v15134_v7 }
 0x6d6   : > { %v12698_v48 = vpop.eup %12697  ;;  %v15174_v60 = vmul.f32 %v12696_v41, %v15141_v62 }
 0x6d7   : > { %v12700_v20 = vpop.eup %12699  ;;  %v15181_v17 = vmul.f32 %v12698_v48, %v15146_v9 }
 0x6d8   : > { %18505 = vst [vmem:[#allocation83_spill] sm:$0xff] %v15174_v60  ;;  %v12702_v44 = vpop.eup %12701  ;;  %v5321_v45 = vpack.c.bf16 %v15174_v60, %v15171_v33  ;;  %v15178_v23 = vmul.f32 %v12700_v20, %v5259_v12 }
 0x6d9   : > { %v12704_v14 = vpop.eup %12703  ;;  %v15184_v7 = vmul.f32 %v12702_v44, %v15156_v35  ;;  %v12571_v35 = vld [vmem:[%s14477_s3] ss:$16 sps:$4 sm:$0xff]  }
 0x6da   : > { %v12706_v62 = vpop.eup %12705  ;;  %5612 = vmatprep.mubr.bf16.mxu0 %v5321_v45  ;;  %v15187_v56 = vmul.f32 %v12704_v14, %v15158_v16  ;;  %v12573_v16 = vld [vmem:[%s14477_s3 + $0x4] ss:$16 sps:$4 sm:$0xff]   ;;  %s19102_s3 = sld [smem:[#allocation68_spill]] (!%p11528_p7) }
 0x6db   : > { %18506 = vst [vmem:[#allocation84_spill] sm:$0xff] %v15184_v7  ;;  %v12708_v36 = vpop.eup %12707  ;;  %v5323_v11 = vpack.c.bf16 %v15184_v7, %v15178_v23  ;;  %v15191_v58 = vmul.f32 %v12706_v62, %v5258_v27  ;;  %5727 = vmatprep.subr.bf16.mxu0 %v12573_v16  ;;  %v15217_v27 = vpop.f32.mrf.mxu1 }
 0x6dc   : > { %v5320_v9 = vpack.c.bf16 %v15181_v17, %v15187_v56  ;;  %v15195_v61 = vmul.f32 %v12708_v36, %v5262_v37  ;;  %v8579_v36 = vsub.f32 0.0, %v15209_v43  ;;  %v8583_v16 = vsub.f32 0.0, %v15217_v27 }
 0x6dd   : > { %18507 = vst [vmem:[#allocation85_spill] sm:$0xff] %v15191_v58  ;;  %5653 = vmatprep.mubr.bf16.mxu1 %v5323_v11  ;;  %v8580_v11 = vsub.f32 0.0, %v15211_v6 }
 0x6de   : > { %5613 = vmatmul.mubr.bf16.vlgmr.msra.gmra.mxu0 %v5320_v9  ;;  %v5322_v12 = vpack.c.bf16 %v15195_v61, %v15191_v58  ;;  %v5667_v9 = vld [vmem:[%s18511_s8] sm:$0xf] }
 0x6df   : > { %5728 = vmatpush1.bf16.msra.mxu0 %v12571_v35  ;;  %5745 = vmatprep.mubr.bf16.mxu0 %v13908_v59  ;;  %v5672_v4 = vrot.slane %v5667_v9, %v14745_v51 }
 0x6e0   : > { %5654 = vmatmul.mubr.bf16.vlgmr.msra.gmra.mxu1 %v5322_v12  ;;  %v8581_v12 = vsub.f32 0.0, %v15215_v0 }
 0x6e1   : > { %5771 = vmatpush1.bf16.msra.mxu1 %v12574_v21  ;;  %5788 = vmatprep.mubr.bf16.mxu1 %v13908_v59  ;;  %v8590_v21 = vmul.f32 1.442695, %v8579_v36  ;;  %v5680_v59 = vrot.slane %v5667_v9, %v14857_v47 }
 0x79e   : > { %v11661_v37 = vpop.f32.mrf.mxu0 }
 0x7a0   : > { %v11683_v42 = vpop.f32.mrf.mxu1  ;;  %v11662_v31 = vpop.f32.mrf.mxu0 }
 0x7a1   : > { %v11663_v10 = vadd.f32 %v11662_v31, %v11661_v37  ;;  %v8592_v37 = vmul.f32 1.442695, %v8580_v11 }
 0x7a2   : > { %v11684_v13 = vpop.f32.mrf.mxu1  ;;  %v11664_v28 = vpop.f32.mrf.mxu0 }
 0x7a3   : > { %v11685_v8 = vadd.f32 %v11684_v13, %v11683_v42  ;;  %v8594_v42 = vmul.f32 1.442695, %v8581_v12 }
 0x7a4   : > { %v11686_v24 = vpop.f32.mrf.mxu1  ;;  %v11665_v32 = vpop.f32.mrf.mxu0 }
 0x7a5   : > { %v5656_v26 = vadd.f32 %v11685_v8, %v11663_v10  ;;  %v11666_v15 = vadd.f32 %v11665_v32, %v11664_v28  ;;  %v8598_v10 = vmul.f32 1.442695, %v8583_v16  ;;  %v5676_v8 = vrot.slane %v5667_v9, %v14742_v50 }
 0x7a6   : > { %v11687_v55 = vpop.f32.mrf.mxu1 }
 0x7a7   : > { %v11688_v22 = vadd.f32 %v11687_v55, %v11686_v24  ;;  %v6882_v1 = vrot.slane %v5656_v26, %v14745_v51  ;;  %v6894_v38 = vrot.slane %v5656_v26, %v14742_v50  ;;  %v6906_v39 = vrot.slane %v5656_v26, %v14857_v47 }
 0x7a8   : > { %v6918_v2 = vrot.slane %v5656_v26, %v14860_v49  ;;  %v6930_v19 = vrot.slane %v5656_v26, %v14867_v52  ;;  %v6942_v30 = vrot.slane %v5656_v26, %v14870_v53  ;;  %v6954_v34 = vrot.slane %v5656_v26, %v14874_v57 }
 0x7a9   : > { %v15220_v46 = vadd.f32 %v11688_v22, %v11666_v15  ;;  %6889 = vbcast.lane.b32.xlu1 %v6882_v1, 280  ;;  %6885 = vbcast.lane.b32.xlu0 %v6882_v1, 272  ;;  %v6966_v3 = vrot.slane %v5656_v26, %v18510_v25  ;;  %v5684_v24 = vrot.slane %v5667_v9, %v14860_v49  ;;  %v8578_v15 = vsub.f32 0.0, %v15205_v5 }
 0x7ab   : > { %v5662_v40 = vpack.c.bf16 %v15220_v46, %v5656_v26  ;;  %v6978_v18 = vrot.slane %v15220_v46, %v14745_v51  ;;  %v6990_v41 = vrot.slane %v15220_v46, %v14742_v50  ;;  %v7002_v48 = vrot.slane %v15220_v46, %v14857_v47 }
 0x7ac   : > { %v7014_v20 = vrot.slane %v15220_v46, %v14860_v49  ;;  %v7026_v44 = vrot.slane %v15220_v46, %v14867_v52  ;;  %v7038_v45 = vrot.slane %v15220_v46, %v14870_v53  ;;  %v7050_v14 = vrot.slane %v15220_v46, %v14874_v57 }
 0x7ad   : > { %6897 = vbcast.lane.b32.xlu1 %v6894_v38, 272  ;;  %6909 = vbcast.lane.b32.xlu0 %v6906_v39, 272  ;;  %v7062_v52 = vrot.slane %v15220_v46, %v18510_v25  ;;  %v8576_v53 = vsub.f32 0.0, %v15203_v63  ;;  %v8577_v57 = vsub.f32 0.0, %v15207_v54 }
 0x7ae   : > { %11462 = vmatmul.mubr.msk.bf16.vlgmr.msra.gmra.mxu0 %vm5709_vm4, %v5662_v40  ;;  %11463 = vmatmul.mubr.msk.bf16.vlgmr.msra.gmra.mxu1 %vm5709_vm4, %v5662_v40 }
 0x7af   : > { %v8584_v62 = vmul.f32 1.442695, %v8576_v53  ;;  %v8586_v35 = vmul.f32 1.442695, %v8577_v57 }
 0x7b1   : > { %6901 = vbcast.lane.b32.xlu1 %v6894_v38, 280  ;;  %6921 = vbcast.lane.b32.xlu0 %v6918_v2, 272  ;;  %12709 = vpow2.f32 %v8584_v62 }
 0x7b2   : > { %12711 = vpow2.f32 %v8586_v35 }
 0x7b3   : > { %12713 = vpow2.f32 %v8590_v21 }
 0x7b4   : > { %12715 = vpow2.f32 %v8592_v37 }
 0x7b5   : > { %6913 = vbcast.lane.b32.xlu1 %v6906_v39, 280  ;;  %6933 = vbcast.lane.b32.xlu0 %v6930_v19, 272  ;;  %12717 = vpow2.f32 %v8594_v42 }
 0x7b6   : > { %12719 = vpow2.f32 %v8598_v10 }
 0x7b9   : > { %6925 = vbcast.lane.b32.xlu1 %v6918_v2, 280  ;;  %6945 = vbcast.lane.b32.xlu0 %v6942_v30, 272 }
 0x7bd   : > { %6937 = vbcast.lane.b32.xlu1 %v6930_v19, 280  ;;  %6957 = vbcast.lane.b32.xlu0 %v6954_v34, 272 }
 0x7be   : > { %v12710_v12 = vpop.eup %12709 }
 0x7c1   : > { %6949 = vbcast.lane.b32.xlu1 %v6942_v30, 280  ;;  %6969 = vbcast.lane.b32.xlu0 %v6966_v3, 272 }
 0x7c5   : > { %6961 = vbcast.lane.b32.xlu1 %v6954_v34, 280  ;;  %7521 = vbcast.lane.b32.xlu0 %v6882_v1, 288 }
 0x7c9   : > { %6973 = vbcast.lane.b32.xlu1 %v6966_v3, 280  ;;  %7529 = vbcast.lane.b32.xlu0 %v6894_v38, 288 }
 0x7cd   : > { %7525 = vbcast.lane.b32.xlu1 %v6882_v1, 296  ;;  %7537 = vbcast.lane.b32.xlu0 %v6906_v39, 288 }
 0x7d1   : > { %7533 = vbcast.lane.b32.xlu1 %v6894_v38, 296  ;;  %7545 = vbcast.lane.b32.xlu0 %v6918_v2, 288 }
 0x7d5   : > { %7541 = vbcast.lane.b32.xlu1 %v6906_v39, 296  ;;  %7553 = vbcast.lane.b32.xlu0 %v6930_v19, 288 }
 0x7d9   : > { %7549 = vbcast.lane.b32.xlu1 %v6918_v2, 296  ;;  %7561 = vbcast.lane.b32.xlu0 %v6942_v30, 288 }
 0x7dd   : > { %7557 = vbcast.lane.b32.xlu1 %v6930_v19, 296  ;;  %7569 = vbcast.lane.b32.xlu0 %v6954_v34, 288 }
 0x7e1   : > { %7565 = vbcast.lane.b32.xlu1 %v6942_v30, 296  ;;  %7577 = vbcast.lane.b32.xlu0 %v6966_v3, 288 }
 0x7e5   : > { %7573 = vbcast.lane.b32.xlu1 %v6954_v34, 296  ;;  %6981 = vbcast.lane.b32.xlu0 %v6978_v18, 272 }
 0x7e9   : > { %7581 = vbcast.lane.b32.xlu1 %v6966_v3, 296  ;;  %6993 = vbcast.lane.b32.xlu0 %v6990_v41, 272 }
 0x7ed   : > { %6985 = vbcast.lane.b32.xlu1 %v6978_v18, 280  ;;  %7005 = vbcast.lane.b32.xlu0 %v7002_v48, 272 }
 0x7f1   : > { %6997 = vbcast.lane.b32.xlu1 %v6990_v41, 280  ;;  %7017 = vbcast.lane.b32.xlu0 %v7014_v20, 272 }
 0x7f5   : > { %7009 = vbcast.lane.b32.xlu1 %v7002_v48, 280  ;;  %7029 = vbcast.lane.b32.xlu0 %v7026_v44, 272 }
 0x7f9   : > { %7021 = vbcast.lane.b32.xlu1 %v7014_v20, 280  ;;  %7041 = vbcast.lane.b32.xlu0 %v7038_v45, 272 }
 0x7fd   : > { %7033 = vbcast.lane.b32.xlu1 %v7026_v44, 280  ;;  %7053 = vbcast.lane.b32.xlu0 %v7050_v14, 272 }
 0x801   : > { %7045 = vbcast.lane.b32.xlu1 %v7038_v45, 280  ;;  %7585 = vbcast.lane.b32.xlu0 %v6978_v18, 288 }
 0x805   : > { %7057 = vbcast.lane.b32.xlu1 %v7050_v14, 280  ;;  %7593 = vbcast.lane.b32.xlu0 %v6990_v41, 288 }
 0x809   : > { %7589 = vbcast.lane.b32.xlu1 %v6978_v18, 296  ;;  %7601 = vbcast.lane.b32.xlu0 %v7002_v48, 288  ;;  %v8588_v18 = vmul.f32 1.442695, %v8578_v15 }
 0x80d   : > { %7597 = vbcast.lane.b32.xlu1 %v6990_v41, 296  ;;  %7065 = vbcast.lane.b32.xlu0 %v7062_v52, 272 }
 0x811   : > { %7605 = vbcast.lane.b32.xlu1 %v7002_v48, 296  ;;  %7609 = vbcast.lane.b32.xlu0 %v7014_v20, 288 }
 0x815   : > { %7069 = vbcast.lane.b32.xlu1 %v7062_v52, 280  ;;  %7617 = vbcast.lane.b32.xlu0 %v7026_v44, 288 }
 0x819   : > { %7613 = vbcast.lane.b32.xlu1 %v7014_v20, 296  ;;  %7625 = vbcast.lane.b32.xlu0 %v7038_v45, 288 }
 0x81b   : > { %v15256_v31 = vpop.permute.xlu1 %6889 }
 0x81c   : > { %18512 = vst [vmem:[#allocation82_spill] sm:$0xff] %v15256_v31 }
 0x81d   : > { %7621 = vbcast.lane.b32.xlu1 %v7026_v44, 296  ;;  %7633 = vbcast.lane.b32.xlu0 %v7050_v14, 288 }
 0x81f   : > { %v15271_v19 = vpop.permute.xlu1 %6897 }
 0x820   : > { %18513 = vst [vmem:[#allocation88_spill] sm:$0xff] %v15271_v19 }
 0x821   : > { %7629 = vbcast.lane.b32.xlu1 %v7038_v45, 296  ;;  %7641 = vbcast.lane.b32.xlu0 %v7062_v52, 288  ;;  %v8582_v45 = vsub.f32 0.0, %v15213_v29 }
 0x823   : > { %v8596_v42 = vmul.f32 1.442695, %v8582_v45 }
 0x825   : > { %7637 = vbcast.lane.b32.xlu1 %v7050_v14, 296 }
 0x829   : > { %7645 = vbcast.lane.b32.xlu1 %v7062_v52, 296 }
 0x86e   : > { %v5747_v13 = vpop.f32.mrf.mxu0  ;;  %v5790_v28 = vpop.f32.mrf.mxu1 }
 0x86f   : > { %v15260_v32 = vadd.f32 %v5747_v13, %v5672_v4  ;;  %v15262_v26 = vadd.f32 %v5790_v28, %v5680_v59  ;;  %v12712_v28 = vpop.eup %12711 }
 0x870   : > { %v5749_v55 = vpop.f32.mrf.mxu0  ;;  %v5792_v22 = vpop.f32.mrf.mxu1 }
 0x871   : > { %v5807_v1 = vand.u32 2147483647, %v15260_v32  ;;  %v5809_v46 = vand.u32 2147483647, %v15262_v26  ;;  %v15267_v38 = vadd.f32 %v5749_v55, %v5676_v8  ;;  %v15269_v39 = vadd.f32 %v5792_v22, %v5684_v24  ;;  %v12714_v55 = vpop.eup %12713 }
 0x872   : > { %v5751_v40 = vpop.f32.mrf.mxu0  ;;  %v5794_v2 = vpop.f32.mrf.mxu1 }
 0x873   : > { %v5815_v30 = vsub.f32 0.0, %v5807_v1  ;;  %v5817_v34 = vsub.f32 0.0, %v5809_v46  ;;  %v15273_v25 = vadd.f32 %v5751_v40, %v5672_v4  ;;  %v15275_v3 = vadd.f32 %v5794_v2, %v5680_v59  ;;  %v15286_v4 = vpop.permute.xlu1 %6901  ;;  %v12716_v1 = vpop.eup %12715 }
 0x874   : > { %v5808_v41 = vand.u32 2147483647, %v15267_v38  ;;  %v5810_v48 = vand.u32 2147483647, %v15269_v39  ;;  %v5753_v20 = vpop.f32.mrf.mxu0  ;;  %v5796_v44 = vpop.f32.mrf.mxu1  ;;  %18516 = vst [vmem:[#allocation91_spill] sm:$0xff] %v15286_v4  ;;  %v8601_v2 = vadd.f32 1.0, %v12712_v28 }
 0x875   : > { %v5823_v14 = vmul.f32 1.442695, %v5815_v30  ;;  %v5827_v52 = vmul.f32 1.442695, %v5817_v34  ;;  %v5811_v62 = vand.u32 2147483647, %v15273_v25  ;;  %v15282_v11 = vadd.f32 %v5753_v20, %v5676_v8  ;;  %v12718_v40 = vpop.eup %12717 }
 0x876   : > { %v5816_v53 = vsub.f32 0.0, %v5808_v41  ;;  %v5818_v57 = vsub.f32 0.0, %v5810_v48  ;;  %v5813_v36 = vand.u32 2147483647, %v15275_v3  ;;  %v15284_v9 = vadd.f32 %v5796_v44, %v5684_v24  ;;  %v12720_v34 = vpop.eup %12719 }
 0x877   : > { %12721 = vpow2.f32 %v5823_v14  ;;  %18514 = vst [vmem:[#allocation89_spill] sm:$0xff] %v15282_v11  ;;  %v5819_v21 = vsub.f32 0.0, %v5811_v62  ;;  %v5812_v37 = vand.u32 2147483647, %v15282_v11  ;;  %v8600_v8 = vadd.f32 1.0, %v12710_v12  ;;  %v15290_v41 = vpop.permute.xlu1 %6913 }
 0x878   : > { %18515 = vst [vmem:[#allocation90_spill] sm:$0xff] %v15284_v9  ;;  %12723 = vpow2.f32 %v5827_v52  ;;  %v5825_v35 = vmul.f32 1.442695, %v5816_v53  ;;  %v5829_v16 = vmul.f32 1.442695, %v5818_v57  ;;  %v5821_v59 = vsub.f32 0.0, %v5813_v36 }
 0x879   : > { %12725 = vpow2.f32 %v8588_v18  ;;  %v5831_v10 = vmul.f32 1.442695, %v5819_v21  ;;  %v5814_v13 = vand.u32 2147483647, %v15284_v9  ;;  %v5820_v15 = vsub.f32 0.0, %v5812_v37  ;;  %18517 = vst [vmem:[#allocation92_spill] sm:$0xff] %v15290_v41 }
 0x87a   : > { %12727 = vpow2.f32 %v5825_v35  ;;  %v5835_v24 = vmul.f32 1.442695, %v5821_v59  ;;  %v8603_v18 = vadd.f32 1.0, %v12714_v55  ;;  %v8604_v48 = vadd.f32 1.0, %v12716_v1 }
 0x87b   : > { %12729 = vpow2.f32 %v5829_v16  ;;  %v5822_v22 = vsub.f32 0.0, %v5814_v13  ;;  %v5833_v46 = vmul.f32 1.442695, %v5820_v15  ;;  %v8605_v20 = vadd.f32 1.0, %v12718_v40  ;;  %v15292_v52 = vpop.permute.xlu1 %6925 }
 0x87c   : > { %12731 = vpow2.f32 %v5831_v10  ;;  %v8607_v44 = vadd.f32 1.0, %v12720_v34  ;;  %18518 = vst [vmem:[#allocation93_spill] sm:$0xff] %v15292_v52 }
 0x87d   : > { %12733 = vpow2.f32 %v5835_v24  ;;  %v5837_v30 = vmul.f32 1.442695, %v5822_v22 }
 0x87e   : > { %12735 = vpow2.f32 %v8596_v42 }
 0x87f   : > { %12737 = vrcp.f32 %v8600_v8  ;;  %v15294_v10 = vpop.permute.xlu1 %6937 }
 0x880   : > { %12739 = vpow2.f32 %v5833_v46  ;;  %18519 = vst [vmem:[#allocation94_spill] sm:$0xff] %v15294_v10 }
 0x881   : > { %12741 = vpow2.f32 %v5837_v30 }
 0x882   : > { %12743 = vrcp.f32 %v8601_v2 }
 0x883   : > { %12745 = vrcp.f32 %v8603_v18  ;;  %v15296_v2 = vpop.permute.xlu1 %6949  ;;  %v13909_v18 = vmov 1966171168  }
 0x884   : > { %v12722_v45 = vpop.eup %12721  ;;  %12747 = vrcp.f32 %v8604_v48  ;;  %18520 = vst [vmem:[#allocation95_spill] sm:$0xff] %v15296_v2  ;;  %v5892_v48 = vunpack.c.l.s4 %v13909_v18 }
 0x885   : > { %v12724_v14 = vpop.eup %12723  ;;  %12749 = vrcp.f32 %v8605_v20  ;;  %v5839_v53 = vadd.f32 1.0, %v12722_v45  ;;  %v15300_v20 = vld [vmem:[%s18521_s28] sm:$0xf] }
 0x886   : > { %v12726_v57 = vpop.eup %12725  ;;  %12751 = vrcp.f32 %v8607_v44  ;;  %v5841_v62 = vadd.f32 1.0, %v12724_v14  ;;  %v8488_v14 = vrot.slane %v15300_v20, %v14742_v50 }
 0x887   : > { %v12728_v36 = vpop.eup %12727  ;;  %12753 = vlog2.f32 %v5839_v53  ;;  %v8602_v15 = vadd.f32 1.0, %v12726_v57 }
 0x888   : > { %v12730_v12 = vpop.eup %12729  ;;  %12755 = vlog2.f32 %v5841_v62  ;;  %v5840_v35 = vadd.f32 1.0, %v12728_v36  ;;  %v8496_v36 = vrot.slane %v15300_v20, %v14860_v49 }
 0x889   : > { %v12732_v16 = vpop.eup %12731  ;;  %v5842_v21 = vadd.f32 1.0, %v12730_v12 }
 0x88a   : > { %v12734_v59 = vpop.eup %12733  ;;  %12757 = vlog2.f32 %v5840_v35  ;;  %v5843_v37 = vadd.f32 1.0, %v12732_v16 }
 0x88b   : > { %v12736_v42 = vpop.eup %12735  ;;  %12759 = vlog2.f32 %v5842_v21  ;;  %v5845_v13 = vadd.f32 1.0, %v12734_v59  ;;  %v5893_v59 = vunpack.c.0.s8 %v5892_v48 }
 0x88c   : > { %v12738_v28 = vpop.eup %12737  ;;  %12761 = vlog2.f32 %v5843_v37  ;;  %v8606_v22 = vadd.f32 1.0, %v12736_v42 }
 0x88d   : > { %v12740_v8 = vpop.eup %12739  ;;  %12763 = vlog2.f32 %v5845_v13  ;;  %v15303_v45 = vmul.f32 %v12738_v28, %v15203_v63  ;;  %v5799_v63 = vmax.f32 %v15260_v32, 0.0  ;;  %v15327_v13 = vpop.permute.xlu1 %6961  ;;  %v5801_v28 = vmax.f32 %v15262_v26, 0.0 }
 0x88e   : > { %v12742_v24 = vpop.eup %12741  ;;  %v5844_v46 = vadd.f32 1.0, %v12740_v8  ;;  %12765 = vrcp.f32 %v8602_v15  ;;  %18528 = vst [vmem:[#allocation102_spill] sm:$0xff] %v15327_v13  ;;  %v15331_v32 = vmul.f32 %v8488_v14, %v15171_v33  ;;  %v15335_v15 = vmul.f32 %v8488_v14, %v15174_v60 }
 0x88f   : > { %v12744_v55 = vpop.eup %12743  ;;  %v5846_v30 = vadd.f32 1.0, %v12742_v24  ;;  %18522 = vst [vmem:[#allocation96_spill] sm:$0xff] %v15303_v45  ;;  %12767 = vrcp.f32 %v8606_v22  ;;  %v15342_v26 = vmul.f32 %v8496_v36, %v15184_v7  ;;  %v15443_v45 = vld [vmem:[%s14484_s18] sm:$0xff] }
 0x890   : > { %v12746_v1 = vpop.eup %12745  ;;  %v15308_v57 = vmul.f32 %v12744_v55, %v15207_v54  ;;  %12769 = vlog2.f32 %v5844_v46  ;;  %18529 = vst [vmem:[#allocation103_spill] sm:$0xff] %v15331_v32  ;;  %18530 = vst [vmem:[#allocation104_spill] sm:$0xff] %v15335_v15  ;;  %v15338_v55 = vmul.f32 %v8496_v36, %v15178_v23  ;;  %v15466_v15 = vld [vmem:[%s14484_s18 + $0x28] sm:$0xff] }
 0x891   : > { %v12748_v40 = vpop.eup %12747  ;;  %v15311_v62 = vmul.f32 %v12746_v1, %v15209_v43  ;;  %12771 = vlog2.f32 %v5846_v30  ;;  %v8484_v43 = vrot.slane %v15300_v20, %v14745_v51  ;;  %v5802_v1 = vmax.f32 %v15269_v39, 0.0  ;;  %18532 = vst [vmem:[#allocation106_spill] sm:$0xff] %v15342_v26  ;;  %18553 = vst [vmem:[#allocation125_spill] sm:$0xff] %v15443_v45 }
 0x892   : > { %v12750_v34 = vpop.eup %12749  ;;  %18523 = vst [vmem:[#allocation97_spill] sm:$0xff] %v15308_v57  ;;  %v15316_v35 = vmul.f32 %v12748_v40, %v15211_v6  ;;  %18531 = vst [vmem:[#allocation105_spill] sm:$0xff] %v15338_v55  ;;  %v5805_v39 = vmax.f32 %v15275_v3, 0.0  ;;  %v15453_v55 = vld [vmem:[%s14484_s18 + $0x10] sm:$0xff] }
 0x893   : > { %v12752_v44 = vpop.eup %12751  ;;  %18524 = vst [vmem:[#allocation98_spill] sm:$0xff] %v15311_v62  ;;  %v15320_v21 = vmul.f32 %v12750_v34, %v15215_v0  ;;  %v5800_v0 = vmax.f32 %v15267_v38, 0.0  ;;  %v18533_v34 = vld [vmem:[#allocation77_spill] sm:$0xff]  ;;  %v5803_v38 = vmax.f32 %v15273_v25, 0.0  ;;  %v15349_v48 = vmul.f32 %v8484_v43, %v15187_v56  ;;  %18555 = vst [vmem:[#allocation127_spill] sm:$0xff] %v15453_v55 }
 0x894   : > { %v12754_v53 = vpop.eup %12753  ;;  %18525 = vst [vmem:[#allocation99_spill] sm:$0xff] %v15316_v35  ;;  %v15325_v42 = vmul.f32 %v12752_v44, %v15217_v27  ;;  %v15345_v18 = vsub.s32 %v5893_v59, %v18533_v34  ;;  %v15446_v35 = vld [vmem:[%s14484_s18 + $0x8] sm:$0xff]  ;;  %18558 = vst [vmem:[#allocation130_spill] sm:$0xff] %v15466_v15 }
 0x895   : > { %v12756_v12 = vpop.eup %12755  ;;  %v5848_v16 = vmul.f32 0.6931472, %v12754_v53  ;;  %18526 = vst [vmem:[#allocation100_spill] sm:$0xff] %v15320_v21  ;;  %18535 = vst [vmem:[#allocation107_spill] sm:$0xff] %v15349_v48 }
 0x896   : > { %v5852_v54 = vmul.f32 0.6931472, %v12756_v12  ;;  %18527 = vst [vmem:[#allocation101_spill] sm:$0xff] %v15325_v42  ;;  %18534 = vst [vmem:[#allocation77_spill] sm:$0xff] %v15345_v18  ;;  %v15456_v42 = vld [vmem:[%s14484_s18 + $0x18] sm:$0xff] }
 0x897   : > { %v12758_v37 = vpop.eup %12757  ;;  %v5863_v6 = vadd.f32 %v5848_v16, %v5799_v63  ;;  %18554 = vst [vmem:[#allocation126_spill] sm:$0xff] %v15446_v35  ;;  %18556 = vst [vmem:[#allocation128_spill] sm:$0xff] %v15456_v42 }
 0x898   : > { %v12760_v8 = vpop.eup %12759  ;;  %v5850_v24 = vmul.f32 0.6931472, %v12758_v37  ;;  %v5865_v22 = vadd.f32 %v5852_v54, %v5801_v28  ;;  %v15354_v54 = vpop.permute.xlu1 %6973 }
 0x899   : > { %v12762_v27 = vpop.eup %12761  ;;  %v5854_v46 = vmul.f32 0.6931472, %v12760_v8  ;;  %v6727_v44 = vmul.f32 %v5863_v6, %v15187_v56  ;;  %18536 = vst [vmem:[#allocation108_spill] sm:$0xff] %v15354_v54  ;;  %v15469_v54 = vld [vmem:[%s14484_s18 + $0x30] sm:$0xff] }
 0x89a   : > { %v12764_v40 = vpop.eup %12763  ;;  %v5864_v30 = vadd.f32 %v5850_v24, %v5800_v0  ;;  %v5856_v53 = vmul.f32 0.6931472, %v12762_v27  ;;  %v6729_v59 = vmul.f32 %v5865_v22, %v15191_v58  ;;  %18559 = vst [vmem:[#allocation131_spill] sm:$0xff] %v15469_v54 }
 0x89b   : > { %v5866_v14 = vadd.f32 %v5854_v46, %v5802_v1  ;;  %v5860_v16 = vmul.f32 0.6931472, %v12764_v40  ;;  %v15360_v3 = vpop.eup %12765 }
 0x89c   : > { %v5887_v12 = vcombine.low %v5863_v6, %v5864_v30  ;;  %v5888_v63 = vcombine.high %v5863_v6, %v5864_v30  ;;  %v6728_v36 = vmul.f32 %v5864_v30, %v15171_v33  ;;  %18537 = vst [vmem:[#allocation109_spill] sm:$0xff] %v15360_v3  ;;  %v15364_v46 = vpop.eup %12767  ;;  %v15366_v40 = vadd.f32 %v5856_v53, %v5803_v38 }
 0x89d   : > { %v5889_v37 = vcombine.low %v5865_v22, %v5866_v14  ;;  %v5890_v25 = vcombine.high %v5865_v22, %v5866_v14  ;;  %v6730_v28 = vmul.f32 %v5866_v14, %v15178_v23  ;;  %18538 = vst [vmem:[#allocation110_spill] sm:$0xff] %v15364_v46  ;;  %v15368_v22 = vadd.f32 %v5860_v16, %v5805_v39  ;;  %v12770_v34 = vpop.eup %12769  ;;  %v15391_v39 = vpop.permute.xlu1 %7525 }
 0x89e   : > { %v5897_v8 = vrot.slane %v5887_v12, %v15345_v18  ;;  %v5904_v56 = vrot.slane %v5888_v63, %v15345_v18  ;;  %v6743_v0 = vcombine.low %v6727_v44, %v6728_v36  ;;  %v6744_v24 = vcombine.high %v6727_v44, %v6728_v36  ;;  %18539 = vst [vmem:[#allocation111_spill] sm:$0xff] %v15366_v40  ;;  %v12772_v36 = vpop.eup %12771 }
 0x89f   : > { %v5911_v6 = vrot.slane %v5889_v37, %v15345_v18  ;;  %v5918_v33 = vrot.slane %v5890_v25, %v15345_v18  ;;  %v6745_v27 = vcombine.low %v6729_v59, %v6730_v28  ;;  %v6746_v1 = vcombine.high %v6729_v59, %v6730_v28  ;;  %18540 = vst [vmem:[#allocation112_spill] sm:$0xff] %v15368_v22 }
 0x8a0   : > { %v15371_v23 = vmul.f32 %v8484_v43, %v15181_v17  ;;  %v15375_v30 = vrot.slane %v15300_v20, %v14857_v47  ;;  %v15378_v59 = vrot.slane %v6743_v0, %v15345_v18  ;;  %v15381_v38 = vrot.slane %v6744_v24, %v15345_v18  ;;  %v15389_v20 = vpop.permute.xlu0 %6885  ;;  %18544 = vst [vmem:[#allocation116_spill] sm:$0xff] %v15391_v39 }
 0x8a1   : > { %v5919_v44 = vcombine.low %v5897_v8, %v5911_v6  ;;  %v5920_v14 = vcombine.high %v5897_v8, %v5911_v6  ;;  %v5921_v12 = vcombine.low %v5904_v56, %v5918_v33  ;;  %v5922_v63 = vcombine.high %v5904_v56, %v5918_v33  ;;  %18543 = vst [vmem:[#allocation115_spill] sm:$0xff] %v15389_v20 }
 0x8a2   : > { %18541 = vst [vmem:[#allocation113_spill] sm:$0xff] %v15371_v23  ;;  %18542 = vst [vmem:[#allocation114_spill] sm:$0xff] %v15375_v30  ;;  %v15384_v53 = vrot.slane %v6745_v27, %v15345_v18  ;;  %v15387_v43 = vrot.slane %v6746_v1, %v15345_v18  ;;  %v15399_v8 = vmul.f32 %v15366_v40, %v15181_v17  ;;  %v15411_v27 = vmul.f32 0.6931472, %v12770_v34 }
 0x8a3   : > { %v5929_v16 = vrot.slane %v5919_v44, %v15345_v18  ;;  %v5936_v37 = vrot.slane %v5921_v12, %v15345_v18  ;;  %v5943_v25 = vrot.slane %v5920_v14, %v15345_v18  ;;  %v5950_v28 = vrot.slane %v5922_v63, %v15345_v18  ;;  %v15432_v12 = vpop.permute.xlu1 %7533 }
 0x8a4   : > { %18545 = vst [vmem:[#allocation117_spill] sm:$0xff] %v15399_v8  ;;  %v15405_v24 = vmul.f32 %v15375_v30, %v15195_v61  ;;  %v15409_v33 = vmul.f32 %v15368_v22, %v15195_v61  ;;  %18548 = vst [vmem:[#allocation120_spill] sm:$0xff] %v15411_v27  ;;  %v15413_v1 = vmul.f32 0.6931472, %v12772_v36  ;;  %v15430_v3 = vpop.permute.xlu0 %6909 }
 0x8a5   : > { %v5951_v6 = vcombine.high %v5929_v16, %v5929_v16  ;;  %v5953_v44 = vcombine.high %v5943_v25, %v5943_v25  ;;  %v5952_v63 = vcombine.high %v5936_v37, %v5936_v37  ;;  %v15421_v0 = vcombine.high %v5950_v28, %v5950_v28  ;;  %18551 = vst [vmem:[#allocation123_spill] sm:$0xff] %v15430_v3 }
 0x8a6   : > { %18546 = vst [vmem:[#allocation118_spill] sm:$0xff] %v15405_v24  ;;  %18547 = vst [vmem:[#allocation119_spill] sm:$0xff] %v15409_v33  ;;  %v6026_v61 = vrot.slane %v5929_v16, %v14745_v51  ;;  %v6030_v36 = vrot.slane %v5929_v16, %v14742_v50  ;;  %v6034_v56 = vrot.slane %v5929_v16, %v14857_v47 }
 0x8a7   : > { %18549 = vst [vmem:[#allocation121_spill] sm:$0xff] %v15413_v1  ;;  %18550 = vst [vmem:[#allocation122_spill] sm:$0xff] %v15421_v0  ;;  %v6038_v17 = vrot.slane %v5929_v16, %v14860_v49  ;;  %v6042_v14 = vrot.slane %v5943_v25, %v14745_v51  ;;  %v6046_v5 = vrot.slane %v5943_v25, %v14742_v50  ;;  %v15492_v8 = vpop.permute.xlu1 %7541 }
 0x8a8   : > { %18552 = vst [vmem:[#allocation124_spill] sm:$0xff] %v15432_v12  ;;  %v6050_v34 = vrot.slane %v5943_v25, %v14857_v47  ;;  %v6054_v30 = vrot.slane %v5943_v25, %v14860_v49  ;;  %v6058_v58 = vrot.slane %v5951_v6, %v14745_v51  ;;  %v6062_v24 = vrot.slane %v5951_v6, %v14742_v50  ;;  %v15490_v0 = vpop.permute.xlu0 %6921 }
 0x8a9   : > { %v6066_v16 = vrot.slane %v5951_v6, %v14857_v47  ;;  %v6070_v46 = vrot.slane %v5951_v6, %v14860_v49  ;;  %v6074_v29 = vrot.slane %v5953_v44, %v14745_v51  ;;  %v6078_v48 = vrot.slane %v5953_v44, %v14742_v50  ;;  %v15459_v6 = vld [vmem:[%s14484_s18 + $0x20] sm:$0xff]  ;;  %18565 = vst [vmem:[#allocation137_spill] sm:$0xff] %v15490_v0 }
 0x8aa   : > { %v6082_v25 = vrot.slane %v5953_v44, %v14857_v47  ;;  %v6086_v23 = vrot.slane %v5953_v44, %v14860_v49  ;;  %v6090_v62 = vrot.slane %v5936_v37, %v14745_v51  ;;  %18557 = vst [vmem:[#allocation129_spill] sm:$0xff] %v15459_v6  ;;  %v6094_v26 = vrot.slane %v5936_v37, %v14742_v50  ;;  %v15472_v44 = vld [vmem:[%s14484_s18 + $0x38] sm:$0xff] }
 0x8ab   : > { %v6098_v57 = vrot.slane %v5936_v37, %v14857_v47  ;;  %v6102_v32 = vrot.slane %v5936_v37, %v14860_v49  ;;  %v6106_v21 = vrot.slane %v5950_v28, %v14745_v51  ;;  %18560 = vst [vmem:[#allocation132_spill] sm:$0xff] %v15472_v44  ;;  %v6110_v13 = vrot.slane %v5950_v28, %v14742_v50  ;;  %v15522_v39 = vpop.permute.xlu1 %7549 }
 0x8ac   : > { %v6114_v2 = vrot.slane %v5950_v28, %v14857_v47  ;;  %v6118_v10 = vrot.slane %v5950_v28, %v14860_v49  ;;  %v15478_v52 = vrot.slane %v5952_v63, %v14745_v51  ;;  %v15481_v41 = vrot.slane %v5952_v63, %v14742_v50  ;;  %18566 = vst [vmem:[#allocation138_spill] sm:$0xff] %v15492_v8 }
 0x8ad   : > { %v15484_v37 = vrot.slane %v5952_v63, %v14857_v47  ;;  %v15487_v3 = vrot.slane %v5952_v63, %v14860_v49  ;;  %v6343_v33 = vmul.f32 %v6026_v61, %v15443_v45  ;;  %v6344_v28 = vmul.f32 %v6030_v36, %v15446_v35  ;;  %18568 = vst [vmem:[#allocation140_spill] sm:$0xff] %v15522_v39 }
 0x8ae   : > { %18561 = vst [vmem:[#allocation133_spill] sm:$0xff] %v15478_v52  ;;  %18562 = vst [vmem:[#allocation134_spill] sm:$0xff] %v15481_v41  ;;  %v6345_v7 = vmul.f32 %v6034_v56, %v15453_v55  ;;  %v6346_v52 = vmul.f32 %v6038_v17, %v15456_v42  ;;  %v6347_v41 = vmul.f32 %v6026_v61, %v15459_v6 }
 0x8af   : > { %18563 = vst [vmem:[#allocation135_spill] sm:$0xff] %v15484_v37  ;;  %18564 = vst [vmem:[#allocation136_spill] sm:$0xff] %v15487_v3  ;;  %v6348_v22 = vmul.f32 %v6030_v36, %v15466_v15  ;;  %v6349_v37 = vmul.f32 %v6034_v56, %v15469_v54  ;;  %v6350_v63 = vmul.f32 %v6038_v17, %v15472_v44 }
 0x8b0   : > { %v6351_v3 = vmul.f32 %v6042_v14, %v15443_v45  ;;  %v6352_v0 = vmul.f32 %v6046_v5, %v15446_v35  ;;  %v6353_v8 = vmul.f32 %v6050_v34, %v15453_v55  ;;  %v6354_v60 = vmul.f32 %v6054_v30, %v15456_v42 }
 0x8b1   : > { %v6355_v40 = vmul.f32 %v6042_v14, %v15459_v6  ;;  %v6356_v1 = vmul.f32 %v6046_v5, %v15466_v15  ;;  %v6357_v61 = vmul.f32 %v6050_v34, %v15469_v54  ;;  %v6358_v36 = vmul.f32 %v6054_v30, %v15472_v44  ;;  %v15520_v30 = vpop.permute.xlu0 %6933 }
 0x8b2   : > { %v6359_v56 = vmul.f32 %v6058_v58, %v15443_v45  ;;  %v6360_v17 = vmul.f32 %v6062_v24, %v15446_v35  ;;  %v6361_v9 = vmul.f32 %v6066_v16, %v15453_v55  ;;  %v6362_v27 = vmul.f32 %v6070_v46, %v15456_v42  ;;  %18567 = vst [vmem:[#allocation139_spill] sm:$0xff] %v15520_v30 }
 0x8b3   : > { %v6363_v11 = vmul.f32 %v6058_v58, %v15459_v6  ;;  %v6364_v12 = vmul.f32 %v6062_v24, %v15466_v15  ;;  %v6365_v14 = vmul.f32 %v6066_v16, %v15469_v54  ;;  %v6366_v5 = vmul.f32 %v6070_v46, %v15472_v44 }
 0x8b4   : > { %v15518_v34 = vmul.f32 %v6074_v29, %v15443_v45  ;;  %v6368_v4 = vmul.f32 %v6078_v48, %v15446_v35  ;;  %v6369_v19 = vmul.f32 %v6082_v25, %v15453_v55  ;;  %v6370_v31 = vmul.f32 %v6086_v23, %v15456_v42 }
 0x8b5   : > { %v6371_v58 = vmul.f32 %v6074_v29, %v15459_v6  ;;  %v6372_v24 = vmul.f32 %v6078_v48, %v15466_v15  ;;  %v15530_v16 = vmul.f32 %v6082_v25, %v15469_v54  ;;  %v15533_v46 = vmul.f32 %v6086_v23, %v15472_v44 }
 0x8b6   : > { %v15536_v30 = vmul.f32 %v6090_v62, %v15443_v45  ;;  %v15539_v39 = vmul.f32 %v6094_v26, %v15446_v35  ;;  %v15542_v20 = vmul.f32 %v6098_v57, %v15453_v55  ;;  %v15545_v49 = vmul.f32 %v6102_v32, %v15456_v42 }
 0x8b7   : > { %v15548_v29 = vmul.f32 %v6090_v62, %v15459_v6  ;;  %v15551_v48 = vmul.f32 %v6094_v26, %v15466_v15  ;;  %v15554_v23 = vmul.f32 %v6098_v57, %v15469_v54  ;;  %v15557_v25 = vmul.f32 %v6102_v32, %v15472_v44 }
 0x8b8   : > { %v15560_v47 = vmul.f32 %v6106_v21, %v15443_v45  ;;  %v15563_v50 = vmul.f32 %v6110_v13, %v15446_v35  ;;  %v15566_v51 = vmul.f32 %v6114_v2, %v15453_v55  ;;  %v6471_v62 = vmul.f32 1.442695, %v6343_v33  ;;  %v15577_v45 = vpop.permute.xlu0 %6945 }
 0x8b9   : > { %18569 = vst [vmem:[#allocation141_spill] sm:$0xff] %v15548_v29  ;;  %18570 = vst [vmem:[#allocation142_spill] sm:$0xff] %v15557_v25  ;;  %v6473_v29 = vmul.f32 1.442695, %v6344_v28  ;;  %v15569_v26 = vmul.f32 %v6118_v10, %v15456_v42  ;;  %v15572_v57 = vmul.f32 %v6106_v21, %v15459_v6  ;;  %v15575_v32 = vmul.f32 %v6110_v13, %v15466_v15 }
 0x8ba   : > { %18571 = vst [vmem:[#allocation143_spill] sm:$0xff] %v15560_v47  ;;  %v6475_v25 = vmul.f32 1.442695, %v6345_v7  ;;  %18572 = vst [vmem:[#allocation144_spill] sm:$0xff] %v15577_v45  ;;  %v15579_v47 = vpop.permute.xlu1 %7557  ;;  %v15582_v35 = vmul.f32 %v6114_v2, %v15469_v54  ;;  %v15585_v33 = vmul.f32 %v6118_v10, %v15472_v44  ;;  %v6477_v28 = vmul.f32 1.442695, %v6346_v52 }
 0x8bb   : > { %18573 = vst [vmem:[#allocation145_spill] sm:$0xff] %v15579_v47  ;;  %v18574_v21 = vcombine.low %v15378_v59, %v15384_v53  ;;  %12773 = vpow2.f32 %v6471_v62  ;;  %v6479_v13 = vmul.f32 1.442695, %v6347_v41  ;;  %v6481_v7 = vmul.f32 1.442695, %v6348_v22 }
 0x8bc   : > { %v18576_v47 = vcombine.low %v15381_v38, %v15387_v43  ;;  %12775 = vpow2.f32 %v6473_v29  ;;  %v6483_v2 = vmul.f32 1.442695, %v6349_v37  ;;  %v6485_v10 = vmul.f32 1.442695, %v6350_v63 }
 0x8bd   : > { %v15591_v6 = vrot.slane %v18574_v21, %v15345_v18  ;;  %v6487_v44 = vmul.f32 1.442695, %v6351_v3  ;;  %12777 = vpow2.f32 %v6475_v25  ;;  %v6489_v52 = vmul.f32 1.442695, %v6352_v0 }
 0x8be   : > { %v15597_v15 = vrot.slane %v18576_v47, %v15345_v18  ;;  %v6491_v54 = vmul.f32 1.442695, %v6353_v8  ;;  %v6493_v45 = vmul.f32 1.442695, %v6354_v60  ;;  %12779 = vpow2.f32 %v6477_v28  ;;  %v15601_v47 = vpop.permute.xlu1 %7565 }
 0x8bf   : > { %18575 = vst [vmem:[#allocation146_spill] sm:$0xff] %v15591_v6  ;;  %v6495_v21 = vmul.f32 1.442695, %v6355_v40  ;;  %v6497_v42 = vmul.f32 1.442695, %v6356_v1  ;;  %12781 = vpow2.f32 %v6479_v13  ;;  %v15599_v6 = vpop.permute.xlu0 %6957  ;;  %18578 = vst [vmem:[#allocation148_spill] sm:$0xff] %v15601_v47 }
 0x8c0   : > { %v6499_v62 = vmul.f32 1.442695, %v6357_v61  ;;  %v6501_v41 = vmul.f32 1.442695, %v6358_v36  ;;  %v6503_v22 = vmul.f32 1.442695, %v6359_v56  ;;  %12783 = vpow2.f32 %v6481_v7 }
 0x8c1   : > { %v6505_v55 = vmul.f32 1.442695, %v6360_v17  ;;  %18577 = vst [vmem:[#allocation147_spill] sm:$0xff] %v15599_v6  ;;  %v6507_v37 = vmul.f32 1.442695, %v6361_v9  ;;  %12785 = vpow2.f32 %v6483_v2  ;;  %v18608_v6 = vld [vmem:[#allocation115_spill] sm:$0xff] }
 0x8c2   : > { %v15603_v63 = vmul.f32 1.442695, %v6362_v27  ;;  %v15605_v3 = vmul.f32 1.442695, %v6363_v11  ;;  %v15607_v60 = vmul.f32 1.442695, %v6364_v12  ;;  %12787 = vpow2.f32 %v6485_v10  ;;  %v15646_v17 = vpop.permute.xlu1 %7573 }
 0x8c3   : > { %v15609_v40 = vmul.f32 1.442695, %v6365_v14  ;;  %v15611_v8 = vmul.f32 1.442695, %v6366_v5  ;;  %v15614_v0 = vmul.f32 1.442695, %v15518_v34  ;;  %12789 = vpow2.f32 %v6487_v44  ;;  %v15644_v44 = vpop.permute.xlu0 %6969 }
 0x8c4   : > { %v15616_v1 = vmul.f32 1.442695, %v6368_v4  ;;  %v15618_v61 = vmul.f32 1.442695, %v6369_v19  ;;  %v15620_v9 = vmul.f32 1.442695, %v6370_v31  ;;  %12791 = vpow2.f32 %v6489_v52 }
 0x8c5   : > { %v15622_v11 = vmul.f32 1.442695, %v6371_v58  ;;  %v15624_v27 = vmul.f32 1.442695, %v6372_v24  ;;  %v15627_v12 = vmul.f32 1.442695, %v15530_v16  ;;  %12793 = vpow2.f32 %v6491_v54 }
 0x8c6   : > { %v15630_v36 = vmul.f32 1.442695, %v15533_v46  ;;  %v15633_v56 = vmul.f32 1.442695, %v15536_v30  ;;  %v15636_v19 = vmul.f32 1.442695, %v15539_v39  ;;  %12795 = vpow2.f32 %v6493_v45 }
 0x8c7   : > { %v15639_v31 = vmul.f32 1.442695, %v15542_v20  ;;  %v15642_v4 = vmul.f32 1.442695, %v15545_v49  ;;  %18579 = vst [vmem:[#allocation149_spill] sm:$0xff] %v15644_v44  ;;  %18580 = vst [vmem:[#allocation150_spill] sm:$0xff] %v15646_v17  ;;  %12797 = vpow2.f32 %v6495_v21  ;;  %v18584_v46 = vcombine.high %v15378_v59, %v15384_v53  ;;  %v15706_v10 = vpop.permute.xlu0 %7521 }
 0x8c8   : > { %v18581_v14 = vld [vmem:[#allocation141_spill] sm:$0xff]  ;;  %v15652_v34 = vmul.f32 1.442695, %v15551_v48  ;;  %v15655_v54 = vmul.f32 1.442695, %v15554_v23  ;;  %v18582_v20 = vld [vmem:[#allocation142_spill] sm:$0xff]  ;;  %v15666_v45 = vpop.eup %12773  ;;  %12799 = vpow2.f32 %v6497_v42  ;;  %v18589_v59 = vcombine.high %v15381_v38, %v15387_v43  ;;  %v15708_v38 = vpop.permute.xlu1 %7581 }
 0x8c9   : > { %v15649_v5 = vmul.f32 1.442695, %v18581_v14  ;;  %v15658_v39 = vmul.f32 1.442695, %v18582_v20  ;;  %v18583_v49 = vld [vmem:[#allocation143_spill] sm:$0xff]  ;;  %v6799_v29 = vrot.slane %v18584_v46, %v15345_v18  ;;  %v12776_v48 = vpop.eup %12775  ;;  %12801 = vpow2.f32 %v6499_v62  ;;  %18595 = vst [vmem:[#allocation153_spill] sm:$0xff] %v15706_v10 }
 0x8ca   : > { %v15661_v30 = vmul.f32 1.442695, %v18583_v49  ;;  %v15664_v58 = vmul.f32 1.442695, %v15563_v50  ;;  %v15669_v24 = vmul.f32 1.442695, %v15566_v51  ;;  %v12778_v51 = vpop.eup %12777  ;;  %12803 = vpow2.f32 %v6501_v41 }
 0x8cb   : > { %v15672_v16 = vmul.f32 1.442695, %v15569_v26  ;;  %v15679_v23 = vmul.f32 1.442695, %v15572_v57  ;;  %v15682_v50 = vmul.f32 1.442695, %v15575_v32  ;;  %v15694_v53 = vrot.slane %v18589_v59, %v15345_v18  ;;  %v12780_v28 = vpop.eup %12779 }
 0x8cc   : > { %v15685_v42 = vmul.f32 1.442695, %v15582_v35  ;;  %v15688_v25 = vmul.f32 1.442695, %v15585_v33  ;;  %v18591_v26 = vld [vmem:[#allocation146_spill] sm:$0xff]  ;;  %12805 = vpow2.f32 %v6503_v22  ;;  %v15700_v35 = vcombine.high %v15597_v15, %v15597_v15  ;;  %v18593_v32 = vld [vmem:[#allocation79_spill] sm:$0xff]  ;;  %v12782_v2 = vpop.eup %12781 }
 0x8cd   : > { %18585 = vst [vmem:[#allocation141_spill] sm:$0xff] %v15679_v23  ;;  %18586 = vst [vmem:[#allocation142_spill] sm:$0xff] %v15682_v50  ;;  %v6807_v57 = vcombine.high %v18591_v26, %v18591_v26  ;;  %v7074_v13 = vrot.slane %v18591_v26, %v18593_v32  ;;  %v18594_v33 = vld [vmem:[#allocation78_spill] sm:$0xff]  ;;  %12807 = vpow2.f32 %v6505_v55  ;;  %v15710_v43 = vcombine.high %v6799_v29, %v6799_v29  ;;  %v18598_v52 = vld [vmem:[#allocation80_spill] sm:$0xff]  ;;  %v12784_v22 = vpop.eup %12783 }
 0x8ce   : > { %18587 = vst [vmem:[#allocation143_spill] sm:$0xff] %v15685_v42  ;;  %18588 = vst [vmem:[#allocation151_spill] sm:$0xff] %v15688_v25  ;;  %v7078_v7 = vrot.slane %v18591_v26, %v18594_v33  ;;  %v7082_v21 = vrot.slane %v18591_v26, %v18598_v52  ;;  %v18599_v62 = vld [vmem:[#allocation81_spill] sm:$0xff]  ;;  %12809 = vpow2.f32 %v6507_v37  ;;  %v15717_v14 = vrot.slane %v6799_v29, %v18593_v32  ;;  %v12786_v55 = vpop.eup %12785 }
 0x8cf   : > { %18590 = vst [vmem:[#allocation152_spill] sm:$0xff] %v15694_v53  ;;  %18592 = vst [vmem:[#allocation146_spill] sm:$0xff] %v15700_v35  ;;  %v7086_v41 = vrot.slane %v18591_v26, %v18599_v62  ;;  %v15720_v20 = vrot.slane %v6799_v29, %v18594_v33  ;;  %v15723_v49 = vrot.slane %v6799_v29, %v18598_v52  ;;  %12811 = vpow2.f32 %v15603_v63  ;;  %v12788_v26 = vpop.eup %12787  ;;  %v18612_v53 = vld [vmem:[#allocation88_spill] sm:$0xff] }
 0x8d0   : > { %18596 = vst [vmem:[#allocation154_spill] sm:$0xff] %v15708_v38  ;;  %18597 = vst [vmem:[#allocation155_spill] sm:$0xff] %v15710_v43  ;;  %v15727_v46 = vrot.slane %v6799_v29, %v18599_v62  ;;  %v15730_v59 = vrot.slane %v6807_v57, %v18593_v32  ;;  %v15733_v37 = vrot.slane %v6807_v57, %v18594_v33  ;;  %12813 = vpow2.f32 %v15605_v3  ;;  %v12790_v29 = vpop.eup %12789 }
 0x8d1   : > { %v15737_v38 = vrot.slane %v6807_v57, %v18598_v52  ;;  %v15740_v17 = vrot.slane %v6807_v57, %v18599_v62  ;;  %v15744_v63 = vrot.slane %v15597_v15, %v18593_v32  ;;  %12815 = vpow2.f32 %v15607_v60  ;;  %v12792_v57 = vpop.eup %12791 }
 0x8d2   : > { %18600 = vst [vmem:[#allocation156_spill] sm:$0xff] %v15730_v59  ;;  %18601 = vst [vmem:[#allocation157_spill] sm:$0xff] %v15733_v37  ;;  %v15749_v47 = vrot.slane %v15597_v15, %v18594_v33  ;;  %v15753_v3 = vrot.slane %v15597_v15, %v18598_v52  ;;  %v15757_v44 = vrot.slane %v15597_v15, %v18599_v62  ;;  %12817 = vpow2.f32 %v15609_v40  ;;  %v15763_v37 = vpop.permute.xlu0 %7529  ;;  %v18611_v15 = vld [vmem:[#allocation82_spill] sm:$0xff] }
 0x8d3   : > { %18602 = vst [vmem:[#allocation158_spill] sm:$0xff] %v15737_v38  ;;  %18603 = vst [vmem:[#allocation159_spill] sm:$0xff] %v15740_v17  ;;  %v7392_v17 = vmul.f32 %v7078_v7, %v18608_v6  ;;  %v7393_v60 = vmul.f32 %v7082_v21, %v18608_v6  ;;  %v12794_v38 = vpop.eup %12793  ;;  %12819 = vpow2.f32 %v15611_v8  ;;  %v7396_v59 = vmul.f32 %v7078_v7, %v18611_v15 }
 0x8d4   : > { %18604 = vst [vmem:[#allocation160_spill] sm:$0xff] %v15744_v63  ;;  %18605 = vst [vmem:[#allocation161_spill] sm:$0xff] %v15749_v47  ;;  %v7391_v63 = vmul.f32 %v7074_v13, %v18608_v6  ;;  %v15765_v47 = vpop.permute.xlu1 %6985  ;;  %v12796_v40 = vpop.eup %12795  ;;  %12821 = vpow2.f32 %v15614_v0  ;;  %v7397_v35 = vmul.f32 %v7082_v21, %v18611_v15  ;;  %v7398_v43 = vmul.f32 %v7086_v41, %v18611_v15 }
 0x8d5   : > { %18606 = vst [vmem:[#allocation162_spill] sm:$0xff] %v15753_v3  ;;  %18607 = vst [vmem:[#allocation163_spill] sm:$0xff] %v15757_v44  ;;  %v7394_v3 = vmul.f32 %v7086_v41, %v18608_v6  ;;  %v7395_v44 = vmul.f32 %v7074_v13, %v18611_v15  ;;  %v7399_v25 = vmul.f32 %v15717_v14, %v18612_v53  ;;  %v12798_v62 = vpop.eup %12797  ;;  %12823 = vpow2.f32 %v15616_v1 }
 0x8d6   : > { %18609 = vst [vmem:[#allocation115_spill] sm:$0xff] %v15763_v37  ;;  %18610 = vst [vmem:[#allocation164_spill] sm:$0xff] %v15765_v47  ;;  %v15779_v6 = vmul.f32 %v15720_v20, %v18612_v53  ;;  %v7647_v8 = vmul.f32 0.0, %v15666_v45  ;;  %v7648_v13 = vmul.f32 0.0, %v12776_v48  ;;  %v12800_v7 = vpop.eup %12799  ;;  %12825 = vpow2.f32 %v15618_v61  ;;  %v15789_v61 = vpop.permute.xlu0 %7537 }
 0x8d7   : > { %v7649_v0 = vmul.f32 0.0, %v12778_v51  ;;  %v7650_v21 = vmul.f32 0.0, %v12780_v28  ;;  %v7651_v47 = vmul.f32 0.0, %v12782_v2  ;;  %v12802_v41 = vpop.eup %12801  ;;  %12827 = vpow2.f32 %v15620_v9  ;;  %18613 = vst [vmem:[#allocation82_spill] sm:$0xff] %v15789_v61  ;;  %v18667_v61 = vld [vmem:[#allocation142_spill] sm:$0xff] }
 0x8d8   : > { %v7652_v15 = vmul.f32 0.0, %v12784_v22  ;;  %v7653_v42 = vmul.f32 0.0, %v12786_v55  ;;  %v7654_v52 = vmul.f32 0.0, %v12788_v26  ;;  %v12804_v1 = vpop.eup %12803  ;;  %12829 = vpow2.f32 %v15622_v11  ;;  %v15791_v51 = vpop.permute.xlu1 %6997 }
 0x8d9   : > { %v7401_v50 = vmul.f32 %v15723_v49, %v18612_v53  ;;  %v7655_v45 = vadd.f32 %v7647_v8, %v7391_v63  ;;  %v7657_v48 = vadd.f32 %v7649_v0, %v7393_v60  ;;  %v15787_v23 = vpop.eup %12805  ;;  %18614 = vst [vmem:[#allocation88_spill] sm:$0xff] %v15791_v51  ;;  %12831 = vpow2.f32 %v15624_v27  ;;  %v18618_v60 = vld [vmem:[#allocation91_spill] sm:$0xff] }
 0x8da   : > { %v7402_v9 = vmul.f32 %v15727_v46, %v18612_v53  ;;  %v15796_v28 = vadd.f32 %v7648_v13, %v7392_v17  ;;  %v7659_v2 = vadd.f32 %v7651_v47, %v7395_v44  ;;  %v12808_v11 = vpop.eup %12807  ;;  %12833 = vpow2.f32 %v15627_v12 }
 0x8db   : > { %v15799_v22 = vadd.f32 %v7650_v21, %v7394_v3  ;;  %v15801_v55 = vadd.f32 %v7652_v15, %v7396_v59  ;;  %v7661_v26 = vadd.f32 %v7653_v42, %v7397_v35  ;;  %v12810_v63 = vpop.eup %12809  ;;  %12835 = vpow2.f32 %v15630_v36 }
 0x8dc   : > { %18615 = vst [vmem:[#allocation165_spill] sm:$0xff] %v15796_v28  ;;  %v7403_v27 = vmul.f32 %v15717_v14, %v18618_v60  ;;  %v15806_v8 = vadd.f32 %v7654_v52, %v7398_v43  ;;  %v7699_v53 = vmul.f32 %v12790_v29, %v7655_v45  ;;  %v12812_v17 = vpop.eup %12811  ;;  %12837 = vpow2.f32 %v15633_v56 }
 0x8dd   : > { %18616 = vst [vmem:[#allocation166_spill] sm:$0xff] %v15799_v22  ;;  %18617 = vst [vmem:[#allocation167_spill] sm:$0xff] %v15801_v55  ;;  %v7404_v47 = vmul.f32 %v15720_v20, %v18618_v60  ;;  %v7405_v12 = vmul.f32 %v15723_v49, %v18618_v60  ;;  %v7701_v44 = vmul.f32 %v12794_v38, %v7657_v48  ;;  %v15813_v42 = vpop.eup %12813  ;;  %12839 = vpow2.f32 %v15636_v19  ;;  %v15826_v49 = vpop.permute.xlu0 %7545 }
 0x8de   : > { %18619 = vst [vmem:[#allocation91_spill] sm:$0xff] %v15806_v8  ;;  %18620 = vst [vmem:[#allocation168_spill] sm:$0xff] %v15813_v42  ;;  %v7406_v36 = vmul.f32 %v15727_v46, %v18618_v60  ;;  %v7700_v35 = vmul.f32 %v12792_v57, %v15796_v28  ;;  %v7703_v43 = vmul.f32 %v12798_v62, %v7659_v2  ;;  %v15819_v52 = vpop.eup %12815  ;;  %12841 = vpow2.f32 %v15639_v31  ;;  %v15828_v19 = vpop.permute.xlu1 %7009  ;;  %v18645_v60 = vld [vmem:[#allocation90_spill] sm:$0xff] }
 0x8df   : > { %18621 = vst [vmem:[#allocation169_spill] sm:$0xff] %v15819_v52  ;;  %v7702_v56 = vmul.f32 %v12796_v40, %v15799_v22  ;;  %v7704_v14 = vmul.f32 %v12800_v7, %v15801_v55  ;;  %v7705_v20 = vmul.f32 %v12802_v41, %v7661_v26  ;;  %v15824_v38 = vpop.eup %12817  ;;  %18623 = vst [vmem:[#allocation171_spill] sm:$0xff] %v15826_v49  ;;  %12843 = vpow2.f32 %v15642_v4  ;;  %v18677_v55 = vld [vmem:[#allocation133_spill] sm:$0xff]  ;;  %v18678_v28 = vld [vmem:[#allocation126_spill] sm:$0xff] }
 0x8e0   : > { %18622 = vst [vmem:[#allocation170_spill] sm:$0xff] %v15824_v38  ;;  %18624 = vst [vmem:[#allocation172_spill] sm:$0xff] %v15828_v19  ;;  %v7706_v46 = vmul.f32 %v12804_v1, %v15806_v8  ;;  %v7707_v62 = vadd.f32 %v7699_v53, %v7399_v25  ;;  %v7709_v59 = vadd.f32 %v7701_v44, %v7401_v50  ;;  %v15832_v29 = vpop.eup %12819  ;;  %12845 = vpow2.f32 %v15649_v5  ;;  %v18630_v25 = vld [vmem:[#allocation116_spill] sm:$0xff]  ;;  %v18647_v53 = vld [vmem:[#allocation121_spill] sm:$0xff] }
 0x8e1   : > { %18625 = vst [vmem:[#allocation173_spill] sm:$0xff] %v15832_v29  ;;  %v15836_v31 = vmul.f32 %v7655_v45, %v15706_v10  ;;  %v15838_v3 = vadd.f32 %v7703_v43, %v7403_v27  ;;  %v15840_v57 = vadd.f32 %v7705_v20, %v7405_v12  ;;  %v15842_v40 = vpop.eup %12821  ;;  %12847 = vpow2.f32 %v15652_v34  ;;  %v18639_v1 = vld [vmem:[#allocation124_spill] sm:$0xff]  ;;  %v15893_v44 = vpop.permute.xlu0 %7553  ;;  %v18664_v8 = vld [vmem:[#allocation141_spill] sm:$0xff] }
 0x8e2   : > { %v15846_v4 = vmul.f32 %v7657_v48, %v15706_v10  ;;  %v15849_v50 = vmul.f32 %v7659_v2, %v18630_v25  ;;  %v15852_v13 = vadd.f32 %v7700_v35, %v15779_v6  ;;  %v15854_v5 = vpop.eup %12823  ;;  %12849 = vpow2.f32 %v15655_v54  ;;  %v18644_v2 = vld [vmem:[#allocation120_spill] sm:$0xff]  ;;  %v18679_v10 = vld [vmem:[#allocation134_spill] sm:$0xff] }
 0x8e3   : > { %18626 = vst [vmem:[#allocation174_spill] sm:$0xff] %v15836_v31  ;;  %18627 = vst [vmem:[#allocation175_spill] sm:$0xff] %v15838_v3  ;;  %v15858_v7 = vmul.f32 %v7661_v26, %v18630_v25  ;;  %v15860_v0 = vadd.f32 %v7702_v56, %v7402_v9  ;;  %v15862_v21 = vadd.f32 %v7704_v14, %v7404_v47  ;;  %v15864_v34 = vpop.eup %12825  ;;  %12851 = vpow2.f32 %v15658_v39  ;;  %v18642_v9 = vld [vmem:[#allocation89_spill] sm:$0xff] }
 0x8e4   : > { %18628 = vst [vmem:[#allocation176_spill] sm:$0xff] %v15840_v57  ;;  %18629 = vst [vmem:[#allocation177_spill] sm:$0xff] %v15846_v4  ;;  %v15867_v41 = vadd.f32 %v7706_v46, %v7406_v36  ;;  %v15870_v6 = vmul.f32 %v7707_v62, %v15763_v37  ;;  %v15873_v15 = vmul.f32 %v7709_v59, %v15763_v37  ;;  %v15875_v54 = vpop.eup %12827  ;;  %v18643_v39 = vmax.f32 %v18642_v9, 0.0  ;;  %v15895_v36 = vpop.permute.xlu1 %7021  ;;  %v18652_v46 = vld [vmem:[#allocation111_spill] sm:$0xff]  ;;  %v18676_v37 = vld [vmem:[#allocation125_spill] sm:$0xff] }
 0x8e5   : > { %18631 = vst [vmem:[#allocation178_spill] sm:$0xff] %v15849_v50  ;;  %18632 = vst [vmem:[#allocation179_spill] sm:$0xff] %v15852_v13  ;;  %v15879_v45 = vmul.f32 %v15838_v3, %v18639_v1  ;;  %v15883_v48 = vmul.f32 %v15840_v57, %v18639_v1  ;;  %v18646_v27 = vmax.f32 %v18645_v60, 0.0  ;;  %v15891_v12 = vpop.eup %12829  ;;  %12853 = vpow2.f32 %v15661_v30  ;;  %v18672_v1 = vld [vmem:[#allocation81_spill] sm:$0xff] }
 0x8e6   : > { %18633 = vst [vmem:[#allocation180_spill] sm:$0xff] %v15858_v7  ;;  %18634 = vst [vmem:[#allocation181_spill] sm:$0xff] %v15860_v0  ;;  %v5868_v26 = vadd.f32 %v18644_v2, %v18643_v39  ;;  %v15899_v35 = vmul.f32 %v15787_v23, %v7707_v62  ;;  %v15902_v43 = vmul.f32 %v12808_v11, %v15852_v13  ;;  %v15906_v14 = vpop.eup %12831  ;;  %v18653_v2 = vld [vmem:[#allocation83_spill] sm:$0xff]  ;;  %12855 = vpow2.f32 %v15664_v58  ;;  %v18655_v23 = vld [vmem:[#allocation112_spill] sm:$0xff] }
 0x8e7   : > { %18635 = vst [vmem:[#allocation182_spill] sm:$0xff] %v15862_v21  ;;  %18636 = vst [vmem:[#allocation183_spill] sm:$0xff] %v15867_v41  ;;  %v5870_v47 = vadd.f32 %v18647_v53, %v18646_v27  ;;  %v15904_v56 = vmul.f32 %v12810_v63, %v7709_v59  ;;  %v15909_v20 = vmul.f32 %v12812_v17, %v15860_v0  ;;  %v15914_v30 = vpop.eup %12833  ;;  %v18656_v62 = vld [vmem:[#allocation84_spill] sm:$0xff]  ;;  %12857 = vpow2.f32 %v15669_v24  ;;  %v15946_v24 = vpop.permute.xlu0 %7561 }
 0x8e8   : > { %18637 = vst [vmem:[#allocation184_spill] sm:$0xff] %v15870_v6  ;;  %18638 = vst [vmem:[#allocation185_spill] sm:$0xff] %v15873_v15  ;;  %v5955_v9 = vcombine.low %v18652_v46, %v5868_v26  ;;  %v5956_v39 = vcombine.high %v18652_v46, %v5868_v26  ;;  %v6732_v60 = vmul.f32 %v5868_v26, %v18653_v2  ;;  %v15920_v27 = vpop.eup %12835  ;;  %v18659_v26 = vld [vmem:[#allocation122_spill] sm:$0xff]  ;;  %12859 = vpow2.f32 %v15672_v16 }
 0x8e9   : > { %18640 = vst [vmem:[#allocation186_spill] sm:$0xff] %v15879_v45  ;;  %18641 = vst [vmem:[#allocation187_spill] sm:$0xff] %v15883_v48  ;;  %v5957_v11 = vcombine.low %v18655_v23, %v5870_v47  ;;  %v5958_v63 = vcombine.high %v18655_v23, %v5870_v47  ;;  %v6734_v59 = vmul.f32 %v5870_v47, %v18656_v62  ;;  %v18658_v48 = vld [vmem:[#allocation117_spill] sm:$0xff]  ;;  %v15929_v15 = vpop.eup %12837  ;;  %12861 = vpow2.f32 %v18664_v8 }
 0x8ea   : > { %18648 = vst [vmem:[#allocation89_spill] sm:$0xff] %v15891_v12  ;;  %18649 = vst [vmem:[#allocation120_spill] sm:$0xff] %v15893_v44  ;;  %v5965_v17 = vrot.slane %v5955_v9, %v15345_v18  ;;  %v5972_v53 = vrot.slane %v5956_v39, %v15345_v18  ;;  %v6811_v46 = vcombine.low %v18658_v48, %v6732_v60  ;;  %v15935_v62 = vpop.eup %12839  ;;  %v18660_v39 = vld [vmem:[#allocation119_spill] sm:$0xff]  ;;  %12863 = vpow2.f32 %v18667_v61  ;;  %v18704_v44 = vld [vmem:[#allocation128_spill] sm:$0xff] }
 0x8eb   : > { %18650 = vst [vmem:[#allocation90_spill] sm:$0xff] %v15895_v36  ;;  %18651 = vst [vmem:[#allocation121_spill] sm:$0xff] %v15906_v14  ;;  %v15927_v2 = vrot.slane %v18659_v26, %v18593_v32  ;;  %v6812_v58 = vcombine.high %v18658_v48, %v6732_v60  ;;  %v5979_v47 = vrot.slane %v5957_v11, %v15345_v18  ;;  %v15944_v6 = vpop.eup %12841  ;;  %v15948_v48 = vpop.permute.xlu1 %7033  ;;  %v18674_v61 = vld [vmem:[#allocation151_spill] sm:$0xff] }
 0x8ec   : > { %18654 = vst [vmem:[#allocation111_spill] sm:$0xff] %v15914_v30  ;;  %18657 = vst [vmem:[#allocation83_spill] sm:$0xff] %v15920_v27  ;;  %v5986_v23 = vrot.slane %v5958_v63, %v15345_v18  ;;  %v6821_v9 = vrot.slane %v6811_v46, %v15345_v18  ;;  %v6813_v7 = vcombine.low %v18660_v39, %v6734_v59  ;;  %v15951_v46 = vpop.eup %12843  ;;  %v15990_v36 = vpop.permute.xlu0 %7569 }
 0x8ed   : > { %v6814_v4 = vcombine.high %v18660_v39, %v6734_v59  ;;  %v15942_v45 = vrot.slane %v18659_v26, %v18594_v33  ;;  %18661 = vst [vmem:[#allocation112_spill] sm:$0xff] %v15946_v24  ;;  %18662 = vst [vmem:[#allocation84_spill] sm:$0xff] %v15948_v48  ;;  %v6828_v60 = vrot.slane %v6812_v58, %v15345_v18  ;;  %v15956_v0 = vpop.eup %12845 }
 0x8ee   : > { %v5987_v11 = vcombine.low %v5965_v17, %v5979_v47  ;;  %v5988_v63 = vcombine.high %v5965_v17, %v5979_v47  ;;  %v5989_v50 = vcombine.low %v5972_v53, %v5986_v23  ;;  %v5990_v59 = vcombine.high %v5972_v53, %v5986_v23  ;;  %18663 = vst [vmem:[#allocation117_spill] sm:$0xff] %v15956_v0  ;;  %v15964_v47 = vpop.eup %12847  ;;  %v18671_v23 = vld [vmem:[#allocation143_spill] sm:$0xff] }
 0x8ef   : > { %v6835_v39 = vrot.slane %v6813_v7, %v15345_v18  ;;  %v6842_v31 = vrot.slane %v6814_v4, %v15345_v18  ;;  %18666 = vst [vmem:[#allocation119_spill] sm:$0xff] %v15964_v47  ;;  %v18669_v4 = vld [vmem:[#allocation80_spill] sm:$0xff]  ;;  %v15974_v8 = vpop.eup %12849  ;;  %12865 = vpow2.f32 %v18671_v23  ;;  %v6391_v25 = vmul.f32 %v18677_v55, %v18676_v37  ;;  %18680 = vst [vmem:[#allocation125_spill] sm:$0xff] %v15990_v36  ;;  %v15992_v23 = vpop.permute.xlu1 %7045  ;;  %v18702_v0 = vld [vmem:[#allocation127_spill] sm:$0xff] }
 0x8f0   : > { %v5997_v22 = vrot.slane %v5987_v11, %v15345_v18  ;;  %v15961_v58 = vrot.slane %v5989_v50, %v15345_v18  ;;  %v6011_v17 = vrot.slane %v5988_v63, %v15345_v18  ;;  %v15968_v16 = vrot.slane %v5990_v59, %v15345_v18  ;;  %18670 = vst [vmem:[#allocation142_spill] sm:$0xff] %v15974_v8  ;;  %v15981_v13 = vpop.eup %12851  ;;  %v16066_v27 = vpop.permute.xlu0 %7577 }
 0x8f1   : > { %v6845_v7 = vcombine.low %v6828_v60, %v6842_v31  ;;  %v15972_v53 = vrot.slane %v18659_v26, %v18669_v4  ;;  %v6843_v50 = vcombine.low %v6821_v9, %v6835_v39  ;;  %v6844_v11 = vcombine.high %v6821_v9, %v6835_v39  ;;  %18673 = vst [vmem:[#allocation143_spill] sm:$0xff] %v15981_v13 }
 0x8f2   : > { %18665 = vst [vmem:[#allocation122_spill] sm:$0xff] %v15961_v58  ;;  %18668 = vst [vmem:[#allocation141_spill] sm:$0xff] %v15968_v16  ;;  %v15979_v63 = vrot.slane %v18659_v26, %v18672_v1  ;;  %12867 = vpow2.f32 %v18674_v61  ;;  %v15984_v59 = vcombine.high %v5997_v22, %v5997_v22  ;;  %v6392_v48 = vmul.f32 %v18679_v10, %v18678_v28  ;;  %v16003_v19 = vpop.eup %12853 }
 0x8f3   : > { %18681 = vst [vmem:[#allocation133_spill] sm:$0xff] %v15992_v23  ;;  %v15996_v26 = vcombine.high %v15961_v58, %v15961_v58  ;;  %v15998_v9 = vcombine.high %v6011_v17, %v6011_v17  ;;  %v6846_v39 = vcombine.high %v6828_v60, %v6842_v31  ;;  %v16001_v61 = vrot.slane %v6845_v7, %v15345_v18  ;;  %v7058_v30 = vpop.permute.xlu1 %7057 }
 0x8f4   : > { %18675 = vst [vmem:[#allocation151_spill] sm:$0xff] %v15984_v59  ;;  %18685 = vst [vmem:[#allocation189_spill] sm:$0xff] %v16003_v19  ;;  %v16007_v51 = vcombine.high %v15968_v16, %v15968_v16  ;;  %v16010_v59 = vrot.slane %v5997_v22, %v18593_v32  ;;  %v16013_v23 = vrot.slane %v5997_v22, %v18594_v33  ;;  %v16029_v16 = vpop.eup %12855  ;;  %v6567_v42 = vmul.f32 1.442695, %v6391_v25 }
 0x8f5   : > { %18682 = vst [vmem:[#allocation126_spill] sm:$0xff] %v15996_v26  ;;  %18683 = vst [vmem:[#allocation134_spill] sm:$0xff] %v15998_v9  ;;  %v16016_v26 = vrot.slane %v5997_v22, %v18669_v4  ;;  %v16019_v31 = vrot.slane %v5997_v22, %v18672_v1  ;;  %v16022_v60 = vrot.slane %v6843_v50, %v15345_v18  ;;  %v16055_v8 = vpop.eup %12857 }
 0x8f6   : > { %18684 = vst [vmem:[#allocation188_spill] sm:$0xff] %v16001_v61  ;;  %18686 = vst [vmem:[#allocation190_spill] sm:$0xff] %v16007_v51  ;;  %v16025_v7 = vrot.slane %v6844_v11, %v15345_v18  ;;  %v6876_v51 = vcombine.high %v16001_v61, %v16001_v61  ;;  %v16032_v58 = vrot.slane %v6011_v17, %v18593_v32  ;;  %v16085_v57 = vpop.eup %12859  ;;  %12869 = vpow2.f32 %v6567_v42 }
 0x8f7   : > { %18687 = vst [vmem:[#allocation191_spill] sm:$0xff] %v16016_v26  ;;  %18688 = vst [vmem:[#allocation192_spill] sm:$0xff] %v16019_v31  ;;  %v16035_v9 = vrot.slane %v6011_v17, %v18594_v33  ;;  %v16038_v22 = vrot.slane %v6011_v17, %v18669_v4  ;;  %v16041_v50 = vrot.slane %v6011_v17, %v18672_v1  ;;  %v18703_v17 = vld [vmem:[#allocation135_spill] sm:$0xff] }
 0x8f8   : > { %18689 = vst [vmem:[#allocation193_spill] sm:$0xff] %v16022_v60  ;;  %18690 = vst [vmem:[#allocation194_spill] sm:$0xff] %v16025_v7  ;;  %v16044_v11 = vrot.slane %v6846_v39, %v15345_v18  ;;  %v16047_v36 = vrot.slane %v6876_v51, %v18593_v32  ;;  %v16050_v61 = vrot.slane %v6876_v51, %v18594_v33  ;;  %v18705_v39 = vld [vmem:[#allocation136_spill] sm:$0xff] }
 0x8f9   : > { %18691 = vst [vmem:[#allocation195_spill] sm:$0xff] %v16029_v16  ;;  %18692 = vst [vmem:[#allocation196_spill] sm:$0xff] %v16032_v58  ;;  %v16053_v13 = vrot.slane %v6876_v51, %v18669_v4  ;;  %v16058_v47 = vrot.slane %v6876_v51, %v18672_v1  ;;  %v6393_v24 = vmul.f32 %v18703_v17, %v18702_v0 }
 0x8fa   : > { %18693 = vst [vmem:[#allocation197_spill] sm:$0xff] %v16035_v9  ;;  %18694 = vst [vmem:[#allocation198_spill] sm:$0xff] %v16038_v22  ;;  %v6394_v18 = vmul.f32 %v18705_v39, %v18704_v44  ;;  %v6400_v49 = vmul.f32 %v15942_v45, %v18678_v28  ;;  %v6401_v14 = vmul.f32 %v15972_v53, %v18702_v0 }
 0x8fb   : > { %18695 = vst [vmem:[#allocation199_spill] sm:$0xff] %v16041_v50  ;;  %18696 = vst [vmem:[#allocation200_spill] sm:$0xff] %v16044_v11  ;;  %v6399_v11 = vmul.f32 %v15927_v2, %v18676_v37  ;;  %v6402_v51 = vmul.f32 %v15979_v63, %v18704_v44  ;;  %v6407_v12 = vmul.f32 %v16010_v59, %v18676_v37 }
 0x8fc   : > { %18697 = vst [vmem:[#allocation201_spill] sm:$0xff] %v16047_v36  ;;  %18698 = vst [vmem:[#allocation202_spill] sm:$0xff] %v16050_v61  ;;  %v16077_v29 = vmul.f32 %v16047_v36, %v7058_v30  ;;  %v6408_v41 = vmul.f32 %v16013_v23, %v18678_v28  ;;  %v6410_v38 = vmul.f32 %v16019_v31, %v18704_v44  ;;  %v6569_v36 = vmul.f32 1.442695, %v6392_v48 }
 0x8fd   : > { %18699 = vst [vmem:[#allocation203_spill] sm:$0xff] %v16053_v13  ;;  %18700 = vst [vmem:[#allocation204_spill] sm:$0xff] %v16055_v8  ;;  %v16088_v52 = vmul.f32 %v16050_v61, %v7058_v30  ;;  %v16091_v21 = vmul.f32 %v16053_v13, %v7058_v30  ;;  %v16096_v3 = vmul.f32 %v16058_v47, %v7058_v30  ;;  %v6573_v48 = vmul.f32 1.442695, %v6394_v18  ;;  %v16118_v61 = vpop.permute.xlu0 %6981 }
 0x8fe   : > { %18701 = vst [vmem:[#allocation205_spill] sm:$0xff] %v16058_v47  ;;  %18706 = vst [vmem:[#allocation127_spill] sm:$0xff] %v16066_v27  ;;  %v6409_v27 = vmul.f32 %v16016_v26, %v18702_v0  ;;  %v6415_v8 = vmul.f32 %v16032_v58, %v18676_v37  ;;  %v6416_v31 = vmul.f32 %v16035_v9, %v18678_v28  ;;  %v6583_v37 = vmul.f32 1.442695, %v6399_v11  ;;  %v18716_v28 = vld [vmem:[#allocation155_spill] sm:$0xff] }
 0x8ff   : > { %18707 = vst [vmem:[#allocation135_spill] sm:$0xff] %v16077_v29  ;;  %18708 = vst [vmem:[#allocation128_spill] sm:$0xff] %v16085_v57  ;;  %v16093_v29 = vpop.eup %12861  ;;  %v6571_v57 = vmul.f32 1.442695, %v6393_v24  ;;  %v6418_v25 = vmul.f32 %v16041_v50, %v18704_v44  ;;  %v6585_v47 = vmul.f32 1.442695, %v6400_v49  ;;  %v16114_v24 = vrot.slane %v18716_v28, %v18593_v32 }
 0x900   : > { %18709 = vst [vmem:[#allocation136_spill] sm:$0xff] %v16088_v52  ;;  %18710 = vst [vmem:[#allocation206_spill] sm:$0xff] %v16091_v21  ;;  %v16102_v16 = vpop.eup %12863  ;;  %v6417_v52 = vmul.f32 %v16038_v22, %v18702_v0  ;;  %v18714_v21 = vld [vmem:[#allocation152_spill] sm:$0xff]  ;;  %12871 = vpow2.f32 %v6569_v36  ;;  %v6587_v0 = vmul.f32 1.442695, %v6401_v14  ;;  %v16126_v36 = vrot.slane %v18716_v28, %v18669_v4  ;;  %v18726_v14 = vld [vmem:[#allocation146_spill] sm:$0xff] }
 0x901   : > { %18711 = vst [vmem:[#allocation207_spill] sm:$0xff] %v16093_v29  ;;  %18712 = vst [vmem:[#allocation208_spill] sm:$0xff] %v16096_v3  ;;  %v6810_v30 = vcombine.high %v18714_v21, %v18714_v21  ;;  %v16110_v3 = vpop.eup %12865  ;;  %v6589_v44 = vmul.f32 1.442695, %v6402_v51  ;;  %v6599_v18 = vmul.f32 1.442695, %v6407_v12  ;;  %12873 = vpow2.f32 %v6571_v57 }
 0x902   : > { %18713 = vst [vmem:[#allocation209_spill] sm:$0xff] %v16102_v16  ;;  %18715 = vst [vmem:[#allocation152_spill] sm:$0xff] %v16110_v3  ;;  %v16116_v13 = vpop.eup %12867  ;;  %v6601_v50 = vmul.f32 1.442695, %v6408_v41  ;;  %v6603_v22 = vmul.f32 1.442695, %v6409_v27  ;;  %12875 = vpow2.f32 %v6573_v48  ;;  %v16122_v3 = vrot.slane %v18716_v28, %v18594_v33 }
 0x903   : > { %18717 = vst [vmem:[#allocation155_spill] sm:$0xff] %v16114_v24  ;;  %18718 = vst [vmem:[#allocation210_spill] sm:$0xff] %v16116_v13  ;;  %v6605_v9 = vmul.f32 1.442695, %v6410_v38  ;;  %v6615_v42 = vmul.f32 1.442695, %v6415_v8  ;;  %12877 = vpow2.f32 %v6583_v37  ;;  %v16130_v57 = vrot.slane %v18716_v28, %v18672_v1 }
 0x904   : > { %v6617_v11 = vmul.f32 1.442695, %v6416_v31  ;;  %v6619_v49 = vmul.f32 1.442695, %v6417_v52  ;;  %v6621_v58 = vmul.f32 1.442695, %v6418_v25  ;;  %12879 = vpow2.f32 %v6585_v47  ;;  %v16152_v47 = vpop.permute.xlu0 %6993 }
 0x905   : > { %18719 = vst [vmem:[#allocation211_spill] sm:$0xff] %v16122_v3  ;;  %18720 = vst [vmem:[#allocation212_spill] sm:$0xff] %v16126_v36  ;;  %v16134_v38 = vrot.slane %v18714_v21, %v18593_v32  ;;  %v16138_v52 = vrot.slane %v18714_v21, %v18594_v33  ;;  %12881 = vpow2.f32 %v6587_v0  ;;  %v16142_v41 = vrot.slane %v18714_v21, %v18669_v4  ;;  %v18742_v13 = vld [vmem:[#allocation156_spill] sm:$0xff] }
 0x906   : > { %18721 = vst [vmem:[#allocation213_spill] sm:$0xff] %v16130_v57  ;;  %v16146_v12 = vrot.slane %v18714_v21, %v18672_v1  ;;  %v16150_v27 = vrot.slane %v18726_v14, %v18593_v32  ;;  %12883 = vpow2.f32 %v6589_v44  ;;  %v16156_v8 = vrot.slane %v18726_v14, %v18594_v33 }
 0x907   : > { %18722 = vst [vmem:[#allocation214_spill] sm:$0xff] %v16134_v38  ;;  %18723 = vst [vmem:[#allocation215_spill] sm:$0xff] %v16138_v52  ;;  %v16160_v31 = vrot.slane %v18726_v14, %v18669_v4  ;;  %v16164_v51 = vrot.slane %v18726_v14, %v18672_v1  ;;  %12885 = vpow2.f32 %v6599_v18  ;;  %v16167_v21 = vrot.slane %v6810_v30, %v18593_v32 }
 0x908   : > { %18724 = vst [vmem:[#allocation216_spill] sm:$0xff] %v16142_v41  ;;  %18725 = vst [vmem:[#allocation217_spill] sm:$0xff] %v16146_v12  ;;  %v16170_v25 = vrot.slane %v6810_v30, %v18594_v33  ;;  %v16173_v48 = vrot.slane %v6810_v30, %v18669_v4  ;;  %12887 = vpow2.f32 %v6601_v50  ;;  %v16176_v37 = vrot.slane %v6810_v30, %v18672_v1  ;;  %v16218_v26 = vpop.permute.xlu0 %7005 }
 0x909   : > { %18727 = vst [vmem:[#allocation146_spill] sm:$0xff] %v16150_v27  ;;  %18728 = vst [vmem:[#allocation218_spill] sm:$0xff] %v16156_v8  ;;  %v16180_v28 = vrot.slane %v16022_v60, %v18593_v32  ;;  %v16184_v0 = vrot.slane %v16022_v60, %v18594_v33  ;;  %12889 = vpow2.f32 %v6603_v22  ;;  %v16188_v44 = vrot.slane %v16022_v60, %v18669_v4 }
 0x90a   : > { %18729 = vst [vmem:[#allocation219_spill] sm:$0xff] %v16160_v31  ;;  %18730 = vst [vmem:[#allocation220_spill] sm:$0xff] %v16164_v51  ;;  %v16192_v18 = vrot.slane %v16022_v60, %v18672_v1  ;;  %v16196_v50 = vrot.slane %v16025_v7, %v18593_v32  ;;  %12891 = vpow2.f32 %v6605_v9  ;;  %v16200_v30 = vrot.slane %v16025_v7, %v18594_v33  ;;  %v18741_v60 = vld [vmem:[#allocation123_spill] sm:$0xff]  ;;  %v18743_v32 = vld [vmem:[#allocation157_spill] sm:$0xff]  ;;  %v16216_v33 = vpop.eup %12869 }
 0x90b   : > { %18731 = vst [vmem:[#allocation221_spill] sm:$0xff] %v16167_v21  ;;  %18732 = vst [vmem:[#allocation222_spill] sm:$0xff] %v16170_v25  ;;  %v16204_v22 = vrot.slane %v16025_v7, %v18669_v4  ;;  %v16208_v14 = vrot.slane %v16025_v7, %v18672_v1  ;;  %12893 = vpow2.f32 %v6615_v42  ;;  %v7407_v16 = vmul.f32 %v18742_v13, %v18741_v60  ;;  %v18744_v9 = vld [vmem:[#allocation158_spill] sm:$0xff]  ;;  %v18746_v4 = vld [vmem:[#allocation159_spill] sm:$0xff] }
 0x90c   : > { %18733 = vst [vmem:[#allocation223_spill] sm:$0xff] %v16173_v48  ;;  %18734 = vst [vmem:[#allocation224_spill] sm:$0xff] %v16184_v0  ;;  %v7408_v29 = vmul.f32 %v18743_v32, %v18741_v60  ;;  %v7409_v19 = vmul.f32 %v18744_v9, %v18741_v60  ;;  %12895 = vpow2.f32 %v6617_v11  ;;  %v18747_v7 = vld [vmem:[#allocation137_spill] sm:$0xff]  ;;  %v18750_v11 = vld [vmem:[#allocation160_spill] sm:$0xff] }
 0x90d   : > { %18735 = vst [vmem:[#allocation225_spill] sm:$0xff] %v16188_v44  ;;  %18736 = vst [vmem:[#allocation226_spill] sm:$0xff] %v16192_v18  ;;  %v7415_v42 = vmul.f32 %v16114_v24, %v18747_v7  ;;  %v7416_v1 = vmul.f32 %v16122_v3, %v18747_v7  ;;  %v16226_v13 = vpop.eup %12871  ;;  %12897 = vpow2.f32 %v6619_v49  ;;  %v7417_v9 = vmul.f32 %v16126_v36, %v18747_v7  ;;  %v18751_v24 = vld [vmem:[#allocation161_spill] sm:$0xff]  ;;  %v18752_v3 = vld [vmem:[#allocation162_spill] sm:$0xff] }
 0x90e   : > { %18737 = vst [vmem:[#allocation227_spill] sm:$0xff] %v16196_v50  ;;  %18738 = vst [vmem:[#allocation228_spill] sm:$0xff] %v16200_v30  ;;  %v7418_v32 = vmul.f32 %v16130_v57, %v18747_v7  ;;  %12899 = vpow2.f32 %v6621_v58  ;;  %v18753_v36 = vld [vmem:[#allocation163_spill] sm:$0xff]  ;;  %v18755_v57 = vld [vmem:[#allocation144_spill] sm:$0xff] }
 0x90f   : > { %18739 = vst [vmem:[#allocation229_spill] sm:$0xff] %v16204_v22  ;;  %18740 = vst [vmem:[#allocation230_spill] sm:$0xff] %v16208_v14  ;;  %v7410_v22 = vmul.f32 %v18746_v4, %v18741_v60  ;;  %v16236_v60 = vpop.eup %12873  ;;  %v16258_v58 = vmul.f32 %v16138_v52, %v18755_v57 }
 0x910   : > { %18745 = vst [vmem:[#allocation123_spill] sm:$0xff] %v16218_v26  ;;  %18748 = vst [vmem:[#allocation137_spill] sm:$0xff] %v16226_v13  ;;  %v18749_v26 = vld [vmem:[#allocation139_spill] sm:$0xff]  ;;  %v16250_v7 = vpop.eup %12875 }
 0x911   : > { %v16234_v14 = vmul.f32 %v18750_v11, %v18749_v26  ;;  %v16240_v4 = vmul.f32 %v18751_v24, %v18749_v26  ;;  %v16244_v49 = vmul.f32 %v18752_v3, %v18749_v26  ;;  %v16248_v13 = vmul.f32 %v18753_v36, %v18749_v26  ;;  %18754 = vst [vmem:[#allocation139_spill] sm:$0xff] %v16250_v7  ;;  %v16268_v26 = vpop.eup %12877  ;;  %v18757_v36 = vld [vmem:[#allocation147_spill] sm:$0xff] }
 0x912   : > { %v16254_v11 = vmul.f32 %v16134_v38, %v18755_v57  ;;  %v16262_v24 = vmul.f32 %v16142_v41, %v18755_v57  ;;  %v16266_v3 = vmul.f32 %v16146_v12, %v18755_v57  ;;  %18756 = vst [vmem:[#allocation144_spill] sm:$0xff] %v16268_v26  ;;  %v16272_v7 = vmul.f32 %v16150_v27, %v18757_v36  ;;  %v16286_v57 = vpop.eup %12879  ;;  %v18758_v12 = vld [vmem:[#allocation149_spill] sm:$0xff] }
 0x913   : > { %v16276_v38 = vmul.f32 %v16156_v8, %v18757_v36  ;;  %v16280_v52 = vmul.f32 %v16160_v31, %v18757_v36  ;;  %v16284_v41 = vmul.f32 %v16164_v51, %v18757_v36  ;;  %v16290_v26 = vmul.f32 %v16167_v21, %v18758_v12  ;;  %v16304_v36 = vpop.eup %12881  ;;  %v16306_v51 = vpop.permute.xlu0 %7017 }
 0x914   : > { %v16294_v27 = vmul.f32 %v16170_v25, %v18758_v12  ;;  %v16298_v8 = vmul.f32 %v16173_v48, %v18758_v12  ;;  %v16302_v31 = vmul.f32 %v16176_v37, %v18758_v12  ;;  %18761 = vst [vmem:[#allocation231_spill] sm:$0xff] %v16306_v51  ;;  %v16310_v21 = vmul.f32 %v16180_v28, %v16118_v61 }
 0x915   : > { %18759 = vst [vmem:[#allocation147_spill] sm:$0xff] %v16290_v26  ;;  %v16313_v26 = vadd.f32 %v15899_v35, %v7407_v16  ;;  %v16316_v25 = vadd.f32 %v15902_v43, %v7408_v29  ;;  %v16319_v48 = vadd.f32 %v15904_v56, %v7409_v19  ;;  %v16325_v12 = vmul.f32 %v16184_v0, %v16118_v61 }
 0x916   : > { %18760 = vst [vmem:[#allocation149_spill] sm:$0xff] %v16298_v8  ;;  %v16321_v8 = vpop.eup %12883  ;;  %v16329_v51 = vmul.f32 %v16188_v44, %v16118_v61  ;;  %v16333_v35 = vmul.f32 %v16192_v18, %v16118_v61  ;;  %v16336_v29 = vadd.f32 %v15909_v20, %v7410_v22  ;;  %v16342_v19 = vmul.f32 %v16196_v50, %v16152_v47  ;;  %v18766_v50 = vld [vmem:[#allocation129_spill] sm:$0xff] }
 0x917   : > { %18762 = vst [vmem:[#allocation232_spill] sm:$0xff] %v16313_v26  ;;  %18763 = vst [vmem:[#allocation233_spill] sm:$0xff] %v16316_v25  ;;  %v16338_v43 = vpop.eup %12885  ;;  %v7803_v56 = vmul.f32 %v15842_v40, %v16313_v26  ;;  %v7804_v16 = vmul.f32 %v15854_v5, %v16316_v25  ;;  %v7805_v61 = vmul.f32 %v15864_v34, %v16319_v48  ;;  %v18767_v40 = vld [vmem:[#allocation130_spill] sm:$0xff]  ;;  %v18770_v25 = vld [vmem:[#allocation131_spill] sm:$0xff] }
 0x918   : > { %18764 = vst [vmem:[#allocation234_spill] sm:$0xff] %v16319_v48  ;;  %18765 = vst [vmem:[#allocation235_spill] sm:$0xff] %v16336_v29  ;;  %v16350_v18 = vpop.eup %12887  ;;  %v16354_v20 = vmul.f32 %v16200_v30, %v16152_v47  ;;  %v7806_v22 = vmul.f32 %v15875_v54, %v16336_v29  ;;  %v6395_v44 = vmul.f32 %v18677_v55, %v18766_v50  ;;  %v18772_v55 = vld [vmem:[#allocation132_spill] sm:$0xff]  ;;  %v16379_v50 = vld [vmem:[%s14484_s18 + $0x20] sm:$0xff] }
 0x919   : > { %v6396_v26 = vmul.f32 %v18679_v10, %v18767_v40  ;;  %v16362_v0 = vpop.eup %12889  ;;  %v16364_v5 = vadd.f32 %v7803_v56, %v7415_v42  ;;  %v16366_v34 = vadd.f32 %v7804_v16, %v7416_v1  ;;  %v16368_v48 = vadd.f32 %v7805_v61, %v7417_v9  ;;  %18773 = vst [vmem:[#allocation132_spill] sm:$0xff] %v16379_v50  ;;  %v16387_v56 = vpop.permute.xlu0 %7029  ;;  %v16405_v61 = vld [vmem:[%s14484_s18 + $0x38] sm:$0xff] }
 0x91a   : > { %v6397_v30 = vmul.f32 %v18703_v17, %v18770_v25  ;;  %v16372_v54 = vpop.eup %12891  ;;  %v16374_v29 = vadd.f32 %v7806_v22, %v7418_v32  ;;  %v6398_v10 = vmul.f32 %v18705_v39, %v18772_v55  ;;  %v6403_v42 = vmul.f32 %v16379_v50, %v15927_v2  ;;  %18774 = vst [vmem:[#allocation236_spill] sm:$0xff] %v16387_v56  ;;  %v16396_v25 = vld [vmem:[%s14484_s18 + $0x30] sm:$0xff] }
 0x91b   : > { %18768 = vst [vmem:[#allocation129_spill] sm:$0xff] %v16366_v34  ;;  %18769 = vst [vmem:[#allocation130_spill] sm:$0xff] %v16368_v48  ;;  %v6404_v1 = vmul.f32 %v15942_v45, %v18767_v40  ;;  %v16385_v9 = vpop.eup %12893  ;;  %v7855_v17 = vmul.f32 %v15929_v15, %v16364_v5  ;;  %v7856_v32 = vmul.f32 %v15935_v62, %v16366_v34  ;;  %v16428_v34 = vld [vmem:[%s14484_s18 + $0x28] sm:$0xff] }
 0x91c   : > { %18771 = vst [vmem:[#allocation131_spill] sm:$0xff] %v16374_v29  ;;  %v7857_v39 = vmul.f32 %v15944_v6, %v16368_v48  ;;  %18775 = vst [vmem:[#allocation237_spill] sm:$0xff] %v16396_v25  ;;  %v6405_v2 = vmul.f32 %v16396_v25, %v15972_v53  ;;  %v16400_v45 = vpop.eup %12895  ;;  %v7858_v16 = vmul.f32 %v15951_v46, %v16374_v29  ;;  %v6575_v6 = vmul.f32 1.442695, %v6395_v44  ;;  %v18780_v44 = vld [vmem:[#allocation191_spill] sm:$0xff] }
 0x91d   : > { %18776 = vst [vmem:[#allocation238_spill] sm:$0xff] %v16405_v61  ;;  %v6406_v15 = vmul.f32 %v16405_v61, %v15979_v63  ;;  %v6411_v62 = vmul.f32 %v16379_v50, %v16010_v59  ;;  %v16411_v22 = vpop.eup %12897  ;;  %v16414_v40 = vadd.f32 %v7855_v17, %v16234_v14  ;;  %v16417_v53 = vadd.f32 %v7856_v32, %v16240_v4  ;;  %v18781_v4 = vld [vmem:[#allocation189_spill] sm:$0xff] }
 0x91e   : > { %v16420_v55 = vadd.f32 %v7857_v39, %v16244_v49  ;;  %v6577_v46 = vmul.f32 1.442695, %v6396_v26  ;;  %v16422_v29 = vpop.eup %12899  ;;  %v16425_v63 = vadd.f32 %v7858_v16, %v16248_v13  ;;  %18779 = vst [vmem:[#allocation241_spill] sm:$0xff] %v16428_v34  ;;  %v6412_v59 = vmul.f32 %v16428_v34, %v16013_v23  ;;  %v18782_v49 = vld [vmem:[#allocation195_spill] sm:$0xff]  ;;  %v18783_v39 = vld [vmem:[#allocation204_spill] sm:$0xff]  ;;  %v16442_v34 = vpop.permute.xlu0 %7041 }
 0x91f   : > { %18777 = vst [vmem:[#allocation239_spill] sm:$0xff] %v16417_v53  ;;  %v6413_v14 = vmul.f32 %v16396_v25, %v18780_v44  ;;  %v6579_v17 = vmul.f32 1.442695, %v6397_v30  ;;  %v7907_v32 = vmul.f32 %v18781_v4, %v16414_v40  ;;  %v7908_v26 = vmul.f32 %v18782_v49, %v16417_v53  ;;  %v18784_v16 = vld [vmem:[#allocation128_spill] sm:$0xff]  ;;  %18785 = vst [vmem:[#allocation191_spill] sm:$0xff] %v16442_v34 }
 0x920   : > { %18778 = vst [vmem:[#allocation240_spill] sm:$0xff] %v16425_v63  ;;  %v7909_v56 = vmul.f32 %v18783_v39, %v16420_v55  ;;  %v6581_v13 = vmul.f32 1.442695, %v6398_v10  ;;  %v7910_v50 = vmul.f32 %v18784_v16, %v16425_v63  ;;  %12901 = vpow2.f32 %v6575_v6  ;;  %v18786_v49 = vld [vmem:[#allocation192_spill] sm:$0xff] }
 0x921   : > { %v6591_v48 = vmul.f32 1.442695, %v6403_v42  ;;  %v6593_v23 = vmul.f32 1.442695, %v6404_v1  ;;  %v16445_v30 = vadd.f32 %v7907_v32, %v16254_v11  ;;  %v16448_v44 = vadd.f32 %v7908_v26, %v16258_v58  ;;  %v18787_v11 = vld [vmem:[#allocation137_spill] sm:$0xff] }
 0x922   : > { %v16451_v4 = vadd.f32 %v7909_v56, %v16262_v24  ;;  %12903 = vpow2.f32 %v6577_v46  ;;  %v16454_v10 = vadd.f32 %v7910_v50, %v16266_v3  ;;  %v6414_v6 = vmul.f32 %v16405_v61, %v18786_v49  ;;  %v18788_v24 = vld [vmem:[#allocation139_spill] sm:$0xff] }
 0x923   : > { %12905 = vpow2.f32 %v6579_v17  ;;  %v6595_v42 = vmul.f32 1.442695, %v6405_v2  ;;  %v7959_v1 = vmul.f32 %v16216_v33, %v16445_v30  ;;  %v7960_v32 = vmul.f32 %v18787_v11, %v16448_v44  ;;  %v18789_v17 = vld [vmem:[#allocation229_spill] sm:$0xff] }
 0x924   : > { %v7961_v58 = vmul.f32 %v16236_v60, %v16451_v4  ;;  %12907 = vpow2.f32 %v6581_v13  ;;  %v7962_v56 = vmul.f32 %v18788_v24, %v16454_v10  ;;  %v6597_v3 = vmul.f32 1.442695, %v6406_v15  ;;  %v16480_v15 = vpop.permute.xlu0 %7053  ;;  %v18792_v13 = vld [vmem:[#allocation230_spill] sm:$0xff] }
 0x925   : > { %12909 = vpow2.f32 %v6591_v48  ;;  %v6607_v50 = vmul.f32 1.442695, %v6411_v62  ;;  %v16467_v46 = vadd.f32 %v7959_v1, %v16272_v7  ;;  %v16470_v2 = vadd.f32 %v7960_v32, %v16276_v38  ;;  %18790 = vst [vmem:[#allocation189_spill] sm:$0xff] %v16480_v15  ;;  %v18791_v7 = vld [vmem:[#allocation144_spill] sm:$0xff]  ;;  %v18794_v1 = vld [vmem:[#allocation149_spill] sm:$0xff]  ;;  %v18798_v24 = vld [vmem:[#allocation158_spill] sm:$0xff] }
 0x926   : > { %v16473_v33 = vadd.f32 %v7961_v58, %v16280_v52  ;;  %12911 = vpow2.f32 %v6593_v23  ;;  %v7465_v60 = vmul.f32 %v18789_v17, %v16152_v47  ;;  %v16478_v26 = vadd.f32 %v7962_v56, %v16284_v41  ;;  %v18793_v23 = vld [vmem:[#allocation147_spill] sm:$0xff]  ;;  %v18824_v15 = vld [vmem:[#allocation102_spill] sm:$0xff]  ;;  %v18831_v17 = vld [vmem:[#allocation221_spill] sm:$0xff] }
 0x927   : > { %12913 = vpow2.f32 %v6595_v42  ;;  %v6609_v48 = vmul.f32 1.442695, %v6412_v59  ;;  %v8011_v62 = vmul.f32 %v18791_v7, %v16467_v46  ;;  %v8012_v38 = vmul.f32 %v16286_v57, %v16470_v2 }
 0x928   : > { %v8013_v52 = vmul.f32 %v16304_v36, %v16473_v33  ;;  %v6611_v39 = vmul.f32 1.442695, %v6413_v14  ;;  %v7466_v16 = vmul.f32 %v18792_v13, %v16152_v47  ;;  %v8014_v41 = vmul.f32 %v16321_v8, %v16478_v26  ;;  %v18795_v47 = vld [vmem:[#allocation92_spill] sm:$0xff]  ;;  %v18797_v8 = vld [vmem:[#allocation157_spill] sm:$0xff] }
 0x929   : > { %12915 = vpow2.f32 %v6597_v3  ;;  %v6613_v59 = vmul.f32 1.442695, %v6414_v6  ;;  %v16493_v49 = vadd.f32 %v8011_v62, %v18793_v23  ;;  %v16496_v42 = vadd.f32 %v8012_v38, %v16294_v27  ;;  %v18796_v14 = vld [vmem:[#allocation156_spill] sm:$0xff]  ;;  %v18799_v3 = vld [vmem:[#allocation159_spill] sm:$0xff] }
 0x92a   : > { %v16499_v57 = vadd.f32 %v8013_v52, %v18794_v1  ;;  %12917 = vpow2.f32 %v6607_v50  ;;  %v16502_v36 = vadd.f32 %v8014_v41, %v16302_v31  ;;  %v16506_v11 = vmul.f32 %v18796_v14, %v18795_v47  ;;  %v18804_v62 = vld [vmem:[#allocation155_spill] sm:$0xff] }
 0x92b   : > { %12919 = vpow2.f32 %v6609_v48  ;;  %v16510_v6 = vmul.f32 %v18797_v8, %v18795_v47  ;;  %v8063_v27 = vmul.f32 %v16338_v43, %v16493_v49  ;;  %v8064_v32 = vmul.f32 %v16350_v18, %v16496_v42  ;;  %v16526_v43 = vpop.permute.xlu0 %7585  ;;  %v18806_v41 = vld [vmem:[#allocation211_spill] sm:$0xff]  ;;  %v18809_v8 = vld [vmem:[#allocation94_spill] sm:$0xff] }
 0x92c   : > { %v8065_v58 = vmul.f32 %v16362_v0, %v16499_v57  ;;  %12921 = vpow2.f32 %v6611_v39  ;;  %v8066_v31 = vmul.f32 %v16372_v54, %v16502_v36  ;;  %v7413_v56 = vmul.f32 %v18798_v24, %v18795_v47  ;;  %v18803_v54 = vld [vmem:[#allocation93_spill] sm:$0xff] }
 0x92d   : > { %12923 = vpow2.f32 %v6613_v59  ;;  %v7414_v50 = vmul.f32 %v18799_v3, %v18795_v47  ;;  %v16524_v48 = vpop.eup %12901  ;;  %v16529_v18 = vadd.f32 %v8063_v27, %v16310_v21  ;;  %v16532_v0 = vadd.f32 %v8064_v32, %v16325_v12  ;;  %v18807_v21 = vld [vmem:[#allocation212_spill] sm:$0xff]  ;;  %v18811_v24 = vld [vmem:[#allocation161_spill] sm:$0xff] }
 0x92e   : > { %v16535_v7 = vadd.f32 %v8065_v58, %v16329_v51  ;;  %v16539_v38 = vmul.f32 %v18804_v62, %v18803_v54  ;;  %v16544_v39 = vadd.f32 %v8066_v31, %v16333_v35  ;;  %v16548_v59 = vmul.f32 %v18806_v41, %v18803_v54  ;;  %v18808_v51 = vld [vmem:[#allocation213_spill] sm:$0xff]  ;;  %v18810_v27 = vld [vmem:[#allocation160_spill] sm:$0xff] }
 0x92f   : > { %18800 = vst [vmem:[#allocation195_spill] sm:$0xff] %v16529_v18  ;;  %18801 = vst [vmem:[#allocation204_spill] sm:$0xff] %v16532_v0  ;;  %v16541_v52 = vpop.eup %12903  ;;  %v16552_v12 = vmul.f32 %v18807_v21, %v18803_v54  ;;  %v16556_v23 = vmul.f32 %v18808_v51, %v18803_v54  ;;  %v8115_v47 = vmul.f32 %v16385_v9, %v16529_v18  ;;  %v18812_v9 = vld [vmem:[#allocation162_spill] sm:$0xff]  ;;  %v7594_v53 = vpop.permute.xlu0 %7593 }
 0x930   : > { %18802 = vst [vmem:[#allocation128_spill] sm:$0xff] %v16535_v7  ;;  %18805 = vst [vmem:[#allocation192_spill] sm:$0xff] %v16544_v39  ;;  %v16558_v1 = vpop.eup %12905  ;;  %v8116_v35 = vmul.f32 %v16400_v45, %v16532_v0  ;;  %v8117_v14 = vmul.f32 %v16411_v22, %v16535_v7  ;;  %v16568_v32 = vmul.f32 %v18810_v27, %v18809_v8  ;;  %v18813_v45 = vld [vmem:[#allocation163_spill] sm:$0xff]  ;;  %v18817_v51 = vld [vmem:[#allocation214_spill] sm:$0xff] }
 0x931   : > { %v16570_v58 = vpop.eup %12907  ;;  %v8118_v31 = vmul.f32 %v16422_v29, %v16544_v39  ;;  %v16576_v3 = vmul.f32 %v18811_v24, %v18809_v8  ;;  %v16580_v54 = vmul.f32 %v18812_v9, %v18809_v8  ;;  %v16584_v22 = vmul.f32 %v18813_v45, %v18809_v8  ;;  %v18816_v29 = vld [vmem:[#allocation95_spill] sm:$0xff]  ;;  %v18840_v7 = vld [vmem:[#allocation182_spill] sm:$0xff]  ;;  %v18841_v0 = vld [vmem:[#allocation169_spill] sm:$0xff] }
 0x932   : > { %v16586_v62 = vpop.eup %12909  ;;  %v16589_v41 = vadd.f32 %v8115_v47, %v16342_v19  ;;  %v16592_v21 = vadd.f32 %v8116_v35, %v16354_v20  ;;  %v16596_v27 = vmul.f32 %v18817_v51, %v18816_v29  ;;  %v18818_v24 = vld [vmem:[#allocation215_spill] sm:$0xff]  ;;  %v16604_v8 = vadd.f32 %v8117_v14, %v7465_v60  ;;  %v18821_v19 = vld [vmem:[#allocation216_spill] sm:$0xff]  ;;  %v18822_v20 = vld [vmem:[#allocation217_spill] sm:$0xff] }
 0x933   : > { %v16600_v9 = vmul.f32 %v18818_v24, %v18816_v29  ;;  %v16602_v63 = vpop.eup %12911  ;;  %v16606_v45 = vadd.f32 %v8118_v31, %v7466_v16  ;;  %v16610_v47 = vmul.f32 %v18821_v19, %v18816_v29  ;;  %v16614_v35 = vmul.f32 %v18822_v20, %v18816_v29  ;;  %v18825_v24 = vld [vmem:[#allocation146_spill] sm:$0xff]  ;;  %v18827_v16 = vld [vmem:[#allocation219_spill] sm:$0xff]  ;;  %v18828_v19 = vld [vmem:[#allocation220_spill] sm:$0xff] }
 0x934   : > { %18814 = vst [vmem:[#allocation137_spill] sm:$0xff] %v16589_v41  ;;  %18815 = vst [vmem:[#allocation139_spill] sm:$0xff] %v16592_v21  ;;  %v16616_v51 = vpop.eup %12913  ;;  %v16620_v34 = vmul.f32 %v18825_v24, %v18824_v15  ;;  %v18826_v60 = vld [vmem:[#allocation218_spill] sm:$0xff]  ;;  %v16628_v31 = vmul.f32 %v18827_v16, %v18824_v15  ;;  %v16632_v13 = vmul.f32 %v18828_v19, %v18824_v15  ;;  %v18830_v20 = vld [vmem:[#allocation108_spill] sm:$0xff] }
 0x935   : > { %18819 = vst [vmem:[#allocation144_spill] sm:$0xff] %v16604_v8  ;;  %18820 = vst [vmem:[#allocation147_spill] sm:$0xff] %v16606_v45  ;;  %v16624_v14 = vmul.f32 %v18826_v60, %v18824_v15  ;;  %v16635_v29 = vmul.f32 %v16589_v41, %v7594_v53  ;;  %v16639_v61 = vmul.f32 %v18831_v17, %v18830_v20  ;;  %v18833_v24 = vld [vmem:[#allocation222_spill] sm:$0xff]  ;;  %v18835_v60 = vld [vmem:[#allocation223_spill] sm:$0xff] }
 0x936   : > { %18823 = vst [vmem:[#allocation149_spill] sm:$0xff] %v16616_v51  ;;  %v16643_v25 = vmul.f32 %v18833_v24, %v18830_v20  ;;  %v16647_v39 = vmul.f32 %v18835_v60, %v18830_v20  ;;  %v16649_v16 = vpop.eup %12915  ;;  %v16652_v15 = vmul.f32 %v16592_v21, %v7594_v53  ;;  %v18838_v19 = vld [vmem:[#allocation175_spill] sm:$0xff]  ;;  %v18839_v41 = vld [vmem:[#allocation168_spill] sm:$0xff]  ;;  %v7756_v17 = vmul.f32 %v18841_v0, %v18840_v7  ;;  %v18843_v51 = vld [vmem:[#allocation170_spill] sm:$0xff] }
 0x937   : > { %18829 = vst [vmem:[#allocation92_spill] sm:$0xff] %v16635_v29  ;;  %18832 = vst [vmem:[#allocation156_spill] sm:$0xff] %v16639_v61  ;;  %v7755_v29 = vmul.f32 %v18839_v41, %v18838_v19  ;;  %v18842_v61 = vld [vmem:[#allocation176_spill] sm:$0xff]  ;;  %v16660_v24 = vpop.eup %12917  ;;  %v16666_v60 = vmul.f32 %v16606_v45, %v7594_v53  ;;  %v18846_v21 = vld [vmem:[#allocation183_spill] sm:$0xff] }
 0x938   : > { %18834 = vst [vmem:[#allocation157_spill] sm:$0xff] %v16643_v25  ;;  %18836 = vst [vmem:[#allocation158_spill] sm:$0xff] %v16647_v39  ;;  %v7757_v18 = vmul.f32 %v18843_v51, %v18842_v61  ;;  %v16663_v25 = vmul.f32 %v16604_v8, %v7594_v53  ;;  %v18847_v41 = vld [vmem:[#allocation173_spill] sm:$0xff]  ;;  %v16674_v39 = vpop.eup %12919  ;;  %v18848_v0 = vld [vmem:[#allocation164_spill] sm:$0xff]  ;;  %v16682_v7 = vadd.f32 %v7756_v17, %v16510_v6 }
 0x939   : > { %18837 = vst [vmem:[#allocation159_spill] sm:$0xff] %v16652_v15  ;;  %18845 = vst [vmem:[#allocation155_spill] sm:$0xff] %v16666_v60  ;;  %v16670_v15 = vmul.f32 %v16176_v37, %v18830_v20  ;;  %v7758_v19 = vmul.f32 %v18847_v41, %v18846_v21  ;;  %v16678_v61 = vmul.f32 %v16180_v28, %v18848_v0  ;;  %v16684_v60 = vpop.eup %12921  ;;  %v18850_v37 = vld [vmem:[#allocation224_spill] sm:$0xff]  ;;  %v18852_v41 = vld [vmem:[#allocation225_spill] sm:$0xff] }
 0x93a   : > { %18844 = vst [vmem:[#allocation93_spill] sm:$0xff] %v16663_v25  ;;  %v7763_v51 = vadd.f32 %v7755_v29, %v16506_v11  ;;  %18849 = vst [vmem:[#allocation211_spill] sm:$0xff] %v16682_v7  ;;  %v7765_v53 = vadd.f32 %v7757_v18, %v7413_v56  ;;  %v16688_v20 = vmul.f32 %v18850_v37, %v18848_v0  ;;  %v18854_v25 = vld [vmem:[#allocation226_spill] sm:$0xff]  ;;  %v16700_v11 = vpop.eup %12923  ;;  %v18857_v6 = vld [vmem:[#allocation89_spill] sm:$0xff] }
 0x93b   : > { %v16692_v21 = vmul.f32 %v18852_v41, %v18848_v0  ;;  %v16696_v28 = vmul.f32 %v18854_v25, %v18848_v0  ;;  %v16698_v45 = vadd.f32 %v7758_v19, %v7414_v50  ;;  %v18858_v18 = vld [vmem:[#allocation121_spill] sm:$0xff]  ;;  %v18859_v17 = vld [vmem:[#allocation171_spill] sm:$0xff]  ;;  %v18860_v8 = vld [vmem:[#allocation130_spill] sm:$0xff] }
 0x93c   : > { %18851 = vst [vmem:[#allocation212_spill] sm:$0xff] %v16688_v20  ;;  %v7807_v56 = vmul.f32 %v18857_v6, %v7763_v51  ;;  %v7808_v29 = vmul.f32 %v18858_v18, %v16682_v7  ;;  %v7819_v37 = vmul.f32 %v16364_v5, %v18859_v17  ;;  %v7821_v41 = vmul.f32 %v18860_v8, %v18859_v17  ;;  %v18862_v25 = vld [vmem:[#allocation83_spill] sm:$0xff]  ;;  %v18863_v50 = vld [vmem:[#allocation120_spill] sm:$0xff] }
 0x93d   : > { %18853 = vst [vmem:[#allocation213_spill] sm:$0xff] %v16692_v21  ;;  %18855 = vst [vmem:[#allocation94_spill] sm:$0xff] %v16696_v28  ;;  %v18861_v21 = vld [vmem:[#allocation111_spill] sm:$0xff]  ;;  %v7810_v0 = vmul.f32 %v18862_v25, %v16698_v45  ;;  %v7871_v19 = vmul.f32 %v16414_v40, %v18863_v50  ;;  %v7873_v6 = vmul.f32 %v16420_v55, %v18863_v50  ;;  %v18864_v7 = vld [vmem:[#allocation112_spill] sm:$0xff] }
 0x93e   : > { %18856 = vst [vmem:[#allocation160_spill] sm:$0xff] %v16698_v45  ;;  %v7809_v20 = vmul.f32 %v18861_v21, %v7765_v53  ;;  %v7815_v28 = vadd.f32 %v7807_v56, %v16539_v38  ;;  %v7816_v18 = vadd.f32 %v7808_v29, %v16548_v59  ;;  %v7923_v5 = vmul.f32 %v16445_v30, %v18864_v7  ;;  %v18865_v21 = vld [vmem:[#allocation138_spill] sm:$0xff]  ;;  %v18868_v59 = vld [vmem:[#allocation117_spill] sm:$0xff]  ;;  %v18869_v30 = vld [vmem:[#allocation119_spill] sm:$0xff] }
 0x93f   : > { %v16722_v8 = vmul.f32 %v16448_v44, %v18864_v7  ;;  %v16725_v17 = vmul.f32 %v7763_v51, %v18865_v21  ;;  %v7818_v40 = vadd.f32 %v7810_v0, %v16556_v23  ;;  %v7925_v55 = vmul.f32 %v16451_v4, %v18864_v7  ;;  %v18870_v45 = vld [vmem:[#allocation140_spill] sm:$0xff]  ;;  %v18873_v23 = vld [vmem:[#allocation125_spill] sm:$0xff] }
 0x940   : > { %v7817_v25 = vadd.f32 %v7809_v20, %v16552_v12  ;;  %v16732_v38 = vmul.f32 %v7765_v53, %v18865_v21  ;;  %v7859_v56 = vmul.f32 %v18868_v59, %v7815_v28  ;;  %v7860_v29 = vmul.f32 %v18869_v30, %v7816_v18  ;;  %v18872_v12 = vld [vmem:[#allocation143_spill] sm:$0xff] }
 0x941   : > { %18866 = vst [vmem:[#allocation161_spill] sm:$0xff] %v16725_v17  ;;  %v7926_v44 = vmul.f32 %v16454_v10, %v18864_v7  ;;  %v7823_v51 = vmul.f32 %v7815_v28, %v18870_v45  ;;  %v18871_v17 = vld [vmem:[#allocation142_spill] sm:$0xff]  ;;  %v7862_v20 = vmul.f32 %v18872_v12, %v7818_v40  ;;  %v7975_v0 = vmul.f32 %v16467_v46, %v18873_v23 }
 0x942   : > { %18867 = vst [vmem:[#allocation162_spill] sm:$0xff] %v16732_v38  ;;  %v7861_v50 = vmul.f32 %v18871_v17, %v7817_v25  ;;  %v7867_v4 = vadd.f32 %v7859_v56, %v16568_v32  ;;  %v7868_v53 = vadd.f32 %v7860_v29, %v16576_v3  ;;  %v7976_v59 = vmul.f32 %v16470_v2, %v18873_v23  ;;  %v18875_v32 = vld [vmem:[#allocation207_spill] sm:$0xff]  ;;  %v18876_v56 = vld [vmem:[#allocation209_spill] sm:$0xff] }
 0x943   : > { %v7977_v30 = vmul.f32 %v16473_v33, %v18873_v23  ;;  %v7825_v10 = vmul.f32 %v7817_v25, %v18870_v45  ;;  %v7870_v28 = vadd.f32 %v7862_v20, %v16584_v22  ;;  %v7978_v17 = vmul.f32 %v16478_v26, %v18873_v23  ;;  %v18877_v2 = vld [vmem:[#allocation127_spill] sm:$0xff]  ;;  %v18882_v26 = vld [vmem:[#allocation145_spill] sm:$0xff] }
 0x944   : > { %v7869_v7 = vadd.f32 %v7861_v50, %v16580_v54  ;;  %v16755_v46 = vmul.f32 %v7816_v18, %v18870_v45  ;;  %v7911_v3 = vmul.f32 %v18875_v32, %v7867_v4  ;;  %v7912_v29 = vmul.f32 %v18876_v56, %v7868_v53  ;;  %v18880_v54 = vld [vmem:[#allocation152_spill] sm:$0xff]  ;;  %v18881_v50 = vld [vmem:[#allocation210_spill] sm:$0xff]  ;;  %v18916_v38 = vld [vmem:[#allocation193_spill] sm:$0xff] }
 0x945   : > { %v8027_v12 = vmul.f32 %v16493_v49, %v18877_v2  ;;  %v16762_v33 = vmul.f32 %v7818_v40, %v18870_v45  ;;  %v16764_v25 = vadd.f32 %v7823_v51, %v7819_v37  ;;  %v7914_v20 = vmul.f32 %v18881_v50, %v7870_v28 }
 0x946   : > { %18874 = vst [vmem:[#allocation163_spill] sm:$0xff] %v16755_v46  ;;  %v7913_v22 = vmul.f32 %v18880_v54, %v7869_v7  ;;  %v7875_v23 = vmul.f32 %v7867_v4, %v18882_v26  ;;  %v7919_v18 = vadd.f32 %v7911_v3, %v16596_v27  ;;  %v7920_v32 = vadd.f32 %v7912_v29, %v16600_v9 }
 0x947   : > { %18878 = vst [vmem:[#allocation95_spill] sm:$0xff] %v16762_v33  ;;  %18879 = vst [vmem:[#allocation214_spill] sm:$0xff] %v16764_v25  ;;  %v16773_v56 = vmul.f32 %v16496_v42, %v18877_v2  ;;  %v16775_v49 = vadd.f32 %v7825_v10, %v7821_v41  ;;  %v7922_v37 = vadd.f32 %v7914_v20, %v16614_v35  ;;  %v18885_v42 = vld [vmem:[#allocation148_spill] sm:$0xff] }
 0x948   : > { %v7921_v45 = vadd.f32 %v7913_v22, %v16610_v47  ;;  %v8029_v40 = vmul.f32 %v16499_v57, %v18877_v2  ;;  %v16782_v51 = vmul.f32 %v7868_v53, %v18882_v26  ;;  %v7877_v27 = vmul.f32 %v7869_v7, %v18882_v26  ;;  %v18937_v25 = vld [vmem:[#allocation144_spill] sm:$0xff] }
 0x949   : > { %18883 = vst [vmem:[#allocation215_spill] sm:$0xff] %v16775_v49  ;;  %v7963_v9 = vmul.f32 %v16524_v48, %v7919_v18  ;;  %v7964_v4 = vmul.f32 %v16541_v52, %v7920_v32  ;;  %v7927_v3 = vmul.f32 %v7919_v18, %v18885_v42  ;;  %v7966_v35 = vmul.f32 %v16570_v58, %v7922_v37  ;;  %v18896_v18 = vld [vmem:[#allocation157_spill] sm:$0xff] }
 0x94a   : > { %18884 = vst [vmem:[#allocation216_spill] sm:$0xff] %v16782_v51  ;;  %v7929_v41 = vmul.f32 %v7921_v45, %v18885_v42  ;;  %v7965_v47 = vmul.f32 %v16558_v1, %v7921_v45  ;;  %v16792_v10 = vmul.f32 %v7870_v28, %v18882_v26  ;;  %v16794_v57 = vadd.f32 %v7875_v23, %v7871_v19  ;;  %v18889_v28 = vld [vmem:[#allocation150_spill] sm:$0xff] }
 0x94b   : > { %v7971_v53 = vadd.f32 %v7963_v9, %v16620_v34  ;;  %v7972_v7 = vadd.f32 %v7964_v4, %v16624_v14  ;;  %v7928_v48 = vmul.f32 %v7920_v32, %v18885_v42  ;;  %v7974_v29 = vadd.f32 %v7966_v35, %v16632_v13 }
 0x94c   : > { %18886 = vst [vmem:[#allocation217_spill] sm:$0xff] %v16792_v10  ;;  %18887 = vst [vmem:[#allocation102_spill] sm:$0xff] %v16794_v57  ;;  %v7973_v52 = vadd.f32 %v7965_v47, %v16628_v31  ;;  %v8030_v1 = vmul.f32 %v16502_v36, %v18877_v2  ;;  %v16803_v54 = vadd.f32 %v7877_v27, %v7873_v6  ;;  %v18892_v31 = vld [vmem:[#allocation195_spill] sm:$0xff]  ;;  %v18893_v6 = vld [vmem:[#allocation149_spill] sm:$0xff] }
 0x94d   : > { %v7930_v58 = vmul.f32 %v7922_v37, %v18885_v42  ;;  %v7979_v19 = vmul.f32 %v7971_v53, %v18889_v28  ;;  %v8015_v22 = vmul.f32 %v16586_v62, %v7971_v53  ;;  %v16808_v34 = vadd.f32 %v7927_v3, %v7923_v5  ;;  %v18895_v5 = vld [vmem:[#allocation156_spill] sm:$0xff]  ;;  %v18898_v37 = vld [vmem:[#allocation158_spill] sm:$0xff] }
 0x94e   : > { %18888 = vst [vmem:[#allocation146_spill] sm:$0xff] %v16803_v54  ;;  %v16810_v14 = vadd.f32 %v7929_v41, %v7925_v55  ;;  %v8016_v50 = vmul.f32 %v16602_v63, %v7972_v7  ;;  %v8079_v13 = vmul.f32 %v18892_v31, %v16526_v43  ;;  %v7980_v20 = vmul.f32 %v7972_v7, %v18889_v28  ;;  %v18930_v54 = vld [vmem:[#allocation200_spill] sm:$0xff] }
 0x94f   : > { %18890 = vst [vmem:[#allocation218_spill] sm:$0xff] %v16808_v34  ;;  %v7981_v36 = vmul.f32 %v7973_v52, %v18889_v28  ;;  %v8017_v2 = vmul.f32 %v18893_v6, %v7973_v52  ;;  %v8018_v26 = vmul.f32 %v16649_v16, %v7974_v29  ;;  %v16820_v23 = vadd.f32 %v7928_v48, %v16722_v8  ;;  %v18899_v8 = vld [vmem:[#allocation154_spill] sm:$0xff] }
 0x950   : > { %18891 = vst [vmem:[#allocation219_spill] sm:$0xff] %v16810_v14  ;;  %v7982_v62 = vmul.f32 %v7974_v29, %v18889_v28  ;;  %v8023_v55 = vadd.f32 %v8015_v22, %v18895_v5  ;;  %v8024_v63 = vadd.f32 %v8016_v50, %v18896_v18  ;;  %v16825_v32 = vadd.f32 %v7930_v58, %v7926_v44  ;;  %v18902_v29 = vld [vmem:[#allocation212_spill] sm:$0xff]  ;;  %v18905_v50 = vld [vmem:[#allocation94_spill] sm:$0xff]  ;;  %v18911_v18 = vld [vmem:[#allocation151_spill] sm:$0xff] }
 0x951   : > { %18894 = vst [vmem:[#allocation220_spill] sm:$0xff] %v16820_v23  ;;  %v16827_v45 = vadd.f32 %v7979_v19, %v7975_v0  ;;  %v8025_v27 = vadd.f32 %v8017_v2, %v18898_v37  ;;  %v8026_v9 = vadd.f32 %v8018_v26, %v16670_v15  ;;  %v16835_v41 = vadd.f32 %v7980_v20, %v7976_v59  ;;  %v18908_v20 = vld [vmem:[#allocation192_spill] sm:$0xff] }
 0x952   : > { %18897 = vst [vmem:[#allocation108_spill] sm:$0xff] %v16825_v32  ;;  %v8031_v42 = vmul.f32 %v8023_v55, %v18899_v8  ;;  %v8067_v3 = vmul.f32 %v16660_v24, %v8023_v55  ;;  %v16837_v47 = vadd.f32 %v7981_v36, %v7977_v30  ;;  %v8068_v0 = vmul.f32 %v16674_v39, %v8024_v63  ;;  %v18903_v39 = vld [vmem:[#allocation213_spill] sm:$0xff]  ;;  %v18910_v55 = vld [vmem:[#allocation79_spill] sm:$0xff] }
 0x953   : > { %18900 = vst [vmem:[#allocation221_spill] sm:$0xff] %v16835_v41  ;;  %v8033_v44 = vmul.f32 %v8025_v27, %v18899_v8  ;;  %v16841_v35 = vadd.f32 %v7982_v62, %v7978_v17  ;;  %v8032_v15 = vmul.f32 %v8024_v63, %v18899_v8  ;;  %v8069_v7 = vmul.f32 %v16684_v60, %v8025_v27  ;;  %v7590_v60 = vpop.permute.xlu1 %7589  ;;  %v18912_v27 = vld [vmem:[#allocation78_spill] sm:$0xff] }
 0x954   : > { %v8035_v53 = vadd.f32 %v8031_v42, %v8027_v12  ;;  %v8034_v52 = vmul.f32 %v8026_v9, %v18899_v8  ;;  %v8070_v24 = vmul.f32 %v16700_v11, %v8026_v9  ;;  %v16849_v59 = vadd.f32 %v8067_v3, %v16678_v61  ;;  %v18904_v12 = vld [vmem:[#allocation204_spill] sm:$0xff] }
 0x955   : > { %18901 = vst [vmem:[#allocation222_spill] sm:$0xff] %v16841_v35  ;;  %v8049_v30 = vadd.f32 %v8033_v44, %v8029_v40  ;;  %v16852_v58 = vadd.f32 %v8068_v0, %v18902_v29  ;;  %v16855_v17 = vadd.f32 %v8069_v7, %v18903_v39  ;;  %v8080_v28 = vmul.f32 %v18904_v12, %v16526_v43  ;;  %v18906_v61 = vld [vmem:[#allocation128_spill] sm:$0xff]  ;;  %v18915_v7 = vld [vmem:[#allocation81_spill] sm:$0xff]  ;;  %v16900_v39 = vld [vmem:[%s14484_s18 + $0x8] sm:$0xff] }
 0x956   : > { %v7998_v19 = vrot.slane %v16837_v47, 4  ;;  %v8036_v22 = vrot.slane %v8035_v53, 4  ;;  %v16861_v31 = vadd.f32 %v8070_v24, %v18905_v50  ;;  %v8081_v11 = vmul.f32 %v18906_v61, %v16526_v43  ;;  %v18914_v3 = vld [vmem:[#allocation80_spill] sm:$0xff] }
 0x957   : > { %v16866_v40 = vadd.f32 %v8032_v15, %v16773_v56  ;;  %v8082_v36 = vmul.f32 %v18908_v20, %v16526_v43  ;;  %v8083_v6 = vmul.f32 %v16849_v59, %v7590_v60  ;;  %v8084_v2 = vmul.f32 %v16852_v58, %v7590_v60  ;;  %v16910_v61 = vld [vmem:[%s14484_s18 + $0x18] sm:$0xff] }
 0x958   : > { %v16872_v26 = vadd.f32 %v8034_v52, %v8030_v1  ;;  %v8085_v62 = vmul.f32 %v16855_v17, %v7590_v60  ;;  %v8086_v5 = vmul.f32 %v16861_v31, %v7590_v60  ;;  %v16878_v63 = vrot.slane %v18911_v18, %v18910_v55  ;;  %v16895_v52 = vld [vmem:[%s14484_s18] sm:$0xff] }
 0x959   : > { %18907 = vst [vmem:[#allocation223_spill] sm:$0xff] %v16866_v40  ;;  %v8050_v56 = vrot.slane %v8049_v30, 4  ;;  %v8087_v37 = vadd.f32 %v8083_v6, %v8079_v13  ;;  %v8094_v43 = vadd.f32 %v8084_v2, %v8080_v28  ;;  %v16882_v9 = vrot.slane %v18911_v18, %v18912_v27  ;;  %v16905_v28 = vld [vmem:[%s14484_s18 + $0x10] sm:$0xff] }
 0x95a   : > { %18909 = vst [vmem:[#allocation175_spill] sm:$0xff] %v16872_v26  ;;  %v16884_v8 = vadd.f32 %v8036_v22, %v8035_v53  ;;  %v8101_v1 = vadd.f32 %v8085_v62, %v8081_v11  ;;  %v8108_v42 = vadd.f32 %v8086_v5, %v8082_v36  ;;  %v16888_v44 = vrot.slane %v18911_v18, %v18914_v3 }
 0x95b   : > { %v8088_v0 = vrot.slane %v8087_v37, 4  ;;  %v8095_v15 = vrot.slane %v8094_v43, 4  ;;  %v16892_v13 = vrot.slane %v18911_v18, %v18915_v7  ;;  %v6423_v24 = vmul.f32 %v16895_v52, %v16878_v63 }
 0x95c   : > { %18913 = vst [vmem:[#allocation168_spill] sm:$0xff] %v16884_v8  ;;  %v8102_v53 = vrot.slane %v8101_v1, 4  ;;  %v8109_v29 = vrot.slane %v8108_v42, 4  ;;  %v6424_v12 = vmul.f32 %v16900_v39, %v16882_v9  ;;  %v6425_v60 = vmul.f32 %v16905_v28, %v16888_v44 }
 0x95d   : > { %v8089_v22 = vadd.f32 %v8088_v0, %v8087_v37  ;;  %v8096_v50 = vadd.f32 %v8095_v15, %v8094_v43  ;;  %v6426_v11 = vmul.f32 %v16910_v61, %v16892_v13  ;;  %v6631_v20 = vmul.f32 1.442695, %v6423_v24 }
 0x95e   : > { %v8103_v36 = vadd.f32 %v8102_v53, %v8101_v1  ;;  %v8110_v6 = vadd.f32 %v8109_v29, %v8108_v42  ;;  %v6633_v2 = vmul.f32 1.442695, %v6424_v12  ;;  %v6635_v62 = vmul.f32 1.442695, %v6425_v60 }
 0x95f   : > { %v8090_v5 = vrot.slane %v8089_v22, 2  ;;  %v8097_v18 = vrot.slane %v8096_v50, 2  ;;  %12925 = vpow2.f32 %v6631_v20  ;;  %v6637_v16 = vmul.f32 1.442695, %v6426_v11  ;;  %v18921_v11 = vld [vmem:[#allocation123_spill] sm:$0xff] }
 0x960   : > { %v8104_v4 = vrot.slane %v8103_v36, 2  ;;  %v8111_v48 = vrot.slane %v8110_v6, 2  ;;  %12927 = vpow2.f32 %v6633_v2  ;;  %v6875_v37 = vcombine.high %v18916_v38, %v18916_v38 }
 0x961   : > { %v16916_v43 = vadd.f32 %v8050_v56, %v8049_v30  ;;  %v8091_v0 = vadd.f32 %v8090_v5, %v8089_v22  ;;  %v8098_v15 = vadd.f32 %v8097_v18, %v8096_v50  ;;  %12929 = vpow2.f32 %v6635_v62  ;;  %v18924_v5 = vld [vmem:[#allocation197_spill] sm:$0xff]  ;;  %v18926_v22 = vld [vmem:[#allocation198_spill] sm:$0xff]  ;;  %v18928_v56 = vld [vmem:[#allocation199_spill] sm:$0xff] }
 0x962   : > { %v8105_v24 = vadd.f32 %v8104_v4, %v8103_v36  ;;  %v8112_v1 = vadd.f32 %v8111_v48, %v8110_v6  ;;  %12931 = vpow2.f32 %v6637_v16  ;;  %v16919_v42 = vrot.slane %v6875_v37, %v18910_v55  ;;  %v18922_v36 = vld [vmem:[#allocation196_spill] sm:$0xff]  ;;  %v18925_v18 = vld [vmem:[#allocation241_spill] sm:$0xff] }
 0x963   : > { %18917 = vst [vmem:[#allocation169_spill] sm:$0xff] %v16916_v43  ;;  %v18918_v53 = vrot.slane %v16827_v45, 4  ;;  %v16927_v12 = vadd.f32 %v7998_v19, %v16837_v47  ;;  %v8092_v38 = vrot.slane %v8091_v0, 1  ;;  %v8099_v30 = vrot.slane %v8098_v15, 1  ;;  %v18923_v6 = vld [vmem:[#allocation132_spill] sm:$0xff]  ;;  %v18927_v48 = vld [vmem:[#allocation237_spill] sm:$0xff] }
 0x964   : > { %v8106_v60 = vrot.slane %v8105_v24, 1  ;;  %v16931_v4 = vrot.slane %v6875_v37, %v18912_v27  ;;  %v16934_v16 = vrot.slane %v6875_v37, %v18914_v3  ;;  %v8113_v50 = vrot.slane %v8112_v1, 1 }
 0x965   : > { %v16924_v29 = vadd.f32 %v18918_v53, %v16827_v45  ;;  %18920 = vst [vmem:[#allocation170_spill] sm:$0xff] %v16927_v12  ;;  %v16939_v47 = vadd.f32 %v8092_v38, %v8091_v0  ;;  %v16942_v19 = vrot.slane %v6875_v37, %v18915_v7  ;;  %v7471_v20 = vmul.f32 %v16919_v42, %v18921_v11  ;;  %v18929_v0 = vld [vmem:[#allocation238_spill] sm:$0xff] }
 0x966   : > { %v6419_v2 = vmul.f32 %v18923_v6, %v18922_v36  ;;  %v16948_v62 = vadd.f32 %v8099_v30, %v8098_v15  ;;  %v6420_v53 = vmul.f32 %v18925_v18, %v18924_v5  ;;  %v6421_v45 = vmul.f32 %v18927_v48, %v18926_v22  ;;  %v7602_v22 = vpop.permute.xlu0 %7601 }
 0x967   : > { %18919 = vst [vmem:[#allocation176_spill] sm:$0xff] %v16924_v29  ;;  %v6422_v38 = vmul.f32 %v18929_v0, %v18928_v56  ;;  %v16956_v43 = vadd.f32 %v8106_v60, %v8105_v24  ;;  %v7472_v37 = vmul.f32 %v16931_v4, %v18921_v11  ;;  %v7473_v12 = vmul.f32 %v16934_v16, %v18921_v11  ;;  %v16968_v56 = vpop.permute.xlu1 %7597 }
 0x968   : > { %v6623_v36 = vmul.f32 1.442695, %v6419_v2  ;;  %v6625_v15 = vmul.f32 1.442695, %v6420_v53  ;;  %v6627_v30 = vmul.f32 1.442695, %v6421_v45  ;;  %v6878_v5 = vcombine.high %v18930_v54, %v18930_v54 }
 0x969   : > { %v6629_v14 = vmul.f32 1.442695, %v6422_v38  ;;  %v16964_v49 = vadd.f32 %v8113_v50, %v8112_v1  ;;  %v7474_v24 = vmul.f32 %v16942_v19, %v18921_v11  ;;  %v6427_v60 = vmul.f32 %v18923_v6, %v16878_v63  ;;  %v18931_v2 = vld [vmem:[#allocation88_spill] sm:$0xff]  ;;  %v18932_v53 = vld [vmem:[#allocation227_spill] sm:$0xff]  ;;  %v18934_v11 = vld [vmem:[#allocation229_spill] sm:$0xff] }
 0x96a   : > { %12933 = vpow2.f32 %v6623_v36  ;;  %v16974_v45 = vmul.f32 %v18932_v53, %v18931_v2  ;;  %v18933_v38 = vld [vmem:[#allocation228_spill] sm:$0xff]  ;;  %v6428_v1 = vmul.f32 %v18925_v18, %v16882_v9  ;;  %v16984_v36 = vmul.f32 %v18934_v11, %v18931_v2  ;;  %v18935_v53 = vld [vmem:[#allocation137_spill] sm:$0xff]  ;;  %v7066_v10 = vpop.permute.xlu0 %7065 }
 0x96b   : > { %12935 = vpow2.f32 %v6625_v15  ;;  %v16978_v8 = vmul.f32 %v18933_v38, %v18931_v2  ;;  %v6429_v63 = vmul.f32 %v18927_v48, %v16888_v44  ;;  %v6430_v6 = vmul.f32 %v18929_v0, %v16892_v13  ;;  %v17004_v33 = vpop.permute.xlu1 %7605 }
 0x96c   : > { %v12926_v50 = vpop.eup %12925  ;;  %12937 = vpow2.f32 %v6627_v30  ;;  %v7314_v38 = vrot.slane %v6878_v5, %v18910_v55  ;;  %v7318_v9 = vrot.slane %v6878_v5, %v18912_v27  ;;  %v18936_v30 = vld [vmem:[#allocation139_spill] sm:$0xff]  ;;  %v7322_v11 = vrot.slane %v6878_v5, %v18914_v3 }
 0x96d   : > { %v12928_v15 = vpop.eup %12927  ;;  %v8167_v29 = vmul.f32 %v12926_v50, %v18935_v53  ;;  %12939 = vpow2.f32 %v6629_v14  ;;  %v16996_v57 = vrot.slane %v6878_v5, %v18915_v7  ;;  %v6639_v44 = vmul.f32 1.442695, %v6427_v60  ;;  %v18938_v53 = vld [vmem:[#allocation147_spill] sm:$0xff]  ;;  %v18939_v5 = vld [vmem:[#allocation230_spill] sm:$0xff] }
 0x96e   : > { %v12930_v18 = vpop.eup %12929  ;;  %v8168_v34 = vmul.f32 %v12928_v15, %v18936_v30  ;;  %v6641_v50 = vmul.f32 1.442695, %v6428_v1  ;;  %v6643_v14 = vmul.f32 1.442695, %v6429_v63  ;;  %v6645_v15 = vmul.f32 1.442695, %v6430_v6 }
 0x96f   : > { %v12932_v48 = vpop.eup %12931  ;;  %v8169_v13 = vmul.f32 %v12930_v18, %v18937_v25  ;;  %v16999_v0 = vadd.f32 %v8167_v29, %v7471_v20  ;;  %12941 = vpow2.f32 %v6639_v44  ;;  %v7470_v60 = vmul.f32 %v18939_v5, %v18931_v2  ;;  %v18945_v63 = vld [vmem:[#allocation134_spill] sm:$0xff] }
 0x970   : > { %v8170_v26 = vmul.f32 %v12932_v48, %v18938_v53  ;;  %v17002_v35 = vadd.f32 %v8168_v34, %v7472_v37  ;;  %v17010_v32 = vmul.f32 %v7314_v38, %v7066_v10  ;;  %12943 = vpow2.f32 %v6641_v50  ;;  %v18946_v44 = vld [vmem:[#allocation194_spill] sm:$0xff]  ;;  %v17066_v53 = vpop.permute.xlu1 %7069 }
 0x971   : > { %v17006_v30 = vadd.f32 %v8169_v13, %v7473_v12  ;;  %v17012_v25 = vmul.f32 %v7318_v9, %v7066_v10  ;;  %v17014_v29 = vmul.f32 %v7322_v11, %v7066_v10  ;;  %v17017_v34 = vmul.f32 %v16996_v57, %v7066_v10  ;;  %v18944_v12 = vld [vmem:[#allocation172_spill] sm:$0xff] }
 0x972   : > { %18940 = vst [vmem:[#allocation173_spill] sm:$0xff] %v17010_v32  ;;  %12945 = vpow2.f32 %v6643_v14  ;;  %v17019_v20 = vadd.f32 %v8170_v26, %v7474_v24  ;;  %v17022_v37 = vmul.f32 %v16999_v0, %v7602_v22  ;;  %v17026_v2 = vmul.f32 %v16919_v42, %v18944_v12 }
 0x973   : > { %18941 = vst [vmem:[#allocation164_spill] sm:$0xff] %v17012_v25  ;;  %18942 = vst [vmem:[#allocation224_spill] sm:$0xff] %v17014_v29  ;;  %12947 = vpow2.f32 %v6645_v15  ;;  %v17029_v1 = vmul.f32 %v17002_v35, %v7602_v22  ;;  %v17033_v6 = vrot.slane %v18945_v63, %v18910_v55  ;;  %v17037_v10 = vrot.slane %v18945_v63, %v18912_v27  ;;  %v12580_v29 = vld [vmem:[%s14491_s10 + $0x170] ss:$8 sps:$4 sm:$0xff]  }
 0x974   : > { %18943 = vst [vmem:[#allocation225_spill] sm:$0xff] %v17017_v34  ;;  %v17041_v26 = vrot.slane %v18945_v63, %v18914_v3  ;;  %v17044_v24 = vmul.f32 %v17006_v30, %v7602_v22  ;;  %v17048_v42 = vmul.f32 %v16931_v4, %v18944_v12  ;;  %v17052_v18 = vrot.slane %v18945_v63, %v18915_v7 }
 0x975   : > { %v6877_v48 = vcombine.high %v18946_v44, %v18946_v44  ;;  %v17058_v13 = vmul.f32 %v16934_v16, %v18944_v12  ;;  %v6431_v50 = vmul.f32 %v16895_v52, %v17033_v6  ;;  %v6432_v14 = vmul.f32 %v16900_v39, %v17037_v10 }
 0x976   : > { %v6433_v4 = vmul.f32 %v16905_v28, %v17041_v26  ;;  %v17069_v5 = vmul.f32 %v17019_v20, %v7602_v22  ;;  %v17073_v63 = vmul.f32 %v16942_v19, %v18944_v12  ;;  %v6434_v16 = vmul.f32 %v16910_v61, %v17052_v18 }
 0x977   : > { %v12934_v15 = vpop.eup %12933  ;;  %v17078_v44 = vmul.f32 %v7314_v38, %v17066_v53  ;;  %v6647_v23 = vmul.f32 1.442695, %v6431_v50  ;;  %v17082_v51 = vrot.slane %v6877_v48, %v18910_v55  ;;  %v17085_v22 = vmul.f32 %v7318_v9, %v17066_v53 }
 0x978   : > { %v12936_v40 = vpop.eup %12935  ;;  %v8119_v41 = vmul.f32 %v12934_v15, %v16849_v59  ;;  %v6649_v12 = vmul.f32 1.442695, %v6432_v14  ;;  %v17089_v34 = vrot.slane %v6877_v48, %v18912_v27  ;;  %v17092_v38 = vmul.f32 %v7322_v11, %v17066_v53 }
 0x979   : > { %18947 = vst [vmem:[#allocation226_spill] sm:$0xff] %v17078_v44  ;;  %18948 = vst [vmem:[#allocation89_spill] sm:$0xff] %v17082_v51  ;;  %v12938_v46 = vpop.eup %12937  ;;  %v8120_v19 = vmul.f32 %v12936_v40, %v16852_v58  ;;  %v6651_v15 = vmul.f32 1.442695, %v6433_v4  ;;  %v17097_v9 = vrot.slane %v6877_v48, %v18914_v3  ;;  %v6653_v14 = vmul.f32 1.442695, %v6434_v16 }
 0x97a   : > { %18949 = vst [vmem:[#allocation121_spill] sm:$0xff] %v17085_v22  ;;  %18950 = vst [vmem:[#allocation130_spill] sm:$0xff] %v17089_v34  ;;  %v12940_v44 = vpop.eup %12939  ;;  %v8121_v59 = vmul.f32 %v12938_v46, %v16855_v17  ;;  %v8127_v50 = vadd.f32 %v8119_v41, %v16974_v45  ;;  %v17102_v22 = vrot.slane %v6877_v48, %v18915_v7  ;;  %12949 = vpow2.f32 %v6647_v23  ;;  %v18952_v41 = vld [vmem:[#allocation231_spill] sm:$0xff]  ;;  %v12579_v48 = vld [vmem:[%s14491_s10 + $0x74] ss:$8 sps:$4 sm:$0xff]  }
 0x97b   : > { %18951 = vst [vmem:[#allocation111_spill] sm:$0xff] %v17092_v38  ;;  %v8122_v58 = vmul.f32 %v12940_v44, %v16861_v31  ;;  %v8128_v40 = vadd.f32 %v8120_v19, %v16978_v8  ;;  %v17108_v17 = vmul.f32 %v17082_v51, %v18952_v41  ;;  %12951 = vpow2.f32 %v6649_v12  ;;  %v18953_v19 = vld [vmem:[#allocation92_spill] sm:$0xff]  ;;  %9028 = vmatprep.subr.bf16.mxu0 %v12579_v48  ;;  %v12585_v48 = vld [vmem:[%s14491_s10 + $0x64] ss:$8 sps:$4 sm:$0xff]  }
 0x97c   : > { %v8129_v11 = vadd.f32 %v8121_v59, %v16984_v36  ;;  %v8135_v46 = vmul.f32 %v8127_v50, %v16968_v56  ;;  %v12942_v45 = vpop.eup %12941  ;;  %v17113_v8 = vmul.f32 %v17089_v34, %v18952_v41  ;;  %v12582_v36 = vld [vmem:[%s14491_s10 + $0x174] ss:$8 sps:$4 sm:$0xff]   ;;  %12953 = vpow2.f32 %v6651_v15  ;;  %v12577_v38 = vld [vmem:[%s14491_s10 + $0x70] ss:$8 sps:$4 sm:$0xff]   ;;  %v18957_v15 = vld [vmem:[#allocation155_spill] sm:$0xff] }
 0x97d   : > { %v8130_v4 = vadd.f32 %v8122_v58, %v7470_v60  ;;  %v8136_v31 = vmul.f32 %v8128_v40, %v16968_v56  ;;  %v12944_v16 = vpop.eup %12943  ;;  %v8171_v59 = vmul.f32 %v12942_v45, %v8127_v50  ;;  %v18954_v58 = vld [vmem:[#allocation159_spill] sm:$0xff]  ;;  %12955 = vpow2.f32 %v6653_v14  ;;  %v18955_v34 = vld [vmem:[#allocation93_spill] sm:$0xff]  ;;  %9071 = vmatprep.subr.bf16.mxu1 %v12582_v36  ;;  %9029 = vmatpush1.bf16.msra.mxu0 %v12577_v38 }
 0x97e   : > { %v8137_v44 = vmul.f32 %v8129_v11, %v16968_v56  ;;  %v8139_v23 = vadd.f32 %v8135_v46, %v18953_v19  ;;  %v8172_v32 = vmul.f32 %v12944_v16, %v8128_v40  ;;  %9072 = vmatpush1.bf16.msra.mxu1 %v12580_v29  ;;  %v12583_v14 = vld [vmem:[%s14491_s10 + $0x60] ss:$8 sps:$4 sm:$0xff]   ;;  %9030 = vmatprep.subr.bf16.mxu0 %v12585_v48  ;;  %v12589_v19 = vld [vmem:[%s14491_s10 + $0x50] ss:$8 sps:$4 sm:$0xff]  }
 0x97f   : > { %v12946_v25 = vpop.eup %12945  ;;  %v8138_v60 = vmul.f32 %v8130_v4, %v16968_v56  ;;  %v8146_v12 = vadd.f32 %v8136_v31, %v18954_v58  ;;  %v17125_v50 = vadd.f32 %v8171_v59, %v17026_v2  ;;  %v12586_v38 = vld [vmem:[%s14491_s10 + $0x160] ss:$8 sps:$4 sm:$0xff]  }
 0x980   : > { %v12948_v21 = vpop.eup %12947  ;;  %v8140_v54 = vrot.slane %v8139_v23, 4  ;;  %v8153_v51 = vadd.f32 %v8137_v44, %v18955_v34  ;;  %v8173_v46 = vmul.f32 %v12946_v25, %v8129_v11  ;;  %v17129_v40 = vadd.f32 %v8172_v32, %v17048_v42  ;;  %v12588_v11 = vld [vmem:[%s14491_s10 + $0x164] ss:$8 sps:$4 sm:$0xff]  }
 0x981   : > { %18956 = vst [vmem:[#allocation83_spill] sm:$0xff] %v17125_v50  ;;  %v8147_v56 = vrot.slane %v8146_v12, 4  ;;  %v8160_v45 = vadd.f32 %v8138_v60, %v18957_v15  ;;  %v8174_v31 = vmul.f32 %v12948_v21, %v8130_v4  ;;  %v8187_v2 = vmul.f32 %v17125_v50, %v17004_v33  ;;  %9073 = vmatprep.subr.bf16.mxu1 %v12588_v11  ;;  %v12595_v11 = vld [vmem:[%s14491_s10 + $0x40] ss:$8 sps:$4 sm:$0xff]  }
 0x982   : > { %18958 = vst [vmem:[#allocation112_spill] sm:$0xff] %v17129_v40  ;;  %v8141_v34 = vadd.f32 %v8140_v54, %v8139_v23  ;;  %v8154_v16 = vrot.slane %v8153_v51, 4  ;;  %v17134_v25 = vadd.f32 %v8173_v46, %v17058_v13  ;;  %v8188_v29 = vmul.f32 %v17129_v40, %v17004_v33  ;;  %v12591_v54 = vld [vmem:[%s14491_s10 + $0x54] ss:$8 sps:$4 sm:$0xff]   ;;  %9031 = vmatpush1.bf16.msra.mxu0 %v12583_v14 }
 0x983   : > { %v8148_v21 = vadd.f32 %v8147_v56, %v8146_v12  ;;  %v8161_v4 = vrot.slane %v8160_v45, 4  ;;  %v17141_v32 = vadd.f32 %v8174_v31, %v17073_v63  ;;  %v8191_v44 = vadd.f32 %v8187_v2, %v17022_v37  ;;  %v12594_v63 = vld [vmem:[%s14491_s10 + $0x154] ss:$8 sps:$4 sm:$0xff]   ;;  %9074 = vmatpush1.bf16.msra.mxu1 %v12586_v38  ;;  %9032 = vmatprep.subr.bf16.mxu0 %v12591_v54  ;;  %v12597_v12 = vld [vmem:[%s14491_s10 + $0x44] ss:$8 sps:$4 sm:$0xff]  }
 0x984   : > { %18959 = vst [vmem:[#allocation117_spill] sm:$0xff] %v17134_v25  ;;  %v8142_v42 = vrot.slane %v8141_v34, 2  ;;  %v8155_v13 = vadd.f32 %v8154_v16, %v8153_v51  ;;  %v8189_v36 = vmul.f32 %v17134_v25, %v17004_v33  ;;  %v8198_v58 = vadd.f32 %v8188_v29, %v17029_v1  ;;  %v12592_v51 = vld [vmem:[%s14491_s10 + $0x150] ss:$8 sps:$4 sm:$0xff]   ;;  %9075 = vmatprep.subr.bf16.mxu1 %v12594_v63  ;;  %v12600_v31 = vld [vmem:[%s14491_s10 + $0x144] ss:$8 sps:$4 sm:$0xff]  }
 0x985   : > { %18960 = vst [vmem:[#allocation119_spill] sm:$0xff] %v17141_v32  ;;  %v8149_v23 = vrot.slane %v8148_v21, 2  ;;  %v8162_v59 = vadd.f32 %v8161_v4, %v8160_v45  ;;  %v8190_v60 = vmul.f32 %v17141_v32, %v17004_v33  ;;  %v8192_v37 = vrot.slane %v8191_v44, 4 }
 0x986   : > { %v8143_v46 = vadd.f32 %v8142_v42, %v8141_v34  ;;  %v8156_v56 = vrot.slane %v8155_v13, 2  ;;  %v8205_v15 = vadd.f32 %v8189_v36, %v17044_v24  ;;  %v8199_v45 = vrot.slane %v8198_v58, 4  ;;  %9033 = vmatpush1.bf16.msra.mxu0 %v12589_v19  ;;  %v12603_v42 = vld [vmem:[%s14491_s10 + $0x34] ss:$8 sps:$4 sm:$0xff]  }
 0x987   : > { %v8150_v14 = vadd.f32 %v8149_v23, %v8148_v21  ;;  %v8163_v48 = vrot.slane %v8162_v59, 2  ;;  %v8212_v33 = vadd.f32 %v8190_v60, %v17069_v5  ;;  %v8193_v2 = vadd.f32 %v8192_v37, %v8191_v44  ;;  %v12950_v34 = vpop.eup %12949  ;;  %9076 = vmatpush1.bf16.msra.mxu1 %v12592_v51  ;;  %9034 = vmatprep.subr.bf16.mxu0 %v12597_v12  ;;  %v12598_v21 = vld [vmem:[%s14491_s10 + $0x140] ss:$8 sps:$4 sm:$0xff]   ;;  %v12606_v19 = vld [vmem:[%s14491_s10 + $0x134] ss:$8 sps:$4 sm:$0xff]  }
 0x988   : > { %v8144_v1 = vrot.slane %v8143_v46, 1  ;;  %v8157_v16 = vadd.f32 %v8156_v56, %v8155_v13  ;;  %v8206_v38 = vrot.slane %v8205_v15, 4  ;;  %v8200_v29 = vadd.f32 %v8199_v45, %v8198_v58  ;;  %v12952_v36 = vpop.eup %12951  ;;  %9077 = vmatprep.subr.bf16.mxu1 %v12600_v31  ;;  %v12601_v45 = vld [vmem:[%s14491_s10 + $0x30] ss:$8 sps:$4 sm:$0xff]  }
 0x989   : > { %v8151_v4 = vrot.slane %v8150_v14, 1  ;;  %v8164_v24 = vadd.f32 %v8163_v48, %v8162_v59  ;;  %v8213_v54 = vrot.slane %v8212_v33, 4  ;;  %v8194_v63 = vrot.slane %v8193_v2, 2  ;;  %v12954_v23 = vpop.eup %12953  ;;  %v18962_v48 = vld [vmem:[#allocation122_spill] sm:$0xff] }
 0x98a   : > { %v8158_v5 = vrot.slane %v8157_v16, 1  ;;  %v8207_v13 = vadd.f32 %v8206_v38, %v8205_v15  ;;  %v7481_v44 = vmul.f32 %v17097_v9, %v18952_v41  ;;  %v8201_v59 = vrot.slane %v8200_v29, 2  ;;  %v12956_v12 = vpop.eup %12955  ;;  %9035 = vmatpush1.bf16.msra.mxu0 %v12595_v11 }
 0x98b   : > { %v8165_v60 = vrot.slane %v8164_v24, 1  ;;  %v8214_v58 = vadd.f32 %v8213_v54, %v8212_v33  ;;  %v7482_v51 = vmul.f32 %v17102_v22, %v18952_v41  ;;  %v8195_v56 = vadd.f32 %v8194_v63, %v8193_v2  ;;  %9078 = vmatpush1.bf16.msra.mxu1 %v12598_v21  ;;  %9036 = vmatprep.subr.bf16.mxu0 %v12603_v42  ;;  %v12604_v41 = vld [vmem:[%s14491_s10 + $0x130] ss:$8 sps:$4 sm:$0xff]   ;;  %v12609_v2 = vld [vmem:[%s14491_s10 + $0x24] ss:$8 sps:$4 sm:$0xff]  }
 0x98c   : > { %v8208_v37 = vrot.slane %v8207_v13, 2  ;;  %v17169_v15 = vmul.f32 %v16996_v57, %v17066_v53  ;;  %v17173_v31 = vrot.slane %v18962_v48, %v18910_v55  ;;  %v8145_v38 = vadd.f32 %v8144_v1, %v8143_v46  ;;  %9079 = vmatprep.subr.bf16.mxu1 %v12606_v19  ;;  %v7610_v19 = vpop.permute.xlu0 %7609 }
 0x98d   : > { %v8152_v33 = vadd.f32 %v8151_v4, %v8150_v14  ;;  %v8202_v54 = vadd.f32 %v8201_v59, %v8200_v29  ;;  %v8215_v32 = vrot.slane %v8214_v58, 2  ;;  %v8159_v63 = vadd.f32 %v8158_v5, %v8157_v16  ;;  %v12607_v16 = vld [vmem:[%s14491_s10 + $0x20] ss:$8 sps:$4 sm:$0xff]   ;;  %v12616_v59 = vld [vmem:[%s14491_s10 + $0x110] ss:$8 sps:$4 sm:$0xff]  }
 0x98e   : > { %18961 = vst [vmem:[#allocation140_spill] sm:$0xff] %v17169_v15  ;;  %v8196_v25 = vrot.slane %v8195_v56, 1  ;;  %v8209_v57 = vadd.f32 %v8208_v37, %v8207_v13  ;;  %v8219_v53 = vmul.f32 %v12950_v34, %v16999_v0  ;;  %v12612_v15 = vld [vmem:[%s14491_s10 + $0x124] ss:$8 sps:$4 sm:$0xff]   ;;  %v8166_v40 = vadd.f32 %v8165_v60, %v8164_v24  ;;  %9037 = vmatpush1.bf16.msra.mxu0 %v12601_v45 }
 0x98f   : > { %v8203_v11 = vrot.slane %v8202_v54, 1  ;;  %v8216_v50 = vadd.f32 %v8215_v32, %v8214_v58  ;;  %v8220_v46 = vmul.f32 %v12952_v36, %v17002_v35  ;;  %v8221_v4 = vmul.f32 %v12954_v23, %v17006_v30  ;;  %9080 = vmatpush1.bf16.msra.mxu1 %v12604_v41  ;;  %9038 = vmatprep.subr.bf16.mxu0 %v12609_v2  ;;  %v12610_v35 = vld [vmem:[%s14491_s10 + $0x120] ss:$8 sps:$4 sm:$0xff]   ;;  %v12621_v58 = vld [vmem:[%s14491_s10 + $0x4] ss:$8 sps:$4 sm:$0xff]  }
 0x990   : > { %v8197_v14 = vadd.f32 %v8196_v25, %v8195_v56  ;;  %v8210_v1 = vrot.slane %v8209_v57, 1  ;;  %v8222_v29 = vmul.f32 %v12956_v12, %v17019_v20  ;;  %v17185_v0 = vadd.f32 %v8219_v53, %v17108_v17  ;;  %9081 = vmatprep.subr.bf16.mxu1 %v12612_v15  ;;  %v12615_v17 = vld [vmem:[%s14491_s10 + $0x14] ss:$8 sps:$4 sm:$0xff]   ;;  %v12624_v15 = vld [vmem:[%s14491_s10 + $0x104] ss:$8 sps:$4 sm:$0xff]  }
 0x991   : > { %v8204_v21 = vadd.f32 %v8203_v11, %v8202_v54  ;;  %v8217_v42 = vrot.slane %v8216_v50, 1  ;;  %v17189_v32 = vrot.slane %v18962_v48, %v18912_v27  ;;  %v8540_v30 = vsel %vm8509_vm5, %v16939_v47, %v8145_v38  ;;  %v12619_v53 = vld [vmem:[%s14491_s10] ss:$8 sps:$4 sm:$0xff]  }
 0x992   : > { %v8211_v25 = vadd.f32 %v8210_v1, %v8209_v57  ;;  %v17195_v20 = vadd.f32 %v8220_v46, %v17113_v8  ;;  %v17197_v34 = vadd.f32 %v8221_v4, %v7481_v44  ;;  %v8541_v24 = vsel %vm8509_vm5, %v16948_v62, %v8152_v33  ;;  %v12618_v8 = vld [vmem:[%s14491_s10 + $0x114] ss:$8 sps:$4 sm:$0xff]   ;;  %9039 = vmatpush1.bf16.msra.mxu0 %v12607_v16  ;;  %v12613_v62 = vld [vmem:[%s14491_s10 + $0x10] ss:$8 sps:$4 sm:$0xff]   ;;  %v12622_v4 = vld [vmem:[%s14491_s10 + $0x100] ss:$8 sps:$4 sm:$0xff]  }
 0x993   : > { %v8542_v36 = vsel %vm8509_vm5, %v16956_v43, %v8159_v63  ;;  %v8543_v5 = vsel %vm8509_vm5, %v16964_v49, %v8166_v40  ;;  %v17207_v47 = vsel %vm8514_vm6, %v8540_v30, %v8197_v14  ;;  %v8218_v13 = vadd.f32 %v8217_v42, %v8216_v50  ;;  %9082 = vmatpush1.bf16.msra.mxu1 %v12610_v35  ;;  %v18964_v33 = vld [vmem:[#allocation188_spill] sm:$0xff]  ;;  %v17267_v14 = vld [vmem:[%s14484_s18 + $0x20] sm:$0xff]  ;;  %v17274_v16 = vld [vmem:[%s14484_s18 + $0x28] sm:$0xff] }
 0x994   : > { %v17211_v44 = vsel %vm8514_vm6, %v8541_v24, %v8204_v21  ;;  %v17213_v23 = vadd.f32 %v8222_v29, %v7482_v51  ;;  %v17217_v43 = vrot.slane %v18962_v48, %v18914_v3  ;;  %v17221_v49 = vmul.f32 %v17185_v0, %v7610_v19  ;;  %9040 = vmatprep.subr.bf16.mxu0 %v12615_v17  ;;  %v12627_v29 = vld [vmem:[%s14491_s10 + $0xf4] ss:$8 sps:$4 sm:$0xff]   ;;  %v17279_v42 = vld [vmem:[%s14484_s18 + $0x30] sm:$0xff] }
 0x995   : > { %18963 = vst [vmem:[#allocation142_spill] sm:$0xff] %v17211_v44  ;;  %v17225_v40 = vrot.slane %v18962_v48, %v18915_v7  ;;  %v6439_v50 = vmul.f32 %v16895_v52, %v17173_v31  ;;  %v6440_v60 = vmul.f32 %v16900_v39, %v17189_v32  ;;  %v17234_v51 = vsel %vm8514_vm6, %v8542_v36, %v8211_v25  ;;  %v17284_v30 = vld [vmem:[%s14484_s18 + $0x38] sm:$0xff] }
 0x996   : > { %v17237_v12 = vmul.f32 %v17195_v20, %v7610_v19  ;;  %v17240_v56 = vmul.f32 %v17197_v34, %v7610_v19  ;;  %v6441_v37 = vmul.f32 %v16905_v28, %v17217_v43  ;;  %v17249_v54 = vrot.slane %v18964_v33, %v18910_v55  ;;  %9083 = vmatprep.subr.bf16.mxu1 %v12618_v8  ;;  %v12630_v25 = vld [vmem:[%s14491_s10 + $0x1f4] ss:$8 sps:$4 sm:$0xff]  }
 0x997   : > { %v6442_v48 = vmul.f32 %v16910_v61, %v17225_v40  ;;  %v6663_v45 = vmul.f32 1.442695, %v6439_v50  ;;  %v6665_v38 = vmul.f32 1.442695, %v6440_v60  ;;  %v17252_v41 = vsel %vm8514_vm6, %v8543_v5, %v8218_v13  ;;  %9041 = vmatpush1.bf16.msra.mxu0 %v12613_v62  ;;  %9084 = vmatpush1.bf16.msra.mxu1 %v12616_v59  ;;  %v18966_v24 = vld [vmem:[#allocation236_spill] sm:$0xff]  ;;  %v18967_v62 = vld [vmem:[#allocation141_spill] sm:$0xff] }
 0x998   : > { %18965 = vst [vmem:[#allocation143_spill] sm:$0xff] %v17252_v41  ;;  %v17255_v2 = vmul.f32 %v17213_v23, %v7610_v19  ;;  %v6667_v63 = vmul.f32 1.442695, %v6441_v37  ;;  %v17259_v57 = vrot.slane %v18964_v33, %v18912_v27  ;;  %v17264_v46 = vrot.slane %v18964_v33, %v18914_v3  ;;  %9042 = vmatprep.subr.bf16.mxu0 %v12621_v58  ;;  %v12628_v60 = vld [vmem:[%s14491_s10 + $0x1f0] ss:$8 sps:$4 sm:$0xff]  }
 0x999   : > { %12957 = vpow2.f32 %v6663_v45  ;;  %v6669_v11 = vmul.f32 1.442695, %v6442_v48  ;;  %v6435_v1 = vmul.f32 %v17267_v14, %v17033_v6  ;;  %v6436_v21 = vmul.f32 %v17274_v16, %v17037_v10  ;;  %9085 = vmatprep.subr.bf16.mxu1 %v12624_v15  ;;  %v12633_v59 = vld [vmem:[%s14491_s10 + $0xe4] ss:$8 sps:$4 sm:$0xff]  }
 0x99a   : > { %12959 = vpow2.f32 %v6665_v38  ;;  %v6437_v35 = vmul.f32 %v17279_v42, %v17041_v26  ;;  %v6438_v6 = vmul.f32 %v17284_v30, %v17052_v18  ;;  %v17291_v17 = vrot.slane %v18964_v33, %v18915_v7  ;;  %v12625_v26 = vld [vmem:[%s14491_s10 + $0xf0] ss:$8 sps:$4 sm:$0xff]   ;;  %v12636_v48 = vld [vmem:[%s14491_s10 + $0x1e4] ss:$8 sps:$4 sm:$0xff]  }
 0x99b   : > { %12961 = vpow2.f32 %v6667_v63  ;;  %v17295_v10 = vmul.f32 %v17249_v54, %v18966_v24  ;;  %v6655_v36 = vmul.f32 1.442695, %v6435_v1  ;;  %v6657_v5 = vmul.f32 1.442695, %v6436_v21  ;;  %9043 = vmatpush1.bf16.msra.mxu0 %v12619_v53  ;;  %9086 = vmatpush1.bf16.msra.mxu1 %v12622_v4  ;;  %v18968_v38 = vld [vmem:[#allocation90_spill] sm:$0xff]  ;;  %v18969_v33 = vld [vmem:[#allocation89_spill] sm:$0xff] }
 0x99c   : > { %12963 = vpow2.f32 %v6669_v11  ;;  %v6659_v8 = vmul.f32 1.442695, %v6437_v35  ;;  %v6661_v18 = vmul.f32 1.442695, %v6438_v6  ;;  %v17300_v13 = vmul.f32 %v17259_v57, %v18966_v24  ;;  %9044 = vmatprep.subr.bf16.mxu0 %v12627_v29  ;;  %9087 = vmatprep.subr.bf16.mxu1 %v12630_v25  ;;  %v12631_v29 = vld [vmem:[%s14491_s10 + $0xe0] ss:$8 sps:$4 sm:$0xff]  }
 0x99d   : > { %v17304_v19 = vmul.f32 %v17264_v46, %v18966_v24  ;;  %12965 = vpow2.f32 %v6655_v36  ;;  %v17308_v50 = vrot.slane %v18967_v62, %v18910_v55  ;;  %v17314_v58 = vrot.slane %v18967_v62, %v18912_v27  ;;  %v18970_v21 = vld [vmem:[#allocation130_spill] sm:$0xff]  ;;  %v18971_v25 = vld [vmem:[#allocation200_spill] sm:$0xff] }
 0x99e   : > { %12967 = vpow2.f32 %v6657_v5  ;;  %v17318_v37 = vrot.slane %v18967_v62, %v18914_v3  ;;  %v17322_v15 = vrot.slane %v18967_v62, %v18915_v7  ;;  %v17327_v45 = vmul.f32 %v17291_v17, %v18966_v24  ;;  %v12634_v5 = vld [vmem:[%s14491_s10 + $0x1e0] ss:$8 sps:$4 sm:$0xff]  }
 0x99f   : > { %12969 = vpow2.f32 %v6659_v8  ;;  %v17331_v63 = vmul.f32 %v18969_v33, %v18968_v38  ;;  %v6447_v53 = vmul.f32 %v16895_v52, %v17308_v50  ;;  %v6448_v11 = vmul.f32 %v16900_v39, %v17314_v58  ;;  %9045 = vmatpush2.bf16.msra.mxu0 %v12625_v26  ;;  %9088 = vmatpush2.bf16.msra.mxu1 %v12628_v60  ;;  %v12639_v8 = vld [vmem:[%s14491_s10 + $0xd4] ss:$8 sps:$4 sm:$0xff]  }
 0x9a0   : > { %12971 = vpow2.f32 %v6661_v18  ;;  %v6449_v1 = vmul.f32 %v16905_v28, %v17318_v37  ;;  %v6450_v4 = vmul.f32 %v16910_v61, %v17322_v15  ;;  %v17344_v35 = vmul.f32 %v18970_v21, %v18968_v38  ;;  %9046 = vmatprep.subr.bf16.mxu0 %v12633_v59  ;;  %9089 = vmatprep.subr.bf16.mxu1 %v12636_v48 }
 0x9a1   : > { %v6679_v6 = vmul.f32 1.442695, %v6447_v53  ;;  %v17348_v24 = vrot.slane %v18971_v25, %v18910_v55  ;;  %v17352_v36 = vrot.slane %v18971_v25, %v18912_v27  ;;  %v17358_v26 = vmul.f32 %v17097_v9, %v18968_v38  ;;  %v12642_v53 = vld [vmem:[%s14491_s10 + $0x1d4] ss:$8 sps:$4 sm:$0xff]  }
 0x9a2   : > { %v6681_v18 = vmul.f32 1.442695, %v6448_v11  ;;  %v6683_v62 = vmul.f32 1.442695, %v6449_v1  ;;  %v17362_v33 = vrot.slane %v18971_v25, %v18914_v3  ;;  %v17367_v21 = vmul.f32 %v17102_v22, %v18968_v38  ;;  %v12637_v38 = vld [vmem:[%s14491_s10 + $0xd0] ss:$8 sps:$4 sm:$0xff]  }
 0x9a3   : > { %18972 = vst [vmem:[#allocation125_spill] sm:$0xff] %v17348_v24  ;;  %18973 = vst [vmem:[#allocation207_spill] sm:$0xff] %v17352_v36  ;;  %12973 = vpow2.f32 %v6679_v6  ;;  %v6685_v60 = vmul.f32 1.442695, %v6450_v4  ;;  %v17371_v9 = vrot.slane %v18971_v25, %v18915_v7  ;;  %v6443_v59 = vmul.f32 %v17267_v14, %v17173_v31  ;;  %9047 = vmatpush2.bf16.msra.mxu0 %v12631_v29  ;;  %v18976_v11 = vld [vmem:[#allocation191_spill] sm:$0xff] }
 0x9a4   : > { %18974 = vst [vmem:[#allocation209_spill] sm:$0xff] %v17362_v33  ;;  %12975 = vpow2.f32 %v6681_v18  ;;  %v6444_v48 = vmul.f32 %v17274_v16, %v17189_v32  ;;  %v6445_v22 = vmul.f32 %v17279_v42, %v17217_v43  ;;  %v17382_v1 = vmul.f32 %v17348_v24, %v18976_v11  ;;  %9090 = vmatpush2.bf16.msra.mxu1 %v12634_v5  ;;  %v12640_v32 = vld [vmem:[%s14491_s10 + $0x1d0] ss:$8 sps:$4 sm:$0xff]   ;;  %v12645_v6 = vld [vmem:[%s14491_s10 + $0xc4] ss:$8 sps:$4 sm:$0xff]  }
 0x9a5   : > { %18975 = vst [vmem:[#allocation127_spill] sm:$0xff] %v17371_v9  ;;  %12977 = vpow2.f32 %v6683_v62  ;;  %v17386_v4 = vmul.f32 %v17352_v36, %v18976_v11  ;;  %v6446_v31 = vmul.f32 %v17284_v30, %v17225_v40  ;;  %9048 = vmatprep.subr.bf16.mxu0 %v12639_v8  ;;  %v12648_v25 = vld [vmem:[%s14491_s10 + $0x1c4] ss:$8 sps:$4 sm:$0xff]   ;;  %v17395_v29 = vmul.f32 %v17362_v33, %v18976_v11  ;;  %v18977_v33 = vld [vmem:[#allocation84_spill] sm:$0xff] }
 0x9a6   : > { %v12958_v43 = vpop.eup %12957  ;;  %v6671_v18 = vmul.f32 1.442695, %v6443_v59  ;;  %v6673_v62 = vmul.f32 1.442695, %v6444_v48  ;;  %v6675_v41 = vmul.f32 1.442695, %v6445_v22  ;;  %9091 = vmatprep.subr.bf16.mxu1 %v12642_v53  ;;  %12979 = vpow2.f32 %v6685_v60 }
 0x9a7   : > { %v12960_v44 = vpop.eup %12959  ;;  %v8271_v36 = vmul.f32 %v12958_v43, %v17185_v0  ;;  %v17400_v40 = vmul.f32 %v17371_v9, %v18976_v11  ;;  %v6677_v5 = vmul.f32 1.442695, %v6446_v31  ;;  %v17405_v59 = vmul.f32 %v17249_v54, %v18977_v33  ;;  %v18978_v53 = vld [vmem:[#allocation126_spill] sm:$0xff]  ;;  %9049 = vmatpush2.bf16.msra.mxu0 %v12637_v38 }
 0x9a8   : > { %v12962_v8 = vpop.eup %12961  ;;  %v8272_v24 = vmul.f32 %v12960_v44, %v17195_v20  ;;  %12981 = vpow2.f32 %v6671_v18  ;;  %v17409_v48 = vrot.slane %v18978_v53, %v18910_v55  ;;  %v12643_v0 = vld [vmem:[%s14491_s10 + $0xc0] ss:$8 sps:$4 sm:$0xff]   ;;  %v17415_v11 = vmul.f32 %v17259_v57, %v18977_v33  ;;  %9092 = vmatpush2.bf16.msra.mxu1 %v12640_v32  ;;  %9050 = vmatprep.subr.bf16.mxu0 %v12645_v6  ;;  %v12651_v57 = vld [vmem:[%s14491_s10 + $0xb4] ss:$8 sps:$4 sm:$0xff]  }
 0x9a9   : > { %v12964_v60 = vpop.eup %12963  ;;  %v8273_v22 = vmul.f32 %v12962_v8, %v17197_v34  ;;  %12983 = vpow2.f32 %v6673_v62  ;;  %v17419_v20 = vrot.slane %v18978_v53, %v18912_v27  ;;  %v12646_v44 = vld [vmem:[%s14491_s10 + $0x1c0] ss:$8 sps:$4 sm:$0xff]   ;;  %v8279_v31 = vadd.f32 %v8271_v36, %v17295_v10  ;;  %9093 = vmatprep.subr.bf16.mxu1 %v12648_v25  ;;  %v18984_v8 = vld [vmem:[#allocation117_spill] sm:$0xff] }
 0x9aa   : > { %18979 = vst [vmem:[#allocation152_spill] sm:$0xff] %v17409_v48  ;;  %v12966_v54 = vpop.eup %12965  ;;  %v8274_v38 = vmul.f32 %v12964_v60, %v17213_v23  ;;  %12985 = vpow2.f32 %v6675_v41  ;;  %v17426_v34 = vmul.f32 %v17264_v46, %v18977_v33  ;;  %v8280_v18 = vadd.f32 %v8272_v24, %v17300_v13  ;;  %v18981_v6 = vld [vmem:[#allocation83_spill] sm:$0xff]  ;;  %v12654_v23 = vld [vmem:[%s14491_s10 + $0x1b4] ss:$8 sps:$4 sm:$0xff]  }
 0x9ab   : > { %18980 = vst [vmem:[#allocation210_spill] sm:$0xff] %v17419_v20  ;;  %v12968_v43 = vpop.eup %12967  ;;  %v8281_v32 = vadd.f32 %v8273_v22, %v17304_v19  ;;  %v8223_v62 = vmul.f32 %v12966_v54, %v18981_v6  ;;  %12987 = vpow2.f32 %v6677_v5  ;;  %v18982_v41 = vld [vmem:[#allocation112_spill] sm:$0xff]  ;;  %v17436_v46 = vmul.f32 %v17291_v17, %v18977_v33  ;;  %9051 = vmatpush2.bf16.msra.mxu0 %v12643_v0  ;;  %v7618_v5 = vpop.permute.xlu0 %7617 }
 0x9ac   : > { %v12970_v10 = vpop.eup %12969  ;;  %v8224_v36 = vmul.f32 %v12968_v43, %v18982_v41  ;;  %v17440_v25 = vrot.slane %v18978_v53, %v18914_v3  ;;  %v6455_v13 = vmul.f32 %v16895_v52, %v17409_v48  ;;  %v12649_v19 = vld [vmem:[%s14491_s10 + $0xb0] ss:$8 sps:$4 sm:$0xff]   ;;  %v17451_v17 = vrot.slane %v18978_v53, %v18915_v7  ;;  %9094 = vmatpush2.bf16.msra.mxu1 %v12646_v44  ;;  %v12657_v52 = vld [vmem:[%s14491_s10 + $0xa4] ss:$8 sps:$4 sm:$0xff]   ;;  %v7614_v6 = vpop.permute.xlu1 %7613 }
 0x9ad   : > { %v12972_v24 = vpop.eup %12971  ;;  %v8225_v60 = vmul.f32 %v12970_v10, %v18984_v8  ;;  %v17447_v22 = vadd.f32 %v8223_v62, %v17331_v63  ;;  %v6456_v33 = vmul.f32 %v16900_v39, %v17419_v20  ;;  %v12652_v54 = vld [vmem:[%s14491_s10 + $0x1b0] ss:$8 sps:$4 sm:$0xff]   ;;  %v8282_v0 = vadd.f32 %v8274_v38, %v17327_v45  ;;  %v18985_v41 = vld [vmem:[#allocation119_spill] sm:$0xff]  ;;  %9052 = vmatprep.subr.bf16.mxu0 %v12651_v57 }
 0x9ae   : > { %18983 = vst [vmem:[#allocation145_spill] sm:$0xff] %v17440_v25  ;;  %v17458_v43 = vmul.f32 %v8279_v31, %v7618_v5  ;;  %v8226_v10 = vmul.f32 %v12972_v24, %v18985_v41  ;;  %v17462_v63 = vadd.f32 %v8224_v36, %v17344_v35  ;;  %v12660_v53 = vld [vmem:[%s14491_s10 + $0x1a4] ss:$8 sps:$4 sm:$0xff]   ;;  %v17465_v62 = vmul.f32 %v8280_v18, %v7618_v5  ;;  %v12655_v24 = vld [vmem:[%s14491_s10 + $0xa0] ss:$8 sps:$4 sm:$0xff]  }
 0x9af   : > { %v17467_v8 = vmul.f32 %v8281_v32, %v7618_v5  ;;  %v17470_v39 = vadd.f32 %v8225_v60, %v17358_v26  ;;  %v8239_v45 = vmul.f32 %v17447_v22, %v7614_v6  ;;  %9095 = vmatprep.subr.bf16.mxu1 %v12654_v23  ;;  %v6457_v57 = vmul.f32 %v16905_v28, %v17440_v25  ;;  %v12666_v25 = vld [vmem:[%s14491_s10 + $0x194] ss:$8 sps:$4 sm:$0xff]  }
 0x9b0   : > { %v12974_v44 = vpop.eup %12973  ;;  %v17474_v38 = vadd.f32 %v8226_v10, %v17367_v21  ;;  %v8240_v35 = vmul.f32 %v17462_v63, %v7614_v6  ;;  %v6695_v36 = vmul.f32 1.442695, %v6455_v13  ;;  %9053 = vmatpush2.bf16.msra.mxu0 %v12649_v19  ;;  %v6697_v9 = vmul.f32 1.442695, %v6456_v33  ;;  %9096 = vmatpush2.bf16.msra.mxu1 %v12652_v54  ;;  %v12658_v21 = vld [vmem:[%s14491_s10 + $0x1a0] ss:$8 sps:$4 sm:$0xff]  }
 0x9b1   : > { %v12976_v26 = vpop.eup %12975  ;;  %v8241_v60 = vmul.f32 %v17470_v39, %v7614_v6  ;;  %v8243_v41 = vadd.f32 %v8239_v45, %v17221_v49  ;;  %v8323_v23 = vmul.f32 %v12974_v44, %v8279_v31  ;;  %9054 = vmatprep.subr.bf16.mxu0 %v12657_v52  ;;  %v12663_v10 = vld [vmem:[%s14491_s10 + $0x94] ss:$8 sps:$4 sm:$0xff]   ;;  %v17484_v48 = vmul.f32 %v8282_v0, %v7618_v5 }
 0x9b2   : > { %v12978_v20 = vpop.eup %12977  ;;  %v8242_v28 = vmul.f32 %v17474_v38, %v7614_v6  ;;  %v8250_v13 = vadd.f32 %v8240_v35, %v17237_v12  ;;  %v8324_v19 = vmul.f32 %v12976_v26, %v8280_v18  ;;  %9097 = vmatprep.subr.bf16.mxu1 %v12660_v53  ;;  %v17492_v33 = vmul.f32 %v16910_v61, %v17451_v17  ;;  %v12661_v12 = vld [vmem:[%s14491_s10 + $0x90] ss:$8 sps:$4 sm:$0xff]   ;;  %v12669_v61 = vld [vmem:[%s14491_s10 + $0x84] ss:$8 sps:$4 sm:$0xff]  }
 0x9b3   : > { %v8244_v7 = vrot.slane %v8243_v41, 4  ;;  %v8257_v49 = vadd.f32 %v8241_v60, %v17240_v56  ;;  %v8325_v31 = vmul.f32 %v12978_v20, %v8281_v32  ;;  %v12980_v5 = vpop.eup %12979  ;;  %v17496_v6 = vadd.f32 %v8323_v23, %v17382_v1  ;;  %v12664_v18 = vld [vmem:[%s14491_s10 + $0x190] ss:$8 sps:$4 sm:$0xff]  }
 0x9b4   : > { %v8251_v54 = vrot.slane %v8250_v13, 4  ;;  %v8264_v52 = vadd.f32 %v8242_v28, %v17255_v2  ;;  %12989 = vpow2.f32 %v6695_v36  ;;  %9055 = vmatpush2.bf16.msra.mxu0 %v12655_v24  ;;  %v6699_v32 = vmul.f32 1.442695, %v6457_v57  ;;  %9098 = vmatpush2.bf16.msra.mxu1 %v12658_v21  ;;  %v12672_v36 = vld [vmem:[%s14491_s10 + $0x184] ss:$8 sps:$4 sm:$0xff]  }
 0x9b5   : > { %v12982_v53 = vpop.eup %12981  ;;  %v8245_v56 = vadd.f32 %v8244_v7, %v8243_v41  ;;  %v8258_v20 = vrot.slane %v8257_v49, 4  ;;  %12991 = vpow2.f32 %v6697_v9  ;;  %9056 = vmatprep.subr.bf16.mxu0 %v12663_v10  ;;  %v8326_v2 = vmul.f32 %v12980_v5, %v8282_v0  ;;  %9099 = vmatprep.subr.bf16.mxu1 %v12666_v25  ;;  %v7626_v7 = vpop.permute.xlu0 %7625  ;;  %v12667_v25 = vld [vmem:[%s14491_s10 + $0x80] ss:$8 sps:$4 sm:$0xff]  }
 0x9b6   : > { %v12984_v45 = vpop.eup %12983  ;;  %v8252_v44 = vadd.f32 %v8251_v54, %v8250_v13  ;;  %v8265_v35 = vrot.slane %v8264_v52, 4  ;;  %v17502_v1 = vadd.f32 %v8324_v19, %v17386_v4  ;;  %v17506_v9 = vadd.f32 %v8325_v31, %v17395_v29  ;;  %v12670_v29 = vld [vmem:[%s14491_s10 + $0x180] ss:$8 sps:$4 sm:$0xff]  }
 0x9b7   : > { %v12986_v24 = vpop.eup %12985  ;;  %v8246_v26 = vrot.slane %v8245_v56, 2  ;;  %v8259_v60 = vadd.f32 %v8258_v20, %v8257_v49  ;;  %v8275_v57 = vmul.f32 %v12982_v53, %v17447_v22  ;;  %v17510_v0 = vmul.f32 %v17496_v6, %v7626_v7 }
 0x9b8   : > { %v12988_v41 = vpop.eup %12987  ;;  %v8253_v23 = vrot.slane %v8252_v44, 2  ;;  %v8266_v21 = vadd.f32 %v8265_v35, %v8264_v52  ;;  %v8276_v4 = vmul.f32 %v12984_v45, %v17462_v63  ;;  %9057 = vmatpush2.bf16.msra.mxu0 %v12661_v12  ;;  %v8277_v13 = vmul.f32 %v12986_v24, %v17470_v39  ;;  %9100 = vmatpush2.bf16.msra.mxu1 %v12664_v18  ;;  %v7622_v52 = vpop.permute.xlu1 %7621 }
 0x9b9   : > { %v8247_v10 = vadd.f32 %v8246_v26, %v8245_v56  ;;  %v8260_v28 = vrot.slane %v8259_v60, 2  ;;  %v8278_v19 = vmul.f32 %v12988_v41, %v17474_v38  ;;  %9058 = vmatprep.subr.bf16.mxu0 %v12669_v61  ;;  %v17518_v31 = vadd.f32 %v8275_v57, %v17405_v59  ;;  %9101 = vmatprep.subr.bf16.mxu1 %v12672_v36 }
 0x9ba   : > { %v8254_v22 = vadd.f32 %v8253_v23, %v8252_v44  ;;  %v8267_v49 = vrot.slane %v8266_v21, 2  ;;  %v17521_v5 = vadd.f32 %v8276_v4, %v17415_v11  ;;  %v17524_v12 = vadd.f32 %v8277_v13, %v17426_v34 }
 0x9bb   : > { %v8248_v63 = vrot.slane %v8247_v10, 1  ;;  %v8261_v54 = vadd.f32 %v8260_v28, %v8259_v60  ;;  %v17527_v39 = vadd.f32 %v8278_v19, %v17436_v46  ;;  %v17530_v18 = vadd.f32 %v8326_v2, %v17400_v40  ;;  %v18986_v19 = vld [vmem:[#allocation189_spill] sm:$0xff] }
 0x9bc   : > { %v8268_v38 = vadd.f32 %v8267_v49, %v8266_v21  ;;  %v8291_v59 = vmul.f32 %v17518_v31, %v7622_v52  ;;  %v8292_v53 = vmul.f32 %v17521_v5, %v7622_v52  ;;  %9059 = vmatpush2.bf16.msra.mxu0 %v12667_v25  ;;  %v8255_v11 = vrot.slane %v8254_v22, 1  ;;  %9102 = vmatpush2.bf16.msra.mxu1 %v12670_v29  ;;  %v18987_v29 = vld [vmem:[#allocation201_spill] sm:$0xff] }
 0x9bd   : > { %v17535_v56 = vmul.f32 %v17502_v1, %v7626_v7  ;;  %v8293_v20 = vmul.f32 %v17524_v12, %v7622_v52  ;;  %v8294_v34 = vmul.f32 %v17527_v39, %v7622_v52  ;;  %v8249_v46 = vadd.f32 %v8248_v63, %v8247_v10 }
 0x9be   : > { %v8262_v61 = vrot.slane %v8261_v54, 1  ;;  %v8295_v45 = vadd.f32 %v8291_v59, %v17458_v43  ;;  %v8302_v40 = vadd.f32 %v8292_v53, %v17465_v62  ;;  %v8269_v44 = vrot.slane %v8268_v38, 1  ;;  %v18988_v59 = vld [vmem:[#allocation202_spill] sm:$0xff] }
 0x9bf   : > { %v17542_v35 = vmul.f32 %v17506_v9, %v7626_v7  ;;  %v8309_v2 = vadd.f32 %v8293_v20, %v17467_v8  ;;  %v8316_v36 = vadd.f32 %v8294_v34, %v17484_v48  ;;  %v17547_v24 = vmul.f32 %v17530_v18, %v7626_v7 }
 0x9c0   : > { %v8296_v26 = vrot.slane %v8295_v45, 4  ;;  %v8303_v60 = vrot.slane %v8302_v40, 4  ;;  %12993 = vpow2.f32 %v6699_v32  ;;  %v17549_v41 = vadd.f32 %v8255_v11, %v8254_v22 }
 0x9c1   : > { %v12990_v57 = vpop.eup %12989  ;;  %v8310_v43 = vrot.slane %v8309_v2, 4  ;;  %v8317_v23 = vrot.slane %v8316_v36, 4  ;;  %v6701_v62 = vmul.f32 1.442695, %v17492_v33  ;;  %v8263_v4 = vadd.f32 %v8262_v61, %v8261_v54 }
 0x9c2   : > { %v12992_v21 = vpop.eup %12991  ;;  %v8548_v8 = vsel %vm4868_vm0, %v17207_v47, %v8249_v46  ;;  %v8297_v25 = vadd.f32 %v8296_v26, %v8295_v45  ;;  %v8304_v48 = vadd.f32 %v8303_v60, %v8302_v40  ;;  %v17554_v10 = vadd.f32 %v8269_v44, %v8268_v38  ;;  %v17578_v26 = vpop.permute.xlu0 %7633  ;;  %v18989_v60 = vld [vmem:[#allocation203_spill] sm:$0xff] }
 0x9c3   : > { %v8311_v7 = vadd.f32 %v8310_v43, %v8309_v2  ;;  %v8318_v28 = vadd.f32 %v8317_v23, %v8316_v36  ;;  %12995 = vpow2.f32 %v6701_v62  ;;  %v7503_v22 = vmul.f32 %v18987_v29, %v18986_v19  ;;  %v18990_v23 = vld [vmem:[#allocation205_spill] sm:$0xff] }
 0x9c4   : > { %v8298_v32 = vrot.slane %v8297_v25, 2  ;;  %v8305_v13 = vrot.slane %v8304_v48, 2  ;;  %v8375_v33 = vmul.f32 %v12990_v57, %v17496_v6  ;;  %v8376_v54 = vmul.f32 %v12992_v21, %v17502_v1 }
 0x9c5   : > { %v8312_v49 = vrot.slane %v8311_v7, 2  ;;  %v8319_v63 = vrot.slane %v8318_v28, 2  ;;  %v6451_v47 = vmul.f32 %v17267_v14, %v17308_v50  ;;  %v7504_v53 = vmul.f32 %v18988_v59, %v18986_v19 }
 0x9c6   : > { %v8299_v52 = vadd.f32 %v8298_v32, %v8297_v25  ;;  %v8306_v38 = vadd.f32 %v8305_v13, %v8304_v48  ;;  %v6452_v11 = vmul.f32 %v17274_v16, %v17314_v58  ;;  %v17566_v46 = vadd.f32 %v8375_v33, %v7503_v22  ;;  %v18991_v32 = vld [vmem:[#allocation133_spill] sm:$0xff]  ;;  %v18993_v22 = vld [vmem:[#allocation190_spill] sm:$0xff] }
 0x9c7   : > { %v8313_v20 = vadd.f32 %v8312_v49, %v8311_v7  ;;  %v8320_v34 = vadd.f32 %v8319_v63, %v8318_v28  ;;  %v6453_v6 = vmul.f32 %v17279_v42, %v17318_v37  ;;  %v17570_v45 = vadd.f32 %v8376_v54, %v7504_v53  ;;  %v18992_v13 = vld [vmem:[#allocation125_spill] sm:$0xff]  ;;  %v18994_v63 = vld [vmem:[#allocation207_spill] sm:$0xff] }
 0x9c8   : > { %v8300_v61 = vrot.slane %v8299_v52, 1  ;;  %v8307_v1 = vrot.slane %v8306_v38, 1  ;;  %v6454_v50 = vmul.f32 %v17284_v30, %v17322_v15  ;;  %v17576_v40 = vsel %vm4868_vm0, %v17234_v51, %v8263_v4  ;;  %v18995_v54 = vld [vmem:[#allocation209_spill] sm:$0xff] }
 0x9c9   : > { %v8314_v44 = vrot.slane %v8313_v20, 1  ;;  %v8321_v58 = vrot.slane %v8320_v34, 1  ;;  %v6687_v2 = vmul.f32 1.442695, %v6451_v47  ;;  %v7505_v37 = vmul.f32 %v18989_v60, %v18986_v19  ;;  %v13041_v53 = vld [vmem:[%s14484_s18] sm:$0xff] }
 0x9ca   : > { %v8301_v36 = vadd.f32 %v8300_v61, %v8299_v52  ;;  %v6689_v57 = vmul.f32 1.442695, %v6452_v11  ;;  %v6691_v43 = vmul.f32 1.442695, %v6453_v6  ;;  %v7506_v62 = vmul.f32 %v18990_v23, %v18986_v19  ;;  %v18996_v52 = vld [vmem:[#allocation81_spill] sm:$0xff] }
 0x9cb   : > { %v17586_v15 = vmul.f32 %v17566_v46, %v17578_v26  ;;  %12997 = vpow2.f32 %v6687_v2  ;;  %v6693_v51 = vmul.f32 1.442695, %v6454_v50  ;;  %v17588_v21 = vadd.f32 %v8307_v1, %v8306_v38  ;;  %v13043_v1 = vld [vmem:[%s14484_s18 + $0x10] sm:$0xff] }
 0x9cc   : > { %v17590_v4 = vadd.f32 %v8314_v44, %v8313_v20  ;;  %v17594_v25 = vmul.f32 %v17570_v45, %v17578_v26  ;;  %12999 = vpow2.f32 %v6689_v57  ;;  %v17596_v7 = vadd.f32 %v8321_v58, %v8320_v34  ;;  %v18997_v34 = vld [vmem:[#allocation152_spill] sm:$0xff] }
 0x9cd   : > { %v12994_v48 = vpop.eup %12993  ;;  %v17599_v28 = vsel %vm8523_vm7, %v8548_v8, %v8301_v36  ;;  %13001 = vpow2.f32 %v6691_v43  ;;  %v17603_v19 = vmul.f32 %v18992_v13, %v18991_v32  ;;  %v6266_v33 = vrot.slane %v18993_v22, %v18910_v55  ;;  %v13044_v44 = vld [vmem:[%s14484_s18 + $0x18] sm:$0xff]  ;;  %v18999_v36 = vld [vmem:[#allocation127_spill] sm:$0xff]  ;;  %v19000_v43 = vld [vmem:[#allocation145_spill] sm:$0xff] }
 0x9ce   : > { %v8377_v29 = vmul.f32 %v12994_v48, %v17506_v9  ;;  %13003 = vpow2.f32 %v6693_v51  ;;  %v6270_v49 = vrot.slane %v18993_v22, %v18912_v27  ;;  %v17612_v8 = vmul.f32 %v18994_v63, %v18991_v32  ;;  %v13042_v27 = vld [vmem:[%s14484_s18 + $0x8] sm:$0xff] }
 0x9cf   : > { %v17616_v47 = vmul.f32 %v18995_v54, %v18991_v32  ;;  %v6274_v9 = vrot.slane %v18993_v22, %v18914_v3  ;;  %v6278_v38 = vrot.slane %v18993_v22, %v18996_v52  ;;  %v6463_v11 = vmul.f32 %v13041_v53, %v6266_v33  ;;  %v18998_v3 = vld [vmem:[#allocation210_spill] sm:$0xff] }
 0x9d0   : > { %v12996_v59 = vpop.eup %12995  ;;  %v17622_v55 = vadd.f32 %v8377_v29, %v7505_v37  ;;  %v6464_v20 = vmul.f32 %v13042_v27, %v6270_v49  ;;  %v6459_v6 = vmul.f32 %v17267_v14, %v18997_v34  ;;  %v6460_v2 = vmul.f32 %v17274_v16, %v18998_v3  ;;  %v19002_v27 = vld [vmem:[#allocation165_spill] sm:$0xff]  ;;  %v19003_v34 = vld [vmem:[#allocation116_spill] sm:$0xff] }
 0x9d1   : > { %v8378_v61 = vmul.f32 %v12996_v59, %v17530_v18  ;;  %v6465_v50 = vmul.f32 %v13043_v1, %v6274_v9  ;;  %v6466_v58 = vmul.f32 %v13044_v44, %v6278_v38  ;;  %v7502_v60 = vmul.f32 %v18999_v36, %v18991_v32 }
 0x9d2   : > { %v6711_v37 = vmul.f32 1.442695, %v6463_v11  ;;  %v6713_v57 = vmul.f32 1.442695, %v6464_v20  ;;  %v6461_v23 = vmul.f32 %v17279_v42, %v19000_v43  ;;  %v17639_v51 = vmul.f32 %v17622_v55, %v17578_v26  ;;  %v19001_v11 = vld [vmem:[#allocation153_spill] sm:$0xff] }
 0x9d3   : > { %v6715_v18 = vmul.f32 1.442695, %v6465_v50  ;;  %v6717_v48 = vmul.f32 1.442695, %v6466_v58  ;;  %v6462_v13 = vmul.f32 %v17284_v30, %v17451_v17  ;;  %v17643_v29 = vadd.f32 %v8378_v61, %v7506_v62  ;;  %v19005_v50 = vld [vmem:[#allocation115_spill] sm:$0xff]  ;;  %v19010_v43 = vld [vmem:[#allocation233_spill] sm:$0xff] }
 0x9d4   : > { %13005 = vpow2.f32 %v6711_v37  ;;  %v6703_v22 = vmul.f32 1.442695, %v6459_v6  ;;  %v6467_v32 = vmul.f32 %v17267_v14, %v6266_v33  ;;  %v6705_v63 = vmul.f32 1.442695, %v6460_v2  ;;  %v19004_v6 = vld [vmem:[#allocation167_spill] sm:$0xff] }
 0x9d5   : > { %13007 = vpow2.f32 %v6713_v57  ;;  %v6468_v54 = vmul.f32 %v17274_v16, %v6270_v49  ;;  %v6469_v52 = vmul.f32 %v17279_v42, %v6274_v9  ;;  %v6707_v59 = vmul.f32 1.442695, %v6461_v23  ;;  %v19006_v16 = vld [vmem:[#allocation179_spill] sm:$0xff]  ;;  %v19007_v42 = vld [vmem:[#allocation124_spill] sm:$0xff]  ;;  %v19008_v9 = vld [vmem:[#allocation182_spill] sm:$0xff] }
 0x9d6   : > { %13009 = vpow2.f32 %v6715_v18  ;;  %v6470_v53 = vmul.f32 %v17284_v30, %v6278_v38  ;;  %v7664_v20 = vmul.f32 %v19002_v27, %v19001_v11  ;;  %v6709_v17 = vmul.f32 1.442695, %v6462_v13  ;;  %v19009_v57 = vld [vmem:[#allocation82_spill] sm:$0xff] }
 0x9d7   : > { %13011 = vpow2.f32 %v6717_v48  ;;  %v6719_v62 = vmul.f32 1.442695, %v6467_v32  ;;  %v7668_v61 = vmul.f32 %v19004_v6, %v19003_v34  ;;  %v6721_v33 = vmul.f32 1.442695, %v6468_v54  ;;  %v7630_v54 = vpop.permute.xlu1 %7629  ;;  %v19011_v27 = vld [vmem:[#allocation138_spill] sm:$0xff] }
 0x9d8   : > { %v12998_v14 = vpop.eup %12997  ;;  %v6723_v1 = vmul.f32 1.442695, %v6469_v52  ;;  %v7716_v49 = vmul.f32 %v19006_v16, %v19005_v50  ;;  %v7720_v44 = vmul.f32 %v19008_v9, %v19007_v42  ;;  %13013 = vpow2.f32 %v6703_v22 }
 0x9d9   : > { %v13000_v58 = vpop.eup %12999  ;;  %v8327_v30 = vmul.f32 %v12998_v14, %v17518_v31  ;;  %v6725_v38 = vmul.f32 1.442695, %v6470_v53  ;;  %v7678_v3 = vadd.f32 %v7668_v61, %v7664_v20  ;;  %13015 = vpow2.f32 %v6705_v63  ;;  %v19012_v20 = vld [vmem:[#allocation211_spill] sm:$0xff] }
 0x9da   : > { %v13002_v2 = vpop.eup %13001  ;;  %v8328_v36 = vmul.f32 %v13000_v58, %v17521_v5  ;;  %v7730_v37 = vadd.f32 %v7720_v44, %v7716_v49  ;;  %v7768_v23 = vmul.f32 %v19010_v43, %v19009_v57  ;;  %13017 = vpow2.f32 %v6707_v59  ;;  %v19014_v43 = vld [vmem:[#allocation129_spill] sm:$0xff] }
 0x9db   : > { %v13004_v18 = vpop.eup %13003  ;;  %v8329_v48 = vmul.f32 %v13002_v2, %v17524_v12  ;;  %v8335_v13 = vadd.f32 %v8327_v30, %v17603_v19  ;;  %v7679_v32 = vrot.slane %v7678_v3, 4  ;;  %13019 = vpow2.f32 %v6709_v17 }
 0x9dc   : > { %v8330_v31 = vmul.f32 %v13004_v18, %v17527_v39  ;;  %v17665_v22 = vadd.f32 %v8328_v36, %v17612_v8  ;;  %v7731_v5 = vrot.slane %v7730_v37, 4  ;;  %v7772_v12 = vmul.f32 %v19012_v20, %v19011_v27 }
 0x9dd   : > { %v17668_v63 = vadd.f32 %v8329_v48, %v17616_v47  ;;  %v8343_v52 = vmul.f32 %v8335_v13, %v7630_v54  ;;  %v7680_v53 = vadd.f32 %v7679_v32, %v7678_v3  ;;  %13021 = vpow2.f32 %v6719_v62  ;;  %v19015_v48 = vld [vmem:[#allocation173_spill] sm:$0xff] }
 0x9de   : > { %v8338_v6 = vadd.f32 %v8330_v31, %v7502_v60  ;;  %v8344_v19 = vmul.f32 %v17665_v22, %v7630_v54  ;;  %v7732_v59 = vadd.f32 %v7731_v5, %v7730_v37  ;;  %13023 = vpow2.f32 %v6721_v33  ;;  %v19013_v37 = vld [vmem:[#allocation171_spill] sm:$0xff]  ;;  %v19016_v5 = vld [vmem:[#allocation164_spill] sm:$0xff] }
 0x9df   : > { %v8345_v39 = vmul.f32 %v17668_v63, %v7630_v54  ;;  %v8347_v8 = vadd.f32 %v8343_v52, %v17510_v0  ;;  %v7681_v17 = vrot.slane %v7680_v53, 2  ;;  %v17677_v47 = vmul.f32 %v17643_v29, %v17578_v26 }
 0x9e0   : > { %v8346_v61 = vmul.f32 %v8338_v6, %v7630_v54  ;;  %v8354_v14 = vadd.f32 %v8344_v19, %v17535_v56  ;;  %13025 = vpow2.f32 %v6723_v1  ;;  %v7733_v62 = vrot.slane %v7732_v59, 2  ;;  %v19017_v19 = vld [vmem:[#allocation224_spill] sm:$0xff] }
 0x9e1   : > { %v13006_v16 = vpop.eup %13005  ;;  %v8348_v60 = vrot.slane %v8347_v8, 4  ;;  %v8361_v49 = vadd.f32 %v8345_v39, %v17542_v35  ;;  %13027 = vpow2.f32 %v6725_v38  ;;  %v17683_v58 = vadd.f32 %v7772_v12, %v7768_v23 }
 0x9e2   : > { %v13008_v9 = vpop.eup %13007  ;;  %v8355_v44 = vrot.slane %v8354_v14, 4  ;;  %v8368_v0 = vadd.f32 %v8346_v61, %v17547_v24  ;;  %v8427_v33 = vmul.f32 %v13006_v16, %v17566_v46  ;;  %v17686_v1 = vadd.f32 %v7681_v17, %v7680_v53  ;;  %v7642_v16 = vpop.permute.xlu0 %7641 }
 0x9e3   : > { %v13010_v26 = vpop.eup %13009  ;;  %v8349_v30 = vadd.f32 %v8348_v60, %v8347_v8  ;;  %v8362_v3 = vrot.slane %v8361_v49, 4  ;;  %v8428_v56 = vmul.f32 %v13008_v9, %v17570_v45  ;;  %v17691_v18 = vmul.f32 %v19014_v43, %v19013_v37  ;;  %v19018_v8 = vld [vmem:[#allocation225_spill] sm:$0xff]  ;;  %v19020_v43 = vld [vmem:[#allocation136_spill] sm:$0xff] }
 0x9e4   : > { %v13012_v2 = vpop.eup %13011  ;;  %v8356_v36 = vadd.f32 %v8355_v44, %v8354_v14  ;;  %v8369_v35 = vrot.slane %v8368_v0, 4  ;;  %v8429_v38 = vmul.f32 %v13010_v26, %v17622_v55  ;;  %v8435_v32 = vadd.f32 %v8427_v33, %v19015_v48 }
 0x9e5   : > { %v8350_v24 = vrot.slane %v8349_v30, 2  ;;  %v8363_v46 = vadd.f32 %v8362_v3, %v8361_v49  ;;  %v8430_v23 = vmul.f32 %v13012_v2, %v17643_v29  ;;  %v13014_v54 = vpop.eup %13013  ;;  %v8436_v52 = vadd.f32 %v8428_v56, %v19016_v5 }
 0x9e6   : > { %v8357_v31 = vrot.slane %v8356_v36, 2  ;;  %v8370_v45 = vadd.f32 %v8369_v35, %v8368_v0  ;;  %v17696_v53 = vadd.f32 %v7733_v62, %v7732_v59  ;;  %v13016_v20 = vpop.eup %13015  ;;  %v8437_v39 = vadd.f32 %v8429_v38, %v19017_v19  ;;  %v7638_v35 = vpop.permute.xlu1 %7637 }
 0x9e7   : > { %v8351_v12 = vadd.f32 %v8350_v24, %v8349_v30  ;;  %v8364_v55 = vrot.slane %v8363_v46, 2  ;;  %v8438_v17 = vadd.f32 %v8430_v23, %v19018_v8  ;;  %v13018_v61 = vpop.eup %13017  ;;  %v8379_v60 = vmul.f32 %v13014_v54, %v8335_v13  ;;  %v19019_v13 = vld [vmem:[#allocation135_spill] sm:$0xff]  ;;  %v19022_v54 = vld [vmem:[#allocation208_spill] sm:$0xff] }
 0x9e8   : > { %v17700_v14 = vadd.f32 %v8357_v31, %v8356_v36  ;;  %v8371_v29 = vrot.slane %v8370_v45, 2  ;;  %v7683_v49 = vrot.slane %v17686_v1, 1  ;;  %v13020_v9 = vpop.eup %13019  ;;  %v8443_v59 = vmul.f32 %v8435_v32, %v7642_v16 }
 0x9e9   : > { %v8352_v44 = vrot.slane %v8351_v12, 1  ;;  %v17703_v0 = vadd.f32 %v8364_v55, %v8363_v46  ;;  %v8380_v62 = vmul.f32 %v13016_v20, %v17665_v22  ;;  %v8444_v26 = vmul.f32 %v8436_v52, %v7642_v16  ;;  %v19021_v22 = vld [vmem:[#allocation206_spill] sm:$0xff] }
 0x9ea   : > { %v17706_v33 = vadd.f32 %v8371_v29, %v8370_v45  ;;  %v8381_v30 = vmul.f32 %v13018_v61, %v17668_v63  ;;  %v8382_v3 = vmul.f32 %v13020_v9, %v8338_v6  ;;  %v13022_v56 = vpop.eup %13021  ;;  %v8445_v2 = vmul.f32 %v8437_v39, %v7642_v16  ;;  %v19023_v9 = vld [vmem:[#allocation226_spill] sm:$0xff] }
 0x9eb   : > { %v8446_v36 = vmul.f32 %v8438_v17, %v7642_v16  ;;  %v8387_v38 = vadd.f32 %v8379_v60, %v19019_v13  ;;  %v8388_v24 = vadd.f32 %v8380_v62, %v19020_v43  ;;  %v13024_v23 = vpop.eup %13023  ;;  %v17711_v46 = vadd.f32 %v8352_v44, %v8351_v12  ;;  %v19024_v62 = vld [vmem:[#allocation121_spill] sm:$0xff]  ;;  %v7646_v13 = vpop.permute.xlu1 %7645  ;;  %v19026_v43 = vld [vmem:[#allocation140_spill] sm:$0xff] }
 0x9ec   : > { %v8359_v48 = vrot.slane %v17700_v14, 1  ;;  %v8389_v32 = vadd.f32 %v8381_v30, %v19021_v22  ;;  %v8390_v31 = vadd.f32 %v8382_v3, %v19022_v54  ;;  %v8366_v63 = vrot.slane %v17703_v0, 1 }
 0x9ed   : > { %v13026_v45 = vpop.eup %13025  ;;  %v8395_v6 = vmul.f32 %v8387_v38, %v7638_v35  ;;  %v8396_v5 = vmul.f32 %v8388_v24, %v7638_v35  ;;  %v8431_v52 = vmul.f32 %v13022_v56, %v8387_v38  ;;  %v8373_v55 = vrot.slane %v17706_v33, 1  ;;  %v19025_v38 = vld [vmem:[#allocation111_spill] sm:$0xff] }
 0x9ee   : > { %v13028_v20 = vpop.eup %13027  ;;  %v8397_v19 = vmul.f32 %v8389_v32, %v7638_v35  ;;  %v8398_v39 = vmul.f32 %v8390_v31, %v7638_v35  ;;  %v8432_v8 = vmul.f32 %v13024_v23, %v8388_v24  ;;  %v8433_v61 = vmul.f32 %v13026_v45, %v8389_v32 }
 0x9ef   : > { %v8399_v12 = vadd.f32 %v8395_v6, %v17586_v15  ;;  %v8406_v17 = vadd.f32 %v8396_v5, %v17594_v25  ;;  %v8434_v29 = vmul.f32 %v13028_v20, %v8390_v31  ;;  %v8439_v44 = vadd.f32 %v8431_v52, %v19023_v9 }
 0x9f0   : > { %v8413_v16 = vadd.f32 %v8397_v19, %v17639_v51  ;;  %v8420_v60 = vadd.f32 %v8398_v39, %v17677_v47  ;;  %v8440_v30 = vadd.f32 %v8432_v8, %v19024_v62  ;;  %v8441_v35 = vadd.f32 %v8433_v61, %v19025_v38 }
 0x9f1   : > { %v8400_v3 = vrot.slane %v8399_v12, 4  ;;  %v8407_v56 = vrot.slane %v8406_v17, 4  ;;  %v8442_v24 = vadd.f32 %v8434_v29, %v19026_v43  ;;  %v8447_v25 = vmul.f32 %v8439_v44, %v7646_v13 }
 0x9f2   : > { %v8414_v15 = vrot.slane %v8413_v16, 4  ;;  %v8421_v23 = vrot.slane %v8420_v60, 4  ;;  %v8448_v22 = vmul.f32 %v8440_v30, %v7646_v13  ;;  %v8449_v51 = vmul.f32 %v8441_v35, %v7646_v13 }
 0x9f3   : > { %v8401_v32 = vadd.f32 %v8400_v3, %v8399_v12  ;;  %v8408_v54 = vadd.f32 %v8407_v56, %v8406_v17  ;;  %v8450_v31 = vmul.f32 %v8442_v24, %v7646_v13  ;;  %v8451_v6 = vadd.f32 %v8447_v25, %v8443_v59 }
 0x9f4   : > { %v8415_v47 = vadd.f32 %v8414_v15, %v8413_v16  ;;  %v8422_v45 = vadd.f32 %v8421_v23, %v8420_v60  ;;  %v8458_v5 = vadd.f32 %v8448_v22, %v8444_v26  ;;  %v8465_v19 = vadd.f32 %v8449_v51, %v8445_v2 }
 0x9f5   : > { %v8402_v52 = vrot.slane %v8401_v32, 2  ;;  %v8409_v20 = vrot.slane %v8408_v54, 2  ;;  %v8472_v39 = vadd.f32 %v8450_v31, %v8446_v36  ;;  %v8452_v9 = vrot.slane %v8451_v6, 4 }
 0x9f6   : > { %v8416_v8 = vrot.slane %v8415_v47, 2  ;;  %v8423_v61 = vrot.slane %v8422_v45, 2  ;;  %v8459_v29 = vrot.slane %v8458_v5, 4  ;;  %v8466_v44 = vrot.slane %v8465_v19, 4 }
 0x9f7   : > { %v8403_v62 = vadd.f32 %v8402_v52, %v8401_v32  ;;  %v8410_v38 = vadd.f32 %v8409_v20, %v8408_v54  ;;  %v8473_v30 = vrot.slane %v8472_v39, 4  ;;  %v8453_v3 = vadd.f32 %v8452_v9, %v8451_v6  ;;  %v19028_v52 = vld [vmem:[#allocation120_spill] sm:$0xff]  ;;  %v19029_v20 = vld [vmem:[#allocation239_spill] sm:$0xff] }
 0x9f8   : > { %v17726_v12 = vadd.f32 %v8416_v8, %v8415_v47  ;;  %v8424_v17 = vadd.f32 %v8423_v61, %v8422_v45  ;;  %v8460_v16 = vadd.f32 %v8459_v29, %v8458_v5  ;;  %v8467_v26 = vadd.f32 %v8466_v44, %v8465_v19  ;;  %v19031_v44 = vld [vmem:[#allocation220_spill] sm:$0xff] }
 0x9f9   : > { %v8404_v60 = vrot.slane %v8403_v62, 1  ;;  %v8411_v59 = vrot.slane %v8410_v38, 1  ;;  %v8474_v56 = vadd.f32 %v8473_v30, %v8472_v39  ;;  %v8360_v2 = vadd.f32 %v8359_v48, %v17700_v14 }
 0x9fa   : > { %v8425_v36 = vrot.slane %v8424_v17, 1  ;;  %v8454_v13 = vrot.slane %v8453_v3, 2  ;;  %v8461_v35 = vrot.slane %v8460_v16, 2  ;;  %v17730_v43 = vadd.f32 %v8366_v63, %v17703_v0 }
 0x9fb   : > { %v17733_v24 = vadd.f32 %v8373_v55, %v17706_v33  ;;  %v8468_v15 = vrot.slane %v8467_v26, 2  ;;  %v8475_v23 = vrot.slane %v8474_v56, 2  ;;  %v17735_v25 = vadd.f32 %v8404_v60, %v8403_v62  ;;  %v19027_v55 = vld [vmem:[#allocation163_spill] sm:$0xff] }
 0x9fc   : > { %v8418_v22 = vrot.slane %v17726_v12, 1  ;;  %v17738_v32 = vadd.f32 %v8454_v13, %v8453_v3  ;;  %v8462_v54 = vadd.f32 %v8461_v35, %v8460_v16  ;;  %v8412_v51 = vadd.f32 %v8411_v59, %v8410_v38  ;;  %v19033_v3 = vld [vmem:[#allocation223_spill] sm:$0xff] }
 0x9fd   : > { %v17740_v14 = vadd.f32 %v8468_v15, %v8467_v26  ;;  %v8476_v48 = vadd.f32 %v8475_v23, %v8474_v56  ;;  %v7735_v31 = vrot.slane %v17696_v53, 1  ;;  %v17743_v0 = vadd.f32 %v8425_v36, %v8424_v17  ;;  %v19035_v56 = vld [vmem:[#allocation142_spill] sm:$0xff] }
 0x9fe   : > { %v8463_v63 = vrot.slane %v8462_v54, 1  ;;  %v7783_v33 = vrot.slane %v17683_v58, 4  ;;  %v7834_v47 = vadd.f32 %v19027_v55, %v17691_v18  ;;  %v7684_v6 = vadd.f32 %v7683_v49, %v17686_v1  ;;  %v19030_v18 = vld [vmem:[#allocation216_spill] sm:$0xff] }
 0x9ff   : > { %v8477_v45 = vrot.slane %v8476_v48, 1  ;;  %v7736_v5 = vadd.f32 %v7735_v31, %v17696_v53  ;;  %v7872_v19 = vmul.f32 %v19029_v20, %v19028_v52  ;;  %v8456_v39 = vrot.slane %v17738_v32, 1  ;;  %v19032_v53 = vld [vmem:[#allocation221_spill] sm:$0xff] }
 0xa00   : > { %v8470_v8 = vrot.slane %v17740_v14, 1  ;;  %v7784_v61 = vadd.f32 %v7783_v33, %v17683_v58  ;;  %v7835_v9 = vrot.slane %v7834_v47, 4  ;;  %v8464_v29 = vadd.f32 %v8463_v63, %v8462_v54  ;;  %v19036_v63 = vld [vmem:[#allocation166_spill] sm:$0xff] }
 0xa01   : > { %v17757_v62 = vadd.f32 %v8477_v45, %v8476_v48  ;;  %v7886_v38 = vadd.f32 %v19030_v18, %v7872_v19  ;;  %v7939_v30 = vrot.slane %v19031_v44, 4  ;;  %v7991_v17 = vrot.slane %v19032_v53, 4  ;;  %v19037_v19 = vld [vmem:[#allocation91_spill] sm:$0xff] }
 0xa02   : > { %v7785_v1 = vrot.slane %v7784_v61, 2  ;;  %v7836_v49 = vadd.f32 %v7835_v9, %v7834_v47  ;;  %v19034_v16 = vrot.slane %v19033_v3, 4  ;;  %v8511_v58 = vsel %vm8509_vm5, %v7684_v6, %v7736_v5 }
 0xa03   : > { %v7887_v59 = vrot.slane %v7886_v38, 4  ;;  %v7940_v26 = vadd.f32 %v7939_v30, %v19031_v44  ;;  %v8549_v36 = vsel %vm4868_vm0, %v19035_v56, %v17549_v41  ;;  %v7992_v15 = vadd.f32 %v7991_v17, %v19032_v53  ;;  %v19038_v56 = vld [vmem:[#allocation104_spill] sm:$0xff] }
 0xa04   : > { %v8044_v60 = vadd.f32 %v19034_v16, %v19033_v3  ;;  %v7786_v13 = vadd.f32 %v7785_v1, %v7784_v61  ;;  %v7837_v35 = vrot.slane %v7836_v49, 2  ;;  %v8553_v31 = vsel %vm8523_vm7, %v8549_v36, %v17588_v21 }
 0xa05   : > { %v7888_v54 = vadd.f32 %v7887_v59, %v7886_v38  ;;  %v7941_v48 = vrot.slane %v7940_v26, 2  ;;  %v7666_v33 = vmul.f32 %v19036_v63, %v19001_v11  ;;  %v7993_v45 = vrot.slane %v7992_v15, 2 }
 0xa06   : > { %v8045_v23 = vrot.slane %v8044_v60, 2  ;;  %v7787_v55 = vrot.slane %v7786_v13, 1  ;;  %v7838_v47 = vadd.f32 %v7837_v35, %v7836_v49  ;;  %v8557_v41 = vsel %vm5227_vm3, %v8553_v31, %v8360_v2  ;;  %v19042_v31 = vld [vmem:[#allocation100_spill] sm:$0xff] }
 0xa07   : > { %v7889_v5 = vrot.slane %v7888_v54, 2  ;;  %v7942_v20 = vadd.f32 %v7941_v48, %v7940_v26  ;;  %v7670_v61 = vmul.f32 %v19037_v19, %v19003_v34  ;;  %v7994_v38 = vadd.f32 %v7993_v45, %v7992_v15  ;;  %v19045_v45 = vld [vmem:[#allocation240_spill] sm:$0xff] }
 0xa08   : > { %v8046_v6 = vadd.f32 %v8045_v23, %v8044_v60  ;;  %v7788_v9 = vadd.f32 %v7787_v55, %v7786_v13  ;;  %v7839_v18 = vrot.slane %v7838_v47, 1  ;;  %v8561_v1 = vsel %vm5130_vm2, %v8557_v41, %v8412_v51  ;;  %v19039_v13 = vld [vmem:[#allocation181_spill] sm:$0xff]  ;;  %v19040_v23 = vld [vmem:[#allocation183_spill] sm:$0xff]  ;;  %v19046_v41 = vld [vmem:[#allocation108_spill] sm:$0xff] }
 0xa09   : > { %v7890_v30 = vadd.f32 %v7889_v5, %v7888_v54  ;;  %v7943_v21 = vrot.slane %v7942_v20, 1  ;;  %v7692_v11 = vadd.f32 %v7670_v61, %v7666_v33  ;;  %v7995_v49 = vrot.slane %v7994_v38, 1  ;;  %v19044_v55 = vld [vmem:[#allocation131_spill] sm:$0xff] }
 0xa0a   : > { %v8047_v44 = vrot.slane %v8046_v6, 1  ;;  %v7840_v53 = vadd.f32 %v7839_v18, %v7838_v47  ;;  %v8516_v3 = vsel %vm8514_vm6, %v8511_v58, %v7788_v9  ;;  %v8565_v2 = vsel %vm5033_vm1, %v8561_v1, %v8464_v29  ;;  %v19041_v58 = vld [vmem:[#allocation235_spill] sm:$0xff]  ;;  %v19043_v29 = vld [vmem:[#allocation160_spill] sm:$0xff] }
 0xa0b   : > { %v7891_v16 = vrot.slane %v7890_v30, 1  ;;  %v7944_v60 = vadd.f32 %v7943_v21, %v7942_v20  ;;  %v7693_v59 = vrot.slane %v7692_v11, 4  ;;  %v7996_v34 = vadd.f32 %v7995_v49, %v7994_v38  ;;  %v19047_v9 = vld [vmem:[#allocation95_spill] sm:$0xff]  ;;  %v19048_v38 = vld [vmem:[#allocation217_spill] sm:$0xff] }
 0xa0c   : > { %v8048_v17 = vadd.f32 %v8047_v44, %v8046_v6  ;;  %v8520_v26 = vsel %vm4868_vm0, %v8516_v3, %v7840_v53  ;;  %v8573_v36 = vadd.f32 %v8565_v2, %v19038_v56  ;;  %v7718_v35 = vmul.f32 %v19039_v13, %v19005_v50  ;;  %v19049_v49 = vld [vmem:[#allocation103_spill] sm:$0xff] }
 0xa0d   : > { %v7892_v51 = vadd.f32 %v7891_v16, %v7890_v30  ;;  %v7694_v15 = vadd.f32 %v7693_v59, %v7692_v11  ;;  %v7722_v54 = vmul.f32 %v19040_v23, %v19007_v42  ;;  %v7770_v48 = vmul.f32 %v19041_v58, %v19009_v57 }
 0xa0e   : > { %v8637_v63 = vmul.f32 %v19042_v31, %v8573_v36  ;;  %v7774_v33 = vmul.f32 %v19043_v29, %v19011_v27  ;;  %v7822_v47 = vmul.f32 %v19044_v55, %v19013_v37  ;;  %v7874_v6 = vmul.f32 %v19045_v45, %v19028_v52  ;;  %v19050_v36 = vld [vmem:[#allocation222_spill] sm:$0xff]  ;;  %v19052_v55 = vld [vmem:[#allocation175_spill] sm:$0xff] }
 0xa0f   : > { %v8525_v50 = vsel %vm8523_vm7, %v8520_v26, %v7892_v51  ;;  %v7695_v5 = vrot.slane %v7694_v15, 2  ;;  %v7744_v20 = vadd.f32 %v7722_v54, %v7718_v35  ;;  %v7953_v42 = vrot.slane %v19046_v41, 4 }
 0xa10   : > { %v8529_v19 = vsel %vm5227_vm3, %v8525_v50, %v7944_v60  ;;  %v7796_v61 = vadd.f32 %v7774_v33, %v7770_v48  ;;  %v7848_v18 = vadd.f32 %v19047_v9, %v7822_v47  ;;  %v7900_v44 = vadd.f32 %v19048_v38, %v7874_v6 }
 0xa11   : > { %v8533_v27 = vsel %vm5130_vm2, %v8529_v19, %v7996_v34  ;;  %v7696_v30 = vadd.f32 %v7695_v5, %v7694_v15  ;;  %v7745_v37 = vrot.slane %v7744_v20, 4  ;;  %v7954_v21 = vadd.f32 %v7953_v42, %v19046_v41  ;;  %v19051_v34 = vld [vmem:[#allocation97_spill] sm:$0xff] }
 0xa12   : > { %v8537_v52 = vsel %vm5033_vm1, %v8533_v27, %v8048_v17  ;;  %v7797_v1 = vrot.slane %v7796_v61, 4  ;;  %v7849_v11 = vrot.slane %v7848_v18, 4  ;;  %v7901_v53 = vrot.slane %v7900_v44, 4 }
 0xa13   : > { %v8569_v3 = vadd.f32 %v8537_v52, %v19049_v49  ;;  %v7697_v16 = vrot.slane %v7696_v30, 1  ;;  %v7746_v60 = vadd.f32 %v7745_v37, %v7744_v20  ;;  %v7955_v2 = vrot.slane %v7954_v21, 2  ;;  %v19056_v52 = vld [vmem:[#allocation178_spill] sm:$0xff] }
 0xa14   : > { %v7798_v59 = vadd.f32 %v7797_v1, %v7796_v61  ;;  %v7850_v26 = vadd.f32 %v7849_v11, %v7848_v18  ;;  %v7902_v56 = vadd.f32 %v7901_v53, %v7900_v44  ;;  %v8005_v13 = vrot.slane %v19050_v36, 4  ;;  %v19054_v61 = vld [vmem:[#allocation143_spill] sm:$0xff] }
 0xa15   : > { %v8633_v35 = vmul.f32 %v19051_v34, %v8569_v3  ;;  %v7698_v51 = vadd.f32 %v7697_v16, %v7696_v30  ;;  %v7747_v15 = vrot.slane %v7746_v60, 2  ;;  %v7956_v23 = vadd.f32 %v7955_v2, %v7954_v21  ;;  %v19055_v21 = vld [vmem:[#allocation174_spill] sm:$0xff] }
 0xa16   : > { %v7799_v54 = vrot.slane %v7798_v59, 2  ;;  %v7851_v17 = vrot.slane %v7850_v26, 2  ;;  %v7903_v58 = vrot.slane %v7902_v56, 2  ;;  %v8006_v48 = vadd.f32 %v8005_v13, %v19050_v36  ;;  %v19058_v36 = vld [vmem:[#allocation186_spill] sm:$0xff] }
 0xa17   : > { %v8641_v31 = vpack.c.bf16 %v8637_v63, %v8633_v35  ;;  %v7748_v29 = vadd.f32 %v7747_v15, %v7746_v60  ;;  %v7957_v33 = vrot.slane %v7956_v23, 1  ;;  %v19053_v47 = vrot.slane %v19052_v55, 4 }
 0xa18   : > { %v7800_v6 = vadd.f32 %v7799_v54, %v7798_v59  ;;  %v7852_v50 = vadd.f32 %v7851_v17, %v7850_v26  ;;  %v7904_v5 = vadd.f32 %v7903_v58, %v7902_v56  ;;  %v8007_v20 = vrot.slane %v8006_v48, 2  ;;  %v19057_v56 = vld [vmem:[#allocation184_spill] sm:$0xff] }
 0xa19   : > { %v8058_v45 = vadd.f32 %v19053_v47, %v19052_v55  ;;  %9060 = vmatprep.mubr.bf16.mxu0 %v8641_v31  ;;  %v7749_v41 = vrot.slane %v7748_v29, 1  ;;  %v7958_v42 = vadd.f32 %v7957_v33, %v7956_v23  ;;  %v8551_v9 = vsel %vm4868_vm0, %v19054_v61, %v17554_v10  ;;  %v19060_v58 = vld [vmem:[#allocation232_spill] sm:$0xff]  ;;  %v19062_v55 = vld [vmem:[#allocation102_spill] sm:$0xff] }
 0xa1a   : > { %v7801_v18 = vrot.slane %v7800_v6, 1  ;;  %v7853_v63 = vrot.slane %v7852_v50, 1  ;;  %v7905_v38 = vrot.slane %v7904_v5, 1  ;;  %v8008_v44 = vadd.f32 %v8007_v20, %v8006_v48 }
 0xa1b   : > { %v8059_v19 = vrot.slane %v8058_v45, 2  ;;  %v7750_v27 = vadd.f32 %v7749_v41, %v7748_v29  ;;  %v8555_v37 = vsel %vm8523_vm7, %v8551_v9, %v17596_v7  ;;  %v7671_v1 = vadd.f32 %v19056_v52, %v19055_v21  ;;  %v19061_v29 = vld [vmem:[#allocation214_spill] sm:$0xff] }
 0xa1c   : > { %v7802_v11 = vadd.f32 %v7801_v18, %v7800_v6  ;;  %v7854_v53 = vadd.f32 %v7853_v63, %v7852_v50  ;;  %v7906_v49 = vadd.f32 %v7905_v38, %v7904_v5  ;;  %v8009_v3 = vrot.slane %v8008_v44, 1  ;;  %v19063_v6 = vld [vmem:[#allocation101_spill] sm:$0xff] }
 0xa1d   : > { %v8060_v30 = vadd.f32 %v8059_v19, %v8058_v45  ;;  %v8513_v60 = vsel %vm8509_vm5, %v7698_v51, %v7750_v27  ;;  %v8559_v10 = vsel %vm5227_vm3, %v8555_v37, %v17733_v24  ;;  %v7672_v2 = vrot.slane %v7671_v1, 4  ;;  %v19059_v24 = vld [vmem:[#allocation106_spill] sm:$0xff]  ;;  %v19064_v5 = vld [vmem:[#allocation161_spill] sm:$0xff] }
 0xa1e   : > { %v8010_v59 = vadd.f32 %v8009_v3, %v8008_v44  ;;  %v8518_v26 = vsel %vm8514_vm6, %v8513_v60, %v7802_v11  ;;  %v8563_v7 = vsel %vm5130_vm2, %v8559_v10, %v17743_v0  ;;  %v7723_v13 = vadd.f32 %v19058_v36, %v19057_v56  ;;  %v19066_v44 = vld [vmem:[#allocation218_spill] sm:$0xff] }
 0xa1f   : > { %v8061_v16 = vrot.slane %v8060_v30, 1  ;;  %v8522_v35 = vsel %vm4868_vm0, %v8518_v26, %v7854_v53  ;;  %v8567_v15 = vsel %vm5033_vm1, %v8563_v7, %v17757_v62  ;;  %v7673_v51 = vadd.f32 %v7672_v2, %v7671_v1  ;;  %v19068_v1 = vld [vmem:[#allocation176_spill] sm:$0xff]  ;;  %v19069_v53 = vld [vmem:[#allocation98_spill] sm:$0xff] }
 0xa20   : > { %v8527_v23 = vsel %vm8523_vm7, %v8522_v35, %v7906_v49  ;;  %v8575_v54 = vadd.f32 %v8567_v15, %v19059_v24  ;;  %v7724_v17 = vrot.slane %v7723_v13, 4  ;;  %v7767_v48 = vmul.f32 %v19060_v58, %v19009_v57 }
 0xa21   : > { %v8062_v34 = vadd.f32 %v8061_v16, %v8060_v30  ;;  %v8531_v0 = vsel %vm5227_vm3, %v8527_v23, %v7958_v42  ;;  %v7674_v31 = vrot.slane %v7673_v51, 2  ;;  %v7828_v33 = vrot.slane %v19061_v29, 4  ;;  %v19065_v42 = vld [vmem:[#allocation105_spill] sm:$0xff] }
 0xa22   : > { %v7880_v47 = vrot.slane %v19062_v55, 4  ;;  %v8535_v45 = vsel %vm5130_vm2, %v8531_v0, %v8010_v59  ;;  %v8639_v62 = vmul.f32 %v19063_v6, %v8575_v54  ;;  %v7725_v50 = vadd.f32 %v7724_v17, %v7723_v13 }
 0xa23   : > { %v7775_v20 = vadd.f32 %v19064_v5, %v7767_v48  ;;  %v8539_v41 = vsel %vm5033_vm1, %v8535_v45, %v8062_v34  ;;  %v7675_v19 = vadd.f32 %v7674_v31, %v7673_v51  ;;  %v7829_v61 = vadd.f32 %v7828_v33, %v19061_v29  ;;  %v19070_v51 = vld [vmem:[#allocation168_spill] sm:$0xff] }
 0xa24   : > { %v7881_v9 = vadd.f32 %v7880_v47, %v19062_v55  ;;  %v8571_v18 = vadd.f32 %v8539_v41, %v19065_v42  ;;  %v7726_v63 = vrot.slane %v7725_v50, 2  ;;  %v19067_v27 = vrot.slane %v19066_v44, 4  ;;  %v19075_v41 = vld [vmem:[#allocation187_spill] sm:$0xff] }
 0xa25   : > { %v7776_v38 = vrot.slane %v7775_v20, 4  ;;  %v7676_v37 = vrot.slane %v7675_v19, 1  ;;  %v7830_v21 = vrot.slane %v7829_v61, 2  ;;  %v7986_v11 = vrot.slane %v19068_v1, 2  ;;  %v19077_v42 = vld [vmem:[#allocation215_spill] sm:$0xff] }
 0xa26   : > { %v7933_v30 = vadd.f32 %v19067_v27, %v19066_v44  ;;  %v7882_v52 = vrot.slane %v7881_v9, 2  ;;  %v8635_v49 = vmul.f32 %v19069_v53, %v8571_v18  ;;  %v7727_v3 = vadd.f32 %v7726_v63, %v7725_v50  ;;  %v19073_v50 = vld [vmem:[#allocation180_spill] sm:$0xff]  ;;  %v19079_v27 = vld [vmem:[#allocation219_spill] sm:$0xff] }
 0xa27   : > { %v7777_v16 = vadd.f32 %v7776_v38, %v7775_v20  ;;  %v8457_v10 = vadd.f32 %v8456_v39, %v17738_v32  ;;  %v7831_v2 = vadd.f32 %v7830_v21, %v7829_v61  ;;  %v7987_v26 = vadd.f32 %v7986_v11, %v19068_v1  ;;  %v19074_v20 = vld [vmem:[#allocation185_spill] sm:$0xff]  ;;  %v19082_v11 = vld [vmem:[#allocation162_spill] sm:$0xff] }
 0xa28   : > { %v7934_v60 = vrot.slane %v7933_v30, 2  ;;  %v7883_v59 = vadd.f32 %v7882_v52, %v7881_v9  ;;  %v8643_v7 = vpack.c.bf16 %v8639_v62, %v8635_v49  ;;  %v7728_v56 = vrot.slane %v7727_v3, 1  ;;  %v19072_v62 = vld [vmem:[#allocation177_spill] sm:$0xff] }
 0xa29   : > { %v7778_v36 = vrot.slane %v7777_v16, 2  ;;  %v7832_v34 = vrot.slane %v7831_v2, 1  ;;  %v7988_v15 = vrot.slane %v7987_v26, 1  ;;  %v19071_v23 = vrot.slane %v19070_v51, 2  ;;  %v19081_v52 = vld [vmem:[#allocation113_spill] sm:$0xff] }
 0xa2a   : > { %v7935_v13 = vadd.f32 %v7934_v60, %v7933_v30  ;;  %v7884_v35 = vrot.slane %v7883_v59, 1  ;;  %9103 = vmatprep.mubr.bf16.mxu1 %v8643_v7  ;;  %v7677_v54 = vadd.f32 %v7676_v37, %v7675_v19  ;;  %v7729_v17 = vadd.f32 %v7728_v56, %v7727_v3 }
 0xa2b   : > { %v8039_v24 = vadd.f32 %v19071_v23, %v19070_v51  ;;  %v7779_v58 = vadd.f32 %v7778_v36, %v7777_v16  ;;  %v7833_v39 = vadd.f32 %v7832_v34, %v7831_v2  ;;  %v8556_v31 = vsel %vm5227_vm3, %v17599_v28, %v17711_v46  ;;  %v19076_v28 = vld [vmem:[#allocation234_spill] sm:$0xff] }
 0xa2c   : > { %v7936_v32 = vrot.slane %v7935_v13, 1  ;;  %v7885_v48 = vadd.f32 %v7884_v35, %v7883_v59  ;;  %v7989_v55 = vadd.f32 %v7988_v15, %v7987_v26  ;;  %v8560_v47 = vsel %vm5130_vm2, %v8556_v31, %v17735_v25  ;;  %v19078_v25 = vld [vmem:[#allocation146_spill] sm:$0xff] }
 0xa2d   : > { %v8040_v0 = vrot.slane %v8039_v24, 1  ;;  %v7780_v29 = vrot.slane %v7779_v58, 1  ;;  %v8510_v45 = vsel %vm8509_vm5, %v7677_v54, %v7729_v17  ;;  %v8564_v6 = vsel %vm5033_vm1, %v8560_v47, %v8457_v10  ;;  %v19085_v47 = vld [vmem:[#allocation170_spill] sm:$0xff] }
 0xa2e   : > { %v7937_v33 = vadd.f32 %v7936_v32, %v7935_v13  ;;  %v7685_v5 = vadd.f32 %v19073_v50, %v19072_v62  ;;  %v7737_v19 = vadd.f32 %v19075_v41, %v19074_v20  ;;  %v7769_v46 = vmul.f32 %v19076_v28, %v19009_v57  ;;  %v19083_v32 = vld [vmem:[#allocation107_spill] sm:$0xff]  ;;  %v19086_v62 = vld [vmem:[#allocation96_spill] sm:$0xff]  ;;  %v19087_v28 = vld [vmem:[#allocation169_spill] sm:$0xff] }
 0xa2f   : > { %v7781_v61 = vadd.f32 %v7780_v29, %v7779_v58  ;;  %v8041_v9 = vadd.f32 %v8040_v0, %v8039_v24  ;;  %v7842_v18 = vrot.slane %v19077_v42, 4  ;;  %v7894_v44 = vrot.slane %v19078_v25, 4 }
 0xa30   : > { %v7686_v63 = vrot.slane %v7685_v5, 4  ;;  %v7738_v38 = vrot.slane %v7737_v19, 4  ;;  %v19080_v30 = vrot.slane %v19079_v27, 4  ;;  %v8572_v1 = vadd.f32 %v8564_v6, %v19081_v52 }
 0xa31   : > { %v8515_v21 = vsel %vm8514_vm6, %v8510_v45, %v7781_v61  ;;  %v7789_v53 = vadd.f32 %v19082_v11, %v7769_v46  ;;  %v7843_v49 = vadd.f32 %v7842_v18, %v19077_v42  ;;  %v7895_v60 = vadd.f32 %v7894_v44, %v19078_v25 }
 0xa32   : > { %v7947_v37 = vadd.f32 %v19080_v30, %v19079_v27  ;;  %v8519_v57 = vsel %vm4868_vm0, %v8515_v21, %v7833_v39  ;;  %v7687_v3 = vadd.f32 %v7686_v63, %v7685_v5  ;;  %v7739_v16 = vadd.f32 %v7738_v38, %v7737_v19  ;;  %v19089_v27 = vld [vmem:[#allocation87_spill] sm:$0xff]  ;;  %v19090_v30 = vld [vmem:[#allocation110_spill] sm:$0xff] }
 0xa33   : > { %v8524_v10 = vsel %vm8523_vm7, %v8519_v57, %v7885_v48  ;;  %v7790_v2 = vrot.slane %v7789_v53, 4  ;;  %v7844_v59 = vrot.slane %v7843_v49, 2  ;;  %v7896_v13 = vrot.slane %v7895_v60, 2  ;;  %v19084_v48 = vld [vmem:[#allocation99_spill] sm:$0xff] }
 0xa34   : > { %v7948_v26 = vrot.slane %v7947_v37, 2  ;;  %v8528_v7 = vsel %vm5227_vm3, %v8524_v10, %v7937_v33  ;;  %v7688_v56 = vrot.slane %v7687_v3, 2  ;;  %v7740_v36 = vrot.slane %v7739_v16, 2  ;;  %v19092_v10 = vld [vmem:[#allocation85_spill] sm:$0xff] }
 0xa35   : > { %v8532_v34 = vsel %vm5130_vm2, %v8528_v7, %v7989_v55  ;;  %v7791_v35 = vadd.f32 %v7790_v2, %v7789_v53  ;;  %v7845_v15 = vadd.f32 %v7844_v59, %v7843_v49  ;;  %v7897_v17 = vadd.f32 %v7896_v13, %v7895_v60  ;;  %v19093_v2 = vld [vmem:[#allocation114_spill] sm:$0xff] }
 0xa36   : > { %v7949_v51 = vadd.f32 %v7948_v26, %v7947_v37  ;;  %v8536_v23 = vsel %vm5033_vm1, %v8532_v34, %v8041_v9  ;;  %v7689_v24 = vadd.f32 %v7688_v56, %v7687_v3  ;;  %v7741_v54 = vadd.f32 %v7740_v36, %v7739_v16  ;;  %v19094_v56 = vld [vmem:[#allocation86_spill] sm:$0xff]  ;;  %v19095_v36 = vld [vmem:[#allocation109_spill] sm:$0xff] }
 0xa37   : > { %v8419_v58 = vadd.f32 %v8418_v22, %v17726_v12  ;;  %v8568_v39 = vadd.f32 %v8536_v23, %v19083_v32  ;;  %v8636_v0 = vmul.f32 %v19084_v48, %v8572_v1  ;;  %v7792_v31 = vrot.slane %v7791_v35, 2  ;;  %v19091_v1 = vld [vmem:[#allocation118_spill] sm:$0xff]  ;;  %v13045_v32 = vld [vmem:[#allocation2 + $0x10] sm:$0xff] }
 0xa38   : > { %v7690_v29 = vrot.slane %v7689_v24, 1  ;;  %v7742_v33 = vrot.slane %v7741_v54, 1  ;;  %v7846_v55 = vrot.slane %v7845_v15, 1  ;;  %v8000_v45 = vrot.slane %v19085_v47, 2 }
 0xa39   : > { %v8471_v6 = vadd.f32 %v8470_v8, %v17740_v14  ;;  %v8632_v50 = vmul.f32 %v19086_v62, %v8568_v39  ;;  %v7793_v5 = vadd.f32 %v7792_v31, %v7791_v35  ;;  %v7898_v20 = vrot.slane %v7897_v17, 1 }
 0xa3a   : > { %v8554_v12 = vsel %vm8523_vm7, %v17576_v40, %v17590_v4  ;;  %v7743_v22 = vadd.f32 %v7742_v33, %v7741_v54  ;;  %v7950_v41 = vrot.slane %v7949_v51, 1  ;;  %v8001_v19 = vadd.f32 %v8000_v45, %v19085_v47  ;;  %v13047_v45 = vld [vmem:[#allocation2 + $0x18] sm:$0xff] }
 0xa3b   : > { %v8640_v61 = vpack.c.bf16 %v8636_v0, %v8632_v50  ;;  %v7794_v9 = vrot.slane %v7793_v5, 1  ;;  %v19088_v46 = vrot.slane %v19087_v28, 2  ;;  %v8558_v14 = vsel %vm5227_vm3, %v8554_v12, %v17730_v43  ;;  %v13048_v50 = vld [vmem:[#allocation2 + $0x8] sm:$0xff] }
 0xa3c   : > { %v7691_v8 = vadd.f32 %v7690_v29, %v7689_v24  ;;  %v7847_v18 = vadd.f32 %v7846_v55, %v7845_v15  ;;  %v8002_v63 = vrot.slane %v8001_v19, 1  ;;  %v8562_v38 = vsel %vm5130_vm2, %v8558_v14, %v8419_v58  ;;  %v13046_v29 = vld [vmem:[#allocation2] sm:$0xff] }
 0xa3d   : > { %v8053_v42 = vadd.f32 %v19088_v46, %v19087_v28  ;;  %9061 = vmatmul.mubr.bf16.vlgmr.msra.gmra.mxu0 %v8640_v61  ;;  %v7795_v40 = vadd.f32 %v7794_v9, %v7793_v5  ;;  %v7899_v4 = vadd.f32 %v7898_v20, %v7897_v17  ;;  %v8566_v44 = vsel %vm5033_vm1, %v8562_v38, %v8471_v6 }
 0xa3e   : > { %v8630_v37 = vmul.f32 %v19090_v30, %v19089_v27  ;;  %v7951_v21 = vadd.f32 %v7950_v41, %v7949_v51  ;;  %v8512_v52 = vsel %vm8509_vm5, %v7691_v8, %v7743_v22  ;;  %v8574_v11 = vadd.f32 %v8566_v44, %v19091_v1 }
 0xa3f   : > { %v8054_v25 = vrot.slane %v8053_v42, 1  ;;  %v8003_v43 = vadd.f32 %v8002_v63, %v8001_v19  ;;  %v8517_v53 = vsel %vm8514_vm6, %v8512_v52, %v7795_v40  ;;  %v8503_v59 = vmul.f32 %v19093_v2, %v19092_v10 }
 0xa40   : > { %v8521_v57 = vsel %vm4868_vm0, %v8517_v53, %v7847_v18  ;;  %v8638_v3 = vmul.f32 %v8630_v37, %v8574_v11  ;;  %v8626_v13 = vmul.f32 %v19095_v36, %v19094_v56 }
 0xa41   : > { %v8055_v49 = vadd.f32 %v8054_v25, %v8053_v42  ;;  %v8526_v16 = vsel %vm8523_vm7, %v8521_v57, %v7899_v4 }
 0xa42   : > { %v8530_v60 = vsel %vm5227_vm3, %v8526_v16, %v7951_v21 }
 0xa43   : > { %v8534_v26 = vsel %vm5130_vm2, %v8530_v60, %v8003_v43 }
 0xa44   : > { %v8538_v7 = vsel %vm5033_vm1, %v8534_v26, %v8055_v49 }
 0xa45   : > { %v8570_v34 = vadd.f32 %v8538_v7, %v8503_v59 }
 0xa47   : > { %v8634_v35 = vmul.f32 %v8626_v13, %v8570_v34 }
 0xa49   : > { %v8642_v15 = vpack.c.bf16 %v8638_v3, %v8634_v35 }
 0xa4b   : > { %9104 = vmatmul.mubr.bf16.vlgmr.msra.gmra.mxu1 %v8642_v15 }
 0xafd   : > { %v9062_v51 = vpop.f32.mrf.mxu0 }
 0xaff   : > { %v9064_v23 = vpop.f32.mrf.mxu0 }
 0xb01   : > { %v9066_v54 = vpop.f32.mrf.mxu0 }
 0xb03   : > { %v9068_v31 = vpop.f32.mrf.mxu0 }
 0xb0b   : > { %v9105_v24 = vpop.f32.mrf.mxu1 }
 0xb0c   : > { %v9106_v17 = vadd.f32 %v9105_v24, %v9062_v51 }
 0xb0d   : > { %v9107_v58 = vpop.f32.mrf.mxu1 }
 0xb0e   : > { %v17918_v39 = vadd.f32 %v13045_v32, %v9106_v17  ;;  %v9108_v48 = vadd.f32 %v9107_v58, %v9064_v23 }
 0xb0f   : > { %v9109_v0 = vpop.f32.mrf.mxu1 }
 0xb10   : > { %9118 = vst [vmem:[#allocation2 + $0x10] sm:$0xff] %v17918_v39  ;;  %v9115_v33 = vadd.f32 %v13046_v29, %v9108_v48  ;;  %v9110_v55 = vadd.f32 %v9109_v0, %v9066_v54 }
 0xb11   : > { %v9111_v47 = vpop.f32.mrf.mxu1 }
 0xb12   : > { %9119 = vst [vmem:[#allocation2] sm:$0xff] %v9115_v33  ;;  %v17921_v6 = vadd.f32 %v13047_v45, %v9110_v55  ;;  %v9112_v62 = vadd.f32 %v9111_v47, %v9068_v31  ;;  %9125 = sbr.rel (%p11528_p7) target bundleno = 4511 (0x119f), region = 208 }
 0xb14   : > { %9120 = vst [vmem:[#allocation2 + $0x18] sm:$0xff] %v17921_v6  ;;  %v9117_v5 = vadd.f32 %v13048_v50, %v9112_v62 }
 0xb16   : > { %9121 = vst [vmem:[#allocation2 + $0x8] sm:$0xff] %v9117_v5 }
 0xb17   : > { %v13051_v20 = vld [vmem:[#allocation22 + $0xe4] ss:$16 sps:$4 sm:$0xff]   ;;  %v9127_v12 = vpack.c.bf16 %v9117_v5, %v9115_v33  ;;  %v13053_v22 = vld [vmem:[#allocation22 + $0xec] ss:$16 sps:$4 sm:$0xff]   ;;  %v13055_v41 = vld [vmem:[#allocation22 + $0xe0] ss:$16 sps:$4 sm:$0xff]  }
 0xb18   : > { %9534 = vmatprep.subr.bf16.mxu0 %v13051_v20  ;;  %v13056_v19 = vld [vmem:[#allocation22 + $0xe8] ss:$16 sps:$4 sm:$0xff]   ;;  %9577 = vmatprep.subr.bf16.mxu1 %v13053_v22  ;;  %v13057_v61 = vld [vmem:[#allocation22 + $0xc4] ss:$16 sps:$4 sm:$0xff]   ;;  %v13059_v9 = vld [vmem:[#allocation22 + $0xcc] ss:$16 sps:$4 sm:$0xff]  }
 0xb19   : > { %9566 = vmatprep.mubr.bf16.mxu0 %v9127_v12  ;;  %9609 = vmatprep.mubr.bf16.mxu1 %v9127_v12  ;;  %v13061_v28 = vld [vmem:[#allocation22 + $0xc0] ss:$16 sps:$4 sm:$0xff]   ;;  %v13062_v46 = vld [vmem:[#allocation22 + $0xc8] ss:$16 sps:$4 sm:$0xff]   ;;  %v13063_v42 = vld [vmem:[#allocation22 + $0xa4] ss:$16 sps:$4 sm:$0xff]  }
 0xb1a   : > { %9535 = vmatpush1.bf16.msra.mxu0 %v13055_v41  ;;  %9578 = vmatpush1.bf16.msra.mxu1 %v13056_v19  ;;  %v13065_v14 = vld [vmem:[#allocation22 + $0xac] ss:$16 sps:$4 sm:$0xff]   ;;  %v13067_v8 = vld [vmem:[#allocation22 + $0xa0] ss:$16 sps:$4 sm:$0xff]   ;;  %v13068_v18 = vld [vmem:[#allocation22 + $0xa8] ss:$16 sps:$4 sm:$0xff]   ;;  %v9126_v41 = vpack.c.bf16 %v17921_v6, %v17918_v39 }
 0xb1b   : > { %9536 = vmatprep.subr.bf16.mxu0 %v13057_v61  ;;  %9579 = vmatprep.subr.bf16.mxu1 %v13059_v9  ;;  %v13069_v63 = vld [vmem:[#allocation22 + $0x84] ss:$16 sps:$4 sm:$0xff]   ;;  %v13071_v38 = vld [vmem:[#allocation22 + $0x8c] ss:$16 sps:$4 sm:$0xff]   ;;  %v13073_v40 = vld [vmem:[#allocation22 + $0x80] ss:$16 sps:$4 sm:$0xff]  }
 0xb1c   : > { %v13074_v4 = vld [vmem:[#allocation22 + $0x88] ss:$16 sps:$4 sm:$0xff]   ;;  %v13075_v25 = vld [vmem:[#allocation22 + $0x64] ss:$16 sps:$4 sm:$0xff]   ;;  %v13077_v44 = vld [vmem:[#allocation22 + $0x6c] ss:$16 sps:$4 sm:$0xff]  }
 0xb1d   : > { %v13079_v27 = vld [vmem:[#allocation22 + $0x60] ss:$16 sps:$4 sm:$0xff]   ;;  %v13080_v30 = vld [vmem:[#allocation22 + $0x68] ss:$16 sps:$4 sm:$0xff]   ;;  %v13081_v37 = vld [vmem:[#allocation22 + $0x44] ss:$16 sps:$4 sm:$0xff]  }
 0xb1e   : > { %9537 = vmatpush1.bf16.msra.mxu0 %v13061_v28  ;;  %9580 = vmatpush1.bf16.msra.mxu1 %v13062_v46  ;;  %v13083_v21 = vld [vmem:[#allocation22 + $0x4c] ss:$16 sps:$4 sm:$0xff]   ;;  %v13085_v52 = vld [vmem:[#allocation22 + $0x40] ss:$16 sps:$4 sm:$0xff]   ;;  %v13086_v1 = vld [vmem:[#allocation22 + $0x48] ss:$16 sps:$4 sm:$0xff]  }
 0xb1f   : > { %9538 = vmatprep.subr.bf16.mxu0 %v13063_v42  ;;  %9581 = vmatprep.subr.bf16.mxu1 %v13065_v14  ;;  %v13087_v11 = vld [vmem:[#allocation22 + $0x24] ss:$16 sps:$4 sm:$0xff]   ;;  %v13089_v43 = vld [vmem:[#allocation22 + $0x2c] ss:$16 sps:$4 sm:$0xff]   ;;  %v13091_v53 = vld [vmem:[#allocation22 + $0x20] ss:$16 sps:$4 sm:$0xff]  }
 0xb20   : > { %v13092_v49 = vld [vmem:[#allocation22 + $0x28] ss:$16 sps:$4 sm:$0xff]   ;;  %v13093_v57 = vld [vmem:[#allocation22 + $0x4] ss:$16 sps:$4 sm:$0xff]   ;;  %v13095_v3 = vld [vmem:[#allocation22 + $0xc] ss:$16 sps:$4 sm:$0xff]  }
 0xb21   : > { %v13097_v16 = vld [vmem:[#allocation22] ss:$16 sps:$4 sm:$0xff]   ;;  %v13098_v60 = vld [vmem:[#allocation22 + $0x8] ss:$16 sps:$4 sm:$0xff]   ;;  %v13099_v10 = vld [vmem:[#allocation22 + $0x1e4] ss:$16 sps:$4 sm:$0xff]  }
 0xb22   : > { %9539 = vmatpush1.bf16.msra.mxu0 %v13067_v8  ;;  %9582 = vmatpush1.bf16.msra.mxu1 %v13068_v18  ;;  %v13101_v2 = vld [vmem:[#allocation22 + $0x1ec] ss:$16 sps:$4 sm:$0xff]   ;;  %v13103_v59 = vld [vmem:[#allocation22 + $0x1e0] ss:$16 sps:$4 sm:$0xff]   ;;  %v13104_v26 = vld [vmem:[#allocation22 + $0x1e8] ss:$16 sps:$4 sm:$0xff]  }
 0xb23   : > { %9540 = vmatprep.subr.bf16.mxu0 %v13069_v63  ;;  %9583 = vmatprep.subr.bf16.mxu1 %v13071_v38  ;;  %v13105_v7 = vld [vmem:[#allocation22 + $0x1c4] ss:$16 sps:$4 sm:$0xff]   ;;  %v13107_v56 = vld [vmem:[#allocation22 + $0x1cc] ss:$16 sps:$4 sm:$0xff]   ;;  %v13109_v36 = vld [vmem:[#allocation22 + $0x1c0] ss:$16 sps:$4 sm:$0xff]  }
 0xb24   : > { %v13110_v13 = vld [vmem:[#allocation22 + $0x1c8] ss:$16 sps:$4 sm:$0xff]   ;;  %v13111_v34 = vld [vmem:[#allocation22 + $0x1a4] ss:$16 sps:$4 sm:$0xff]   ;;  %v13113_v35 = vld [vmem:[#allocation22 + $0x1ac] ss:$16 sps:$4 sm:$0xff]  }
 0xb25   : > { %v13115_v15 = vld [vmem:[#allocation22 + $0x1a0] ss:$16 sps:$4 sm:$0xff]   ;;  %v13116_v51 = vld [vmem:[#allocation22 + $0x1a8] ss:$16 sps:$4 sm:$0xff]   ;;  %v13117_v23 = vld [vmem:[#allocation22 + $0x184] ss:$16 sps:$4 sm:$0xff]  }
 0xb26   : > { %9541 = vmatpush1.bf16.msra.mxu0 %v13073_v40  ;;  %9584 = vmatpush1.bf16.msra.mxu1 %v13074_v4  ;;  %v13119_v24 = vld [vmem:[#allocation22 + $0x18c] ss:$16 sps:$4 sm:$0xff]   ;;  %v13121_v54 = vld [vmem:[#allocation22 + $0x180] ss:$16 sps:$4 sm:$0xff]   ;;  %v13122_v17 = vld [vmem:[#allocation22 + $0x188] ss:$16 sps:$4 sm:$0xff]  }
 0xb27   : > { %9542 = vmatprep.subr.bf16.mxu0 %v13075_v25  ;;  %9585 = vmatprep.subr.bf16.mxu1 %v13077_v44  ;;  %v13123_v58 = vld [vmem:[#allocation22 + $0x164] ss:$16 sps:$4 sm:$0xff]   ;;  %v13125_v32 = vld [vmem:[#allocation22 + $0x16c] ss:$16 sps:$4 sm:$0xff]   ;;  %v13127_v48 = vld [vmem:[#allocation22 + $0x160] ss:$16 sps:$4 sm:$0xff]  }
 0xb28   : > { %v13128_v0 = vld [vmem:[#allocation22 + $0x168] ss:$16 sps:$4 sm:$0xff]   ;;  %v13129_v31 = vld [vmem:[#allocation22 + $0x144] ss:$16 sps:$4 sm:$0xff]   ;;  %v13131_v29 = vld [vmem:[#allocation22 + $0x14c] ss:$16 sps:$4 sm:$0xff]  }
 0xb29   : > { %v13133_v33 = vld [vmem:[#allocation22 + $0x140] ss:$16 sps:$4 sm:$0xff]   ;;  %v13134_v55 = vld [vmem:[#allocation22 + $0x148] ss:$16 sps:$4 sm:$0xff]   ;;  %v13135_v47 = vld [vmem:[#allocation22 + $0x124] ss:$16 sps:$4 sm:$0xff]  }
 0xb2a   : > { %9543 = vmatpush1.bf16.msra.mxu0 %v13079_v27  ;;  %9586 = vmatpush1.bf16.msra.mxu1 %v13080_v30  ;;  %v13137_v45 = vld [vmem:[#allocation22 + $0x12c] ss:$16 sps:$4 sm:$0xff]   ;;  %v13139_v62 = vld [vmem:[#allocation22 + $0x120] ss:$16 sps:$4 sm:$0xff]   ;;  %v13140_v50 = vld [vmem:[#allocation22 + $0x128] ss:$16 sps:$4 sm:$0xff]  }
 0xb2b   : > { %9544 = vmatprep.subr.bf16.mxu0 %v13081_v37  ;;  %9587 = vmatprep.subr.bf16.mxu1 %v13083_v21  ;;  %v13141_v5 = vld [vmem:[#allocation22 + $0x104] ss:$16 sps:$4 sm:$0xff]   ;;  %v13143_v20 = vld [vmem:[#allocation22 + $0x10c] ss:$16 sps:$4 sm:$0xff]   ;;  %v13145_v12 = vld [vmem:[#allocation22 + $0x100] ss:$16 sps:$4 sm:$0xff]  }
 0xb2c   : > { %v13146_v22 = vld [vmem:[#allocation22 + $0x108] ss:$16 sps:$4 sm:$0xff]   ;;  %v9192_v19 = vld [vmem:[#allocation24] sm:$0xf]  ;;  %v19098_v28 = vld [vmem:[#allocation80_spill] sm:$0xff]  ;;  %vm10114_vm8 = vcmask 7168  }
 0xb2d   : > { %v19097_v61 = vld [vmem:[#allocation79_spill] sm:$0xff]  ;;  %v9205_v46 = vrot.slane %v9192_v19, %v19098_v28  ;;  %v19099_v42 = vld [vmem:[#allocation78_spill] sm:$0xff]  ;;  %v19100_v63 = vld [vmem:[#allocation81_spill] sm:$0xff]  ;;  %vm10429_vm10 = vcmask 8192  }
 0xb2e   : > { %9545 = vmatpush1.bf16.msra.mxu0 %v13085_v52  ;;  %9588 = vmatpush1.bf16.msra.mxu1 %v13086_v1  ;;  %v9197_v9 = vrot.slane %v9192_v19, %v19097_v61  ;;  %v9201_v14 = vrot.slane %v9192_v19, %v19099_v42  ;;  %v9209_v38 = vrot.slane %v9192_v19, %v19100_v63 }
 0xb2f   : > { %9546 = vmatprep.subr.bf16.mxu0 %v13087_v11  ;;  %9589 = vmatprep.subr.bf16.mxu1 %v13089_v43 }
 0xb32   : > { %9547 = vmatpush1.bf16.msra.mxu0 %v13091_v53  ;;  %9590 = vmatpush1.bf16.msra.mxu1 %v13092_v49 }
 0xb33   : > { %9548 = vmatprep.subr.bf16.mxu0 %v13093_v57  ;;  %9591 = vmatprep.subr.bf16.mxu1 %v13095_v3 }
 0xb36   : > { %9549 = vmatpush1.bf16.msra.mxu0 %v13097_v16  ;;  %9592 = vmatpush1.bf16.msra.mxu1 %v13098_v60 }
 0xb37   : > { %9550 = vmatprep.subr.bf16.mxu0 %v13099_v10  ;;  %9593 = vmatprep.subr.bf16.mxu1 %v13101_v2 }
 0xb3a   : > { %9551 = vmatpush2.bf16.msra.mxu0 %v13103_v59  ;;  %9594 = vmatpush2.bf16.msra.mxu1 %v13104_v26 }
 0xb3b   : > { %9552 = vmatprep.subr.bf16.mxu0 %v13105_v7  ;;  %9595 = vmatprep.subr.bf16.mxu1 %v13107_v56 }
 0xb3e   : > { %9553 = vmatpush2.bf16.msra.mxu0 %v13109_v36  ;;  %9596 = vmatpush2.bf16.msra.mxu1 %v13110_v13 }
 0xb3f   : > { %9554 = vmatprep.subr.bf16.mxu0 %v13111_v34  ;;  %9597 = vmatprep.subr.bf16.mxu1 %v13113_v35  ;;  %v13147_v34 = vld [vmem:[#allocation28 + $0x78] sm:$0xff]  }
 0xb40   : > { %v13148_v35 = vld [vmem:[#allocation28 + $0xf8] sm:$0xff]  }
 0xb42   : > { %9555 = vmatpush2.bf16.msra.mxu0 %v13115_v15  ;;  %9598 = vmatpush2.bf16.msra.mxu1 %v13116_v51 }
 0xb43   : > { %9556 = vmatprep.subr.bf16.mxu0 %v13117_v23  ;;  %9599 = vmatprep.subr.bf16.mxu1 %v13119_v24 }
 0xb46   : > { %9557 = vmatpush2.bf16.msra.mxu0 %v13121_v54  ;;  %9600 = vmatpush2.bf16.msra.mxu1 %v13122_v17 }
 0xb47   : > { %9558 = vmatprep.subr.bf16.mxu0 %v13123_v58  ;;  %9601 = vmatprep.subr.bf16.mxu1 %v13125_v32 }
 0xb4a   : > { %9559 = vmatpush2.bf16.msra.mxu0 %v13127_v48  ;;  %9602 = vmatpush2.bf16.msra.mxu1 %v13128_v0 }
 0xb4b   : > { %9560 = vmatprep.subr.bf16.mxu0 %v13129_v31  ;;  %9603 = vmatprep.subr.bf16.mxu1 %v13131_v29 }
 0xb4e   : > { %9561 = vmatpush2.bf16.msra.mxu0 %v13133_v33  ;;  %9604 = vmatpush2.bf16.msra.mxu1 %v13134_v55 }
 0xb4f   : > { %9562 = vmatprep.subr.bf16.mxu0 %v13135_v47  ;;  %9605 = vmatprep.subr.bf16.mxu1 %v13137_v45 }
 0xb52   : > { %9563 = vmatpush2.bf16.msra.mxu0 %v13139_v62  ;;  %9606 = vmatpush2.bf16.msra.mxu1 %v13140_v50 }
 0xb53   : > { %9564 = vmatprep.subr.bf16.mxu0 %v13141_v5  ;;  %9607 = vmatprep.subr.bf16.mxu1 %v13143_v20 }
 0xb56   : > { %9565 = vmatpush2.bf16.msra.mxu0 %v13145_v12  ;;  %9608 = vmatpush2.bf16.msra.mxu1 %v13146_v22 }
 0xb57   : > { %11689 = vmatprep.subr.bf16.mxu0 %v13147_v34  ;;  %11711 = vmatprep.subr.bf16.mxu1 %v13148_v35 }
 0xb59   : > { %9567 = vmatmul.mubr.bf16.vlgmr.msra.gmra.mxu0 %v9126_v41  ;;  %9610 = vmatmul.mubr.bf16.vlgmr.msra.gmra.mxu1 %v9126_v41 }
 0xc19   : > { %v9568_v8 = vpop.f32.mrf.mxu0  ;;  %v9611_v18 = vpop.f32.mrf.mxu1 }
 0xc1a   : > { %v9569_v40 = vadd.f32 %v9568_v8, %v9197_v9  ;;  %v9612_v4 = vadd.f32 %v9611_v18, %v9205_v46  ;;  %v13150_v8 = vld [vmem:[#allocation28 + $0xb8] sm:$0xff]   ;;  %v13151_v18 = vld [vmem:[#allocation28 + $0x70] sm:$0xff]  }
 0xc1b   : > { %v9570_v25 = vpop.f32.mrf.mxu0  ;;  %v9613_v44 = vpop.f32.mrf.mxu1  ;;  %11712 = vmatpush3.bf16.msra.mxu1 %v13150_v8 }
 0xc1c   : > { %v9571_v39 = vadd.f32 %v9570_v25, %v9201_v14  ;;  %v9614_v6 = vadd.f32 %v9613_v44, %v9209_v38  ;;  %v9620_v37 = vmax.f32 %v9569_v40, 0.0  ;;  %v9622_v21 = vmax.f32 %v9612_v4, 0.0  ;;  %v13153_v40 = vld [vmem:[#allocation28 + $0x30] sm:$0xff]   ;;  %v13155_v25 = vld [vmem:[#allocation28 + $0x68] sm:$0xff]  }
 0xc1d   : > { %v9572_v27 = vpop.f32.mrf.mxu0  ;;  %v9615_v30 = vpop.f32.mrf.mxu1  ;;  %v13154_v4 = vld [vmem:[#allocation28 + $0xb0] sm:$0xff]   ;;  %v13156_v44 = vld [vmem:[#allocation28 + $0xe8] sm:$0xff]  }
 0xc1e   : > { %v9621_v52 = vmax.f32 %v9571_v39, 0.0  ;;  %v9573_v1 = vadd.f32 %v9572_v27, %v9197_v9  ;;  %v9616_v49 = vadd.f32 %v9615_v30, %v9205_v46  ;;  %v9623_v3 = vmax.f32 %v9614_v6, 0.0  ;;  %v13157_v39 = vld [vmem:[#allocation28 + $0x28] sm:$0xff]   ;;  %v13159_v27 = vld [vmem:[#allocation28 + $0x60] sm:$0xff]  }
 0xc1f   : > { %v9574_v11 = vpop.f32.mrf.mxu0  ;;  %v9617_v43 = vpop.f32.mrf.mxu1  ;;  %v13158_v6 = vld [vmem:[#allocation28 + $0xa8] sm:$0xff]   ;;  %v13160_v30 = vld [vmem:[#allocation28 + $0xe0] sm:$0xff]  }
 0xc20   : > { %v9628_v53 = vadd.f32 %v9621_v52, %v9620_v37  ;;  %v9575_v57 = vadd.f32 %v9574_v11, %v9201_v14  ;;  %v9624_v16 = vmax.f32 %v9573_v1, 0.0  ;;  %v9618_v10 = vadd.f32 %v9617_v43, %v9209_v38  ;;  %v13149_v14 = vld [vmem:[#allocation28 + $0x38] sm:$0xff]   ;;  %v13152_v38 = vld [vmem:[#allocation28 + $0xf0] sm:$0xff]  }
 0xc21   : > { %v9626_v59 = vmax.f32 %v9616_v49, 0.0  ;;  %11690 = vmatpush3.bf16.msra.mxu0 %v13149_v14  ;;  %11713 = vmatprep.subr.bf16.mxu1 %v13152_v38  ;;  %v13164_v1 = vld [vmem:[#allocation28 + $0xd8] sm:$0xff]   ;;  %v13168_v49 = vld [vmem:[#allocation28 + $0xd0] sm:$0xff]  }
 0xc22   : > { %v9625_v60 = vmax.f32 %v9575_v57, 0.0  ;;  %v9629_v2 = vadd.f32 %v9628_v53, %v9622_v21  ;;  %v9627_v56 = vmax.f32 %v9618_v10, 0.0  ;;  %11691 = vmatprep.subr.bf16.mxu0 %v13151_v18  ;;  %11714 = vmatpush3.bf16.msra.mxu1 %v13154_v4  ;;  %v13165_v11 = vld [vmem:[#allocation28 + $0x18] sm:$0xff]   ;;  %v13167_v53 = vld [vmem:[#allocation28 + $0x50] sm:$0xff]   ;;  %v13173_v10 = vld [vmem:[#allocation28 + $0x8] sm:$0xff]  }
 0xc23   : > { %11715 = vmatprep.subr.bf16.mxu1 %v13156_v44  ;;  %v13166_v43 = vld [vmem:[#allocation28 + $0x98] sm:$0xff]   ;;  %v13169_v57 = vld [vmem:[#allocation28 + $0x10] sm:$0xff]  }
 0xc24   : > { %v9633_v26 = vadd.f32 %v9625_v60, %v9624_v16  ;;  %v9630_v7 = vadd.f32 %v9629_v2, %v9623_v3  ;;  %v13174_v2 = vld [vmem:[#allocation28 + $0x88] sm:$0xff]  }
 0xc25   : > { %11692 = vmatpush3.bf16.msra.mxu0 %v13153_v40 }
 0xc26   : > { %9631 = vadd.xlane.f32.xlu0 %v9630_v7  ;;  %v9634_v36 = vadd.f32 %v9633_v26, %v9626_v59  ;;  %11693 = vmatprep.subr.bf16.mxu0 %v13155_v25  ;;  %v13176_v26 = vld [vmem:[#allocation28 + $0xc0] sm:$0xff]  }
 0xc27   : > { %11716 = vmatpush3.bf16.msra.mxu1 %v13158_v6  ;;  %v13177_v7 = vld [vmem:[#allocation28] sm:$0xff]  }
 0xc28   : > { %v9635_v13 = vadd.f32 %v9634_v36, %v9627_v56  ;;  %11717 = vmatprep.subr.bf16.mxu1 %v13160_v30 }
 0xc29   : > { %11694 = vmatpush3.bf16.msra.mxu0 %v13157_v39 }
 0xc2a   : > { %9636 = vadd.xlane.f32.xlu0 %v9635_v13  ;;  %11695 = vmatprep.subr.bf16.mxu0 %v13159_v27 }
 0xcaf   : > { %v9632_v15 = vpop.xlane.xlu0 %9631 }
 0xcb0   : > { %v9639_v51 = vmul.f32 0.001953125, %v9632_v15 }
 0xcb2   : > { %v17931_v23 = vsub.f32 %v9620_v37, %v9639_v51  ;;  %v17933_v24 = vsub.f32 %v9621_v52, %v9639_v51  ;;  %v17935_v54 = vsub.f32 %v9622_v21, %v9639_v51  ;;  %v17937_v58 = vsub.f32 %v9623_v3, %v9639_v51  ;;  %v13161_v37 = vld [vmem:[#allocation28 + $0x20] sm:$0xff]   ;;  %v13163_v52 = vld [vmem:[#allocation28 + $0x58] sm:$0xff]   ;;  %v13170_v3 = vld [vmem:[#allocation28 + $0x90] sm:$0xff]  }
 0xcb3   : > { %v9637_v17 = vpop.xlane.xlu0 %9636  ;;  %v13162_v21 = vld [vmem:[#allocation28 + $0xa0] sm:$0xff]   ;;  %11696 = vmatpush3.bf16.msra.mxu0 %v13161_v37 }
 0xcb4   : > { %v9640_v32 = vmul.f32 0.001953125, %v9637_v17  ;;  %v9649_v48 = vmul.f32 %v17931_v23, %v17931_v23  ;;  %v9650_v0 = vmul.f32 %v17933_v24, %v17933_v24  ;;  %v9651_v31 = vmul.f32 %v17935_v54, %v17935_v54  ;;  %11718 = vmatpush3.bf16.msra.mxu1 %v13162_v21  ;;  %11697 = vmatprep.subr.bf16.mxu0 %v13163_v52  ;;  %v9681_v17 = vld [vmem:[#allocation25] sm:$0xf]  ;;  %v11593_v52 = vld [vmem:[#allocation30] ss:$0 sm:$0xff] }
 0xcb5   : > { %v9652_v45 = vmul.f32 %v17937_v58, %v17937_v58  ;;  %11719 = vmatprep.subr.bf16.mxu1 %v13164_v1 }
 0xcb6   : > { %v17945_v29 = vsub.f32 %v9624_v16, %v9640_v32  ;;  %v17947_v33 = vsub.f32 %v9625_v60, %v9640_v32  ;;  %v9657_v55 = vadd.f32 %v9650_v0, %v9649_v48  ;;  %v17949_v47 = vsub.f32 %v9626_v59, %v9640_v32  ;;  %v13171_v16 = vld [vmem:[#allocation28 + $0x48] sm:$0xff]   ;;  %v13175_v59 = vld [vmem:[#allocation28 + $0x40] sm:$0xff]  }
 0xcb7   : > { %v17953_v50 = vsub.f32 %v9627_v56, %v9640_v32  ;;  %11698 = vmatpush3.bf16.msra.mxu0 %v13165_v11  ;;  %v13172_v60 = vld [vmem:[#allocation28 + $0xc8] sm:$0xff]   ;;  %v13178_v56 = vld [vmem:[#allocation28 + $0x80] sm:$0xff]   ;;  %v9690_v0 = vrot.slane %v9681_v17, %v19099_v42 }
 0xcb8   : > { %v9658_v62 = vadd.f32 %v9657_v55, %v9651_v31  ;;  %v9653_v5 = vmul.f32 %v17945_v29, %v17945_v29  ;;  %v9654_v20 = vmul.f32 %v17947_v33, %v17947_v33  ;;  %v9655_v22 = vmul.f32 %v17949_v47, %v17949_v47  ;;  %11720 = vmatpush3.bf16.msra.mxu1 %v13166_v43  ;;  %v9711_v31 = vld [vmem:[#allocation27] sm:$0xf] }
 0xcb9   : > { %v9656_v19 = vmul.f32 %v17953_v50, %v17953_v50  ;;  %11699 = vmatprep.subr.bf16.mxu0 %v13167_v53  ;;  %11721 = vmatprep.subr.bf16.mxu1 %v13168_v49 }
 0xcba   : > { %v9659_v12 = vadd.f32 %v9658_v62, %v9652_v45  ;;  %v9662_v41 = vadd.f32 %v9654_v20, %v9653_v5  ;;  %v9698_v45 = vrot.slane %v9681_v17, %v19100_v63  ;;  %v9686_v5 = vrot.slane %v9681_v17, %v19097_v61 }
 0xcbb   : > { %11700 = vmatpush3.bf16.msra.mxu0 %v13169_v57 }
 0xcbc   : > { %9660 = vadd.xlane.f32.xlu1 %v9659_v12  ;;  %v9663_v9 = vadd.f32 %v9662_v41, %v9655_v22  ;;  %11722 = vmatpush3.bf16.msra.mxu1 %v13170_v3  ;;  %v9694_v12 = vrot.slane %v9681_v17, %v19098_v28  ;;  %v9720_v41 = vrot.slane %v9711_v31, %v19099_v42  ;;  %v10287_v17 = vld [vmem:[%s19101_s15 + $0x1f8] sm:$0xff] }
 0xcbd   : > { %11701 = vmatprep.subr.bf16.mxu0 %v13171_v16  ;;  %11723 = vmatprep.subr.bf16.mxu1 %v13172_v60 }
 0xcbe   : > { %v9664_v46 = vadd.f32 %v9663_v9, %v9656_v19  ;;  %v9716_v19 = vrot.slane %v9711_v31, %v19097_v61  ;;  %v9724_v9 = vrot.slane %v9711_v31, %v19098_v28 }
 0xcbf   : > { %11702 = vmatpush3.bf16.msra.mxu0 %v13173_v10 }
 0xcc0   : > { %9665 = vadd.xlane.f32.xlu1 %v9664_v46  ;;  %11724 = vmatpush3.bf16.msra.mxu1 %v13174_v2 }
 0xcc1   : > { %11703 = vmatprep.subr.bf16.mxu0 %v13175_v59  ;;  %11725 = vmatprep.subr.bf16.mxu1 %v13176_v26 }
 0xcc3   : > { %11704 = vmatpush3.bf16.msra.mxu0 %v13177_v7 }
 0xcc4   : > { %11726 = vmatpush3.bf16.msra.mxu1 %v13178_v56  ;;  %v11626_v56 = vld [vmem:[#allocation31] ss:$0 sm:$0xff] }
 0xcc5   : > { %11768 = vmatprep.subr.mxu1 %v10287_v17 }
 0xd45   : > { %v9661_v36 = vpop.xlane.xlu1 %9660 }
 0xd46   : > { %v9667_v13 = vmul.f32 0.001953125, %v9661_v36 }
 0xd48   : > { %v9669_v34 = vadd.f32 1e-05, %v9667_v13 }
 0xd49   : > { %v9666_v35 = vpop.xlane.xlu1 %9665 }
 0xd4a   : > { %13179 = vrsqrt.f32 %v9669_v34  ;;  %v9668_v15 = vmul.f32 0.001953125, %v9666_v35 }
 0xd4c   : > { %v9670_v51 = vadd.f32 1e-05, %v9668_v15  ;;  %v13910_v15 = vmov 0  }
 0xd4d   : > { %13050 = vset.pattern.permute.xlu1 %v13910_v15  ;;  %13049 = vset.pattern.permute.xlu0 %v13910_v15 }
 0xd4e   : > { %13181 = vrsqrt.f32 %v9670_v51  ;;  %v10255_v51 = vld [vmem:[%s19101_s15 + $0xf8] sm:$0xff] }
 0xd4f   : > { %11733 = vmatprep.subr.mxu0 %v10255_v51 }
 0xd57   : > { %v13180_v32 = vpop.eup %13179 }
 0xd58   : > { %v9674_v48 = vmul.f32 %v13180_v32, %v17933_v24  ;;  %v9676_v55 = vmul.f32 %v13180_v32, %v17937_v58  ;;  %v9673_v62 = vmul.f32 %v13180_v32, %v17931_v23  ;;  %v9675_v20 = vmul.f32 %v13180_v32, %v17935_v54  ;;  %v10239_v32 = vld [vmem:[%s19101_s15 + $0x78] sm:$0xff] }
 0xd59   : > { %v9728_v24 = vrot.slane %v9711_v31, %v19100_v63  ;;  %v10286_v31 = vld [vmem:[%s19101_s15 + $0x1f0] sm:$0xff] }
 0xd5a   : > { %v9704_v46 = vmul.f32 %v9690_v0, %v9674_v48  ;;  %v9706_v14 = vmul.f32 %v9698_v45, %v9676_v55  ;;  %v9703_v54 = vmul.f32 %v9686_v5, %v9673_v62  ;;  %v9705_v38 = vmul.f32 %v9694_v12, %v9675_v20  ;;  %v10271_v48 = vld [vmem:[%s19101_s15 + $0x178] sm:$0xff]  ;;  %v10238_v55 = vld [vmem:[%s19101_s15 + $0x70] sm:$0xff]  ;;  %v10253_v62 = vld [vmem:[%s19101_s15 + $0xe8] sm:$0xff] }
 0xd5b   : > { %v13182_v22 = vpop.eup %13181  ;;  %v10237_v20 = vld [vmem:[%s19101_s15 + $0x68] sm:$0xff] }
 0xd5c   : > { %v9678_v58 = vmul.f32 %v13182_v22, %v17947_v33  ;;  %v9680_v23 = vmul.f32 %v13182_v22, %v17953_v50  ;;  %v9677_v8 = vmul.f32 %v13182_v22, %v17945_v29  ;;  %v9679_v18 = vmul.f32 %v13182_v22, %v17949_v47  ;;  %v10252_v22 = vld [vmem:[%s19101_s15 + $0xe0] sm:$0xff] }
 0xd5d   : > { %v17979_v25 = vadd.f32 %v9720_v41, %v9704_v46  ;;  %v17983_v28 = vadd.f32 %v9728_v24, %v9706_v14  ;;  %v17987_v50 = vadd.f32 %v9716_v19, %v9703_v54  ;;  %v17991_v29 = vadd.f32 %v9724_v9, %v9705_v38  ;;  %v10235_v46 = vld [vmem:[%s19101_s15 + $0x58] sm:$0xff]  ;;  %v10250_v14 = vld [vmem:[%s19101_s15 + $0xd0] sm:$0xff]  ;;  %v10249_v38 = vld [vmem:[%s19101_s15 + $0xc8] sm:$0xff] }
 0xd5e   : > { %v9708_v40 = vmul.f32 %v9690_v0, %v9678_v58  ;;  %v9710_v42 = vmul.f32 %v9698_v45, %v9680_v23  ;;  %v9707_v4 = vmul.f32 %v9686_v5, %v9677_v8  ;;  %v9709_v63 = vmul.f32 %v9694_v12, %v9679_v18  ;;  %v10254_v0 = vld [vmem:[%s19101_s15 + $0xf0] sm:$0xff]  ;;  %v10285_v5 = vld [vmem:[%s19101_s15 + $0x1e8] sm:$0xff]  ;;  %v10283_v58 = vld [vmem:[%s19101_s15 + $0x1d8] sm:$0xff] }
 0xd5f   : > { %v10270_v45 = vld [vmem:[%s19101_s15 + $0x170] sm:$0xff]  ;;  %v10269_v12 = vld [vmem:[%s19101_s15 + $0x168] sm:$0xff]  ;;  %v10267_v23 = vld [vmem:[%s19101_s15 + $0x158] sm:$0xff] }
 0xd60   : > { %v17981_v61 = vadd.f32 %v9720_v41, %v9708_v40  ;;  %v17985_v33 = vadd.f32 %v9728_v24, %v9710_v42  ;;  %v17989_v44 = vadd.f32 %v9716_v19, %v9707_v4  ;;  %v17993_v47 = vadd.f32 %v9724_v9, %v9709_v63  ;;  %v10284_v41 = vld [vmem:[%s19101_s15 + $0x1e0] sm:$0xff]  ;;  %v10251_v9 = vld [vmem:[%s19101_s15 + $0xd8] sm:$0xff]  ;;  %v10282_v8 = vld [vmem:[%s19101_s15 + $0x1d0] sm:$0xff] }
 0xd61   : > { %v10236_v24 = vld [vmem:[%s19101_s15 + $0x60] sm:$0xff]  ;;  %v10234_v54 = vld [vmem:[%s19101_s15 + $0x50] sm:$0xff]  ;;  %v10281_v40 = vld [vmem:[%s19101_s15 + $0x1c8] sm:$0xff] }
 0xd62   : > { %v9742_v39 = vpack.c.bf16 %v17981_v61, %v17979_v25  ;;  %v9744_v6 = vpack.c.bf16 %v17985_v33, %v17983_v28  ;;  %v9741_v27 = vpack.c.bf16 %v17989_v44, %v17987_v50  ;;  %v9743_v30 = vpack.c.bf16 %v17993_v47, %v17991_v29  ;;  %v10268_v19 = vld [vmem:[%s19101_s15 + $0x160] sm:$0xff]  ;;  %v10266_v18 = vld [vmem:[%s19101_s15 + $0x150] sm:$0xff]  ;;  %v10233_v42 = vld [vmem:[%s19101_s15 + $0x48] sm:$0xff] }
 0xd63   : > { %v10265_v4 = vld [vmem:[%s19101_s15 + $0x148] sm:$0xff]  ;;  %v10248_v63 = vld [vmem:[%s19101_s15 + $0xc0] sm:$0xff] }
 0xd64   : > { %10040 = vmatprep.mubr.bf16.mxu0 %v9742_v39  ;;  %10081 = vmatprep.mubr.bf16.mxu1 %v9744_v6  ;;  %v10280_v39 = vld [vmem:[%s19101_s15 + $0x1c0] sm:$0xff] }
 0xd65   : > { %10041 = vmatmul.mubr.bf16.vlgmr.msra.gmra.mxu0 %v9741_v27  ;;  %10082 = vmatmul.mubr.bf16.vlgmr.msra.gmra.mxu1 %v9743_v30  ;;  %v11627_v6 = vld [vmem:[#allocation3] ss:$0 sm:$0xff] }
 0xd66   : > { %11734 = vmatpush3.msra.mxu0 %v10239_v32  ;;  %11769 = vmatpush3.msra.mxu1 %v10271_v48  ;;  %v10232_v48 = vld [vmem:[%s19101_s15 + $0x40] sm:$0xff] }
 0xd67   : > { %11735 = vmatprep.subr.mxu0 %v10254_v0  ;;  %11770 = vmatprep.subr.mxu1 %v10286_v31  ;;  %v10264_v0 = vld [vmem:[%s19101_s15 + $0x140] sm:$0xff] }
 0xd68   : > { %11736 = vmatpush3.msra.mxu0 %v10238_v55  ;;  %11771 = vmatpush3.msra.mxu1 %v10270_v45  ;;  %v10247_v55 = vld [vmem:[%s19101_s15 + $0xb8] sm:$0xff] }
 0xd69   : > { %11737 = vmatprep.subr.mxu0 %v10253_v62  ;;  %11772 = vmatprep.subr.mxu1 %v10285_v5  ;;  %v10279_v45 = vld [vmem:[%s19101_s15 + $0x1b8] sm:$0xff] }
 0xd6a   : > { %11738 = vmatpush3.msra.mxu0 %v10237_v20  ;;  %11773 = vmatpush3.msra.mxu1 %v10269_v12  ;;  %v10231_v20 = vld [vmem:[%s19101_s15 + $0x38] sm:$0xff] }
 0xd6b   : > { %11739 = vmatprep.subr.mxu0 %v10252_v22  ;;  %11774 = vmatprep.subr.mxu1 %v10284_v41  ;;  %v10263_v12 = vld [vmem:[%s19101_s15 + $0x138] sm:$0xff]  ;;  %v10246_v22 = vld [vmem:[%s19101_s15 + $0xb0] sm:$0xff] }
 0xd6c   : > { %11740 = vmatpush3.msra.mxu0 %v10236_v24  ;;  %11775 = vmatpush3.msra.mxu1 %v10268_v19  ;;  %v10278_v41 = vld [vmem:[%s19101_s15 + $0x1b0] sm:$0xff] }
 0xd6d   : > { %11741 = vmatprep.subr.mxu0 %v10251_v9  ;;  %11776 = vmatprep.subr.mxu1 %v10283_v58  ;;  %v10230_v24 = vld [vmem:[%s19101_s15 + $0x30] sm:$0xff]  ;;  %v10245_v9 = vld [vmem:[%s19101_s15 + $0xa8] sm:$0xff] }
 0xd6e   : > { %11742 = vmatpush3.msra.mxu0 %v10235_v46  ;;  %11777 = vmatpush3.msra.mxu1 %v10267_v23  ;;  %v10262_v19 = vld [vmem:[%s19101_s15 + $0x130] sm:$0xff]  ;;  %v10277_v58 = vld [vmem:[%s19101_s15 + $0x1a8] sm:$0xff] }
 0xd6f   : > { %11743 = vmatprep.subr.mxu0 %v10250_v14  ;;  %11778 = vmatprep.subr.mxu1 %v10282_v8  ;;  %v10229_v46 = vld [vmem:[%s19101_s15 + $0x28] sm:$0xff]  ;;  %v10244_v14 = vld [vmem:[%s19101_s15 + $0xa0] sm:$0xff] }
 0xd70   : > { %11744 = vmatpush3.msra.mxu0 %v10234_v54  ;;  %11779 = vmatpush3.msra.mxu1 %v10266_v18  ;;  %v10261_v23 = vld [vmem:[%s19101_s15 + $0x128] sm:$0xff]  ;;  %v10276_v8 = vld [vmem:[%s19101_s15 + $0x1a0] sm:$0xff] }
 0xd71   : > { %11745 = vmatprep.subr.mxu0 %v10249_v38  ;;  %11780 = vmatprep.subr.mxu1 %v10281_v40  ;;  %v10228_v54 = vld [vmem:[%s19101_s15 + $0x20] sm:$0xff]  ;;  %v10243_v38 = vld [vmem:[%s19101_s15 + $0x98] sm:$0xff] }
 0xd72   : > { %11746 = vmatpush3.msra.mxu0 %v10233_v42  ;;  %11781 = vmatpush3.msra.mxu1 %v10265_v4  ;;  %v10260_v18 = vld [vmem:[%s19101_s15 + $0x120] sm:$0xff]  ;;  %v10275_v40 = vld [vmem:[%s19101_s15 + $0x198] sm:$0xff] }
 0xd73   : > { %11747 = vmatprep.subr.mxu0 %v10248_v63  ;;  %11782 = vmatprep.subr.mxu1 %v10280_v39  ;;  %v10227_v42 = vld [vmem:[%s19101_s15 + $0x18] sm:$0xff]  ;;  %v10242_v63 = vld [vmem:[%s19101_s15 + $0x90] sm:$0xff] }
 0xd74   : > { %11748 = vmatpush3.msra.mxu0 %v10232_v48  ;;  %11783 = vmatpush3.msra.mxu1 %v10264_v0  ;;  %v10259_v4 = vld [vmem:[%s19101_s15 + $0x118] sm:$0xff]  ;;  %v10274_v39 = vld [vmem:[%s19101_s15 + $0x190] sm:$0xff] }
 0xd75   : > { %11749 = vmatprep.subr.mxu0 %v10247_v55  ;;  %11784 = vmatprep.subr.mxu1 %v10279_v45 }
 0xd76   : > { %11750 = vmatpush3.msra.mxu0 %v10231_v20  ;;  %11785 = vmatpush3.msra.mxu1 %v10263_v12 }
 0xd77   : > { %11751 = vmatprep.subr.mxu0 %v10246_v22  ;;  %11786 = vmatprep.subr.mxu1 %v10278_v41 }
 0xd78   : > { %11752 = vmatpush3.msra.mxu0 %v10230_v24  ;;  %11787 = vmatpush3.msra.mxu1 %v10262_v19 }
 0xd79   : > { %11753 = vmatprep.subr.mxu0 %v10245_v9  ;;  %11788 = vmatprep.subr.mxu1 %v10277_v58  ;;  %v19103_v9 = vld [vmem:[#allocation77_spill] sm:$0xff] }
 0xd7a   : > { %11754 = vmatpush3.msra.mxu0 %v10229_v46  ;;  %11789 = vmatpush3.msra.mxu1 %v10261_v23 }
 0xd7b   : > { %11755 = vmatprep.subr.mxu0 %v10244_v14  ;;  %11790 = vmatprep.subr.mxu1 %v10276_v8  ;;  %v19105_v14 = vlaneseq }
 0xd7c   : > { %11756 = vmatpush3.msra.mxu0 %v10228_v54  ;;  %11791 = vmatpush3.msra.mxu1 %v10260_v18 }
 0xd7d   : > { %11757 = vmatprep.subr.mxu0 %v10243_v38  ;;  %11792 = vmatprep.subr.mxu1 %v10275_v40  ;;  %vm10221_vm9 = vcmp.lt.s32.totalorder %v19105_v14, 512  ;;  %v10288_v38 = vld [vmem:[#allocation33] sm:$0x1] }
 0xd7e   : > { %11758 = vmatpush3.msra.mxu0 %v10227_v42  ;;  %11793 = vmatpush3.msra.mxu1 %v10259_v4 }
 0xd7f   : > { %11759 = vmatprep.subr.mxu0 %v10242_v63  ;;  %11794 = vmatprep.subr.mxu1 %v10274_v39 }
 0xe25   : > { %v11705_v37 = vpop.f32.mrf.mxu0  ;;  %v11727_v21 = vpop.f32.mrf.mxu1 }
 0xe27   : > { %v11706_v1 = vpop.f32.mrf.mxu0  ;;  %v11728_v11 = vpop.f32.mrf.mxu1 }
 0xe28   : > { %v11707_v43 = vadd.f32 %v11706_v1, %v11705_v37  ;;  %v11729_v3 = vadd.f32 %v11728_v11, %v11727_v21 }
 0xe29   : > { %v11708_v53 = vpop.f32.mrf.mxu0  ;;  %v11730_v49 = vpop.f32.mrf.mxu1 }
 0xe2a   : > { %v10043_v57 = vadd.f32 %v11707_v43, %v11593_v52 }
 0xe2b   : > { %v11709_v16 = vpop.f32.mrf.mxu0  ;;  %v11731_v60 = vpop.f32.mrf.mxu1 }
 0xe2c   : > { %v10084_v10 = vadd.f32 %v11729_v3, %v10043_v57  ;;  %v11710_v2 = vadd.f32 %v11709_v16, %v11708_v53  ;;  %v11732_v26 = vadd.f32 %v11731_v60, %v11730_v49 }
 0xe2e   : > { %13183 = vtanh.f32 %v10084_v10  ;;  %v10046_v59 = vadd.f32 %v11710_v2, %v11593_v52 }
 0xe30   : > { %v10087_v7 = vadd.f32 %v11732_v26, %v10046_v59 }
 0xe32   : > { %13185 = vtanh.f32 %v10087_v7 }
 0xe3b   : > { %v13184_v36 = vpop.eup %13183 }
 0xe3c   : > { %v10099_v13 = vmul.f32 %v13184_v36, %v11626_v56 }
 0xe3e   : > { %10101 = vadd.xlane.f32.xlu0 %v10099_v13 }
 0xe3f   : > { %v13186_v34 = vpop.eup %13185 }
 0xe40   : > { %v10100_v35 = vmul.f32 %v13186_v34, %v11626_v56 }
 0xe42   : > { %10103 = vadd.xlane.f32.xlu1 %v10100_v35 }
 0xec7   : > { %v10102_v27 = vpop.xlane.xlu0 %10101 }
 0xec8   : > { %v10112_v30 = vadd.f32 %v11627_v6, %v10102_v27  ;;  %v10258_v27 = vld [vmem:[%s19101_s15 + $0x110] sm:$0xff] }
 0xec9   : > { %11795 = vmatpush3.msra.mxu1 %v10258_v27 }
 0xeca   : > { %10115 = vst.msk [vmem:[%s19102_s3] sm:$0xff] %vm10114_vm8, %v10112_v30  ;;  %v10117_v52 = vsel %vm10114_vm8, %v10112_v30, -inf }
 0xecb   : > { %v10104_v37 = vpop.xlane.xlu1 %10103 }
 0xecc   : > { %v10113_v21 = vadd.f32 %v11627_v6, %v10104_v37  ;;  %v10226_v6 = vld [vmem:[%s19101_s15 + $0x10] sm:$0xff]  ;;  %v10273_v37 = vld [vmem:[%s19101_s15 + $0x188] sm:$0xff] }
 0xecd   : > { %11760 = vmatpush3.msra.mxu0 %v10226_v6  ;;  %11796 = vmatprep.subr.mxu1 %v10273_v37 }
 0xece   : > { %10116 = vst.msk [vmem:[%s19102_s3 + $0x8] sm:$0xff] %vm10114_vm8, %v10113_v21  ;;  %v10118_v1 = vsel %vm10114_vm8, %v10113_v21, -inf }
 0xecf   : > { %v10119_v11 = vmax.f32 %v10117_v52, %v10118_v1  ;;  %v10257_v52 = vld [vmem:[%s19101_s15 + $0x108] sm:$0xff]  ;;  %v10240_v1 = vld [vmem:[%s19101_s15 + $0x80] sm:$0xff] }
 0xed0   : > { %11797 = vmatpush3.msra.mxu1 %v10257_v52 }
 0xed1   : > { %v10120_v43 = vrot.slane %v10119_v11, 4 }
 0xed3   : > { %v10121_v53 = vmax.f32 %v10119_v11, %v10120_v43  ;;  %v10272_v11 = vld [vmem:[%s19101_s15 + $0x180] sm:$0xff] }
 0xed4   : > { %v10224_v43 = vld [vmem:[%s19101_s15] sm:$0xff]  ;;  %11798 = vmatprep.subr.mxu1 %v10272_v11 }
 0xed5   : > { %v10122_v49 = vrot.slane %v10121_v53, 2 }
 0xed7   : > { %v10123_v57 = vmax.f32 %v10121_v53, %v10122_v49  ;;  %v10256_v53 = vld [vmem:[%s19101_s15 + $0x100] sm:$0xff] }
 0xed8   : > { %11799 = vmatpush3.msra.mxu1 %v10256_v53 }
 0xed9   : > { %v10124_v3 = vrot.slane %v10123_v57, 1 }
 0xedb   : > { %v10125_v16 = vmax.f32 %v10123_v57, %v10124_v3 }
 0xedd   : > { %v10126_v60 = vsub.f32 %v10112_v30, %v10125_v16  ;;  %v10127_v10 = vsub.f32 %v10113_v21, %v10125_v16  ;;  %v10241_v30 = vld [vmem:[%s19101_s15 + $0x88] sm:$0xff] }
 0xede   : > { %v10225_v21 = vld [vmem:[%s19101_s15 + $0x8] sm:$0xff]  ;;  %11761 = vmatprep.subr.mxu0 %v10241_v30 }
 0xedf   : > { %v10128_v2 = vmul.f32 1.442695, %v10126_v60  ;;  %v10130_v59 = vmul.f32 1.442695, %v10127_v10  ;;  %11762 = vmatpush3.msra.mxu0 %v10225_v21 }
 0xee0   : > { %11763 = vmatprep.subr.mxu0 %v10240_v1 }
 0xee1   : > { %13187 = vpow2.f32 %v10128_v2  ;;  %11764 = vmatpush3.msra.mxu0 %v10224_v43 }
 0xee2   : > { %13189 = vpow2.f32 %v10130_v59 }
 0xeee   : > { %v13188_v26 = vpop.eup %13187 }
 0xeef   : > { %v13190_v7 = vpop.eup %13189  ;;  %v10132_v56 = vsel %vm10114_vm8, %v13188_v26, 0.0 }
 0xef0   : > { %v10133_v36 = vsel %vm10114_vm8, %v13190_v7, 0.0 }
 0xef1   : > { %v10134_v13 = vadd.f32 %v10133_v36, %v10132_v56 }
 0xef3   : > { %v10135_v34 = vrot.slane %v10134_v13, 4 }
 0xef5   : > { %v10136_v35 = vadd.f32 %v10135_v34, %v10134_v13 }
 0xef7   : > { %v10137_v15 = vrot.slane %v10136_v35, 2 }
 0xef9   : > { %v10138_v51 = vadd.f32 %v10137_v15, %v10136_v35 }
 0xefb   : > { %v10139_v17 = vrot.slane %v10138_v51, 1 }
 0xefd   : > { %v10140_v32 = vadd.f32 %v10139_v17, %v10138_v51 }
 0xeff   : > { %13191 = vrcp.f32 %v10140_v32 }
 0xf0c   : > { %v13192_v31 = vpop.eup %13191 }
 0xf0d   : > { %v10143_v62 = vmul.f32 %v13192_v31, %v13190_v7  ;;  %v10142_v5 = vmul.f32 %v13192_v31, %v13188_v26 }
 0xf0f   : > { %10151 = vperm.xlu1 %13050, %v10143_v62   ;;  %10146 = vperm.xlu0 %13049, %v10142_v5  }
 0xf8a   : > { %v10152_v49 = vpop.permute.xlu1 %10151  ;;  %v10147_v57 = vpop.permute.xlu0 %10146 }
 0xf8b   : > { %v10158_v3 = vmul.f32 %v10152_v49, %v17989_v44  ;;  %v10159_v16 = vmul.f32 %v10152_v49, %v17981_v61  ;;  %v10160_v60 = vmul.f32 %v10152_v49, %v17993_v47  ;;  %v10161_v10 = vmul.f32 %v10152_v49, %v17985_v33 }
 0xf8c   : > { %v10154_v2 = vmul.f32 %v10147_v57, %v17987_v50  ;;  %v10155_v59 = vmul.f32 %v10147_v57, %v17979_v25  ;;  %v10156_v26 = vmul.f32 %v10147_v57, %v17991_v29  ;;  %v10157_v7 = vmul.f32 %v10147_v57, %v17983_v28 }
 0xf8e   : > { %v10162_v56 = vadd.f32 %v10158_v3, %v10154_v2  ;;  %v10169_v36 = vadd.f32 %v10159_v16, %v10155_v59  ;;  %v10176_v13 = vadd.f32 %v10160_v60, %v10156_v26  ;;  %v10183_v34 = vadd.f32 %v10161_v10, %v10157_v7 }
 0xf90   : > { %v10163_v35 = vrot.slane %v10162_v56, 4  ;;  %v10170_v44 = vrot.slane %v10169_v36, 4  ;;  %v10177_v15 = vrot.slane %v10176_v13, 4  ;;  %v10184_v61 = vrot.slane %v10183_v34, 4 }
 0xf92   : > { %v10164_v51 = vadd.f32 %v10163_v35, %v10162_v56  ;;  %v10178_v47 = vadd.f32 %v10177_v15, %v10176_v13  ;;  %v10171_v17 = vadd.f32 %v10170_v44, %v10169_v36  ;;  %v10185_v33 = vadd.f32 %v10184_v61, %v10183_v34 }
 0xf94   : > { %v10165_v32 = vrot.slane %v10164_v51, 2  ;;  %v10179_v50 = vrot.slane %v10178_v47, 2  ;;  %v10172_v48 = vrot.slane %v10171_v17, 2  ;;  %v10186_v25 = vrot.slane %v10185_v33, 2 }
 0xf96   : > { %v10166_v0 = vadd.f32 %v10165_v32, %v10164_v51  ;;  %v10173_v29 = vadd.f32 %v10172_v48, %v10171_v17  ;;  %v10180_v31 = vadd.f32 %v10179_v50, %v10178_v47  ;;  %v10187_v28 = vadd.f32 %v10186_v25, %v10185_v33 }
 0xf98   : > { %v10167_v55 = vrot.slane %v10166_v0, 1  ;;  %v10174_v45 = vrot.slane %v10173_v29, 1  ;;  %v10181_v62 = vrot.slane %v10180_v31, 1  ;;  %v10188_v5 = vrot.slane %v10187_v28, 1 }
 0xf9a   : > { %v10168_v20 = vadd.f32 %v10167_v55, %v10166_v0  ;;  %v10175_v12 = vadd.f32 %v10174_v45, %v10173_v29  ;;  %v10182_v22 = vadd.f32 %v10181_v62, %v10180_v31  ;;  %v10189_v41 = vadd.f32 %v10188_v5, %v10187_v28 }
 0xf9c   : > { %v10194_v24 = vcombine.low %v10168_v20, %v10175_v12  ;;  %10353 = vmatprep.mubr.f32.mxu0 %v10175_v12  ;;  %v10195_v19 = vcombine.low %v10182_v22, %v10189_v41  ;;  %10423 = vmatprep.mubr.f32.mxu1 %v10189_v41 }
 0xf9d   : > { %10354 = vmatmul.mubr.f32.vlgmr.msra.gmra.mxu0 %v10168_v20  ;;  %10424 = vmatmul.mubr.f32.vlgmr.msra.gmra.mxu1 %v10182_v22 }
 0xf9e   : > { %v10202_v58 = vrot.slane %v10194_v24, %v19103_v9  ;;  %v10209_v46 = vrot.slane %v10195_v19, %v19103_v9 }
 0xfa0   : > { %v10210_v23 = vcombine.low %v10202_v58, %v10209_v46 }
 0xfa2   : > { %v10217_v8 = vrot.slane %v10210_v23, %v19103_v9 }
 0xfa4   : > { %10223 = vst.msk [vmem:[#allocation34] sm:$0xf] %vm10221_vm9, %v10217_v8 }
0x105d   : > { %v11765_v54 = vpop.f32.mrf.mxu0  ;;  %v11800_v18 = vpop.f32.mrf.mxu1 }
0x105f   : > { %v11766_v40 = vpop.f32.mrf.mxu0  ;;  %v11801_v42 = vpop.f32.mrf.mxu1 }
0x1060   : > { %v11767_v4 = vadd.f32 %v11766_v40, %v11765_v54  ;;  %v11802_v39 = vadd.f32 %v11801_v42, %v11800_v18 }
0x1062   : > { %v10356_v63 = vadd.f32 %v11767_v4, %v10288_v38 }
0x1064   : > { %v10426_v6 = vadd.f32 %v11802_v39, %v10356_v63 }
0x1066   : > { %v10431_v27 = vsel %vm10429_vm10, %v10426_v6, -inf  ;;  %10430 = vst.msk [vmem:[%s19104_s2] sm:$0x1] %vm10429_vm10, %v10426_v6 }
0x1067   : > { %10432 = vmax.xlane.f32.xlu1 %v10431_v27 }
0x10f0   : > { %v10433_v30 = vpop.xlane.xlu1 %10432 }
0x10f1   : > { %v10434_v37 = vsub.f32 %v10426_v6, %v10433_v30 }
0x10f3   : > { %v10435_v21 = vmul.f32 1.442695, %v10434_v37 }
0x10f5   : > { %13193 = vpow2.f32 %v10435_v21 }
0x1102   : > { %v13194_v52 = vpop.eup %13193 }
0x1103   : > { %v10437_v1 = vsel %vm10429_vm10, %v13194_v52, 0.0 }
0x1104   : > { %10438 = vadd.xlane.f32.xlu0 %v10437_v1 }
0x118d   : > { %v10439_v11 = vpop.xlane.xlu0 %10438 }
0x118e   : > { %13195 = vrcp.f32 %v10439_v11 }
0x119b   : > { %v13196_v43 = vpop.eup %13195 }
0x119c   : > { %v10441_v53 = vmul.f32 %v13196_v43, %v13194_v52 }
0x119e   : > { %10442 = vst.msk [vmem:[#allocation35] sm:$0x1] %vm10429_vm10, %v10441_v53 }
0x119f PF: > { %p11953_p11 = scmp.eq.s32.totalorder %s14097_s23, 1  ;;  %s13911_s18 = smov [#allocation34]  }
0x11a0   : > { %s10461_s22 = sshll.u32 %s13911_s18, 4  ;;  %s13912_s10 = smov [#allocation35]   ;;  %s10462_s22 = int_to_ptr.vmem [resolvable:$true] %s10461_s22 }
0x11a1   : > { %s10480_s0 = sshll.u32 %s13912_s10, 4  ;;  %s13707_s16 = scalar_lea.vmem %s10462_s22, 64  ;;  %s10481_s0 = int_to_ptr.vmem [resolvable:$true] %s10480_s0 }
0x11a2   : > { %p13708_p13 = scmp.ne.s32.totalorder %s10462_s22, %s13707_s16  ;;  %p13714_p8 = scmp.lt.s32.totalorder %s10462_s22, %s10462_s22 }
0x11a3   : > { %p13715_p10 = scmp.lt.s32.totalorder %s13707_s16, %s13707_s16 }
0x11a4   : > { %p13709_p6 = pnand %p13708_p13, %p11953_p11 }
0x11a5   : > { %p13716_p12 = por %p13715_p10, %p13714_p8 }
0x11a6   : > { %p13710_p1 = pneg %p13709_p6 }
0x11a8   : > { %p13717_p9 = pnand %p13716_p12, %p13710_p1 }
0x11aa   : > { %13720 = shalt.err (!%p13717_p9)
}
0x11ab   : > { %s19106_s1 = sld [smem:[#allocation67_spill]]  ;;  %s13731_s6 = scalar_lea.vmem %s10481_s0, 16 }
0x11ac   : > { %p13732_p0 = scmp.ne.s32.totalorder %s10481_s0, %s13731_s6  ;;  %s13737_s24 = scalar_lea.vmem %s10481_s0, 32 }
0x11ad   : > { %p13738_p3 = scmp.lt.s32.totalorder %s10481_s0, %s10481_s0  ;;  %p13739_p2 = scmp.lt.s32.totalorder %s13737_s24, %s13731_s6 }
0x11ae   : > { %p13733_p4 = pnand %p13732_p0, %p11953_p11 }
0x11af   : > { %p13740_p7 = por %p13739_p2, %p13738_p3 }
0x11b0   : > { %p13734_p5 = pneg %p13733_p4 }
0x11b1   : > { %11864 = dma.vmem_to_hbm [thread:$0]  (%p11953_p11), %s10462_s22, 64, %s19106_s1, [#allocation6]  }
0x11b2   : > { %p13741_p13 = pnand %p13740_p7, %p13734_p5 }
0x11b4   : > { %13744 = shalt.err (!%p13741_p13)
}
0x11b5   : > { %s19107_s9 = sld [smem:[#allocation70_spill]] }
0x11bb   : > { %11866 = dma.vmem_to_hbm [thread:$0]  (%p11953_p11), %s10481_s0, 16, %s19107_s9, [#allocation36]  }
0x11bc   : > { %13820 = dma.done.wait (%p11953_p11), [#allocation6], 64  }
0x11bd   : > { %13822 = vsyncadd (%p11953_p11), [#allocation6], 4294967232 }
0x11be   : > { %13824 = dma.done.wait (%p11953_p11), [#allocation36], 16  }
0x11bf   : > { %13826 = vsyncadd (%p11953_p11), [#allocation36], 4294967280 }
0x11c0 PF: > { %s19108_s14 = sld [smem:[#allocation73_spill]]  ;;  %s19112_s0 = smov %s13833_s20 }
0x11c1   : > { %s19109_s8 = sld [smem:[#allocation71_spill]]  ;;  %s19114_s7 = smov %s13845_s11 }
0x11c2   : > { %s19110_s10 = sld [smem:[#allocation76_spill]] }
0x11c3   : > { %s19111_s28 = sld [smem:[#allocation74_spill]] }
0x11c6   : > { %s92_s16 = sadd.s32 1, %s19108_s14  }
0x11c7   : > { %p89_p6 = scmp.ge.s32.totalorder %s92_s16, 4   ;;  %s19113_s20 = smov %s19109_s8 }
0x11c9   : > { %s19115_s11 = smov %s19111_s28  ;;  %91 = sbr.rel (!%p89_p6) target bundleno = 73 (0x49), region = 370 }
0x11ce   :  { %10511 = vsyncpa [#allocation5], 1 }
0x11cf   :  { %10513 = vsyncpa [#allocation5 + $0x1], 1 }
0x11d0   :  { %10514 = vsyncpa [#allocation8], 1 }
0x11d1   :  { %10515 = vsyncpa [#allocation11], 1 }
0x11d2   :  { %10517 = vsyncpa [#allocation11 + $0x1], 1 }
0x11d3   :  { %10518 = vsyncpa [#allocation14], 1 }
0x11d4   :  { %10520 = vsyncpa [#allocation14 + $0x1], 1 }
0x11d5   :  { %10521 = vsyncpa [#allocation17], 1 }
0x11d6   :  { %10523 = vsyncpa [#allocation17 + $0x1], 1 }
0x11d7   :  { %10524 = vsyncpa [#allocation20], 1 }
0x11d8   :  { %10526 = vsyncpa [#allocation20 + $0x1], 1 }
0x11d9   :  { %10527 = vsyncpa [#allocation23], 1 }
0x11da   :  { %10528 = vsyncpa [#allocation26], 1 }
0x11db   :  { %10529 = vsyncpa [#allocation29], 1 }
0x11dc   :  { %10530 = vsyncpa [#allocation32], 1 }
0x11dd   :  { %10531 = vsyncpa [#allocation6], 1 }
0x11de   :  { %10533 = vsyncpa [#allocation6 + $0x1], 1 }
0x11df   :  { %10534 = vsyncpa [#allocation36], 1 }

</bundles_post_ra>
